<compile_context>
chip_gen: v7x
topology: tpu7x:2x2x1
jax: 0.10.0
libtpu: 0.0.40
codegen_flags: <defaults>
</compile_context>

<pallas_src>
import jax
import jax.numpy as jnp
from jax.experimental import pallas as pl
from jax.experimental.pallas import tpu as pltpu


_LN_EPS = 1e-5
TILE_GRID = 512   # grid-node rows per tile
TILE_EDGE = 512   # edges per tile in the fused edge/dst kernel


def _pick_vmem_limit():
    # v5e/v6e: 128 MiB physical VMEM -> 96 MiB; v7x: 64 MiB -> 48 MiB.
    try:
        cap = pltpu.get_tpu_info().vmem_capacity_bytes
    except Exception:
        cap = 64 * 1024 * 1024
    return int(min(96 * 1024 * 1024, cap * 3 // 4))


_VMEM_LIMIT = _pick_vmem_limit()


def _silu(x):
    return x * jax.nn.sigmoid(x)


def _layer_norm(y, gamma, beta):
    # single-pass statistics: E[y], E[y^2]
    mu = jnp.mean(y, axis=-1, keepdims=True)
    ms = jnp.mean(y * y, axis=-1, keepdims=True)
    var = jnp.maximum(ms - mu * mu, 0.0)
    return (y - mu) * jax.lax.rsqrt(var + _LN_EPS) * gamma + beta


# ---------------------------------------------------------------------------
# Kernels
# ---------------------------------------------------------------------------

def _src_kernel(x_ref, u1_ref, ub1_ref, u2_ref, ub2_ref, g_ref, bt_ref, w1s_ref,
                out_ref, gp_ref):
    """src-node MLP + residual, fused with the grid-side projection of the edge
    MLP's first layer (gp = grid_tile @ W1_src, emitted in bf16)."""
    x = x_ref[...]                                   # (T, D) f32
    xb = x.astype(jnp.bfloat16)
    h = jnp.dot(xb, u1_ref[...], preferred_element_type=jnp.float32) + ub1_ref[...]
    h = _silu(h)
    y = jnp.dot(h.astype(jnp.bfloat16), u2_ref[...],
                preferred_element_type=jnp.float32) + ub2_ref[...]
    y = _layer_norm(y, g_ref[...], bt_ref[...])
    out_ref[...] = x + y                             # residual onto grid_nfeat
    gp_ref[...] = jnp.dot(xb, w1s_ref[...],
                          preferred_element_type=jnp.float32).astype(gp_ref.dtype)


def _edge_dst_kernel(efeat_ref, eprojs_ref, dstr_ref, dstc_ref, mesh_ref,
                     w1e_ref, w1d_ref, b1_ref, w2_ref, b2_ref, ge_ref, bte_ref,
                     v1_ref, c1_ref, v2_ref, c2_ref, gd_ref, btd_ref,
                     o_ref, agg_ref, mproj_ref):
    """Fused: (t==0) mesh-side projection -> per edge tile: edge MLP ->
    f32 sum-aggregation into a per-dst VMEM accumulator -> (last tile)
    dst-node MLP + LayerNorm + residual onto mesh feats."""
    t = pl.program_id(0)
    n_mesh = agg_ref.shape[0]
    te = efeat_ref.shape[0]

    @pl.when(t == 0)
    def _():
        agg_ref[...] = jnp.zeros_like(agg_ref)
        # mesh-side projection of the edge MLP's first layer, computed once.
        mproj_ref[...] = jnp.dot(mesh_ref[...].astype(jnp.bfloat16), w1d_ref[...],
                                 preferred_element_type=jnp.float32)

    # ---- per-edge dst contribution via one-hot selection from resident mproj ----
    mesh_cols = jax.lax.broadcasted_iota(jnp.int32, (te, n_mesh), 1)
    sel = (mesh_cols == dstc_ref[...]).astype(jnp.float32)          # (TE, Nm)
    dst_proj = jnp.dot(sel, mproj_ref[...], preferred_element_type=jnp.float32)

    # ---- edge MLP (concat folded into a split first layer) ----
    h = (jnp.dot(efeat_ref[...], w1e_ref[...], preferred_element_type=jnp.float32)
         + eprojs_ref[...].astype(jnp.float32) + dst_proj + b1_ref[...])
    h = _silu(h)
    y = jnp.dot(h.astype(jnp.bfloat16), w2_ref[...],
                preferred_element_type=jnp.float32) + b2_ref[...]
    e_out = _layer_norm(y, ge_ref[...], bte_ref[...])               # (TE, De_out) f32

    # ---- f32 sum-aggregation of this tile's edges into their dst mesh rows ----
    # NOTE: relies on the edge grid axis executing sequentially ("arbitrary").
    mesh_rows = jax.lax.broadcasted_iota(jnp.int32, (n_mesh, te), 0)
    onehot = (mesh_rows == dstr_ref[...]).astype(jnp.float32)       # (Nm, TE)
    agg_ref[...] += jnp.dot(onehot, e_out, preferred_element_type=jnp.float32)

    # ---- last edge tile: dst-node MLP + residual ----
    @pl.when(t == pl.num_programs(0) - 1)
    def _():
        mesh = mesh_ref[...]                                        # (Nm, Dm) f32
        cat = jnp.concatenate([agg_ref[...], mesh], axis=-1).astype(jnp.bfloat16)
        hd = jnp.dot(cat, v1_ref[...], preferred_element_type=jnp.float32) + c1_ref[...]
        hd = _silu(hd)
        yd = jnp.dot(hd.astype(jnp.bfloat16), v2_ref[...],
                     preferred_element_type=jnp.float32) + c2_ref[...]
        yd = _layer_norm(yd, gd_ref[...], btd_ref[...])
        o_ref[...] = mesh + yd                                      # residual onto mesh_nfeat


# ---------------------------------------------------------------------------
# pallas_call wrappers
# ---------------------------------------------------------------------------

def run_src_stage(grid_nfeat, sp, w1_src_bf16, *, tile_rows=TILE_GRID):
    n, d = grid_nfeat.shape
    hid = sp["w1"].shape[1]
    out_d = sp["w2"].shape[1]
    tile_rows = min(tile_rows, n)
    assert n % tile_rows == 0

    row = lambda i: (i, 0)
    const = lambda i: (0, 0)
    args = (grid_nfeat,
            sp["w1"].astype(jnp.bfloat16), sp["b1"],
            sp["w2"].astype(jnp.bfloat16), sp["b2"],
            sp["g"], sp["bt"], w1_src_bf16)
    in_specs = [pl.BlockSpec((tile_rows, d), row)] + \
               [pl.BlockSpec(a.shape, const) for a in args[1:]]

    alias = {0: 0} if d == out_d else {}

    return pl.pallas_call(
        _src_kernel,
        out_shape=(jax.ShapeDtypeStruct((n, out_d), jnp.float32),
                   jax.ShapeDtypeStruct((n, hid), jnp.bfloat16)),
        grid=(n // tile_rows,),
        in_specs=in_specs,
        out_specs=(pl.BlockSpec((tile_rows, out_d), row),
                   pl.BlockSpec((tile_rows, hid), row)),
        input_output_aliases=alias,
        compiler_params=pltpu.CompilerParams(
            dimension_semantics=("parallel",),
            vmem_limit_bytes=_VMEM_LIMIT),
    )(*args)


def run_edge_dst_stage(efeat_bf16, eproj_src_bf16, dst_row, dst_col, mesh_nfeat,
                       ep, dp, *, tile_edges=TILE_EDGE):
    e_cnt, de = efeat_bf16.shape
    hid = eproj_src_bf16.shape[1]
    n_mesh, dm = mesh_nfeat.shape
    de_out = ep["w2"].shape[1]
    d_out = dp["w2"].shape[1]
    tile_edges = min(tile_edges, e_cnt)
    # TODO(synk): add masking / padded-dst handling for E % tile_edges != 0.
    assert e_cnt % tile_edges == 0

    erow = lambda t: (t, 0)
    eidx = lambda t: (0, t)
    const = lambda t: (0, 0)

    # K=(De_out+Dm) fused first layer of the dst MLP.
    v1_full = jnp.concatenate([dp["w1a"], dp["w1m"]], axis=0).astype(jnp.bfloat16)

    args = (efeat_bf16, eproj_src_bf16, dst_row, dst_col, mesh_nfeat,
            ep["w1e"].astype(jnp.bfloat16), ep["w1d"].astype(jnp.bfloat16),
            ep["b1"], ep["w2"].astype(jnp.bfloat16), ep["b2"], ep["g"], ep["bt"],
            v1_full, dp["b1"], dp["w2"].astype(jnp.bfloat16), dp["b2"],
            dp["g"], dp["bt"])
    in_specs = [pl.BlockSpec((tile_edges, de), erow),
                pl.BlockSpec((tile_edges, hid), erow),
                pl.BlockSpec((1, tile_edges), eidx),
                pl.BlockSpec((tile_edges, 1), erow),
                pl.BlockSpec((n_mesh, dm), const)] + \
               [pl.BlockSpec(a.shape, const) for a in args[5:]]

    alias = {4: 0} if (dm == d_out and mesh_nfeat.dtype == jnp.float32) else {}

    return pl.pallas_call(
        _edge_dst_kernel,
        out_shape=jax.ShapeDtypeStruct((n_mesh, d_out), jnp.float32),
        grid=(e_cnt // tile_edges,),
        in_specs=in_specs,
        out_specs=pl.BlockSpec((n_mesh, d_out), const),
        scratch_shapes=[pltpu.VMEM((n_mesh, de_out), jnp.float32),
                        pltpu.VMEM((n_mesh, hid), jnp.float32)],
        input_output_aliases=alias,          # mesh_nfeat -> mesh_out (residual update)
        compiler_params=pltpu.CompilerParams(
            dimension_semantics=("arbitrary",),   # reduction over edge tiles
            vmem_limit_bytes=_VMEM_LIMIT),
    )(*args)


# ---------------------------------------------------------------------------
# MeshGraphEncoder forward
# ---------------------------------------------------------------------------

@jax.jit
def mesh_graph_encoder_forward(g2m_efeat, grid_nfeat, mesh_nfeat, src_idx, dst_idx, params):
    e, d, s = params["edge"], params["dst"], params["src"]

    # 3) src-node MLP + residual, fused with the grid-side edge-MLP projection (bf16 out).
    grid_out, gp = run_src_stage(grid_nfeat, s, e["w1s"].astype(jnp.bfloat16))

    # Per-edge gather of the projected src contribution: [E, H] bf16 instead of [E, 3D] f32.
    # TODO(synk): move in-kernel via dst-sorted edges + scalar-prefetch segment offsets at scale.
    eproj_src = gp[src_idx]

    # 1)+2) fused: mesh-side projection -> edge MLP -> f32 sum aggregation -> dst MLP + residual.
    dst_i32 = dst_idx.astype(jnp.int32)
    mesh_out = run_edge_dst_stage(
        g2m_efeat.astype(jnp.bfloat16), eproj_src,
        dst_i32.reshape(1, -1), dst_i32.reshape(-1, 1), mesh_nfeat, e, d)

    return grid_out, mesh_out


# ---------------------------------------------------------------------------
# Pure-JAX f32 reference (original concat formulation)
# ---------------------------------------------------------------------------

def _ref_mlp(x, w1, b1, w2, b2, g, bt):
    h = x @ w1 + b1
    h = h * jax.nn.sigmoid(h)
    y = h @ w2 + b2
    mu = y.mean(-1, keepdims=True)
    var = ((y - mu) ** 2).mean(-1, keepdims=True)
    return (y - mu) / jnp.sqrt(var + _LN_EPS) * g + bt


def reference_forward(g2m_efeat, grid_nfeat, mesh_nfeat, src_idx, dst_idx, params):
    e, d, s = params["edge"], params["dst"], params["src"]
    edge_in = jnp.concatenate(
        [g2m_efeat, grid_nfeat[src_idx], mesh_nfeat[dst_idx]], axis=-1)
    w1_full = jnp.concatenate([e["w1e"], e["w1s"], e["w1d"]], axis=0)
    efeat_out = _ref_mlp(edge_in, w1_full, e["b1"], e["w2"], e["b2"], e["g"], e["bt"])
    agg = jnp.zeros((mesh_nfeat.shape[0], efeat_out.shape[1]),
                    jnp.float32).at[dst_idx].add(efeat_out)
    cat_feat = jnp.concatenate([agg, mesh_nfeat], axis=-1)
    v1_full = jnp.concatenate([d["w1a"], d["w1m"]], axis=0)
    mesh_out = mesh_nfeat + _ref_mlp(cat_feat, v1_full, d["b1"], d["w2"], d["b2"],
                                     d["g"], d["bt"])
    grid_out = grid_nfeat + _ref_mlp(grid_nfeat, s["w1"], s["b1"], s["w2"], s["b2"],
                                     s["g"], s["bt"])
    return grid_out, mesh_out


# ---------------------------------------------------------------------------
# main
# ---------------------------------------------------------------------------

if __name__ == "__main__":
    N_GRID, N_MESH, N_EDGES = 1024, 64, 1024
    D_SRC = D_DST = D_EDGE = HID = D_EDGE_OUT = D_SRC_OUT = D_DST_OUT = 128

    key = jax.random.PRNGKey(0)
    ks = jax.random.split(key, 30)
    f32 = jnp.float32

    def w(k, shape, scale=0.05):
        return (scale * jax.random.normal(k, shape)).astype(f32)

    params = {
        "edge": {  # MeshGraphEdgeMLPConcat: first layer stored pre-split [efeat|src|dst]
            "w1e": w(ks[0], (D_EDGE, HID)),
            "w1s": w(ks[1], (D_SRC, HID)),
            "w1d": w(ks[2], (D_DST, HID)),
            "b1": w(ks[3], (1, HID)),
            "w2": w(ks[4], (HID, D_EDGE_OUT)),
            "b2": w(ks[5], (1, D_EDGE_OUT)),
            "g": (1.0 + 0.1 * jax.random.normal(ks[6], (1, D_EDGE_OUT))).astype(f32),
            "bt": w(ks[7], (1, D_EDGE_OUT)),
        },
        "dst": {  # dst_node_mlp: first layer stored pre-split [agg|mesh]
            "w1a": w(ks[8], (D_EDGE_OUT, HID)),
            "w1m": w(ks[9], (D_DST, HID)),
            "b1": w(ks[10], (1, HID)),
            "w2": w(ks[11], (HID, D_DST_OUT)),
            "b2": w(ks[12], (1, D_DST_OUT)),
            "g": (1.0 + 0.1 * jax.random.normal(ks[13], (1, D_DST_OUT))).astype(f32),
            "bt": w(ks[14], (1, D_DST_OUT)),
        },
        "src": {  # src_node_mlp
            "w1": w(ks[15], (D_SRC, HID)),
            "b1": w(ks[16], (1, HID)),
            "w2": w(ks[17], (HID, D_SRC_OUT)),
            "b2": w(ks[18], (1, D_SRC_OUT)),
            "g": (1.0 + 0.1 * jax.random.normal(ks[19], (1, D_SRC_OUT))).astype(f32),
            "bt": w(ks[20], (1, D_SRC_OUT)),
        },
    }

    g2m_efeat = jax.random.normal(ks[21], (N_EDGES, D_EDGE)).astype(f32)
    grid_nfeat = jax.random.normal(ks[22], (N_GRID, D_SRC)).astype(f32)
    mesh_nfeat = jax.random.normal(ks[23], (N_MESH, D_DST)).astype(f32)
    src_idx = jax.random.randint(ks[24], (N_EDGES,), 0, N_GRID, dtype=jnp.int32)
    dst_idx = jax.random.randint(ks[25], (N_EDGES,), 0, N_MESH, dtype=jnp.int32)

    grid_out, mesh_out = mesh_graph_encoder_forward(
        g2m_efeat, grid_nfeat, mesh_nfeat, src_idx, dst_idx, params)
    jax.block_until_ready((grid_out, mesh_out))

    grid_ref, mesh_ref = reference_forward(
        g2m_efeat, grid_nfeat, mesh_nfeat, src_idx, dst_idx, params)

    assert grid_out.shape == (N_GRID, D_SRC_OUT) and mesh_out.shape == (N_MESH, D_DST_OUT)
    # bf16 MXU operands (f32 accumulation) vs the pure-f32 reference.
    assert jnp.allclose(grid_out, grid_ref, atol=5e-2, rtol=5e-2)
    assert jnp.allclose(mesh_out, mesh_ref, atol=5e-2, rtol=5e-2)

    print("KERNEL_OK")
</pallas_src>

<mosaic_0001>
module attributes {stable_mosaic.version = 11 : i64} {
  func.func @_src_kernel(%arg0: i32, %arg1: memref<512x128xf32, #tpu.memory_space<vmem>>, %arg2: memref<128x128xbf16, #tpu.memory_space<vmem>>, %arg3: memref<1x128xf32, #tpu.memory_space<vmem>>, %arg4: memref<128x128xbf16, #tpu.memory_space<vmem>>, %arg5: memref<1x128xf32, #tpu.memory_space<vmem>>, %arg6: memref<1x128xf32, #tpu.memory_space<vmem>>, %arg7: memref<1x128xf32, #tpu.memory_space<vmem>>, %arg8: memref<128x128xbf16, #tpu.memory_space<vmem>>, %arg9: memref<512x128xf32, #tpu.memory_space<vmem>>, %arg10: memref<512x128xbf16, #tpu.memory_space<vmem>>) attributes {dimension_semantics = [#tpu.dimension_semantics<parallel>], iteration_bounds = array<i64: 2>, scalar_prefetch = 0 : i64, scratch_operands = 0 : i64, tpu.core_type = #tpu.core_type<tc>, window_params = [{transform_indices = @transform_0, window_bounds = array<i64: 512, 128>}, {pipeline_mode = #tpu.pipeline_mode<synchronous>, transform_indices = @transform_1, window_bounds = array<i64: 128, 128>}, {pipeline_mode = #tpu.pipeline_mode<synchronous>, transform_indices = @transform_2, window_bounds = array<i64: 1, 128>}, {pipeline_mode = #tpu.pipeline_mode<synchronous>, transform_indices = @transform_3, window_bounds = array<i64: 128, 128>}, {pipeline_mode = #tpu.pipeline_mode<synchronous>, transform_indices = @transform_4, window_bounds = array<i64: 1, 128>}, {pipeline_mode = #tpu.pipeline_mode<synchronous>, transform_indices = @transform_5, window_bounds = array<i64: 1, 128>}, {pipeline_mode = #tpu.pipeline_mode<synchronous>, transform_indices = @transform_6, window_bounds = array<i64: 1, 128>}, {pipeline_mode = #tpu.pipeline_mode<synchronous>, transform_indices = @transform_7, window_bounds = array<i64: 128, 128>}, {transform_indices = @transform_8, window_bounds = array<i64: 512, 128>}, {transform_indices = @transform_9, window_bounds = array<i64: 512, 128>}]} {
    %c0 = arith.constant 0 : index
    %c0_0 = arith.constant 0 : index
    %0 = vector.load %arg1[%c0, %c0_0] : memref<512x128xf32, #tpu.memory_space<vmem>>, vector<512x128xf32>
    %1 = arith.truncf %0 : vector<512x128xf32> to vector<512x128xbf16>
    %c0_1 = arith.constant 0 : index
    %c0_2 = arith.constant 0 : index
    %2 = vector.load %arg2[%c0_1, %c0_2] : memref<128x128xbf16, #tpu.memory_space<vmem>>, vector<128x128xbf16>
    %cst = arith.constant dense<0.000000e+00> : vector<512x128xf32>
    %3 = tpu.matmul %1, %2, %cst {dimension_numbers = #tpu.dot_dimension_numbers<[1], [0], [0], [1], [0, 0, 1, 1], [], []>} : vector<512x128xbf16>, vector<128x128xbf16>, vector<512x128xf32> -> vector<512x128xf32>
    %c0_3 = arith.constant 0 : index
    %c0_4 = arith.constant 0 : index
    %4 = vector.load %arg3[%c0_3, %c0_4] : memref<1x128xf32, #tpu.memory_space<vmem>>, vector<1x128xf32>
    %5 = vector.broadcast %4 : vector<1x128xf32> to vector<512x128xf32>
    %6 = arith.addf %3, %5 : vector<512x128xf32>
    %7 = arith.negf %6 : vector<512x128xf32>
    %8 = math.exp %7 : vector<512x128xf32>
    %cst_5 = arith.constant 1.000000e+00 : f32
    %9 = vector.broadcast %cst_5 : f32 to vector<512x128xf32>
    %10 = arith.addf %9, %8 : vector<512x128xf32>
    %11 = arith.divf %9, %10 : vector<512x128xf32>
    %12 = arith.mulf %6, %11 : vector<512x128xf32>
    %13 = arith.truncf %12 : vector<512x128xf32> to vector<512x128xbf16>
    %c0_6 = arith.constant 0 : index
    %c0_7 = arith.constant 0 : index
    %14 = vector.load %arg4[%c0_6, %c0_7] : memref<128x128xbf16, #tpu.memory_space<vmem>>, vector<128x128xbf16>
    %cst_8 = arith.constant dense<0.000000e+00> : vector<512x128xf32>
    %15 = tpu.matmul %13, %14, %cst_8 {dimension_numbers = #tpu.dot_dimension_numbers<[1], [0], [0], [1], [0, 0, 1, 1], [], []>} : vector<512x128xbf16>, vector<128x128xbf16>, vector<512x128xf32> -> vector<512x128xf32>
    %c0_9 = arith.constant 0 : index
    %c0_10 = arith.constant 0 : index
    %16 = vector.load %arg5[%c0_9, %c0_10] : memref<1x128xf32, #tpu.memory_space<vmem>>, vector<1x128xf32>
    %17 = vector.broadcast %16 : vector<1x128xf32> to vector<512x128xf32>
    %18 = arith.addf %15, %17 : vector<512x128xf32>
    %c0_11 = arith.constant 0 : index
    %c0_12 = arith.constant 0 : index
    %19 = vector.load %arg6[%c0_11, %c0_12] : memref<1x128xf32, #tpu.memory_space<vmem>>, vector<1x128xf32>
    %c0_13 = arith.constant 0 : index
    %c0_14 = arith.constant 0 : index
    %20 = vector.load %arg7[%c0_13, %c0_14] : memref<1x128xf32, #tpu.memory_space<vmem>>, vector<1x128xf32>
    %cst_15 = arith.constant dense<0.000000e+00> : vector<512xf32>
    %21 = vector.multi_reduction <add>, %18, %cst_15 [1] : vector<512x128xf32> to vector<512xf32>
    %22 = vector.shape_cast %21 : vector<512xf32> to vector<512x1xf32>
    %cst_16 = arith.constant 1.280000e+02 : f32
    %23 = vector.broadcast %cst_16 : f32 to vector<512x1xf32>
    %24 = arith.divf %22, %23 : vector<512x1xf32>
    %25 = arith.mulf %18, %18 : vector<512x128xf32>
    %cst_17 = arith.constant dense<0.000000e+00> : vector<512xf32>
    %26 = vector.multi_reduction <add>, %25, %cst_17 [1] : vector<512x128xf32> to vector<512xf32>
    %27 = vector.shape_cast %26 : vector<512xf32> to vector<512x1xf32>
    %cst_18 = arith.constant 1.280000e+02 : f32
    %28 = vector.broadcast %cst_18 : f32 to vector<512x1xf32>
    %29 = arith.divf %27, %28 : vector<512x1xf32>
    %30 = arith.mulf %24, %24 : vector<512x1xf32>
    %31 = arith.subf %29, %30 : vector<512x1xf32>
    %cst_19 = arith.constant 0.000000e+00 : f32
    %32 = vector.broadcast %cst_19 : f32 to vector<512x1xf32>
    %33 = arith.maximumf %31, %32 : vector<512x1xf32>
    %34 = vector.broadcast %24 : vector<512x1xf32> to vector<512x128xf32>
    %35 = arith.subf %18, %34 : vector<512x128xf32>
    %cst_20 = arith.constant 9.99999974E-6 : f32
    %36 = vector.broadcast %cst_20 : f32 to vector<512x1xf32>
    %37 = arith.addf %33, %36 : vector<512x1xf32>
    %38 = math.rsqrt %37 : vector<512x1xf32>
    %39 = vector.broadcast %38 : vector<512x1xf32> to vector<512x128xf32>
    %40 = arith.mulf %35, %39 : vector<512x128xf32>
    %41 = vector.broadcast %19 : vector<1x128xf32> to vector<512x128xf32>
    %42 = arith.mulf %40, %41 : vector<512x128xf32>
    %43 = vector.broadcast %20 : vector<1x128xf32> to vector<512x128xf32>
    %44 = arith.addf %42, %43 : vector<512x128xf32>
    %45 = arith.addf %0, %44 : vector<512x128xf32>
    %c0_21 = arith.constant 0 : index
    %c0_22 = arith.constant 0 : index
    %46 = vector.load %arg9[%c0_21, %c0_22] : memref<512x128xf32, #tpu.memory_space<vmem>>, vector<512x128xf32>
    tpu.vector_store %arg9[%c0_21, %c0_22], %45 {strides = array<i32>} : memref<512x128xf32, #tpu.memory_space<vmem>>, vector<512x128xf32>,
    %c0_23 = arith.constant 0 : index
    %c0_24 = arith.constant 0 : index
    %47 = vector.load %arg8[%c0_23, %c0_24] : memref<128x128xbf16, #tpu.memory_space<vmem>>, vector<128x128xbf16>
    %cst_25 = arith.constant dense<0.000000e+00> : vector<512x128xf32>
    %48 = tpu.matmul %1, %47, %cst_25 {dimension_numbers = #tpu.dot_dimension_numbers<[1], [0], [0], [1], [0, 0, 1, 1], [], []>} : vector<512x128xbf16>, vector<128x128xbf16>, vector<512x128xf32> -> vector<512x128xf32>
    %49 = arith.truncf %48 : vector<512x128xf32> to vector<512x128xbf16>
    %c0_26 = arith.constant 0 : index
    %c0_27 = arith.constant 0 : index
    %50 = vector.load %arg10[%c0_26, %c0_27] : memref<512x128xbf16, #tpu.memory_space<vmem>>, vector<512x128xbf16>
    tpu.vector_store %arg10[%c0_26, %c0_27], %49 {strides = array<i32>} : memref<512x128xbf16, #tpu.memory_space<vmem>>, vector<512x128xbf16>,
    return
  }
  func.func @transform_0(%arg0: i32) -> (i32, i32) {
    %c0_i32 = arith.constant 0 : i32
    %c0_i32_0 = arith.constant 0 : i32
    return %arg0, %c0_i32 : i32, i32
  }
  func.func @transform_1(%arg0: i32) -> (i32, i32) {
    %c0_i32 = arith.constant 0 : i32
    %c0_i32_0 = arith.constant 0 : i32
    %c0_i32_1 = arith.constant 0 : i32
    return %c0_i32, %c0_i32_0 : i32, i32
  }
  func.func @transform_2(%arg0: i32) -> (i32, i32) {
    %c0_i32 = arith.constant 0 : i32
    %c0_i32_0 = arith.constant 0 : i32
    %c0_i32_1 = arith.constant 0 : i32
    return %c0_i32, %c0_i32_0 : i32, i32
  }
  func.func @transform_3(%arg0: i32) -> (i32, i32) {
    %c0_i32 = arith.constant 0 : i32
    %c0_i32_0 = arith.constant 0 : i32
    %c0_i32_1 = arith.constant 0 : i32
    return %c0_i32, %c0_i32_0 : i32, i32
  }
  func.func @transform_4(%arg0: i32) -> (i32, i32) {
    %c0_i32 = arith.constant 0 : i32
    %c0_i32_0 = arith.constant 0 : i32
    %c0_i32_1 = arith.constant 0 : i32
    return %c0_i32, %c0_i32_0 : i32, i32
  }
  func.func @transform_5(%arg0: i32) -> (i32, i32) {
    %c0_i32 = arith.constant 0 : i32
    %c0_i32_0 = arith.constant 0 : i32
    %c0_i32_1 = arith.constant 0 : i32
    return %c0_i32, %c0_i32_0 : i32, i32
  }
  func.func @transform_6(%arg0: i32) -> (i32, i32) {
    %c0_i32 = arith.constant 0 : i32
    %c0_i32_0 = arith.constant 0 : i32
    %c0_i32_1 = arith.constant 0 : i32
    return %c0_i32, %c0_i32_0 : i32, i32
  }
  func.func @transform_7(%arg0: i32) -> (i32, i32) {
    %c0_i32 = arith.constant 0 : i32
    %c0_i32_0 = arith.constant 0 : i32
    %c0_i32_1 = arith.constant 0 : i32
    return %c0_i32, %c0_i32_0 : i32, i32
  }
  func.func @transform_8(%arg0: i32) -> (i32, i32) {
    %c0_i32 = arith.constant 0 : i32
    %c0_i32_0 = arith.constant 0 : i32
    return %arg0, %c0_i32 : i32, i32
  }
  func.func @transform_9(%arg0: i32) -> (i32, i32) {
    %c0_i32 = arith.constant 0 : i32
    %c0_i32_0 = arith.constant 0 : i32
    return %arg0, %c0_i32 : i32, i32
  }
}

module attributes {stable_mosaic.version = 11 : i64} {
  func.func @_edge_dst_kernel(%arg0: i32, %arg1: memref<512x128xbf16, #tpu.memory_space<vmem>>, %arg2: memref<512x128xbf16, #tpu.memory_space<vmem>>, %arg3: memref<1x512xi32, #tpu.memory_space<vmem>>, %arg4: memref<512x1xi32, #tpu.memory_space<vmem>>, %arg5: memref<64x128xf32, #tpu.memory_space<vmem>>, %arg6: memref<128x128xbf16, #tpu.memory_space<vmem>>, %arg7: memref<128x128xbf16, #tpu.memory_space<vmem>>, %arg8: memref<1x128xf32, #tpu.memory_space<vmem>>, %arg9: memref<128x128xbf16, #tpu.memory_space<vmem>>, %arg10: memref<1x128xf32, #tpu.memory_space<vmem>>, %arg11: memref<1x128xf32, #tpu.memory_space<vmem>>, %arg12: memref<1x128xf32, #tpu.memory_space<vmem>>, %arg13: memref<256x128xbf16, #tpu.memory_space<vmem>>, %arg14: memref<1x128xf32, #tpu.memory_space<vmem>>, %arg15: memref<128x128xbf16, #tpu.memory_space<vmem>>, %arg16: memref<1x128xf32, #tpu.memory_space<vmem>>, %arg17: memref<1x128xf32, #tpu.memory_space<vmem>>, %arg18: memref<1x128xf32, #tpu.memory_space<vmem>>, %arg19: memref<64x128xf32, #tpu.memory_space<vmem>>, %arg20: memref<64x128xf32, #tpu.memory_space<vmem>>, %arg21: memref<64x128xf32, #tpu.memory_space<vmem>>) attributes {dimension_semantics = [#tpu.dimension_semantics<arbitrary>], iteration_bounds = array<i64: 2>, scalar_prefetch = 0 : i64, scratch_operands = 2 : i64, tpu.core_type = #tpu.core_type<tc>, window_params = [{transform_indices = @transform_0, window_bounds = array<i64: 512, 128>}, {transform_indices = @transform_1, window_bounds = array<i64: 512, 128>}, {transform_indices = @transform_2, window_bounds = array<i64: 1, 512>}, {transform_indices = @transform_3, window_bounds = array<i64: 512, 1>}, {pipeline_mode = #tpu.pipeline_mode<synchronous>, transform_indices = @transform_4, window_bounds = array<i64: 64, 128>}, {pipeline_mode = #tpu.pipeline_mode<synchronous>, transform_indices = @transform_5, window_bounds = array<i64: 128, 128>}, {pipeline_mode = #tpu.pipeline_mode<synchronous>, transform_indices = @transform_6, window_bounds = array<i64: 128, 128>}, {pipeline_mode = #tpu.pipeline_mode<synchronous>, transform_indices = @transform_7, window_bounds = array<i64: 1, 128>}, {pipeline_mode = #tpu.pipeline_mode<synchronous>, transform_indices = @transform_8, window_bounds = array<i64: 128, 128>}, {pipeline_mode = #tpu.pipeline_mode<synchronous>, transform_indices = @transform_9, window_bounds = array<i64: 1, 128>}, {pipeline_mode = #tpu.pipeline_mode<synchronous>, transform_indices = @transform_10, window_bounds = array<i64: 1, 128>}, {pipeline_mode = #tpu.pipeline_mode<synchronous>, transform_indices = @transform_11, window_bounds = array<i64: 1, 128>}, {pipeline_mode = #tpu.pipeline_mode<synchronous>, transform_indices = @transform_12, window_bounds = array<i64: 256, 128>}, {pipeline_mode = #tpu.pipeline_mode<synchronous>, transform_indices = @transform_13, window_bounds = array<i64: 1, 128>}, {pipeline_mode = #tpu.pipeline_mode<synchronous>, transform_indices = @transform_14, window_bounds = array<i64: 128, 128>}, {pipeline_mode = #tpu.pipeline_mode<synchronous>, transform_indices = @transform_15, window_bounds = array<i64: 1, 128>}, {pipeline_mode = #tpu.pipeline_mode<synchronous>, transform_indices = @transform_16, window_bounds = array<i64: 1, 128>}, {pipeline_mode = #tpu.pipeline_mode<synchronous>, transform_indices = @transform_17, window_bounds = array<i64: 1, 128>}, {pipeline_mode = #tpu.pipeline_mode<synchronous>, transform_indices = @transform_18, window_bounds = array<i64: 64, 128>}]} {
    %c0_i32 = arith.constant 0 : i32
    %0 = arith.cmpi eq, %arg0, %c0_i32 : i32
    %1 = arith.extui %0 : i1 to i32
    %c0_i32_0 = arith.constant 0 : i32
    %2 = arith.cmpi ne, %1, %c0_i32_0 : i32
    scf.if %2 {
      %cst_37 = arith.constant 0.000000e+00 : f32
      %72 = vector.broadcast %cst_37 : f32 to vector<64x128xf32>
      %c0_38 = arith.constant 0 : index
      %c0_39 = arith.constant 0 : index
      %73 = vector.load %arg20[%c0_38, %c0_39] : memref<64x128xf32, #tpu.memory_space<vmem>>, vector<64x128xf32>
      tpu.vector_store %arg20[%c0_38, %c0_39], %72 {strides = array<i32>} : memref<64x128xf32, #tpu.memory_space<vmem>>, vector<64x128xf32>,
      %c0_40 = arith.constant 0 : index
      %c0_41 = arith.constant 0 : index
      %74 = vector.load %arg5[%c0_40, %c0_41] : memref<64x128xf32, #tpu.memory_space<vmem>>, vector<64x128xf32>
      %75 = arith.truncf %74 : vector<64x128xf32> to vector<64x128xbf16>
      %c0_42 = arith.constant 0 : index
      %c0_43 = arith.constant 0 : index
      %76 = vector.load %arg7[%c0_42, %c0_43] : memref<128x128xbf16, #tpu.memory_space<vmem>>, vector<128x128xbf16>
      %cst_44 = arith.constant dense<0.000000e+00> : vector<64x128xf32>
      %77 = tpu.matmul %75, %76, %cst_44 {dimension_numbers = #tpu.dot_dimension_numbers<[1], [0], [0], [1], [0, 0, 1, 1], [], []>} : vector<64x128xbf16>, vector<128x128xbf16>, vector<64x128xf32> -> vector<64x128xf32>
      %c0_45 = arith.constant 0 : index
      %c0_46 = arith.constant 0 : index
      %78 = vector.load %arg21[%c0_45, %c0_46] : memref<64x128xf32, #tpu.memory_space<vmem>>, vector<64x128xf32>
      tpu.vector_store %arg21[%c0_45, %c0_46], %77 {strides = array<i32>} : memref<64x128xf32, #tpu.memory_space<vmem>>, vector<64x128xf32>,
    } else {
    }
    %3 = tpu.iota {dimensions = array<i32: 1>} : vector<512x64xi32>
    %c0 = arith.constant 0 : index
    %c0_1 = arith.constant 0 : index
    %4 = vector.load %arg4[%c0, %c0_1] : memref<512x1xi32, #tpu.memory_space<vmem>>, vector<512x1xi32>
    %5 = vector.broadcast %4 : vector<512x1xi32> to vector<512x64xi32>
    %6 = arith.cmpi eq, %3, %5 : vector<512x64xi32>
    %7 = arith.extui %6 : vector<512x64xi1> to vector<512x64xi32>
    %8 = arith.sitofp %7 : vector<512x64xi32> to vector<512x64xf32>
    %c0_2 = arith.constant 0 : index
    %c0_3 = arith.constant 0 : index
    %9 = vector.load %arg21[%c0_2, %c0_3] : memref<64x128xf32, #tpu.memory_space<vmem>>, vector<64x128xf32>
    %cst = arith.constant dense<0.000000e+00> : vector<512x128xf32>
    %10 = tpu.matmul %8, %9, %cst {dimension_numbers = #tpu.dot_dimension_numbers<[1], [0], [0], [1], [0, 0, 1, 1], [], []>} : vector<512x64xf32>, vector<64x128xf32>, vector<512x128xf32> -> vector<512x128xf32>
    %c0_4 = arith.constant 0 : index
    %c0_5 = arith.constant 0 : index
    %11 = vector.load %arg1[%c0_4, %c0_5] : memref<512x128xbf16, #tpu.memory_space<vmem>>, vector<512x128xbf16>
    %c0_6 = arith.constant 0 : index
    %c0_7 = arith.constant 0 : index
    %12 = vector.load %arg6[%c0_6, %c0_7] : memref<128x128xbf16, #tpu.memory_space<vmem>>, vector<128x128xbf16>
    %cst_8 = arith.constant dense<0.000000e+00> : vector<512x128xf32>
    %13 = tpu.matmul %11, %12, %cst_8 {dimension_numbers = #tpu.dot_dimension_numbers<[1], [0], [0], [1], [0, 0, 1, 1], [], []>} : vector<512x128xbf16>, vector<128x128xbf16>, vector<512x128xf32> -> vector<512x128xf32>
    %c0_9 = arith.constant 0 : index
    %c0_10 = arith.constant 0 : index
    %14 = vector.load %arg2[%c0_9, %c0_10] : memref<512x128xbf16, #tpu.memory_space<vmem>>, vector<512x128xbf16>
    %15 = arith.extf %14 : vector<512x128xbf16> to vector<512x128xf32>
    %16 = arith.addf %13, %15 : vector<512x128xf32>
    %17 = arith.addf %16, %10 : vector<512x128xf32>
    %c0_11 = arith.constant 0 : index
    %c0_12 = arith.constant 0 : index
    %18 = vector.load %arg8[%c0_11, %c0_12] : memref<1x128xf32, #tpu.memory_space<vmem>>, vector<1x128xf32>
    %19 = vector.broadcast %18 : vector<1x128xf32> to vector<512x128xf32>
    %20 = arith.addf %17, %19 : vector<512x128xf32>
    %21 = arith.negf %20 : vector<512x128xf32>
    %22 = math.exp %21 : vector<512x128xf32>
    %cst_13 = arith.constant 1.000000e+00 : f32
    %23 = vector.broadcast %cst_13 : f32 to vector<512x128xf32>
    %24 = arith.addf %23, %22 : vector<512x128xf32>
    %25 = arith.divf %23, %24 : vector<512x128xf32>
    %26 = arith.mulf %20, %25 : vector<512x128xf32>
    %27 = arith.truncf %26 : vector<512x128xf32> to vector<512x128xbf16>
    %c0_14 = arith.constant 0 : index
    %c0_15 = arith.constant 0 : index
    %28 = vector.load %arg9[%c0_14, %c0_15] : memref<128x128xbf16, #tpu.memory_space<vmem>>, vector<128x128xbf16>
    %cst_16 = arith.constant dense<0.000000e+00> : vector<512x128xf32>
    %29 = tpu.matmul %27, %28, %cst_16 {dimension_numbers = #tpu.dot_dimension_numbers<[1], [0], [0], [1], [0, 0, 1, 1], [], []>} : vector<512x128xbf16>, vector<128x128xbf16>, vector<512x128xf32> -> vector<512x128xf32>
    %c0_17 = arith.constant 0 : index
    %c0_18 = arith.constant 0 : index
    %30 = vector.load %arg10[%c0_17, %c0_18] : memref<1x128xf32, #tpu.memory_space<vmem>>, vector<1x128xf32>
    %31 = vector.broadcast %30 : vector<1x128xf32> to vector<512x128xf32>
    %32 = arith.addf %29, %31 : vector<512x128xf32>
    %c0_19 = arith.constant 0 : index
    %c0_20 = arith.constant 0 : index
    %33 = vector.load %arg11[%c0_19, %c0_20] : memref<1x128xf32, #tpu.memory_space<vmem>>, vector<1x128xf32>
    %c0_21 = arith.constant 0 : index
    %c0_22 = arith.constant 0 : index
    %34 = vector.load %arg12[%c0_21, %c0_22] : memref<1x128xf32, #tpu.memory_space<vmem>>, vector<1x128xf32>
    %cst_23 = arith.constant dense<0.000000e+00> : vector<512xf32>
    %35 = vector.multi_reduction <add>, %32, %cst_23 [1] : vector<512x128xf32> to vector<512xf32>
    %36 = vector.shape_cast %35 : vector<512xf32> to vector<512x1xf32>
    %cst_24 = arith.constant 1.280000e+02 : f32
    %37 = vector.broadcast %cst_24 : f32 to vector<512x1xf32>
    %38 = arith.divf %36, %37 : vector<512x1xf32>
    %39 = arith.mulf %32, %32 : vector<512x128xf32>
    %cst_25 = arith.constant dense<0.000000e+00> : vector<512xf32>
    %40 = vector.multi_reduction <add>, %39, %cst_25 [1] : vector<512x128xf32> to vector<512xf32>
    %41 = vector.shape_cast %40 : vector<512xf32> to vector<512x1xf32>
    %cst_26 = arith.constant 1.280000e+02 : f32
    %42 = vector.broadcast %cst_26 : f32 to vector<512x1xf32>
    %43 = arith.divf %41, %42 : vector<512x1xf32>
    %44 = arith.mulf %38, %38 : vector<512x1xf32>
    %45 = arith.subf %43, %44 : vector<512x1xf32>
    %cst_27 = arith.constant 0.000000e+00 : f32
    %46 = vector.broadcast %cst_27 : f32 to vector<512x1xf32>
    %47 = arith.maximumf %45, %46 : vector<512x1xf32>
    %48 = vector.broadcast %38 : vector<512x1xf32> to vector<512x128xf32>
    %49 = arith.subf %32, %48 : vector<512x128xf32>
    %cst_28 = arith.constant 9.99999974E-6 : f32
    %50 = vector.broadcast %cst_28 : f32 to vector<512x1xf32>
    %51 = arith.addf %47, %50 : vector<512x1xf32>
    %52 = math.rsqrt %51 : vector<512x1xf32>
    %53 = vector.broadcast %52 : vector<512x1xf32> to vector<512x128xf32>
    %54 = arith.mulf %49, %53 : vector<512x128xf32>
    %55 = vector.broadcast %33 : vector<1x128xf32> to vector<512x128xf32>
    %56 = arith.mulf %54, %55 : vector<512x128xf32>
    %57 = vector.broadcast %34 : vector<1x128xf32> to vector<512x128xf32>
    %58 = arith.addf %56, %57 : vector<512x128xf32>
    %59 = tpu.iota {dimensions = array<i32: 0>} : vector<64x512xi32>
    %c0_29 = arith.constant 0 : index
    %c0_30 = arith.constant 0 : index
    %60 = vector.load %arg3[%c0_29, %c0_30] : memref<1x512xi32, #tpu.memory_space<vmem>>, vector<1x512xi32>
    %61 = vector.broadcast %60 : vector<1x512xi32> to vector<64x512xi32>
    %62 = arith.cmpi eq, %59, %61 : vector<64x512xi32>
    %63 = arith.extui %62 : vector<64x512xi1> to vector<64x512xi32>
    %64 = arith.sitofp %63 : vector<64x512xi32> to vector<64x512xf32>
    %c0_31 = arith.constant 0 : index
    %c0_32 = arith.constant 0 : index
    %65 = vector.load %arg20[%c0_31, %c0_32] : memref<64x128xf32, #tpu.memory_space<vmem>>, vector<64x128xf32>
    %cst_33 = arith.constant dense<0.000000e+00> : vector<64x128xf32>
    %66 = tpu.matmul %64, %58, %cst_33 {dimension_numbers = #tpu.dot_dimension_numbers<[1], [0], [0], [1], [0, 0, 1, 1], [], []>} : vector<64x512xf32>, vector<512x128xf32>, vector<64x128xf32> -> vector<64x128xf32>
    %67 = arith.addf %65, %66 : vector<64x128xf32>
    %c0_34 = arith.constant 0 : index
    %c0_35 = arith.constant 0 : index
    %68 = vector.load %arg20[%c0_34, %c0_35] : memref<64x128xf32, #tpu.memory_space<vmem>>, vector<64x128xf32>
    tpu.vector_store %arg20[%c0_34, %c0_35], %67 {strides = array<i32>} : memref<64x128xf32, #tpu.memory_space<vmem>>, vector<64x128xf32>,
    %c1_i32 = arith.constant 1 : i32
    %69 = arith.cmpi eq, %arg0, %c1_i32 : i32
    %70 = arith.extui %69 : i1 to i32
    %c0_i32_36 = arith.constant 0 : i32
    %71 = arith.cmpi ne, %70, %c0_i32_36 : i32
    scf.if %71 {
      %c0_37 = arith.constant 0 : index
      %c0_38 = arith.constant 0 : index
      %72 = vector.load %arg5[%c0_37, %c0_38] : memref<64x128xf32, #tpu.memory_space<vmem>>, vector<64x128xf32>
      %c0_39 = arith.constant 0 : index
      %c0_40 = arith.constant 0 : index
      %73 = vector.load %arg20[%c0_39, %c0_40] : memref<64x128xf32, #tpu.memory_space<vmem>>, vector<64x128xf32>
      %74 = tpu.concatenate %73, %72 in 1 : vector<64x128xf32>, vector<64x128xf32> -> vector<64x256xf32>
      %75 = arith.truncf %74 : vector<64x256xf32> to vector<64x256xbf16>
      %c0_41 = arith.constant 0 : index
      %c0_42 = arith.constant 0 : index
      %76 = vector.load %arg13[%c0_41, %c0_42] : memref<256x128xbf16, #tpu.memory_space<vmem>>, vector<256x128xbf16>
      %cst_43 = arith.constant dense<0.000000e+00> : vector<64x128xf32>
      %77 = tpu.matmul %75, %76, %cst_43 {dimension_numbers = #tpu.dot_dimension_numbers<[1], [0], [0], [1], [0, 0, 1, 1], [], []>} : vector<64x256xbf16>, vector<256x128xbf16>, vector<64x128xf32> -> vector<64x128xf32>
      %c0_44 = arith.constant 0 : index
      %c0_45 = arith.constant 0 : index
      %78 = vector.load %arg14[%c0_44, %c0_45] : memref<1x128xf32, #tpu.memory_space<vmem>>, vector<1x128xf32>
      %79 = vector.broadcast %78 : vector<1x128xf32> to vector<64x128xf32>
      %80 = arith.addf %77, %79 : vector<64x128xf32>
      %81 = arith.negf %80 : vector<64x128xf32>
      %82 = math.exp %81 : vector<64x128xf32>
      %cst_46 = arith.constant 1.000000e+00 : f32
      %83 = vector.broadcast %cst_46 : f32 to vector<64x128xf32>
      %84 = arith.addf %83, %82 : vector<64x128xf32>
      %85 = arith.divf %83, %84 : vector<64x128xf32>
      %86 = arith.mulf %80, %85 : vector<64x128xf32>
      %87 = arith.truncf %86 : vector<64x128xf32> to vector<64x128xbf16>
      %c0_47 = arith.constant 0 : index
      %c0_48 = arith.constant 0 : index
      %88 = vector.load %arg15[%c0_47, %c0_48] : memref<128x128xbf16, #tpu.memory_space<vmem>>, vector<128x128xbf16>
      %cst_49 = arith.constant dense<0.000000e+00> : vector<64x128xf32>
      %89 = tpu.matmul %87, %88, %cst_49 {dimension_numbers = #tpu.dot_dimension_numbers<[1], [0], [0], [1], [0, 0, 1, 1], [], []>} : vector<64x128xbf16>, vector<128x128xbf16>, vector<64x128xf32> -> vector<64x128xf32>
      %c0_50 = arith.constant 0 : index
      %c0_51 = arith.constant 0 : index
      %90 = vector.load %arg16[%c0_50, %c0_51] : memref<1x128xf32, #tpu.memory_space<vmem>>, vector<1x128xf32>
      %91 = vector.broadcast %90 : vector<1x128xf32> to vector<64x128xf32>
      %92 = arith.addf %89, %91 : vector<64x128xf32>
      %c0_52 = arith.constant 0 : index
      %c0_53 = arith.constant 0 : index
      %93 = vector.load %arg17[%c0_52, %c0_53] : memref<1x128xf32, #tpu.memory_space<vmem>>, vector<1x128xf32>
      %c0_54 = arith.constant 0 : index
      %c0_55 = arith.constant 0 : index
      %94 = vector.load %arg18[%c0_54, %c0_55] : memref<1x128xf32, #tpu.memory_space<vmem>>, vector<1x128xf32>
      %cst_56 = arith.constant dense<0.000000e+00> : vector<64xf32>
      %95 = vector.multi_reduction <add>, %92, %cst_56 [1] : vector<64x128xf32> to vector<64xf32>
      %96 = vector.shape_cast %95 : vector<64xf32> to vector<64x1xf32>
      %cst_57 = arith.constant 1.280000e+02 : f32
      %97 = vector.broadcast %cst_57 : f32 to vector<64x1xf32>
      %98 = arith.divf %96, %97 : vector<64x1xf32>
      %99 = arith.mulf %92, %92 : vector<64x128xf32>
      %cst_58 = arith.constant dense<0.000000e+00> : vector<64xf32>
      %100 = vector.multi_reduction <add>, %99, %cst_58 [1] : vector<64x128xf32> to vector<64xf32>
      %101 = vector.shape_cast %100 : vector<64xf32> to vector<64x1xf32>
      %cst_59 = arith.constant 1.280000e+02 : f32
      %102 = vector.broadcast %cst_59 : f32 to vector<64x1xf32>
      %103 = arith.divf %101, %102 : vector<64x1xf32>
      %104 = arith.mulf %98, %98 : vector<64x1xf32>
      %105 = arith.subf %103, %104 : vector<64x1xf32>
      %cst_60 = arith.constant 0.000000e+00 : f32
      %106 = vector.broadcast %cst_60 : f32 to vector<64x1xf32>
      %107 = arith.maximumf %105, %106 : vector<64x1xf32>
      %108 = vector.broadcast %98 : vector<64x1xf32> to vector<64x128xf32>
      %109 = arith.subf %92, %108 : vector<64x128xf32>
      %cst_61 = arith.constant 9.99999974E-6 : f32
      %110 = vector.broadcast %cst_61 : f32 to vector<64x1xf32>
      %111 = arith.addf %107, %110 : vector<64x1xf32>
      %112 = math.rsqrt %111 : vector<64x1xf32>
      %113 = vector.broadcast %112 : vector<64x1xf32> to vector<64x128xf32>
      %114 = arith.mulf %109, %113 : vector<64x128xf32>
      %115 = vector.broadcast %93 : vector<1x128xf32> to vector<64x128xf32>
      %116 = arith.mulf %114, %115 : vector<64x128xf32>
      %117 = vector.broadcast %94 : vector<1x128xf32> to vector<64x128xf32>
      %118 = arith.addf %116, %117 : vector<64x128xf32>
      %119 = arith.addf %72, %118 : vector<64x128xf32>
      %c0_62 = arith.constant 0 : index
      %c0_63 = arith.constant 0 : index
      %120 = vector.load %arg19[%c0_62, %c0_63] : memref<64x128xf32, #tpu.memory_space<vmem>>, vector<64x128xf32>
      tpu.vector_store %arg19[%c0_62, %c0_63], %119 {strides = array<i32>} : memref<64x128xf32, #tpu.memory_space<vmem>>, vector<64x128xf32>,
    } else {
    }
    return
  }
  func.func @transform_0(%arg0: i32) -> (i32, i32) {
    %c0_i32 = arith.constant 0 : i32
    %c0_i32_0 = arith.constant 0 : i32
    return %arg0, %c0_i32 : i32, i32
  }
  func.func @transform_1(%arg0: i32) -> (i32, i32) {
    %c0_i32 = arith.constant 0 : i32
    %c0_i32_0 = arith.constant 0 : i32
    return %arg0, %c0_i32 : i32, i32
  }
  func.func @transform_2(%arg0: i32) -> (i32, i32) {
    %c0_i32 = arith.constant 0 : i32
    %c0_i32_0 = arith.constant 0 : i32
    return %c0_i32, %arg0 : i32, i32
  }
  func.func @transform_3(%arg0: i32) -> (i32, i32) {
    %c0_i32 = arith.constant 0 : i32
    %c0_i32_0 = arith.constant 0 : i32
    return %arg0, %c0_i32 : i32, i32
  }
  func.func @transform_4(%arg0: i32) -> (i32, i32) {
    %c0_i32 = arith.constant 0 : i32
    %c0_i32_0 = arith.constant 0 : i32
    %c0_i32_1 = arith.constant 0 : i32
    return %c0_i32, %c0_i32_0 : i32, i32
  }
  func.func @transform_5(%arg0: i32) -> (i32, i32) {
    %c0_i32 = arith.constant 0 : i32
    %c0_i32_0 = arith.constant 0 : i32
    %c0_i32_1 = arith.constant 0 : i32
    return %c0_i32, %c0_i32_0 : i32, i32
  }
  func.func @transform_6(%arg0: i32) -> (i32, i32) {
    %c0_i32 = arith.constant 0 : i32
    %c0_i32_0 = arith.constant 0 : i32
    %c0_i32_1 = arith.constant 0 : i32
    return %c0_i32, %c0_i32_0 : i32, i32
  }
  func.func @transform_7(%arg0: i32) -> (i32, i32) {
    %c0_i32 = arith.constant 0 : i32
    %c0_i32_0 = arith.constant 0 : i32
    %c0_i32_1 = arith.constant 0 : i32
    return %c0_i32, %c0_i32_0 : i32, i32
  }
  func.func @transform_8(%arg0: i32) -> (i32, i32) {
    %c0_i32 = arith.constant 0 : i32
    %c0_i32_0 = arith.constant 0 : i32
    %c0_i32_1 = arith.constant 0 : i32
    return %c0_i32, %c0_i32_0 : i32, i32
  }
  func.func @transform_9(%arg0: i32) -> (i32, i32) {
    %c0_i32 = arith.constant 0 : i32
    %c0_i32_0 = arith.constant 0 : i32
    %c0_i32_1 = arith.constant 0 : i32
    return %c0_i32, %c0_i32_0 : i32, i32
  }
  func.func @transform_10(%arg0: i32) -> (i32, i32) {
    %c0_i32 = arith.constant 0 : i32
    %c0_i32_0 = arith.constant 0 : i32
    %c0_i32_1 = arith.constant 0 : i32
    return %c0_i32, %c0_i32_0 : i32, i32
  }
  func.func @transform_11(%arg0: i32) -> (i32, i32) {
    %c0_i32 = arith.constant 0 : i32
    %c0_i32_0 = arith.constant 0 : i32
    %c0_i32_1 = arith.constant 0 : i32
    return %c0_i32, %c0_i32_0 : i32, i32
  }
  func.func @transform_12(%arg0: i32) -> (i32, i32) {
    %c0_i32 = arith.constant 0 : i32
    %c0_i32_0 = arith.constant 0 : i32
    %c0_i32_1 = arith.constant 0 : i32
    return %c0_i32, %c0_i32_0 : i32, i32
  }
  func.func @transform_13(%arg0: i32) -> (i32, i32) {
    %c0_i32 = arith.constant 0 : i32
    %c0_i32_0 = arith.constant 0 : i32
    %c0_i32_1 = arith.constant 0 : i32
    return %c0_i32, %c0_i32_0 : i32, i32
  }
  func.func @transform_14(%arg0: i32) -> (i32, i32) {
    %c0_i32 = arith.constant 0 : i32
    %c0_i32_0 = arith.constant 0 : i32
    %c0_i32_1 = arith.constant 0 : i32
    return %c0_i32, %c0_i32_0 : i32, i32
  }
  func.func @transform_15(%arg0: i32) -> (i32, i32) {
    %c0_i32 = arith.constant 0 : i32
    %c0_i32_0 = arith.constant 0 : i32
    %c0_i32_1 = arith.constant 0 : i32
    return %c0_i32, %c0_i32_0 : i32, i32
  }
  func.func @transform_16(%arg0: i32) -> (i32, i32) {
    %c0_i32 = arith.constant 0 : i32
    %c0_i32_0 = arith.constant 0 : i32
    %c0_i32_1 = arith.constant 0 : i32
    return %c0_i32, %c0_i32_0 : i32, i32
  }
  func.func @transform_17(%arg0: i32) -> (i32, i32) {
    %c0_i32 = arith.constant 0 : i32
    %c0_i32_0 = arith.constant 0 : i32
    %c0_i32_1 = arith.constant 0 : i32
    return %c0_i32, %c0_i32_0 : i32, i32
  }
  func.func @transform_18(%arg0: i32) -> (i32, i32) {
    %c0_i32 = arith.constant 0 : i32
    %c0_i32_0 = arith.constant 0 : i32
    %c0_i32_1 = arith.constant 0 : i32
    return %c0_i32, %c0_i32_0 : i32, i32
  }
}

</mosaic_0001>

<bundles_post_ra>
// kernel: mesh_graph_encoder_forward.2
= control target key start
LH: loop header
LB: loop body
LE: loop exit
PB: predicated region body
PF: predicated region fallthrough
CT: control target
= control target key end

     0   :  { %s4858_s30 = smov 0   ;;  %s7011_s0 = inlined_call_operand.vmem [shape: f32[1024,128], index: 0, kind: input, shape index: {}, may-alias: {0,8}]   ;;  %s7012_s1 = inlined_call_operand.vmem [shape: bf16[128,128], index: 1, kind: input, shape index: {}]   ;;  %s7013_s2 = inlined_call_operand.vmem [shape: f32[1,128], index: 2, kind: input, shape index: {}]   ;;  %s7014_s3 = inlined_call_operand.vmem [shape: bf16[128,128], index: 3, kind: input, shape index: {}]   ;;  %s7015_s4 = inlined_call_operand.vmem [shape: f32[1,128], index: 4, kind: input, shape index: {}]   ;;  %s7016_s5 = inlined_call_operand.vmem [shape: f32[1,128], index: 5, kind: input, shape index: {}]   ;;  %s7017_s6 = inlined_call_operand.vmem [shape: f32[1,128], index: 6, kind: input, shape index: {}]   ;;  %s7018_s7 = inlined_call_operand.vmem [shape: bf16[128,128], index: 7, kind: input, shape index: {}]   ;;  %s7019_s8 = inlined_call_operand.vmem [shape: f32[1024,128], index: 8, kind: output, shape index: {0}, may-alias: {0,8}]   ;;  %s7020_s9 = inlined_call_operand.vmem [shape: bf16[1024,128], index: 9, kind: output, shape index: {1}]  }
   0x1 LB: > { %s3577_s10 = sadd.s32 4294967295, %s4806_s30   ;;  %p3581_p0 = scmp.ge.s32.totalorder %s4806_s30, 1  ;;  %s4806_s30 = sphi %s4858_s30, %s20_s30  }
   0x2   : > { %p291_p1 = scmp.lt.s32.totalorder %s4806_s30, 3 }
   0x4   : > { %p292_p2 = pnand %p3581_p0, %p291_p1 }
   0x6   : > { %295 = sbr.rel (%p292_p2) target bundleno = 933 (0x3a5), region = 52 }
   0xd   : > { %v4385_v0 = vld [vmem:[%s7012_s1] sm:$0xff]   ;;  %s3582_s13 = sshll.u32 %s3577_s10, 6  ;;  %v4386_v1 = vld [vmem:[%s7012_s1 + $0x8] sm:$0xff]   ;;  %v4387_v2 = vld [vmem:[%s7012_s1 + $0x10] sm:$0xff]  }
   0xe   : > { %p333_p3 = scmp.lt.s32.totalorder %s3582_s13, 127  ;;  %4121 = vmatprep.subr.bf16.mxu0 %v4385_v0  ;;  %4361 = vmatprep.subr.bf16.mxu1 %v4385_v0  ;;  %v4388_v3 = vld [vmem:[%s7012_s1 + $0x18] sm:$0xff]   ;;  %v4389_v7 = vld [vmem:[%s7012_s1 + $0x20] sm:$0xff]   ;;  %v4390_v8 = vld [vmem:[%s7012_s1 + $0x28] sm:$0xff]  }
   0xf   : > { %4122 = vmatpush3.bf16.msra.mxu0 %v4385_v0  ;;  %4369 = vmatpush3.bf16.msra.mxu1 %v4385_v0  ;;  %v4391_v11 = vld [vmem:[%s7012_s1 + $0x30] sm:$0xff]   ;;  %v4392_v13 = vld [vmem:[%s7012_s1 + $0x38] sm:$0xff]   ;;  %v4393_v22 = vld [vmem:[%s7014_s3] sm:$0xff]  }
  0x10   : > { %s7415_s13 = smov (!%p333_p3, %s3582_s13), 127  ;;  %4123 = vmatprep.subr.bf16.mxu0 %v4386_v1  ;;  %4362 = vmatprep.subr.bf16.mxu1 %v4386_v1  ;;  %v4394_v29 = vld [vmem:[%s7014_s3 + $0x8] sm:$0xff]   ;;  %v4395_v36 = vld [vmem:[%s7014_s3 + $0x10] sm:$0xff]   ;;  %v4396_v41 = vld [vmem:[%s7014_s3 + $0x18] sm:$0xff]  }
  0x11   : > { %s3583_s18 = sshll.u32 %s7415_s13, 3  ;;  %s3587_s26 = sshll.u32 %s7415_s13, 2 }
  0x12   : > { %s4883_s21 = scalar_lea.vmem %s7011_s0, %s3583_s18  ;;  %s6204_s25 = scalar_lea.vmem %s7019_s8, %s3583_s18 }
  0x13   : > { %4124 = vmatpush3.bf16.msra.mxu0 %v4386_v1  ;;  %4370 = vmatpush3.bf16.msra.mxu1 %v4386_v1  ;;  %v4889_v4 = vld [vmem:[%s4883_s21] sm:$0xff]  ;;  %v4892_v5 = vld [vmem:[%s4883_s21 + $0x8] sm:$0xff]  ;;  %v353_v14 = vld [vmem:[%s4883_s21 + $0x10] sm:$0xff]  ;;  %s6215_s28 = scalar_lea.vmem %s7020_s9, %s3587_s26 }
  0x14   : > { %4125 = vmatprep.subr.bf16.mxu0 %v4387_v2  ;;  %7144 = vst [vmem:[#allocation2_spill] sm:$0xff] %v4889_v4  ;;  %7145 = vst [vmem:[#allocation3_spill] sm:$0xff] %v4892_v5  ;;  %4363 = vmatprep.subr.bf16.mxu1 %v4387_v2  ;;  %v4896_v6 = vpack.c.bf16 %v4892_v5, %v4889_v4  ;;  %v4906_v9 = vld [vmem:[%s4883_s21 + $0x100] sm:$0xff]  ;;  %v4909_v10 = vld [vmem:[%s4883_s21 + $0x108] sm:$0xff] }
  0x15   : > { %7146 = vst [vmem:[#allocation4_spill] sm:$0xff] %v4906_v9  ;;  %7147 = vst [vmem:[#allocation5_spill] sm:$0xff] %v4909_v10  ;;  %v4916_v12 = vpack.c.bf16 %v4909_v10, %v4906_v9  ;;  %v4924_v15 = vld [vmem:[%s4883_s21 + $0x18] sm:$0xff]  ;;  %v4927_v16 = vld [vmem:[%s4883_s21 + $0x20] sm:$0xff] }
  0x16   : > { %4137 = vmatprep.mubr.bf16.mxu0 %v4896_v6  ;;  %7149 = vst [vmem:[#allocation7_spill] sm:$0xff] %v4924_v15  ;;  %7150 = vst [vmem:[#allocation8_spill] sm:$0xff] %v4927_v16  ;;  %v4930_v17 = vld [vmem:[%s4883_s21 + $0x28] sm:$0xff]  ;;  %v4933_v18 = vld [vmem:[%s4883_s21 + $0x110] sm:$0xff]  ;;  %v4948_v23 = vpack.c.bf16 %v4924_v15, %v353_v14 }
  0x17   : > { %4126 = vmatpush3.bf16.msra.mxu0 %v4387_v2  ;;  %4371 = vmatpush3.bf16.msra.mxu1 %v4387_v2  ;;  %7148 = vst [vmem:[#allocation6_spill] sm:$0xff] %v4916_v12  ;;  %7151 = vst [vmem:[#allocation9_spill] sm:$0xff] %v4930_v17  ;;  %v4936_v19 = vld [vmem:[%s4883_s21 + $0x118] sm:$0xff]  ;;  %v4939_v20 = vld [vmem:[%s4883_s21 + $0x120] sm:$0xff]  ;;  %v4952_v24 = vpack.c.bf16 %v4930_v17, %v4927_v16 }
  0x18   : > { %4127 = vmatprep.subr.bf16.mxu0 %v4388_v3  ;;  %4364 = vmatprep.subr.bf16.mxu1 %v4388_v3  ;;  %7152 = vst [vmem:[#allocation10_spill] sm:$0xff] %v4933_v18  ;;  %7153 = vst [vmem:[#allocation11_spill] sm:$0xff] %v4936_v19  ;;  %v4942_v21 = vld [vmem:[%s4883_s21 + $0x128] sm:$0xff]  ;;  %v4956_v25 = vpack.c.bf16 %v4936_v19, %v4933_v18  ;;  %v4963_v27 = vld [vmem:[%s4883_s21 + $0x30] sm:$0xff] }
  0x19   : > { %4169 = vmatprep.mubr.bf16.mxu1 %v4916_v12  ;;  %7154 = vst [vmem:[#allocation12_spill] sm:$0xff] %v4939_v20  ;;  %7155 = vst [vmem:[#allocation13_spill] sm:$0xff] %v4942_v21  ;;  %v4960_v26 = vpack.c.bf16 %v4942_v21, %v4939_v20  ;;  %v4966_v28 = vld [vmem:[%s4883_s21 + $0x38] sm:$0xff]  ;;  %v4973_v30 = vld [vmem:[%s4883_s21 + $0x40] sm:$0xff] }
  0x1a   : > { %7156 = vst [vmem:[#allocation14_spill] sm:$0xff] %v4948_v23  ;;  %7157 = vst [vmem:[#allocation15_spill] sm:$0xff] %v4952_v24  ;;  %v4976_v31 = vld [vmem:[%s4883_s21 + $0x48] sm:$0xff]  ;;  %v4979_v32 = vld [vmem:[%s4883_s21 + $0x130] sm:$0xff]  ;;  %v4998_v37 = vpack.c.bf16 %v4966_v28, %v4963_v27 }
  0x1b   : > { %4128 = vmatpush3.bf16.msra.mxu0 %v4388_v3  ;;  %4372 = vmatpush3.bf16.msra.mxu1 %v4388_v3  ;;  %7158 = vst [vmem:[#allocation16_spill] sm:$0xff] %v4956_v25  ;;  %7159 = vst [vmem:[#allocation17_spill] sm:$0xff] %v4960_v26  ;;  %v4982_v33 = vld [vmem:[%s4883_s21 + $0x138] sm:$0xff]  ;;  %v4987_v34 = vld [vmem:[%s4883_s21 + $0x140] sm:$0xff]  ;;  %v5002_v38 = vpack.c.bf16 %v4976_v31, %v4973_v30 }
  0x1c   : > { %4129 = vmatprep.subr.bf16.mxu0 %v4389_v7  ;;  %4365 = vmatprep.subr.bf16.mxu1 %v4389_v7  ;;  %7160 = vst [vmem:[#allocation18_spill] sm:$0xff] %v4963_v27  ;;  %7161 = vst [vmem:[#allocation19_spill] sm:$0xff] %v4966_v28  ;;  %v4990_v35 = vld [vmem:[%s4883_s21 + $0x148] sm:$0xff]  ;;  %v5006_v39 = vpack.c.bf16 %v4982_v33, %v4979_v32  ;;  %v5018_v42 = vld [vmem:[%s4883_s21 + $0x50] sm:$0xff] }
  0x1d   : > { %7162 = vst [vmem:[#allocation20_spill] sm:$0xff] %v4973_v30  ;;  %7163 = vst [vmem:[#allocation21_spill] sm:$0xff] %v4976_v31  ;;  %v5010_v40 = vpack.c.bf16 %v4990_v35, %v4987_v34  ;;  %v5021_v43 = vld [vmem:[%s4883_s21 + $0x58] sm:$0xff]  ;;  %v5024_v44 = vld [vmem:[%s4883_s21 + $0x60] sm:$0xff] }
  0x1e   : > { %7164 = vst [vmem:[#allocation22_spill] sm:$0xff] %v4979_v32  ;;  %7165 = vst [vmem:[#allocation23_spill] sm:$0xff] %v4982_v33  ;;  %v5028_v45 = vld [vmem:[%s4883_s21 + $0x68] sm:$0xff]  ;;  %v5032_v46 = vld [vmem:[%s4883_s21 + $0x150] sm:$0xff]  ;;  %v5045_v50 = vpack.c.bf16 %v5021_v43, %v5018_v42 }
  0x1f   : > { %4130 = vmatpush3.bf16.msra.mxu0 %v4389_v7  ;;  %4373 = vmatpush3.bf16.msra.mxu1 %v4389_v7  ;;  %7166 = vst [vmem:[#allocation24_spill] sm:$0xff] %v4987_v34  ;;  %7167 = vst [vmem:[#allocation25_spill] sm:$0xff] %v4990_v35  ;;  %v5035_v47 = vld [vmem:[%s4883_s21 + $0x158] sm:$0xff]  ;;  %v5038_v48 = vld [vmem:[%s4883_s21 + $0x160] sm:$0xff]  ;;  %v5049_v51 = vpack.c.bf16 %v5028_v45, %v5024_v44 }
  0x20   : > { %4131 = vmatprep.subr.bf16.mxu0 %v4390_v8  ;;  %4366 = vmatprep.subr.bf16.mxu1 %v4390_v8  ;;  %7168 = vst [vmem:[#allocation26_spill] sm:$0xff] %v4998_v37  ;;  %7169 = vst [vmem:[#allocation27_spill] sm:$0xff] %v5002_v38  ;;  %v5041_v49 = vld [vmem:[%s4883_s21 + $0x168] sm:$0xff]  ;;  %v5053_v52 = vpack.c.bf16 %v5035_v47, %v5032_v46  ;;  %v5062_v54 = vld [vmem:[%s4883_s21 + $0x70] sm:$0xff] }
  0x21   : > { %7170 = vst [vmem:[#allocation28_spill] sm:$0xff] %v5006_v39  ;;  %7171 = vst [vmem:[#allocation29_spill] sm:$0xff] %v5010_v40  ;;  %v5057_v53 = vpack.c.bf16 %v5041_v49, %v5038_v48  ;;  %v5065_v55 = vld [vmem:[%s4883_s21 + $0x78] sm:$0xff]  ;;  %v5068_v56 = vld [vmem:[%s4883_s21 + $0x80] sm:$0xff] }
  0x22   : > { %7172 = vst [vmem:[#allocation30_spill] sm:$0xff] %v5018_v42  ;;  %7173 = vst [vmem:[#allocation31_spill] sm:$0xff] %v5021_v43  ;;  %v5072_v57 = vld [vmem:[%s4883_s21 + $0x88] sm:$0xff]  ;;  %v5076_v58 = vld [vmem:[%s4883_s21 + $0x170] sm:$0xff]  ;;  %v5089_v62 = vpack.c.bf16 %v5065_v55, %v5062_v54 }
  0x23   : > { %4132 = vmatpush3.bf16.msra.mxu0 %v4390_v8  ;;  %4374 = vmatpush3.bf16.msra.mxu1 %v4390_v8  ;;  %7174 = vst [vmem:[#allocation32_spill] sm:$0xff] %v5024_v44  ;;  %7175 = vst [vmem:[#allocation33_spill] sm:$0xff] %v5028_v45  ;;  %v5079_v59 = vld [vmem:[%s4883_s21 + $0x178] sm:$0xff]  ;;  %v5082_v60 = vld [vmem:[%s4883_s21 + $0x180] sm:$0xff]  ;;  %v5093_v63 = vpack.c.bf16 %v5072_v57, %v5068_v56 }
  0x24   : > { %4133 = vmatprep.subr.bf16.mxu0 %v4391_v11  ;;  %4367 = vmatprep.subr.bf16.mxu1 %v4391_v11  ;;  %7176 = vst [vmem:[#allocation34_spill] sm:$0xff] %v5032_v46  ;;  %7177 = vst [vmem:[#allocation35_spill] sm:$0xff] %v5035_v47  ;;  %v5085_v61 = vld [vmem:[%s4883_s21 + $0x188] sm:$0xff]  ;;  %v5097_v0 = vpack.c.bf16 %v5079_v59, %v5076_v58  ;;  %v5106_v2 = vld [vmem:[%s4883_s21 + $0x90] sm:$0xff] }
  0x25   : > { %7178 = vst [vmem:[#allocation36_spill] sm:$0xff] %v5038_v48  ;;  %7179 = vst [vmem:[#allocation37_spill] sm:$0xff] %v5041_v49  ;;  %v5101_v1 = vpack.c.bf16 %v5085_v61, %v5082_v60  ;;  %v5109_v3 = vld [vmem:[%s4883_s21 + $0x98] sm:$0xff]  ;;  %v5112_v7 = vld [vmem:[%s4883_s21 + $0xa0] sm:$0xff] }
  0x26   : > { %7180 = vst [vmem:[#allocation38_spill] sm:$0xff] %v5045_v50  ;;  %7181 = vst [vmem:[#allocation39_spill] sm:$0xff] %v5049_v51  ;;  %v5116_v8 = vld [vmem:[%s4883_s21 + $0xa8] sm:$0xff]  ;;  %v5126_v14 = vld [vmem:[%s4883_s21 + $0x1a0] sm:$0xff] }
  0x27   : > { %4134 = vmatpush3.bf16.msra.mxu0 %v4391_v11  ;;  %4375 = vmatpush3.bf16.msra.mxu1 %v4391_v11  ;;  %7182 = vst [vmem:[#allocation40_spill] sm:$0xff] %v5053_v52  ;;  %7183 = vst [vmem:[#allocation41_spill] sm:$0xff] %v5057_v53  ;;  %v5120_v11 = vld [vmem:[%s4883_s21 + $0x190] sm:$0xff]  ;;  %v5153_v48 = vld [vmem:[%s4883_s21 + $0xb8] sm:$0xff] }
  0x28   : > { %4135 = vmatprep.subr.bf16.mxu0 %v4392_v13  ;;  %4368 = vmatprep.subr.bf16.mxu1 %v4392_v13  ;;  %7184 = vst [vmem:[#allocation42_spill] sm:$0xff] %v5062_v54  ;;  %7185 = vst [vmem:[#allocation43_spill] sm:$0xff] %v5065_v55  ;;  %v5156_v49 = vld [vmem:[%s4883_s21 + $0xc0] sm:$0xff]  ;;  %v5194_v47 = vld [vmem:[%s4883_s21 + $0xd0] sm:$0xff] }
  0x29   : > { %7186 = vst [vmem:[#allocation44_spill] sm:$0xff] %v5068_v56  ;;  %7187 = vst [vmem:[#allocation45_spill] sm:$0xff] %v5072_v57  ;;  %v5197_v20 = vld [vmem:[%s4883_s21 + $0xd8] sm:$0xff]  ;;  %v5200_v21 = vld [vmem:[%s4883_s21 + $0xe0] sm:$0xff] }
  0x2a   : > { %7188 = vst [vmem:[#allocation46_spill] sm:$0xff] %v5076_v58  ;;  %7189 = vst [vmem:[#allocation47_spill] sm:$0xff] %v5079_v59  ;;  %v5173_v58 = vld [vmem:[%s4883_s21 + $0x1c8] sm:$0xff]  ;;  %v5221_v33 = vpack.c.bf16 %v5197_v20, %v5194_v47  ;;  %v5238_v19 = vld [vmem:[%s4883_s21 + $0xf0] sm:$0xff] }
  0x2b   : > { %4136 = vmatpush3.bf16.msra.mxu0 %v4392_v13  ;;  %4376 = vmatpush3.bf16.msra.mxu1 %v4392_v13  ;;  %7190 = vst [vmem:[#allocation48_spill] sm:$0xff] %v5082_v60  ;;  %7191 = vst [vmem:[#allocation49_spill] sm:$0xff] %v5085_v61  ;;  %v5123_v13 = vld [vmem:[%s4883_s21 + $0x198] sm:$0xff]  ;;  %v5150_v61 = vld [vmem:[%s4883_s21 + $0xb0] sm:$0xff] }
  0x2c   : > { %4201 = vmatprep.subr.bf16.mxu1 %v4393_v22  ;;  %7192 = vst [vmem:[#allocation50_spill] sm:$0xff] %v5089_v62  ;;  %7193 = vst [vmem:[#allocation51_spill] sm:$0xff] %v5093_v63  ;;  %v5177_v59 = vpack.c.bf16 %v5153_v48, %v5150_v61  ;;  %v5217_v32 = vld [vmem:[%s4883_s21 + $0x1e8] sm:$0xff] }
  0x2d   : > { %7194 = vst [vmem:[#allocation52_spill] sm:$0xff] %v5097_v0  ;;  %7195 = vst [vmem:[#allocation53_spill] sm:$0xff] %v5101_v1 }
  0x2e   : > { %4138 = vmatmul.mubr.bf16.vlgmr.msra.gmra.mrb[0].mxu0 %v4948_v23  ;;  %4170 = vmatmul.mubr.bf16.vlgmr.msra.gmra.mrb[0].mxu1 %v4956_v25  ;;  %7196 = vst [vmem:[#allocation54_spill] sm:$0xff] %v5106_v2  ;;  %7197 = vst [vmem:[#allocation55_spill] sm:$0xff] %v5109_v3 }
  0x2f   : > { %4141 = vmatprep.mubr.bf16.mxu0 %v4952_v24  ;;  %4173 = vmatprep.mubr.bf16.mxu1 %v4960_v26  ;;  %7198 = vst [vmem:[#allocation56_spill] sm:$0xff] %v5112_v7  ;;  %7199 = vst [vmem:[#allocation57_spill] sm:$0xff] %v5116_v8 }
  0x30   : > { %4202 = vmatpush3.bf16.msra.mxu1 %v4393_v22  ;;  %7200 = vst [vmem:[#allocation58_spill] sm:$0xff] %v5120_v11  ;;  %7201 = vst [vmem:[#allocation59_spill] sm:$0xff] %v5123_v13  ;;  %v5129_v22 = vld [vmem:[%s4883_s21 + $0x1a8] sm:$0xff] }
  0x31   : > { %4203 = vmatprep.subr.bf16.mxu1 %v4394_v29  ;;  %7202 = vst [vmem:[#allocation60_spill] sm:$0xff] %v5126_v14  ;;  %7203 = vst [vmem:[#allocation61_spill] sm:$0xff] %v5129_v22  ;;  %v5145_v60 = vpack.c.bf16 %v5129_v22, %v5126_v14  ;;  %v5164_v14 = vld [vmem:[%s4883_s21 + $0x1b0] sm:$0xff]  ;;  %v5167_v22 = vld [vmem:[%s4883_s21 + $0x1b8] sm:$0xff] }
  0x32   : > { %7208 = vst [vmem:[#allocation66_spill] sm:$0xff] %v5150_v61  ;;  %7209 = vst [vmem:[#allocation67_spill] sm:$0xff] %v5153_v48  ;;  %v5185_v35 = vpack.c.bf16 %v5167_v22, %v5164_v14 }
  0x33   : > { %7207 = vst [vmem:[#allocation65_spill] sm:$0xff] %v5145_v60  ;;  %7210 = vst [vmem:[#allocation68_spill] sm:$0xff] %v5156_v49 }
  0x34   : > { %4204 = vmatpush3.bf16.msra.mxu1 %v4394_v29  ;;  %v5133_v29 = vpack.c.bf16 %v5109_v3, %v5106_v2  ;;  %7212 = vst [vmem:[#allocation70_spill] sm:$0xff] %v5164_v14  ;;  %7213 = vst [vmem:[#allocation71_spill] sm:$0xff] %v5167_v22  ;;  %v5204_v14 = vld [vmem:[%s4883_s21 + $0xe8] sm:$0xff]  ;;  %v5214_v22 = vld [vmem:[%s4883_s21 + $0x1e0] sm:$0xff] }
  0x35   : > { %4205 = vmatprep.subr.bf16.mxu1 %v4395_v36  ;;  %7215 = vst [vmem:[#allocation73_spill] sm:$0xff] %v5173_v58  ;;  %7216 = vst [vmem:[#allocation74_spill] sm:$0xff] %v5177_v59  ;;  %v5225_v9 = vpack.c.bf16 %v5204_v14, %v5200_v21  ;;  %v5233_v18 = vpack.c.bf16 %v5217_v32, %v5214_v22 }
  0x36   : > { %4142 = vmatmul.mubr.bf16.gmra.mrb[4].mxu0 %v4998_v37  ;;  %4174 = vmatmul.mubr.bf16.gmra.mrb[4].mxu1 %v5006_v39  ;;  %7204 = vst [vmem:[#allocation62_spill] sm:$0xff] %v5133_v29  ;;  %7218 = vst [vmem:[#allocation76_spill] sm:$0xff] %v5185_v35 }
  0x37   : > { %4145 = vmatprep.mubr.bf16.mxu0 %v5002_v38  ;;  %4177 = vmatprep.mubr.bf16.mxu1 %v5010_v40  ;;  %7220 = vst [vmem:[#allocation78_spill] sm:$0xff] %v5194_v47  ;;  %7221 = vst [vmem:[#allocation79_spill] sm:$0xff] %v5197_v20 }
  0x38   : > { %4206 = vmatpush3.bf16.msra.mxu1 %v4395_v36  ;;  %v5137_v36 = vpack.c.bf16 %v5116_v8, %v5112_v7  ;;  %7222 = vst [vmem:[#allocation80_spill] sm:$0xff] %v5200_v21  ;;  %7223 = vst [vmem:[#allocation81_spill] sm:$0xff] %v5204_v14  ;;  %v5246_v21 = vld [vmem:[%s4883_s21 + $0x1f0] sm:$0xff]  ;;  %v4398_v14 = vld [vmem:[%s7014_s3 + $0x28] sm:$0xff]  }
  0x39   : > { %4207 = vmatprep.subr.bf16.mxu1 %v4396_v41  ;;  %7226 = vst [vmem:[#allocation84_spill] sm:$0xff] %v5214_v22  ;;  %7227 = vst [vmem:[#allocation85_spill] sm:$0xff] %v5217_v32 }
  0x3a   : > { %7205 = vst [vmem:[#allocation63_spill] sm:$0xff] %v5137_v36  ;;  %7228 = vst [vmem:[#allocation86_spill] sm:$0xff] %v5221_v33 }
  0x3b   : > { %7229 = vst [vmem:[#allocation87_spill] sm:$0xff] %v5225_v9  ;;  %7231 = vst [vmem:[#allocation89_spill] sm:$0xff] %v5233_v18 }
  0x3c   : > { %4208 = vmatpush3.bf16.msra.mxu1 %v4396_v41  ;;  %v5141_v41 = vpack.c.bf16 %v5123_v13, %v5120_v11  ;;  %v5160_v11 = vld [vmem:[%s4883_s21 + $0xc8] sm:$0xff]  ;;  %v5170_v13 = vld [vmem:[%s4883_s21 + $0x1c0] sm:$0xff]  ;;  %7232 = vst [vmem:[#allocation90_spill] sm:$0xff] %v5238_v19  ;;  %7234 = vst [vmem:[#allocation92_spill] sm:$0xff] %v5246_v21 }
  0x3d   : > { %7211 = vst [vmem:[#allocation69_spill] sm:$0xff] %v5160_v11  ;;  %7214 = vst [vmem:[#allocation72_spill] sm:$0xff] %v5170_v13  ;;  %v5181_v34 = vpack.c.bf16 %v5160_v11, %v5156_v49  ;;  %v5189_v46 = vpack.c.bf16 %v5173_v58, %v5170_v13  ;;  %v5208_v13 = vld [vmem:[%s4883_s21 + $0x1d0] sm:$0xff]  ;;  %v5211_v58 = vld [vmem:[%s4883_s21 + $0x1d8] sm:$0xff] }
  0x3e   : > { %4146 = vmatmul.mubr.bf16.gmra.mrb[8].mxu0 %v5045_v50  ;;  %4178 = vmatmul.mubr.bf16.gmra.mrb[8].mxu1 %v5053_v52  ;;  %7206 = vst [vmem:[#allocation64_spill] sm:$0xff] %v5141_v41  ;;  %7224 = vst [vmem:[#allocation82_spill] sm:$0xff] %v5208_v13  ;;  %v5229_v10 = vpack.c.bf16 %v5211_v58, %v5208_v13  ;;  %v5241_v49 = vld [vmem:[%s4883_s21 + $0xf8] sm:$0xff] }
  0x3f   : > { %4149 = vmatprep.mubr.bf16.mxu0 %v5049_v51  ;;  %4181 = vmatprep.mubr.bf16.mxu1 %v5057_v53  ;;  %7217 = vst [vmem:[#allocation75_spill] sm:$0xff] %v5181_v34  ;;  %7219 = vst [vmem:[#allocation77_spill] sm:$0xff] %v5189_v46  ;;  %v5249_v13 = vld [vmem:[%s4883_s21 + $0x1f8] sm:$0xff]  ;;  %v5253_v22 = vpack.c.bf16 %v5241_v49, %v5238_v19 }
  0x40   : > { %7225 = vst [vmem:[#allocation83_spill] sm:$0xff] %v5211_v58  ;;  %7230 = vst [vmem:[#allocation88_spill] sm:$0xff] %v5229_v10  ;;  %v5257_v32 = vpack.c.bf16 %v5249_v13, %v5246_v21  ;;  %v4397_v58 = vld [vmem:[%s7014_s3 + $0x20] sm:$0xff]   ;;  %v4399_v21 = vld [vmem:[%s7014_s3 + $0x30] sm:$0xff]  }
  0x41   : > { %7233 = vst [vmem:[#allocation91_spill] sm:$0xff] %v5241_v49  ;;  %7235 = vst [vmem:[#allocation93_spill] sm:$0xff] %v5249_v13  ;;  %4209 = vmatprep.subr.bf16.mxu1 %v4397_v58 }
  0x42   : > { %7236 = vst [vmem:[#allocation94_spill] sm:$0xff] %v5253_v22  ;;  %7237 = vst [vmem:[#allocation95_spill] sm:$0xff] %v5257_v32  ;;  %4210 = vmatpush3.bf16.msra.mxu1 %v4397_v58  ;;  %v5277_v58 = vld [vmem:[%s7013_s2] ss:$0 sm:$0xff] }
  0x43   : > { %4211 = vmatprep.subr.bf16.mxu1 %v4398_v14 }
  0x46   : > { %4150 = vmatmul.mubr.bf16.gmra.mrb[12].mxu0 %v5089_v62  ;;  %4182 = vmatmul.mubr.bf16.gmra.mrb[12].mxu1 %v5097_v0 }
  0x47   : > { %4153 = vmatprep.mubr.bf16.mxu0 %v5093_v63  ;;  %4185 = vmatprep.mubr.bf16.mxu1 %v5101_v1 }
  0x48   : > { %4212 = vmatpush3.bf16.msra.mxu1 %v4398_v14 }
  0x49   : > { %4213 = vmatprep.subr.bf16.mxu1 %v4399_v21 }
  0x4c   : > { %4214 = vmatpush3.bf16.msra.mxu1 %v4399_v21 }
  0x4e   : > { %4154 = vmatmul.mubr.bf16.gmra.mrb[16].mxu0 %v5133_v29  ;;  %4186 = vmatmul.mubr.bf16.gmra.mrb[16].mxu1 %v5141_v41 }
  0x4f   : > { %4157 = vmatprep.mubr.bf16.mxu0 %v5137_v36  ;;  %4189 = vmatprep.mubr.bf16.mxu1 %v5145_v60 }
  0x56   : > { %4158 = vmatmul.mubr.bf16.gmra.mrb[20].mxu0 %v5177_v59  ;;  %4190 = vmatmul.mubr.bf16.gmra.mrb[20].mxu1 %v5185_v35 }
  0x57   : > { %4161 = vmatprep.mubr.bf16.mxu0 %v5181_v34  ;;  %4193 = vmatprep.mubr.bf16.mxu1 %v5189_v46 }
  0x5e   : > { %4162 = vmatmul.mubr.bf16.gmra.mrb[24].mxu0 %v5221_v33  ;;  %4194 = vmatmul.mubr.bf16.gmra.mrb[24].mxu1 %v5229_v10 }
  0x5f   : > { %4165 = vmatprep.mubr.bf16.mxu0 %v5225_v9  ;;  %4197 = vmatprep.mubr.bf16.mxu1 %v5233_v18 }
  0x66   : > { %4166 = vmatmul.mubr.bf16.gmra.mrb[28].mxu0 %v5253_v22  ;;  %4198 = vmatmul.mubr.bf16.gmra.mrb[28].mxu1 %v5257_v32 }
  0x67   : > { %4297 = vmatprep.mubr.bf16.mxu0 %v4896_v6  ;;  %v4400_v6 = vld [vmem:[%s7014_s3 + $0x38] sm:$0xff]  }
  0x68   : > { %4215 = vmatprep.subr.bf16.mxu1 %v4400_v6 }
  0x69   : > { %4216 = vmatpush3.bf16.msra.mxu1 %v4400_v6 }
 0x101   : > { %v4139_v13 = vpop.f32.mrb[0].mxu0  ;;  %v4171_v49 = vpop.f32.mrb[0].mxu1 }
 0x102   : > { %v5280_v14 = vadd.f32 %v4139_v13, %v5277_v58  ;;  %v552_v19 = vpop.f32.mrb[1].mxu0  ;;  %v5286_v47 = vadd.f32 %v4171_v49, %v5277_v58  ;;  %v680_v20 = vpop.f32.mrb[1].mxu1 }
 0x103   : > { %v5283_v11 = vadd.f32 %v5277_v58, %v552_v19  ;;  %v4140_v21 = vpop.f32.mrb[2].mxu0  ;;  %v5293_v61 = vadd.f32 %v5277_v58, %v680_v20  ;;  %v4172_v13 = vpop.f32.mrb[2].mxu1 }
 0x104   : > { %v3599_v6 = vmul.f32 -1.442695, %v5280_v14  ;;  %v5290_v7 = vadd.f32 %v4140_v21, %v5277_v58  ;;  %v555_v8 = vpop.f32.mrb[3].mxu0  ;;  %v5300_v56 = vadd.f32 %v4172_v13, %v5277_v58  ;;  %v683_v49 = vpop.f32.mrb[3].mxu1  ;;  %v3631_v2 = vmul.f32 -1.442695, %v5286_v47 }
 0x105   : > { %v3597_v48 = vmul.f32 -1.442695, %v5283_v11  ;;  %v5297_v19 = vadd.f32 %v5277_v58, %v555_v8  ;;  %v3629_v20 = vmul.f32 -1.442695, %v5293_v61 }
 0x106   : > { %4409 = vpow2.f32 %v3599_v6  ;;  %v3600_v57 = vmul.f32 -1.442695, %v5290_v7  ;;  %v3632_v8 = vmul.f32 -1.442695, %v5300_v56  ;;  %v5311_v6 = vadd.f32 %v5277_v58, %v683_v49 }
 0x107   : > { %4411 = vpow2.f32 %v3597_v48  ;;  %v3598_v21 = vmul.f32 -1.442695, %v5297_v19 }
 0x108   : > { %4413 = vpow2.f32 %v3600_v57  ;;  %v3630_v42 = vmul.f32 -1.442695, %v5311_v6 }
 0x109   : > { %4415 = vpow2.f32 %v3598_v21  ;;  %v4143_v3 = vpop.f32.mrb[4].mxu0  ;;  %v5313_v45 = vpop.f32.mrb[4].mxu1 }
 0x10a   : > { %v5308_v44 = vadd.f32 %v4143_v3, %v5277_v58  ;;  %v568_v13 = vpop.f32.mrb[5].mxu0  ;;  %4417 = vpow2.f32 %v3631_v2  ;;  %v5318_v57 = vpop.f32.mrb[5].mxu1 }
 0x10b   : > { %v5316_v48 = vadd.f32 %v5277_v58, %v568_v13  ;;  %v4144_v54 = vpop.f32.mrb[6].mxu0  ;;  %4419 = vpow2.f32 %v3629_v20  ;;  %v5324_v30 = vpop.f32.mrb[6].mxu1 }
 0x10c   : > { %v3603_v21 = vmul.f32 -1.442695, %v5308_v44  ;;  %v5322_v55 = vadd.f32 %v4144_v54, %v5277_v58  ;;  %v571_v3 = vpop.f32.mrb[7].mxu0  ;;  %4421 = vpow2.f32 %v3632_v8  ;;  %v5330_v13 = vpop.f32.mrb[7].mxu1 }
 0x10d   : > { %v3601_v49 = vmul.f32 -1.442695, %v5316_v48  ;;  %v5328_v31 = vadd.f32 %v5277_v58, %v571_v3 }
 0x10e   : > { %4423 = vpow2.f32 %v3603_v21  ;;  %v3604_v2 = vmul.f32 -1.442695, %v5322_v55 }
 0x10f   : > { %4425 = vpow2.f32 %v3601_v49  ;;  %v3602_v54 = vmul.f32 -1.442695, %v5328_v31 }
 0x110   : > { %v4410_v43 = vpop.eup %4409  ;;  %4427 = vpow2.f32 %v3604_v2 }
 0x111   : > { %v4412_v20 = vpop.eup %4411  ;;  %v1001_v16 = vadd.f32 1.0, %v4410_v43  ;;  %4429 = vpow2.f32 %v3602_v54  ;;  %v4147_v17 = vpop.f32.mrb[8].mxu0 }
 0x112   : > { %v4414_v27 = vpop.eup %4413  ;;  %v999_v3 = vadd.f32 1.0, %v4412_v20  ;;  %v5336_v8 = vadd.f32 %v4147_v17, %v5277_v58  ;;  %v584_v28 = vpop.f32.mrb[9].mxu0  ;;  %4431 = vpow2.f32 %v3630_v42 }
 0x113   : > { %v5338_v21 = vpop.f32.mrb[8].mxu1  ;;  %v4416_v4 = vpop.eup %4415  ;;  %4433 = vrcp.f32 %v1001_v16  ;;  %v1002_v49 = vadd.f32 1.0, %v4414_v27  ;;  %v5341_v5 = vadd.f32 %v5277_v58, %v584_v28 }
 0x114   : > { %v4148_v2 = vpop.f32.mrb[10].mxu0  ;;  %v5343_v15 = vpop.f32.mrb[9].mxu1  ;;  %4435 = vrcp.f32 %v999_v3  ;;  %v1000_v43 = vadd.f32 1.0, %v4416_v4  ;;  %v3607_v54 = vmul.f32 -1.442695, %v5336_v8 }
 0x115   : > { %v5347_v17 = vadd.f32 %v4148_v2, %v5277_v58  ;;  %v587_v20 = vpop.f32.mrb[11].mxu0  ;;  %v5349_v42 = vpop.f32.mrb[10].mxu1  ;;  %4437 = vrcp.f32 %v1002_v49  ;;  %v3605_v16 = vmul.f32 -1.442695, %v5341_v5 }
 0x116   : > { %v5351_v32 = vpop.eup %4417  ;;  %v5355_v27 = vadd.f32 %v5277_v58, %v587_v20  ;;  %v5357_v28 = vpop.f32.mrb[11].mxu1  ;;  %4439 = vrcp.f32 %v1000_v43 }
 0x117   : > { %v5359_v3 = vpop.eup %4419  ;;  %v3608_v4 = vmul.f32 -1.442695, %v5347_v17  ;;  %4441 = vpow2.f32 %v3607_v54 }
 0x118   : > { %v5362_v2 = vpop.eup %4421  ;;  %v3606_v18 = vmul.f32 -1.442695, %v5355_v27  ;;  %4443 = vpow2.f32 %v3605_v16 }
 0x119   : > { %v4424_v10 = vpop.eup %4423  ;;  %4445 = vpow2.f32 %v3608_v4  ;;  %v4151_v35 = vpop.f32.mrb[12].mxu0 }
 0x11a   : > { %v4426_v49 = vpop.eup %4425  ;;  %v1005_v46 = vadd.f32 1.0, %v4424_v10  ;;  %4447 = vpow2.f32 %v3606_v18  ;;  %v5366_v41 = vadd.f32 %v4151_v35, %v5277_v58  ;;  %v600_v43 = vpop.f32.mrb[13].mxu0  ;;  %v5375_v10 = vadd.f32 %v5313_v45, %v5277_v58 }
 0x11b   : > { %v4428_v20 = vpop.eup %4427  ;;  %v1003_v60 = vadd.f32 1.0, %v4426_v49  ;;  %v5368_v1 = vpop.f32.mrb[12].mxu1  ;;  %v5371_v53 = vadd.f32 %v5277_v58, %v600_v43 }
 0x11c   : > { %v4430_v0 = vpop.eup %4429  ;;  %4449 = vrcp.f32 %v1005_v46  ;;  %v1006_v54 = vadd.f32 1.0, %v4428_v20  ;;  %v4152_v16 = vpop.f32.mrb[14].mxu0  ;;  %7238 = vst [vmem:[#allocation96_spill] sm:$0xff] %v5375_v10  ;;  %v3611_v49 = vmul.f32 -1.442695, %v5366_v41 }
 0x11d   : > { %v5377_v4 = vpop.f32.mrb[13].mxu1  ;;  %v5379_v18 = vpop.eup %4431  ;;  %4451 = vrcp.f32 %v1003_v60  ;;  %v1004_v35 = vadd.f32 1.0, %v4430_v0  ;;  %v5383_v52 = vadd.f32 %v4152_v16, %v5277_v58  ;;  %v3609_v40 = vmul.f32 -1.442695, %v5371_v53 }
 0x11e   : > { %v603_v46 = vpop.f32.mrb[15].mxu0  ;;  %v5385_v20 = vpop.f32.mrb[14].mxu1  ;;  %4453 = vrcp.f32 %v1006_v54  ;;  %v3635_v25 = vmul.f32 -1.442695, %v5375_v10 }
 0x11f   : > { %v4434_v43 = vpop.eup %4433  ;;  %v5389_v45 = vadd.f32 %v5277_v58, %v603_v46  ;;  %v5391_v39 = vpop.f32.mrb[15].mxu1  ;;  %4455 = vrcp.f32 %v1004_v35  ;;  %v3612_v60 = vmul.f32 -1.442695, %v5383_v52 }
 0x120   : > { %v4436_v26 = vpop.eup %4435  ;;  %4457 = vpow2.f32 %v3611_v49  ;;  %v1193_v54 = vmul.f32 %v4434_v43, %v5280_v14 }
 0x121   : > { %v4438_v0 = vpop.eup %4437  ;;  %v3610_v16 = vmul.f32 -1.442695, %v5389_v45  ;;  %4459 = vpow2.f32 %v3609_v40  ;;  %v1191_v9 = vmul.f32 %v4436_v26, %v5283_v11  ;;  %v4155_v35 = vpop.f32.mrb[16].mxu0 }
 0x122   : > { %v4440_v12 = vpop.eup %4439  ;;  %v1194_v22 = vmul.f32 %v4438_v0, %v5290_v7  ;;  %4461 = vpow2.f32 %v3612_v60  ;;  %v5401_v36 = vadd.f32 %v4155_v35, %v5277_v58  ;;  %v616_v29 = vpop.f32.mrb[17].mxu0 }
 0x123   : > { %v4442_v46 = vpop.eup %4441  ;;  %v1192_v33 = vmul.f32 %v4440_v12, %v5297_v19  ;;  %4463 = vpow2.f32 %v3610_v16  ;;  %v5403_v63 = vpop.f32.mrb[16].mxu1  ;;  %v5406_v40 = vadd.f32 %v5277_v58, %v616_v29 }
 0x124   : > { %v4444_v34 = vpop.eup %4443  ;;  %v1256_v59 = vpack.c.bf16 %v1194_v22, %v1193_v54  ;;  %v1009_v49 = vadd.f32 1.0, %v4442_v46  ;;  %v4156_v26 = vpop.f32.mrb[18].mxu0  ;;  %4465 = vpow2.f32 %v3635_v25  ;;  %v3615_v43 = vmul.f32 -1.442695, %v5401_v36 }
 0x125   : > { %v4446_v14 = vpop.eup %4445  ;;  %v1007_v7 = vadd.f32 1.0, %v4444_v34  ;;  %v1255_v11 = vpack.c.bf16 %v1192_v33, %v1191_v9  ;;  %v5408_v12 = vpop.f32.mrb[17].mxu1  ;;  %v5412_v60 = vadd.f32 %v4156_v26, %v5277_v58  ;;  %v3613_v54 = vmul.f32 -1.442695, %v5406_v40 }
 0x126   : > { %v4448_v19 = vpop.eup %4447  ;;  %4467 = vrcp.f32 %v1009_v49  ;;  %v1010_v22 = vadd.f32 1.0, %v4446_v14  ;;  %v619_v0 = vpop.f32.mrb[19].mxu0 }
 0x127   : > { %v5414_v16 = vpop.f32.mrb[18].mxu1  ;;  %v4450_v34 = vpop.eup %4449  ;;  %4469 = vrcp.f32 %v1007_v7  ;;  %v1008_v29 = vadd.f32 1.0, %v4448_v19  ;;  %v5418_v9 = vadd.f32 %v5277_v58, %v619_v0  ;;  %4217 = vmatprep.mubr.bf16.mxu1 %v1255_v11  ;;  %v3616_v46 = vmul.f32 -1.442695, %v5412_v60 }
 0x128   : > { %v5420_v25 = vpop.f32.mrb[19].mxu1  ;;  %v4452_v33 = vpop.eup %4451  ;;  %4471 = vrcp.f32 %v1010_v22  ;;  %4218 = vmatmul.mubr.bf16.vlgmr.msra.gmra.mrb[32].mxu1 %v1256_v59  ;;  %v1197_v7 = vmul.f32 %v4450_v34, %v5308_v44 }
 0x129   : > { %v4454_v35 = vpop.eup %4453  ;;  %4473 = vrcp.f32 %v1008_v29  ;;  %v3614_v49 = vmul.f32 -1.442695, %v5418_v9  ;;  %v1195_v11 = vmul.f32 %v4452_v33, %v5316_v48  ;;  %v4159_v22 = vpop.f32.mrb[20].mxu0 }
 0x12a   : > { %v4456_v14 = vpop.eup %4455  ;;  %v1198_v26 = vmul.f32 %v4454_v35, %v5322_v55  ;;  %4475 = vpow2.f32 %v3615_v43  ;;  %v5429_v29 = vadd.f32 %v4159_v22, %v5277_v58  ;;  %v632_v50 = vpop.f32.mrb[21].mxu0 }
 0x12b   : > { %v4458_v19 = vpop.eup %4457  ;;  %v1196_v0 = vmul.f32 %v4456_v14, %v5328_v31  ;;  %4477 = vpow2.f32 %v3613_v54  ;;  %v5431_v38 = vpop.f32.mrb[20].mxu1  ;;  %v5434_v48 = vadd.f32 %v5277_v58, %v632_v50 }
 0x12c   : > { %v4460_v62 = vpop.eup %4459  ;;  %v1013_v51 = vadd.f32 1.0, %v4458_v19  ;;  %4479 = vpow2.f32 %v3616_v46  ;;  %v1258_v59 = vpack.c.bf16 %v1198_v26, %v1197_v7  ;;  %v4160_v31 = vpop.f32.mrb[22].mxu0  ;;  %v3619_v46 = vmul.f32 -1.442695, %v5429_v29 }
 0x12d   : > { %v4462_v44 = vpop.eup %4461  ;;  %v1011_v55 = vadd.f32 1.0, %v4460_v62  ;;  %4481 = vpow2.f32 %v3614_v49  ;;  %v1257_v43 = vpack.c.bf16 %v1196_v0, %v1195_v11  ;;  %v5436_v34 = vpop.f32.mrb[21].mxu1  ;;  %v5440_v35 = vadd.f32 %v4160_v31, %v5277_v58 }
 0x12e   : > { %v4464_v54 = vpop.eup %4463  ;;  %4483 = vrcp.f32 %v1013_v51  ;;  %v1014_v33 = vadd.f32 1.0, %v4462_v44  ;;  %v635_v14 = vpop.f32.mrb[23].mxu0  ;;  %v3617_v50 = vmul.f32 -1.442695, %v5434_v48 }
 0x12f   : > { %v5442_v7 = vpop.f32.mrb[22].mxu1  ;;  %v5444_v62 = vpop.eup %4465  ;;  %4485 = vrcp.f32 %v1011_v55  ;;  %v1012_v49 = vadd.f32 1.0, %v4464_v54  ;;  %4221 = vmatprep.mubr.bf16.mxu1 %v1257_v43  ;;  %v5448_v26 = vadd.f32 %v5277_v58, %v635_v14  ;;  %v3620_v11 = vmul.f32 -1.442695, %v5440_v35 }
 0x130   : > { %v5450_v51 = vpop.f32.mrb[23].mxu1  ;;  %v4468_v19 = vpop.eup %4467  ;;  %4487 = vrcp.f32 %v1014_v33  ;;  %4222 = vmatmul.mubr.bf16.gmra.mrb[36].mxu1 %v1258_v59  ;;  %v1033_v55 = vadd.f32 1.0, %v5351_v32 }
 0x131   : > { %v4470_v0 = vpop.eup %4469  ;;  %4489 = vrcp.f32 %v1012_v49  ;;  %v3618_v22 = vmul.f32 -1.442695, %v5448_v26  ;;  %v1201_v31 = vmul.f32 %v4468_v19, %v5336_v8  ;;  %v4163_v14 = vpop.f32.mrb[24].mxu0 }
 0x132   : > { %v4472_v44 = vpop.eup %4471  ;;  %4491 = vpow2.f32 %v3619_v46  ;;  %v1199_v59 = vmul.f32 %v4470_v0, %v5341_v5  ;;  %v5460_v49 = vadd.f32 %v4163_v14, %v5277_v58  ;;  %v648_v24 = vpop.f32.mrb[25].mxu0 }
 0x133   : > { %v4474_v43 = vpop.eup %4473  ;;  %v1202_v54 = vmul.f32 %v4472_v44, %v5347_v17  ;;  %4493 = vpow2.f32 %v3617_v50  ;;  %v5462_v46 = vpop.f32.mrb[24].mxu1  ;;  %v5465_v17 = vadd.f32 %v5277_v58, %v648_v24 }
 0x134   : > { %v4476_v37 = vpop.eup %4475  ;;  %v1200_v33 = vmul.f32 %v4474_v43, %v5355_v27  ;;  %4495 = vpow2.f32 %v3620_v11  ;;  %7239 = vst [vmem:[#allocation97_spill] sm:$0xff] %v5462_v46  ;;  %v4164_v50 = vpop.f32.mrb[26].mxu0 }
 0x135   : > { %v4478_v32 = vpop.eup %4477  ;;  %v1017_v23 = vadd.f32 1.0, %v4476_v37  ;;  %4497 = vpow2.f32 %v3618_v22  ;;  %v1260_v8 = vpack.c.bf16 %v1202_v54, %v1201_v31  ;;  %v5467_v19 = vpop.f32.mrb[25].mxu1  ;;  %v5470_v11 = vadd.f32 %v4164_v50, %v5277_v58 }
 0x136   : > { %7240 = vst [vmem:[#allocation98_spill] sm:$0xff] %v5467_v19  ;;  %v4480_v5 = vpop.eup %4479  ;;  %v1015_v0 = vadd.f32 1.0, %v4478_v32  ;;  %v1259_v27 = vpack.c.bf16 %v1200_v33, %v1199_v59  ;;  %v651_v44 = vpop.f32.mrb[27].mxu0  ;;  %4499 = vrcp.f32 %v1033_v55  ;;  %v3623_v22 = vmul.f32 -1.442695, %v5460_v49 }
 0x137   : > { %v5472_v43 = vpop.f32.mrb[26].mxu1  ;;  %v4482_v14 = vpop.eup %4481  ;;  %4501 = vrcp.f32 %v1017_v23  ;;  %v1018_v37 = vadd.f32 1.0, %v4480_v5  ;;  %v5476_v24 = vadd.f32 %v5277_v58, %v651_v44  ;;  %v3621_v33 = vmul.f32 -1.442695, %v5465_v17 }
 0x138   : > { %7241 = vst [vmem:[#allocation99_spill] sm:$0xff] %v5472_v43  ;;  %v5478_v31 = vpop.f32.mrb[27].mxu1  ;;  %v4484_v54 = vpop.eup %4483  ;;  %4503 = vrcp.f32 %v1015_v0  ;;  %v1016_v59 = vadd.f32 1.0, %v4482_v14  ;;  %4225 = vmatprep.mubr.bf16.mxu1 %v1259_v27  ;;  %v3624_v55 = vmul.f32 -1.442695, %v5470_v11 }
 0x139   : > { %7242 = vst [vmem:[#allocation100_spill] sm:$0xff] %v5478_v31  ;;  %v4486_v32 = vpop.eup %4485  ;;  %4505 = vrcp.f32 %v1018_v37  ;;  %4226 = vmatmul.mubr.bf16.gmra.mrb[40].mxu1 %v1260_v8  ;;  %v3622_v50 = vmul.f32 -1.442695, %v5476_v24  ;;  %v1205_v44 = vmul.f32 %v4484_v54, %v5366_v41  ;;  %v4167_v0 = vpop.f32.mrb[28].mxu0 }
 0x13a   : > { %v4488_v23 = vpop.eup %4487  ;;  %4507 = vrcp.f32 %v1016_v59  ;;  %v1203_v27 = vmul.f32 %v4486_v32, %v5371_v53  ;;  %v5488_v8 = vadd.f32 %v4167_v0, %v5277_v58  ;;  %v664_v37 = vpop.f32.mrb[29].mxu0 }
 0x13b   : > { %v4490_v5 = vpop.eup %4489  ;;  %v1206_v31 = vmul.f32 %v4488_v23, %v5383_v52  ;;  %4509 = vpow2.f32 %v3623_v22  ;;  %v5490_v59 = vpop.f32.mrb[28].mxu1  ;;  %v5493_v52 = vadd.f32 %v5277_v58, %v664_v37 }
 0x13c   : > { %v4492_v14 = vpop.eup %4491  ;;  %v1204_v43 = vmul.f32 %v4490_v5, %v5389_v45  ;;  %4511 = vpow2.f32 %v3621_v33  ;;  %v4168_v41 = vpop.f32.mrb[30].mxu0  ;;  %v3627_v0 = vmul.f32 -1.442695, %v5488_v8 }
 0x13d   : > { %v4494_v19 = vpop.eup %4493  ;;  %v1021_v46 = vadd.f32 1.0, %v4492_v14  ;;  %v1262_v10 = vpack.c.bf16 %v1206_v31, %v1205_v44  ;;  %4513 = vpow2.f32 %v3624_v55  ;;  %v5495_v22 = vpop.f32.mrb[29].mxu1  ;;  %v5501_v31 = vadd.f32 %v4168_v41, %v5277_v58 }
 0x13e   : > { %7243 = vst [vmem:[#allocation101_spill] sm:$0xff] %v5495_v22  ;;  %v4496_v53 = vpop.eup %4495  ;;  %v1019_v54 = vadd.f32 1.0, %v4494_v19  ;;  %v1261_v45 = vpack.c.bf16 %v1204_v43, %v1203_v27  ;;  %4515 = vpow2.f32 %v3622_v50  ;;  %v667_v33 = vpop.f32.mrb[31].mxu0  ;;  %v3625_v19 = vmul.f32 -1.442695, %v5493_v52 }
 0x13f   : > { %v5497_v32 = vpop.f32.mrb[30].mxu1  ;;  %v4498_v23 = vpop.eup %4497  ;;  %4517 = vrcp.f32 %v1021_v46  ;;  %v1022_v5 = vadd.f32 1.0, %v4496_v53  ;;  %v5509_v43 = vadd.f32 %v5277_v58, %v667_v33  ;;  %v3628_v46 = vmul.f32 -1.442695, %v5501_v31 }
 0x140   : > { %7244 = vst [vmem:[#allocation102_spill] sm:$0xff] %v5497_v32  ;;  %v5503_v55 = vpop.f32.mrb[31].mxu1  ;;  %v5505_v44 = vpop.eup %4499  ;;  %4519 = vrcp.f32 %v1019_v54  ;;  %v1020_v14 = vadd.f32 1.0, %v4498_v23  ;;  %4229 = vmatprep.mubr.bf16.mxu1 %v1261_v45  ;;  %v1031_v45 = vadd.f32 1.0, %v5359_v3 }
 0x141   : > { %7245 = vst [vmem:[#allocation103_spill] sm:$0xff] %v5503_v55  ;;  %v4502_v50 = vpop.eup %4501  ;;  %4521 = vrcp.f32 %v1022_v5  ;;  %4230 = vmatmul.mubr.bf16.gmra.mrb[44].mxu1 %v1262_v10  ;;  %v3626_v41 = vmul.f32 -1.442695, %v5509_v43 }
 0x142   : > { %v4504_v27 = vpop.eup %4503  ;;  %v1209_v37 = vmul.f32 %v4502_v50, %v5401_v36  ;;  %4523 = vrcp.f32 %v1020_v14 }
 0x143   : > { %v4506_v53 = vpop.eup %4505  ;;  %v1207_v54 = vmul.f32 %v4504_v27, %v5406_v40  ;;  %4525 = vpow2.f32 %v3627_v0  ;;  %v5520_v40 = vadd.f32 %v5277_v58, %v5318_v57  ;;  %v1034_v0 = vadd.f32 1.0, %v5362_v2 }
 0x144   : > { %v4508_v23 = vpop.eup %4507  ;;  %v1210_v33 = vmul.f32 %v4506_v53, %v5412_v60  ;;  %4527 = vpow2.f32 %v3625_v19 }
 0x145   : > { %v4510_v5 = vpop.eup %4509  ;;  %v1208_v10 = vmul.f32 %v4508_v23, %v5418_v9  ;;  %4529 = vpow2.f32 %v3628_v46  ;;  %v1032_v46 = vadd.f32 1.0, %v5379_v18  ;;  %v5531_v18 = vadd.f32 %v5324_v30, %v5277_v58 }
 0x146   : > { %v4512_v55 = vpop.eup %4511  ;;  %v1025_v32 = vadd.f32 1.0, %v4510_v5  ;;  %v1264_v36 = vpack.c.bf16 %v1210_v33, %v1209_v37  ;;  %4531 = vpow2.f32 %v3626_v41  ;;  %v1037_v37 = vadd.f32 1.0, %v5444_v62 }
 0x147   : > { %v4514_v14 = vpop.eup %4513  ;;  %v1023_v50 = vadd.f32 1.0, %v4512_v55  ;;  %v1263_v22 = vpack.c.bf16 %v1208_v10, %v1207_v54  ;;  %4533 = vrcp.f32 %v1031_v45  ;;  %v3636_v10 = vmul.f32 -1.442695, %v5531_v18 }
 0x148   : > { %v4516_v3 = vpop.eup %4515  ;;  %4535 = vrcp.f32 %v1025_v32  ;;  %v1026_v60 = vadd.f32 1.0, %v4514_v14  ;;  %v3633_v32 = vmul.f32 -1.442695, %v5520_v40 }
 0x149   : > { %v4518_v19 = vpop.eup %4517  ;;  %4537 = vrcp.f32 %v1023_v50  ;;  %v1024_v9 = vadd.f32 1.0, %v4516_v3  ;;  %4233 = vmatprep.mubr.bf16.mxu1 %v1263_v22  ;;  %v5562_v3 = vadd.f32 %v5277_v58, %v5377_v4 }
 0x14a   : > { %v4520_v27 = vpop.eup %4519  ;;  %v1213_v55 = vmul.f32 %v4518_v19, %v5429_v29  ;;  %4539 = vrcp.f32 %v1026_v60  ;;  %4234 = vmatmul.mubr.bf16.gmra.mrb[48].mxu1 %v1264_v36  ;;  %v5535_v29 = vadd.f32 %v5277_v58, %v5330_v13  ;;  %v5548_v13 = vadd.f32 %v5349_v42, %v5277_v58 }
 0x14b   : > { %v4522_v57 = vpop.eup %4521  ;;  %v1211_v41 = vmul.f32 %v4520_v27, %v5434_v48  ;;  %4541 = vrcp.f32 %v1024_v9  ;;  %v5540_v48 = vadd.f32 %v5338_v21, %v5277_v58  ;;  %v5552_v21 = vadd.f32 %v5277_v58, %v5357_v28 }
 0x14c   : > { %v4524_v2 = vpop.eup %4523  ;;  %v1214_v53 = vmul.f32 %v4522_v57, %v5440_v35  ;;  %4543 = vrcp.f32 %v1034_v0  ;;  %v5544_v35 = vadd.f32 %v5277_v58, %v5343_v15  ;;  %v5557_v36 = vadd.f32 %v5368_v1, %v5277_v58 }
 0x14d   : > { %v4526_v22 = vpop.eup %4525  ;;  %v1212_v62 = vmul.f32 %v4524_v2, %v5448_v26  ;;  %4545 = vrcp.f32 %v1032_v46  ;;  %v3634_v50 = vmul.f32 -1.442695, %v5535_v29  ;;  %v3639_v60 = vmul.f32 -1.442695, %v5540_v48 }
 0x14e   : > { %v4528_v54 = vpop.eup %4527  ;;  %v1029_v45 = vadd.f32 1.0, %v4526_v22  ;;  %v1266_v30 = vpack.c.bf16 %v1214_v53, %v1213_v55  ;;  %4547 = vrcp.f32 %v1037_v37  ;;  %v3637_v0 = vmul.f32 -1.442695, %v5544_v35 }
 0x14f   : > { %v4530_v23 = vpop.eup %4529  ;;  %v1027_v33 = vadd.f32 1.0, %v4528_v54  ;;  %v1265_v26 = vpack.c.bf16 %v1212_v62, %v1211_v41  ;;  %4549 = vpow2.f32 %v3633_v32  ;;  %v3640_v9 = vmul.f32 -1.442695, %v5548_v13 }
 0x150   : > { %v4532_v5 = vpop.eup %4531  ;;  %4551 = vrcp.f32 %v1029_v45  ;;  %v1030_v15 = vadd.f32 1.0, %v4530_v23  ;;  %v3638_v46 = vmul.f32 -1.442695, %v5552_v21  ;;  %v3643_v4 = vmul.f32 -1.442695, %v5557_v36 }
 0x151   : > { %v4534_v14 = vpop.eup %4533  ;;  %4553 = vrcp.f32 %v1027_v33  ;;  %v1028_v42 = vadd.f32 1.0, %v4532_v5  ;;  %4237 = vmatprep.mubr.bf16.mxu1 %v1265_v26  ;;  %v5573_v37 = vadd.f32 %v5385_v20, %v5277_v58  ;;  %v3641_v32 = vmul.f32 -1.442695, %v5562_v3 }
 0x152   : > { %v4536_v28 = vpop.eup %4535  ;;  %4555 = vrcp.f32 %v1030_v15  ;;  %4238 = vmatmul.mubr.bf16.gmra.mrb[52].mxu1 %v1266_v30  ;;  %v1223_v53 = vmul.f32 %v4534_v14, %v5293_v61  ;;  %v5585_v20 = vadd.f32 %v5277_v58, %v5391_v39  ;;  %v5599_v39 = vadd.f32 %v5277_v58, %v5408_v12 }
 0x153   : > { %v4538_v19 = vpop.eup %4537  ;;  %v1217_v1 = vmul.f32 %v4536_v28, %v5460_v49  ;;  %4557 = vrcp.f32 %v1028_v42  ;;  %v5578_v49 = vmul.f32 %v5505_v44, %v5286_v47  ;;  %v5592_v47 = vadd.f32 %v5403_v63, %v5277_v58 }
 0x154   : > { %v4540_v27 = vpop.eup %4539  ;;  %v1215_v55 = vmul.f32 %v4538_v19, %v5465_v17  ;;  %4559 = vpow2.f32 %v3636_v10  ;;  %v3644_v45 = vmul.f32 -1.442695, %v5573_v37  ;;  %v3645_v10 = vmul.f32 -1.442695, %v5599_v39 }
 0x155   : > { %v4542_v57 = vpop.eup %4541  ;;  %v1218_v41 = vmul.f32 %v4540_v27, %v5470_v11  ;;  %4561 = vpow2.f32 %v3634_v50  ;;  %v3647_v12 = vmul.f32 -1.442695, %v5592_v47  ;;  %v5613_v27 = vadd.f32 %v5414_v16, %v5277_v58 }
 0x156   : > { %v4544_v2 = vpop.eup %4543  ;;  %v1216_v17 = vmul.f32 %v4542_v57, %v5476_v24  ;;  %4563 = vpow2.f32 %v3639_v60 }
 0x157   : > { %v4546_v22 = vpop.eup %4545  ;;  %v5588_v11 = vmul.f32 %v4544_v2, %v5300_v56  ;;  %v1268_v62 = vpack.c.bf16 %v1218_v41, %v1217_v1  ;;  %4565 = vpow2.f32 %v3637_v0 }
 0x158   : > { %v5594_v44 = vpop.eup %4547  ;;  %v1224_v24 = vmul.f32 %v4546_v22, %v5311_v6  ;;  %v1267_v61 = vpack.c.bf16 %v1216_v17, %v1215_v55  ;;  %4567 = vpow2.f32 %v3640_v9  ;;  %v3642_v6 = vmul.f32 -1.442695, %v5585_v20 }
 0x159   : > { %v4550_v54 = vpop.eup %4549  ;;  %4569 = vpow2.f32 %v3638_v46  ;;  %v1272_v56 = vpack.c.bf16 %v5588_v11, %v5578_v49  ;;  %v3648_v17 = vmul.f32 -1.442695, %v5613_v27  ;;  %v7249_v11 = vld [vmem:[#allocation99_spill] sm:$0xff] }
 0x15a   : > { %v4552_v30 = vpop.eup %4551  ;;  %4241 = vmatprep.mubr.bf16.mxu1 %v1267_v61  ;;  %v1035_v63 = vadd.f32 1.0, %v4550_v54  ;;  %v1271_v23 = vpack.c.bf16 %v1224_v24, %v1223_v53  ;;  %4571 = vpow2.f32 %v3643_v4  ;;  %v5622_v53 = vadd.f32 %v5431_v38, %v5277_v58 }
 0x15b   : > { %v4554_v33 = vpop.eup %4553  ;;  %v1221_v26 = vmul.f32 %v4552_v30, %v5488_v8  ;;  %4242 = vmatmul.mubr.bf16.gmra.mrb[56].mxu1 %v1268_v62  ;;  %4573 = vpow2.f32 %v3641_v32  ;;  %v5617_v32 = vadd.f32 %v5277_v58, %v5420_v25  ;;  %v5626_v61 = vadd.f32 %v5277_v58, %v5436_v34 }
 0x15c   : > { %v4556_v5 = vpop.eup %4555  ;;  %v1219_v15 = vmul.f32 %v4554_v33, %v5493_v52  ;;  %4575 = vrcp.f32 %v1035_v63  ;;  %v5631_v30 = vadd.f32 %v5442_v7, %v5277_v58  ;;  %v7246_v33 = vld [vmem:[#allocation96_spill] sm:$0xff] }
 0x15d   : > { %v4558_v14 = vpop.eup %4557  ;;  %v1222_v42 = vmul.f32 %v4556_v5, %v5501_v31  ;;  %4577 = vpow2.f32 %v3644_v45  ;;  %v3646_v45 = vmul.f32 -1.442695, %v5617_v32  ;;  %v7247_v5 = vld [vmem:[#allocation97_spill] sm:$0xff] }
 0x15e   : > { %v4560_v50 = vpop.eup %4559  ;;  %v1220_v28 = vmul.f32 %v4558_v14, %v5509_v43  ;;  %4579 = vpow2.f32 %v3642_v6  ;;  %v5636_v6 = vadd.f32 %v5277_v58, %v5450_v51  ;;  %v3649_v14 = vmul.f32 -1.442695, %v5626_v61 }
 0x15f   : > { %v4562_v60 = vpop.eup %4561  ;;  %v1038_v8 = vadd.f32 1.0, %v4560_v50  ;;  %v1270_v0 = vpack.c.bf16 %v1222_v42, %v1221_v26  ;;  %4581 = vpow2.f32 %v3647_v12  ;;  %v1229_v26 = vmul.f32 %v5594_v44, %v7246_v33 }
 0x160   : > { %v4564_v19 = vpop.eup %4563  ;;  %v1036_v1 = vadd.f32 1.0, %v4562_v60  ;;  %v1269_v9 = vpack.c.bf16 %v1220_v28, %v1219_v15  ;;  %4583 = vpow2.f32 %v3645_v10  ;;  %v5642_v15 = vadd.f32 %v7247_v5, %v5277_v58  ;;  %v7248_v28 = vld [vmem:[#allocation98_spill] sm:$0xff] }
 0x161   : > { %v4566_v52 = vpop.eup %4565  ;;  %4585 = vrcp.f32 %v1038_v8  ;;  %v1041_v46 = vadd.f32 1.0, %v4564_v19  ;;  %v3652_v50 = vmul.f32 -1.442695, %v5631_v30  ;;  %v5653_v60 = vadd.f32 %v5277_v58, %v7248_v28 }
 0x162   : > { %v4568_v31 = vpop.eup %4567  ;;  %4587 = vrcp.f32 %v1036_v1  ;;  %4245 = vmatprep.mubr.bf16.mxu1 %v1269_v9  ;;  %v1039_v43 = vadd.f32 1.0, %v4566_v52  ;;  %v3650_v49 = vmul.f32 -1.442695, %v5636_v6  ;;  %v3655_v1 = vmul.f32 -1.442695, %v5642_v15 }
 0x163   : > { %v4570_v55 = vpop.eup %4569  ;;  %4246 = vmatmul.mubr.bf16.gmra.mrb[60].mxu1 %v1270_v0  ;;  %4589 = vrcp.f32 %v1041_v46  ;;  %v1042_v4 = vadd.f32 1.0, %v4568_v31 }
 0x164   : > { %v4572_v57 = vpop.eup %4571  ;;  %4591 = vrcp.f32 %v1039_v43  ;;  %v1040_v41 = vadd.f32 1.0, %v4570_v55  ;;  %4249 = vmatprep.mubr.bf16.mxu1 %v1271_v23  ;;  %v3651_v23 = vmul.f32 -1.442695, %v5622_v53 }
 0x165   : > { %v4574_v2 = vpop.eup %4573  ;;  %4593 = vrcp.f32 %v1042_v4  ;;  %v1045_v16 = vadd.f32 1.0, %v4572_v57  ;;  %v3653_v4 = vmul.f32 -1.442695, %v5653_v60 }
 0x166   : > { %v4576_v22 = vpop.eup %4575  ;;  %4595 = vrcp.f32 %v1040_v41  ;;  %v1043_v62 = vadd.f32 1.0, %v4574_v2  ;;  %v7251_v2 = vld [vmem:[#allocation101_spill] sm:$0xff] }
 0x167   : > { %v4578_v24 = vpop.eup %4577  ;;  %4597 = vrcp.f32 %v1045_v16  ;;  %v1227_v10 = vmul.f32 %v4576_v22, %v5520_v40  ;;  %v7252_v22 = vld [vmem:[#allocation102_spill] sm:$0xff] }
 0x168   : > { %v4580_v25 = vpop.eup %4579  ;;  %4599 = vrcp.f32 %v1043_v62  ;;  %v1046_v54 = vadd.f32 1.0, %v4578_v24 }
 0x169   : > { %v4582_v38 = vpop.eup %4581  ;;  %v1044_v63 = vadd.f32 1.0, %v4580_v25  ;;  %4601 = vpow2.f32 %v3648_v17 }
 0x16a   : > { %v4584_v34 = vpop.eup %4583  ;;  %4603 = vrcp.f32 %v1046_v54  ;;  %v1049_v12 = vadd.f32 1.0, %v4582_v38 }
 0x16b   : > { %v4586_v7 = vpop.eup %4585  ;;  %4250 = vmatmul.mubr.bf16.gmra.mrb[64].mxu1 %v1272_v56  ;;  %4605 = vrcp.f32 %v1044_v63  ;;  %v1047_v51 = vadd.f32 1.0, %v4584_v34  ;;  %v5659_v56 = vadd.f32 %v7249_v11, %v5277_v58 }
 0x16c   : > { %v4588_v42 = vpop.eup %4587  ;;  %v1230_v44 = vmul.f32 %v4586_v7, %v5531_v18  ;;  %4607 = vrcp.f32 %v1049_v12 }
 0x16d   : > { %v4590_v8 = vpop.eup %4589  ;;  %v1228_v40 = vmul.f32 %v4588_v42, %v5535_v29  ;;  %4609 = vrcp.f32 %v1047_v51  ;;  %v7250_v29 = vld [vmem:[#allocation100_spill] sm:$0xff] }
 0x16e   : > { %v4592_v0 = vpop.eup %4591  ;;  %v1233_v18 = vmul.f32 %v4590_v8, %v5540_v48  ;;  %v1274_v19 = vpack.c.bf16 %v1230_v44, %v1229_v26  ;;  %4611 = vpow2.f32 %v3646_v45  ;;  %v5666_v31 = vadd.f32 %v5277_v58, %v7250_v29  ;;  %v4793_v48 = vld [vmem:[%s7013_s2] ss:$0 sm:$0xff] }
 0x16f   : > { %v4594_v9 = vpop.eup %4593  ;;  %v1231_v52 = vmul.f32 %v4592_v0, %v5544_v35  ;;  %v1273_v46 = vpack.c.bf16 %v1228_v40, %v1227_v10  ;;  %4613 = vpow2.f32 %v3651_v23  ;;  %v5674_v57 = vadd.f32 %v4793_v48, %v5490_v59 }
 0x170   : > { %v4596_v43 = vpop.eup %4595  ;;  %v1234_v55 = vmul.f32 %v4594_v9, %v5548_v13  ;;  %4615 = vpow2.f32 %v3649_v14  ;;  %v3656_v58 = vmul.f32 -1.442695, %v5659_v56  ;;  %v5679_v16 = vadd.f32 %v4793_v48, %v7251_v2 }
 0x171   : > { %v4598_v35 = vpop.eup %4597  ;;  %v1232_v41 = vmul.f32 %v4596_v43, %v5552_v21  ;;  %4253 = vmatprep.mubr.bf16.mxu1 %v1273_v46  ;;  %4617 = vpow2.f32 %v3652_v50  ;;  %v5682_v62 = vadd.f32 %v4793_v48, %v7252_v22  ;;  %v3654_v21 = vmul.f32 -1.442695, %v5666_v31 }
 0x172   : > { %v4600_v13 = vpop.eup %4599  ;;  %v1276_v17 = vpack.c.bf16 %v1234_v55, %v1233_v18  ;;  %4619 = vpow2.f32 %v3650_v49  ;;  %v1237_v59 = vmul.f32 %v4598_v35, %v5557_v36  ;;  %v3659_v63 = vmul.f32 -1.442695, %v5674_v57 }
 0x173   : > { %v4602_v24 = vpop.eup %4601  ;;  %4254 = vmatmul.mubr.bf16.gmra.mrb[68].mxu1 %v1274_v19  ;;  %v1275_v25 = vpack.c.bf16 %v1232_v41, %v1231_v52  ;;  %4621 = vpow2.f32 %v3655_v1  ;;  %v1235_v45 = vmul.f32 %v4600_v13, %v5562_v3  ;;  %v3657_v33 = vmul.f32 -1.442695, %v5679_v16 }
 0x174   : > { %v4604_v54 = vpop.eup %4603  ;;  %v1050_v38 = vadd.f32 1.0, %v4602_v24  ;;  %4623 = vpow2.f32 %v3653_v4  ;;  %v3660_v12 = vmul.f32 -1.442695, %v5682_v62 }
 0x175   : > { %v4606_v23 = vpop.eup %4605  ;;  %v1238_v34 = vmul.f32 %v4604_v54, %v5573_v37  ;;  %4257 = vmatprep.mubr.bf16.mxu1 %v1275_v25  ;;  %4625 = vpow2.f32 %v3656_v58 }
 0x176   : > { %v4608_v36 = vpop.eup %4607  ;;  %v1236_v26 = vmul.f32 %v4606_v23, %v5585_v20  ;;  %4627 = vrcp.f32 %v1050_v38  ;;  %v7253_v20 = vld [vmem:[#allocation103_spill] sm:$0xff] }
 0x177   : > { %v4610_v5 = vpop.eup %4609  ;;  %v1278_v7 = vpack.c.bf16 %v1238_v34, %v1237_v59  ;;  %4629 = vpow2.f32 %v3654_v21  ;;  %v5693_v28 = vadd.f32 %v4793_v48, %v7253_v20  ;;  %v1241_v1 = vmul.f32 %v4608_v36, %v5592_v47  ;;  %v4404_v20 = vld [vmem:[%s7018_s7 + $0x18] sm:$0xff]  }
 0x178   : > { %v4612_v3 = vpop.eup %4611  ;;  %v1277_v10 = vpack.c.bf16 %v1236_v26, %v1235_v45  ;;  %4631 = vpow2.f32 %v3659_v63  ;;  %v1239_v2 = vmul.f32 %v4610_v5, %v5599_v39 }
 0x179   : > { %v4614_v51 = vpop.eup %4613  ;;  %v1048_v14 = vadd.f32 1.0, %v4612_v3  ;;  %4633 = vpow2.f32 %v3657_v33  ;;  %v3658_v52 = vmul.f32 -1.442695, %v5693_v28 }
 0x17a   : > { %v4616_v37 = vpop.eup %4615  ;;  %v1053_v42 = vadd.f32 1.0, %v4614_v51  ;;  %4635 = vpow2.f32 %v3660_v12 }
 0x17b   : > { %v4618_v44 = vpop.eup %4617  ;;  %4637 = vrcp.f32 %v1048_v14  ;;  %4258 = vmatmul.mubr.bf16.gmra.mrb[72].mxu1 %v1276_v17  ;;  %v1051_v50 = vadd.f32 1.0, %v4616_v37 }
 0x17c   : > { %v4620_v8 = vpop.eup %4619  ;;  %4639 = vrcp.f32 %v1053_v42  ;;  %v1054_v40 = vadd.f32 1.0, %v4618_v44  ;;  %4261 = vmatprep.mubr.bf16.mxu1 %v1277_v10 }
 0x17d   : > { %v4622_v49 = vpop.eup %4621  ;;  %4641 = vrcp.f32 %v1051_v50  ;;  %v1052_v11 = vadd.f32 1.0, %v4620_v8  ;;  %v4407_v8 = vld [vmem:[%s7018_s7 + $0x30] sm:$0xff]  }
 0x17e   : > { %v4624_v0 = vpop.eup %4623  ;;  %4643 = vrcp.f32 %v1054_v40  ;;  %v1057_v18 = vadd.f32 1.0, %v4622_v49  ;;  %v4408_v40 = vld [vmem:[%s7018_s7 + $0x38] sm:$0xff]   ;;  %v7254_v49 = vld [vmem:[#allocation14_spill] sm:$0xff] }
 0x17f   : > { %v4626_v19 = vpop.eup %4625  ;;  %4645 = vrcp.f32 %v1052_v11  ;;  %v1055_v9 = vadd.f32 1.0, %v4624_v0  ;;  %v7255_v11 = vld [vmem:[#allocation15_spill] sm:$0xff]  ;;  %v7256_v0 = vld [vmem:[#allocation26_spill] sm:$0xff] }
 0x180   : > { %v4628_v46 = vpop.eup %4627  ;;  %4647 = vrcp.f32 %v1057_v18  ;;  %v1058_v29 = vadd.f32 1.0, %v4626_v19  ;;  %v7257_v18 = vld [vmem:[#allocation27_spill] sm:$0xff]  ;;  %v7258_v19 = vld [vmem:[#allocation38_spill] sm:$0xff] }
 0x181   : > { %v4630_v43 = vpop.eup %4629  ;;  %v1242_v55 = vmul.f32 %v4628_v46, %v5613_v27  ;;  %4649 = vrcp.f32 %v1055_v9  ;;  %v7260_v9 = vld [vmem:[#allocation50_spill] sm:$0xff] }
 0x182   : > { %v4632_v4 = vpop.eup %4631  ;;  %4651 = vrcp.f32 %v1058_v29  ;;  %v1056_v48 = vadd.f32 1.0, %v4630_v43  ;;  %v7262_v46 = vld [vmem:[#allocation62_spill] sm:$0xff]  ;;  %v7263_v29 = vld [vmem:[#allocation63_spill] sm:$0xff] }
 0x183   : > { %v4634_v35 = vpop.eup %4633  ;;  %4262 = vmatmul.mubr.bf16.gmra.mrb[76].mxu1 %v1278_v7  ;;  %v1280_v41 = vpack.c.bf16 %v1242_v55, %v1241_v1  ;;  %v1061_v58 = vadd.f32 1.0, %v4632_v4  ;;  %4653 = vpow2.f32 %v3658_v52  ;;  %v7259_v1 = vld [vmem:[#allocation39_spill] sm:$0xff]  ;;  %v7264_v43 = vld [vmem:[#allocation74_spill] sm:$0xff] }
 0x184   : > { %v4636_v47 = vpop.eup %4635  ;;  %4655 = vrcp.f32 %v1056_v48  ;;  %v1059_v45 = vadd.f32 1.0, %v4634_v35  ;;  %v7261_v52 = vld [vmem:[#allocation51_spill] sm:$0xff]  ;;  %v5751_v4 = vld [vmem:[%s7015_s4] ss:$0 sm:$0xff] }
 0x185   : > { %v4638_v13 = vpop.eup %4637  ;;  %4657 = vrcp.f32 %v1061_v58  ;;  %v1062_v17 = vadd.f32 1.0, %v4636_v47  ;;  %v7265_v55 = vld [vmem:[#allocation75_spill] sm:$0xff] }
 0x186   : > { %v4640_v22 = vpop.eup %4639  ;;  %v1240_v24 = vmul.f32 %v4638_v13, %v5617_v32 }
 0x187   : > { %v4642_v27 = vpop.eup %4641  ;;  %v1245_v59 = vmul.f32 %v4640_v22, %v5622_v53  ;;  %4659 = vrcp.f32 %v1062_v17  ;;  %v7267_v17 = vld [vmem:[#allocation87_spill] sm:$0xff] }
 0x188   : > { %v4644_v25 = vpop.eup %4643  ;;  %v1243_v21 = vmul.f32 %v4642_v27, %v5626_v61  ;;  %v1279_v54 = vpack.c.bf16 %v1240_v24, %v1239_v2  ;;  %4661 = vrcp.f32 %v1059_v45  ;;  %v7266_v2 = vld [vmem:[#allocation86_spill] sm:$0xff] }
 0x189   : > { %v4646_v38 = vpop.eup %4645  ;;  %v1246_v63 = vmul.f32 %v4644_v25, %v5631_v30  ;;  %v7268_v45 = vld [vmem:[#allocation94_spill] sm:$0xff] }
 0x18a   : > { %v4648_v39 = vpop.eup %4647  ;;  %v1244_v23 = vmul.f32 %v4646_v38, %v5636_v6  ;;  %4265 = vmatprep.mubr.bf16.mxu1 %v1279_v54 }
 0x18b   : > { %v4650_v34 = vpop.eup %4649  ;;  %v1249_v33 = vmul.f32 %v4648_v39, %v5642_v15  ;;  %4266 = vmatmul.mubr.bf16.gmra.mrb[80].mxu1 %v1280_v41  ;;  %v1282_v32 = vpack.c.bf16 %v1246_v63, %v1245_v59  ;;  %v4401_v15 = vld [vmem:[%s7018_s7] sm:$0xff]  }
 0x18c   : > { %v4652_v36 = vpop.eup %4651  ;;  %v1281_v53 = vpack.c.bf16 %v1244_v23, %v1243_v21  ;;  %v1247_v61 = vmul.f32 %v4650_v34, %v5653_v60  ;;  %4281 = vmatprep.subr.bf16.mxu0 %v4401_v15  ;;  %v7269_v63 = vld [vmem:[#allocation6_spill] sm:$0xff] }
 0x18d   : > { %v4654_v26 = vpop.eup %4653  ;;  %v1250_v12 = vmul.f32 %v4652_v36, %v5659_v56  ;;  %4282 = vmatpush3.bf16.msra.mxu0 %v4401_v15  ;;  %v7272_v15 = vld [vmem:[#allocation28_spill] sm:$0xff] }
 0x18e   : > { %v4656_v5 = vpop.eup %4655  ;;  %v1060_v7 = vadd.f32 1.0, %v4654_v26  ;;  %4269 = vmatprep.mubr.bf16.mxu1 %v1281_v53  ;;  %v7270_v53 = vld [vmem:[#allocation16_spill] sm:$0xff] }
 0x18f   : > { %v4658_v30 = vpop.eup %4657  ;;  %v1248_v6 = vmul.f32 %v4656_v5, %v5666_v31  ;;  %v1284_v3 = vpack.c.bf16 %v1250_v12, %v1249_v33  ;;  %v4402_v31 = vld [vmem:[%s7018_s7 + $0x8] sm:$0xff]  }
 0x190   : > { %v1253_v10 = vmul.f32 %v4658_v30, %v5674_v57  ;;  %4663 = vrcp.f32 %v1060_v7  ;;  %4283 = vmatprep.subr.bf16.mxu0 %v4402_v31 }
 0x191   : > { %v4660_v51 = vpop.eup %4659  ;;  %v1283_v14 = vpack.c.bf16 %v1248_v6, %v1247_v61  ;;  %4284 = vmatpush3.bf16.msra.mxu0 %v4402_v31  ;;  %v7271_v61 = vld [vmem:[#allocation17_spill] sm:$0xff] }
 0x192   : > { %v1254_v60 = vmul.f32 %v4660_v51, %v5682_v62  ;;  %v4662_v37 = vpop.eup %4661  ;;  %v4403_v62 = vld [vmem:[%s7018_s7 + $0x10] sm:$0xff]  }
 0x193   : > { %4270 = vmatmul.mubr.bf16.gmra.mrb[84].mxu1 %v1282_v32  ;;  %v1251_v57 = vmul.f32 %v4662_v37, %v5679_v16  ;;  %4285 = vmatprep.subr.bf16.mxu0 %v4403_v62  ;;  %v4405_v16 = vld [vmem:[%s7018_s7 + $0x20] sm:$0xff]  }
 0x194   : > { %4273 = vmatprep.mubr.bf16.mxu1 %v1283_v14  ;;  %v1286_v56 = vpack.c.bf16 %v1254_v60, %v1253_v10  ;;  %v7273_v14 = vld [vmem:[#allocation29_spill] sm:$0xff] }
 0x195   : > { %4286 = vmatpush3.bf16.msra.mxu0 %v4403_v62  ;;  %v7275_v62 = vld [vmem:[#allocation41_spill] sm:$0xff] }
 0x196   : > { %4287 = vmatprep.subr.bf16.mxu0 %v4404_v20 }
 0x199   : > { %4288 = vmatpush3.bf16.msra.mxu0 %v4404_v20 }
 0x19a   : > { %v4664_v42 = vpop.eup %4663  ;;  %4289 = vmatprep.subr.bf16.mxu0 %v4405_v16 }
 0x19b   : > { %v1252_v44 = vmul.f32 %v4664_v42, %v5693_v28  ;;  %4274 = vmatmul.mubr.bf16.gmra.mrb[88].mxu1 %v1284_v3  ;;  %v4406_v28 = vld [vmem:[%s7018_s7 + $0x28] sm:$0xff]  }
 0x19d   : > { %v1285_v50 = vpack.c.bf16 %v1252_v44, %v1251_v57  ;;  %4290 = vmatpush3.bf16.msra.mxu0 %v4405_v16  ;;  %v7274_v44 = vld [vmem:[#allocation40_spill] sm:$0xff] }
 0x19e   : > { %4291 = vmatprep.subr.bf16.mxu0 %v4406_v28 }
 0x19f   : > { %4277 = vmatprep.mubr.bf16.mxu1 %v1285_v50 }
 0x1a1   : > { %4292 = vmatpush3.bf16.msra.mxu0 %v4406_v28 }
 0x1a2   : > { %4293 = vmatprep.subr.bf16.mxu0 %v4407_v8 }
 0x1a3   : > { %4278 = vmatmul.mubr.bf16.gmra.mrb[92].mxu1 %v1286_v56 }
 0x1a5   : > { %4294 = vmatpush3.bf16.msra.mxu0 %v4407_v8 }
 0x1a6   : > { %4295 = vmatprep.subr.bf16.mxu0 %v4408_v40 }
 0x1a9   : > { %4296 = vmatpush3.bf16.msra.mxu0 %v4408_v40 }
 0x1ac   : > { %4298 = vmatmul.mubr.bf16.vlgmr.msra.gmra.mrb[32].mxu0 %v7254_v49 }
 0x1ad   : > { %4301 = vmatprep.mubr.bf16.mxu0 %v7255_v11 }
 0x1b4   : > { %4302 = vmatmul.mubr.bf16.gmra.mrb[36].mxu0 %v7256_v0  ;;  %v7276_v0 = vld [vmem:[#allocation52_spill] sm:$0xff] }
 0x1b5   : > { %4305 = vmatprep.mubr.bf16.mxu0 %v7257_v18 }
 0x1bc   : > { %4306 = vmatmul.mubr.bf16.gmra.mrb[40].mxu0 %v7258_v19  ;;  %v7277_v19 = vld [vmem:[#allocation53_spill] sm:$0xff] }
 0x1bd   : > { %4309 = vmatprep.mubr.bf16.mxu0 %v7259_v1 }
 0x1c4   : > { %4310 = vmatmul.mubr.bf16.gmra.mrb[44].mxu0 %v7260_v9 }
 0x1c5   : > { %4313 = vmatprep.mubr.bf16.mxu0 %v7261_v52 }
 0x1cc   : > { %4314 = vmatmul.mubr.bf16.gmra.mrb[48].mxu0 %v7262_v46 }
 0x1cd   : > { %4317 = vmatprep.mubr.bf16.mxu0 %v7263_v29 }
 0x1d4   : > { %4318 = vmatmul.mubr.bf16.gmra.mrb[52].mxu0 %v7264_v43 }
 0x1d5   : > { %4321 = vmatprep.mubr.bf16.mxu0 %v7265_v55  ;;  %v7278_v55 = vld [vmem:[#allocation64_spill] sm:$0xff] }
 0x1dc   : > { %4322 = vmatmul.mubr.bf16.gmra.mrb[56].mxu0 %v7266_v2 }
 0x1dd   : > { %4325 = vmatprep.mubr.bf16.mxu0 %v7267_v17 }
 0x1e4   : > { %4326 = vmatmul.mubr.bf16.gmra.mrb[60].mxu0 %v7268_v45  ;;  %v7281_v45 = vld [vmem:[#allocation77_spill] sm:$0xff] }
 0x1e5   : > { %4329 = vmatprep.mubr.bf16.mxu0 %v7269_v63 }
 0x1ec   : > { %4330 = vmatmul.mubr.bf16.gmra.mrb[64].mxu0 %v7270_v53 }
 0x1ed   : > { %4333 = vmatprep.mubr.bf16.mxu0 %v7271_v61 }
 0x1f4   : > { %4334 = vmatmul.mubr.bf16.gmra.mrb[68].mxu0 %v7272_v15 }
 0x1f5   : > { %4337 = vmatprep.mubr.bf16.mxu0 %v7273_v14 }
 0x1fb   : > { %v4219_v48 = vpop.f32.mrb[32].mxu1 }
 0x1fc   : > { %v5754_v35 = vadd.f32 %v4219_v48, %v5751_v4  ;;  %v1392_v41 = vpop.f32.mrb[33].mxu1  ;;  %4338 = vmatmul.mubr.bf16.gmra.mrb[72].mxu0 %v7274_v44 }
 0x1fd   : > { %v5757_v58 = vadd.f32 %v5751_v4, %v1392_v41  ;;  %v4220_v47 = vpop.f32.mrb[34].mxu1  ;;  %4341 = vmatprep.mubr.bf16.mxu0 %v7275_v62  ;;  %v7279_v41 = vld [vmem:[#allocation65_spill] sm:$0xff] }
 0x1fe   : > { %1653 = vadd.xlane.f32.xlu1 %v5754_v35  ;;  %v1395_v13 = vpop.f32.mrb[35].mxu1  ;;  %v5764_v22 = vadd.f32 %v4220_v47, %v5751_v4  ;;  %v1844_v24 = vmul.f32 %v5754_v35, %v5754_v35 }
 0x1ff   : > { %1649 = vadd.xlane.f32.xlu0 %v5757_v58  ;;  %v5770_v59 = vadd.f32 %v5751_v4, %v1395_v13  ;;  %v1842_v23 = vmul.f32 %v5757_v58, %v5757_v58 }
 0x200   : > { %v1845_v21 = vmul.f32 %v5764_v22, %v5764_v22 }
 0x201   : > { %v1843_v39 = vmul.f32 %v5770_v59, %v5770_v59 }
 0x202   : > { %1655 = vadd.xlane.f32.xlu1 %v5764_v22 }
 0x203   : > { %v4223_v27 = vpop.f32.mrb[36].mxu1  ;;  %1910 = vadd.xlane.f32.xlu0 %v1844_v24 }
 0x204   : > { %v1408_v25 = vpop.f32.mrb[37].mxu1  ;;  %v5785_v32 = vadd.f32 %v4223_v27, %v5751_v4  ;;  %4342 = vmatmul.mubr.bf16.gmra.mrb[76].mxu0 %v7276_v0 }
 0x205   : > { %v4224_v54 = vpop.f32.mrb[38].mxu1  ;;  %v5795_v7 = vadd.f32 %v5751_v4, %v1408_v25  ;;  %4345 = vmatprep.mubr.bf16.mxu0 %v7277_v19 }
 0x206   : > { %1912 = vadd.xlane.f32.xlu1 %v1845_v21  ;;  %v1411_v38 = vpop.f32.mrb[39].mxu1  ;;  %v5782_v34 = vadd.f32 %v4224_v54, %v5751_v4  ;;  %v1848_v10 = vmul.f32 %v5785_v32, %v5785_v32  ;;  %v7280_v21 = vld [vmem:[#allocation76_spill] sm:$0xff] }
 0x207   : > { %1651 = vadd.xlane.f32.xlu0 %v5770_v59  ;;  %v5792_v5 = vadd.f32 %v5751_v4, %v1411_v38  ;;  %v1846_v37 = vmul.f32 %v5795_v7, %v5795_v7 }
 0x208   : > { %v1849_v6 = vmul.f32 %v5782_v34, %v5782_v34 }
 0x209   : > { %v1847_v56 = vmul.f32 %v5792_v5, %v5792_v5 }
 0x20a   : > { %1908 = vadd.xlane.f32.xlu1 %v1843_v39 }
 0x20b   : > { %1906 = vadd.xlane.f32.xlu0 %v1842_v23 }
 0x20c   : > { %v4227_v33 = vpop.f32.mrb[40].mxu1  ;;  %4346 = vmatmul.mubr.bf16.gmra.mrb[80].mxu0 %v7278_v55 }
 0x20d   : > { %v1424_v36 = vpop.f32.mrb[41].mxu1  ;;  %v5813_v57 = vadd.f32 %v4227_v33, %v5751_v4  ;;  %4349 = vmatprep.mubr.bf16.mxu0 %v7279_v41 }
 0x20e   : > { %v4228_v26 = vpop.f32.mrb[42].mxu1  ;;  %1663 = vadd.xlane.f32.xlu1 %v5782_v34  ;;  %v5823_v8 = vadd.f32 %v5751_v4, %v1424_v36 }
 0x20f   : > { %v1427_v12 = vpop.f32.mrb[43].mxu1  ;;  %1661 = vadd.xlane.f32.xlu0 %v5785_v32  ;;  %v5810_v31 = vadd.f32 %v4228_v26, %v5751_v4  ;;  %v1852_v49 = vmul.f32 %v5813_v57, %v5813_v57  ;;  %v7284_v26 = vld [vmem:[#allocation88_spill] sm:$0xff] }
 0x210   : > { %v5820_v16 = vadd.f32 %v5751_v4, %v1427_v12  ;;  %v1850_v46 = vmul.f32 %v5823_v8, %v5823_v8  ;;  %v7285_v12 = vld [vmem:[#allocation89_spill] sm:$0xff] }
 0x211   : > { %v1853_v40 = vmul.f32 %v5810_v31, %v5810_v31 }
 0x212   : > { %1659 = vadd.xlane.f32.xlu1 %v5792_v5  ;;  %v1851_v9 = vmul.f32 %v5820_v16, %v5820_v16 }
 0x213   : > { %1657 = vadd.xlane.f32.xlu0 %v5795_v7 }
 0x214   : > { %v4231_v30 = vpop.f32.mrb[44].mxu1  ;;  %4350 = vmatmul.mubr.bf16.gmra.mrb[84].mxu0 %v7280_v21 }
 0x215   : > { %v1440_v3 = vpop.f32.mrb[45].mxu1  ;;  %v5847_v43 = vadd.f32 %v4231_v30, %v5751_v4  ;;  %4353 = vmatprep.mubr.bf16.mxu0 %v7281_v45 }
 0x216   : > { %v4232_v51 = vpop.f32.mrb[46].mxu1  ;;  %1920 = vadd.xlane.f32.xlu1 %v1849_v6  ;;  %v5863_v17 = vadd.f32 %v5751_v4, %v1440_v3 }
 0x217   : > { %v1443_v60 = vpop.f32.mrb[47].mxu1  ;;  %1918 = vadd.xlane.f32.xlu0 %v1848_v10  ;;  %v5844_v29 = vadd.f32 %v4232_v51, %v5751_v4  ;;  %v1856_v25 = vmul.f32 %v5847_v43, %v5847_v43 }
 0x218   : > { %v5858_v2 = vadd.f32 %v5751_v4, %v1443_v60  ;;  %v1854_v23 = vmul.f32 %v5863_v17, %v5863_v17  ;;  %v7288_v60 = vld [vmem:[#allocation95_spill] sm:$0xff] }
 0x219   : > { %v1857_v27 = vmul.f32 %v5844_v29, %v5844_v29 }
 0x21a   : > { %1916 = vadd.xlane.f32.xlu1 %v1847_v56  ;;  %v1855_v63 = vmul.f32 %v5858_v2, %v5858_v2 }
 0x21b   : > { %1914 = vadd.xlane.f32.xlu0 %v1846_v37 }
 0x21c   : > { %4354 = vmatmul.mubr.bf16.gmra.mrb[88].mxu0 %v7284_v26 }
 0x21d   : > { %v4235_v42 = vpop.f32.mrb[48].mxu1  ;;  %4357 = vmatprep.mubr.bf16.mxu0 %v7285_v12 }
 0x21e   : > { %v1456_v50 = vpop.f32.mrb[49].mxu1  ;;  %1671 = vadd.xlane.f32.xlu1 %v5810_v31  ;;  %v5891_v53 = vadd.f32 %v4235_v42, %v5751_v4 }
 0x21f   : > { %v4236_v20 = vpop.f32.mrb[50].mxu1  ;;  %1669 = vadd.xlane.f32.xlu0 %v5813_v57  ;;  %v5907_v10 = vadd.f32 %v5751_v4, %v1456_v50 }
 0x220   : > { %v1459_v28 = vpop.f32.mrb[51].mxu1  ;;  %v5888_v36 = vadd.f32 %v4236_v20, %v5751_v4  ;;  %7283 = vst [vmem:[#allocation97_spill] sm:$0xff] %v5891_v53  ;;  %v1860_v14 = vmul.f32 %v5891_v53, %v5891_v53 }
 0x221   : > { %v5902_v6 = vadd.f32 %v5751_v4, %v1459_v28  ;;  %7287 = vst [vmem:[#allocation99_spill] sm:$0xff] %v5907_v10  ;;  %v1858_v50 = vmul.f32 %v5907_v10, %v5907_v10 }
 0x222   : > { %1667 = vadd.xlane.f32.xlu1 %v5820_v16  ;;  %7282 = vst [vmem:[#allocation96_spill] sm:$0xff] %v5888_v36  ;;  %v1861_v51 = vmul.f32 %v5888_v36, %v5888_v36 }
 0x223   : > { %1665 = vadd.xlane.f32.xlu0 %v5823_v8  ;;  %7286 = vst [vmem:[#allocation98_spill] sm:$0xff] %v5902_v6  ;;  %v1859_v42 = vmul.f32 %v5902_v6, %v5902_v6 }
 0x224   : > { %4358 = vmatmul.mubr.bf16.gmra.mrb[92].mxu0 %v7288_v60 }
 0x225   : > { %v5831_v11 = vpop.f32.mrb[52].mxu1 }
 0x226   : > { %1928 = vadd.xlane.f32.xlu1 %v1853_v40  ;;  %v5834_v18 = vpop.f32.mrb[53].mxu1  ;;  %v5935_v28 = vadd.f32 %v5831_v11, %v5751_v4 }
 0x227   : > { %1926 = vadd.xlane.f32.xlu0 %v1852_v49  ;;  %v4240_v1 = vpop.f32.mrb[54].mxu1 }
 0x228   : > { %v5839_v52 = vpop.f32.mrb[55].mxu1  ;;  %v5931_v20 = vadd.f32 %v4240_v1, %v5751_v4  ;;  %7290 = vst [vmem:[#allocation101_spill] sm:$0xff] %v5935_v28  ;;  %v5951_v1 = vadd.f32 %v5751_v4, %v5834_v18 }
 0x229   : > { %v5945_v0 = vadd.f32 %v5751_v4, %v5839_v52 }
 0x22a   : > { %1924 = vadd.xlane.f32.xlu1 %v1851_v9  ;;  %7289 = vst [vmem:[#allocation100_spill] sm:$0xff] %v5931_v20  ;;  %7292 = vst [vmem:[#allocation103_spill] sm:$0xff] %v5951_v1  ;;  %v1865_v9 = vmul.f32 %v5931_v20, %v5931_v20 }
 0x22b   : > { %1922 = vadd.xlane.f32.xlu0 %v1850_v46  ;;  %7291 = vst [vmem:[#allocation102_spill] sm:$0xff] %v5945_v0  ;;  %v1864_v46 = vmul.f32 %v5935_v28, %v5935_v28  ;;  %v1863_v18 = vmul.f32 %v5945_v0, %v5945_v0 }
 0x22e   : > { %1679 = vadd.xlane.f32.xlu1 %v5844_v29  ;;  %v5851_v48 = vpop.f32.mrb[56].mxu1 }
 0x22f   : > { %1677 = vadd.xlane.f32.xlu0 %v5847_v43  ;;  %v5855_v47 = vpop.f32.mrb[57].mxu1  ;;  %v5979_v45 = vadd.f32 %v5851_v48, %v5751_v4 }
 0x230   : > { %v5860_v13 = vpop.f32.mrb[58].mxu1 }
 0x231   : > { %v5865_v24 = vpop.f32.mrb[59].mxu1  ;;  %v5975_v21 = vadd.f32 %v5860_v13, %v5751_v4  ;;  %7294 = vst [vmem:[#allocation15_spill] sm:$0xff] %v5979_v45  ;;  %v5995_v13 = vadd.f32 %v5751_v4, %v5855_v47 }
 0x232   : > { %1675 = vadd.xlane.f32.xlu1 %v5858_v2  ;;  %v5989_v26 = vadd.f32 %v5751_v4, %v5865_v24 }
 0x233   : > { %1673 = vadd.xlane.f32.xlu0 %v5863_v17  ;;  %7293 = vst [vmem:[#allocation14_spill] sm:$0xff] %v5975_v21  ;;  %7296 = vst [vmem:[#allocation27_spill] sm:$0xff] %v5995_v13 }
 0x234   : > { %7295 = vst [vmem:[#allocation26_spill] sm:$0xff] %v5989_v26  ;;  %v1867_v47 = vmul.f32 %v5989_v26, %v5989_v26 }
 0x236   : > { %1936 = vadd.xlane.f32.xlu1 %v1857_v27  ;;  %v5874_v54 = vpop.f32.mrb[60].mxu1  ;;  %v1862_v27 = vmul.f32 %v5951_v1, %v5951_v1 }
 0x237   : > { %1934 = vadd.xlane.f32.xlu0 %v1856_v25  ;;  %v5877_v38 = vpop.f32.mrb[61].mxu1 }
 0x238   : > { %v5881_v39 = vpop.f32.mrb[62].mxu1 }
 0x239   : > { %v5885_v33 = vpop.f32.mrb[63].mxu1 }
 0x23a   : > { %1932 = vadd.xlane.f32.xlu1 %v1855_v63 }
 0x23b   : > { %1930 = vadd.xlane.f32.xlu0 %v1854_v23 }
 0x23e   : > { %1687 = vadd.xlane.f32.xlu1 %v5888_v36  ;;  %v5895_v61 = vpop.f32.mrb[64].mxu1 }
 0x23f   : > { %1685 = vadd.xlane.f32.xlu0 %v5891_v53  ;;  %v5899_v30 = vpop.f32.mrb[65].mxu1 }
 0x240   : > { %v5904_v3 = vpop.f32.mrb[66].mxu1 }
 0x241   : > { %v5909_v15 = vpop.f32.mrb[67].mxu1 }
 0x242   : > { %1683 = vadd.xlane.f32.xlu1 %v5902_v6 }
 0x243   : > { %1681 = vadd.xlane.f32.xlu0 %v5907_v10 }
 0x246   : > { %1944 = vadd.xlane.f32.xlu1 %v1861_v51  ;;  %v5918_v56 = vpop.f32.mrb[68].mxu1  ;;  %v1869_v51 = vmul.f32 %v5975_v21, %v5975_v21 }
 0x247   : > { %1942 = vadd.xlane.f32.xlu0 %v1860_v14  ;;  %v5920_v37 = vpop.f32.mrb[69].mxu1  ;;  %v1868_v14 = vmul.f32 %v5979_v45, %v5979_v45 }
 0x248   : > { %v5924_v44 = vpop.f32.mrb[70].mxu1 }
 0x249   : > { %v5928_v62 = vpop.f32.mrb[71].mxu1 }
 0x24a   : > { %1940 = vadd.xlane.f32.xlu1 %v1859_v42 }
 0x24b   : > { %1938 = vadd.xlane.f32.xlu0 %v1858_v50  ;;  %v1866_v50 = vmul.f32 %v5995_v13, %v5995_v13 }
 0x24e   : > { %1695 = vadd.xlane.f32.xlu1 %v5931_v20  ;;  %v5938_v40 = vpop.f32.mrb[72].mxu1 }
 0x24f   : > { %1693 = vadd.xlane.f32.xlu0 %v5935_v28  ;;  %v5941_v49 = vpop.f32.mrb[73].mxu1 }
 0x250   : > { %v5947_v19 = vpop.f32.mrb[74].mxu1 }
 0x251   : > { %v5953_v11 = vpop.f32.mrb[75].mxu1 }
 0x252   : > { %1691 = vadd.xlane.f32.xlu1 %v5945_v0 }
 0x253   : > { %1689 = vadd.xlane.f32.xlu0 %v5951_v1 }
 0x256   : > { %1952 = vadd.xlane.f32.xlu1 %v1865_v9  ;;  %v5961_v52 = vpop.f32.mrb[76].mxu1 }
 0x257   : > { %1950 = vadd.xlane.f32.xlu0 %v1864_v46  ;;  %v5963_v55 = vpop.f32.mrb[77].mxu1  ;;  %v6019_v46 = vadd.f32 %v5881_v39, %v5751_v4  ;;  %v6039_v39 = vadd.f32 %v5751_v4, %v5877_v38 }
 0x258   : > { %v5967_v41 = vpop.f32.mrb[78].mxu1 }
 0x259   : > { %v5971_v25 = vpop.f32.mrb[79].mxu1  ;;  %7297 = vst [vmem:[#allocation38_spill] sm:$0xff] %v6019_v46  ;;  %7300 = vst [vmem:[#allocation51_spill] sm:$0xff] %v6039_v39 }
 0x25a   : > { %1948 = vadd.xlane.f32.xlu1 %v1863_v18  ;;  %v6023_v18 = vadd.f32 %v5874_v54, %v5751_v4 }
 0x25b   : > { %1946 = vadd.xlane.f32.xlu0 %v1862_v27 }
 0x25c   : > { %7298 = vst [vmem:[#allocation39_spill] sm:$0xff] %v6023_v18 }
 0x25e   : > { %1703 = vadd.xlane.f32.xlu1 %v5975_v21  ;;  %v5982_v63 = vpop.f32.mrb[80].mxu1  ;;  %v1870_v21 = vmul.f32 %v6039_v39, %v6039_v39 }
 0x25f   : > { %1701 = vadd.xlane.f32.xlu0 %v5979_v45  ;;  %v5985_v23 = vpop.f32.mrb[81].mxu1 }
 0x260   : > { %v5991_v12 = vpop.f32.mrb[82].mxu1 }
 0x261   : > { %v5997_v48 = vpop.f32.mrb[83].mxu1 }
 0x262   : > { %1699 = vadd.xlane.f32.xlu1 %v5989_v26 }
 0x263   : > { %1697 = vadd.xlane.f32.xlu0 %v5995_v13  ;;  %v1872_v13 = vmul.f32 %v6023_v18, %v6023_v18 }
 0x266   : > { %1960 = vadd.xlane.f32.xlu1 %v1869_v51  ;;  %v6005_v24 = vpop.f32.mrb[84].mxu1 }
 0x267   : > { %1958 = vadd.xlane.f32.xlu0 %v1868_v14  ;;  %v6007_v60 = vpop.f32.mrb[85].mxu1  ;;  %v6033_v14 = vadd.f32 %v5751_v4, %v5885_v33 }
 0x268   : > { %v6011_v42 = vpop.f32.mrb[86].mxu1 }
 0x269   : > { %v6015_v9 = vpop.f32.mrb[87].mxu1  ;;  %7299 = vst [vmem:[#allocation50_spill] sm:$0xff] %v6033_v14  ;;  %v1871_v38 = vmul.f32 %v6033_v14, %v6033_v14 }
 0x26a   : > { %1956 = vadd.xlane.f32.xlu1 %v1867_v47 }
 0x26b   : > { %1954 = vadd.xlane.f32.xlu0 %v1866_v50  ;;  %v1873_v50 = vmul.f32 %v6019_v46, %v6019_v46 }
 0x26e   : > { %1711 = vadd.xlane.f32.xlu1 %v6019_v46  ;;  %v6026_v27 = vpop.f32.mrb[88].mxu1 }
 0x26f   : > { %1709 = vadd.xlane.f32.xlu0 %v6023_v18  ;;  %v6029_v51 = vpop.f32.mrb[89].mxu1 }
 0x270   : > { %v6035_v47 = vpop.f32.mrb[90].mxu1 }
 0x271   : > { %v6041_v54 = vpop.f32.mrb[91].mxu1 }
 0x272   : > { %7301 = vst [vmem:[#allocation62_spill] sm:$0xff] %v6041_v54  ;;  %1707 = vadd.xlane.f32.xlu1 %v6033_v14  ;;  %v6073_v14 = vadd.f32 %v5751_v4, %v5909_v15 }
 0x273   : > { %1705 = vadd.xlane.f32.xlu0 %v6039_v39  ;;  %v6091_v39 = vadd.f32 %v5924_v44, %v5751_v4 }
 0x274   : > { %7308 = vst [vmem:[#allocation6_spill] sm:$0xff] %v6073_v14  ;;  %v1875_v15 = vmul.f32 %v6073_v14, %v6073_v14 }
 0x275   : > { %7310 = vst [vmem:[#allocation17_spill] sm:$0xff] %v6091_v39  ;;  %v1881_v0 = vmul.f32 %v6091_v39, %v6091_v39 }
 0x276   : > { %1968 = vadd.xlane.f32.xlu1 %v1873_v50  ;;  %v6049_v33 = vpop.f32.mrb[92].mxu1  ;;  %v6063_v50 = vadd.f32 %v5904_v3, %v5751_v4 }
 0x277   : > { %7302 = vst [vmem:[#allocation63_spill] sm:$0xff] %v6049_v33  ;;  %1966 = vadd.xlane.f32.xlu0 %v1872_v13  ;;  %v6051_v26 = vpop.f32.mrb[93].mxu1  ;;  %v6067_v13 = vadd.f32 %v5895_v61, %v5751_v4 }
 0x278   : > { %7303 = vst [vmem:[#allocation74_spill] sm:$0xff] %v6051_v26  ;;  %v6055_v45 = vpop.f32.mrb[94].mxu1  ;;  %7306 = vst [vmem:[#allocation87_spill] sm:$0xff] %v6063_v50  ;;  %v1877_v61 = vmul.f32 %v6063_v50, %v6063_v50 }
 0x279   : > { %7304 = vst [vmem:[#allocation75_spill] sm:$0xff] %v6055_v45  ;;  %v6059_v1 = vpop.f32.mrb[95].mxu1  ;;  %7307 = vst [vmem:[#allocation94_spill] sm:$0xff] %v6067_v13  ;;  %v1876_v3 = vmul.f32 %v6067_v13, %v6067_v13 }
 0x27a   : > { %7305 = vst [vmem:[#allocation86_spill] sm:$0xff] %v6059_v1  ;;  %1964 = vadd.xlane.f32.xlu1 %v1871_v38  ;;  %v6077_v38 = vadd.f32 %v5751_v4, %v5899_v30 }
 0x27b   : > { %1962 = vadd.xlane.f32.xlu0 %v1870_v21 }
 0x27c   : > { %7309 = vst [vmem:[#allocation16_spill] sm:$0xff] %v6077_v38  ;;  %v1874_v21 = vmul.f32 %v6077_v38, %v6077_v38 }
 0x27e   : > { %1719 = vadd.xlane.f32.xlu1 %v6063_v50  ;;  %v6095_v50 = vadd.f32 %v5918_v56, %v5751_v4 }
 0x27f   : > { %1717 = vadd.xlane.f32.xlu0 %v6067_v13 }
 0x280   : > { %7311 = vst [vmem:[#allocation28_spill] sm:$0xff] %v6095_v50 }
 0x282   : > { %1715 = vadd.xlane.f32.xlu1 %v6073_v14 }
 0x283   : > { %1713 = vadd.xlane.f32.xlu0 %v6077_v38  ;;  %v6109_v38 = vadd.f32 %v5751_v4, %v5920_v37 }
 0x285   : > { %7313 = vst [vmem:[#allocation40_spill] sm:$0xff] %v6109_v38 }
 0x286   : > { %1976 = vadd.xlane.f32.xlu1 %v1877_v61 }
 0x287   : > { %1974 = vadd.xlane.f32.xlu0 %v1876_v3 }
 0x28a   : > { %1972 = vadd.xlane.f32.xlu1 %v1875_v15  ;;  %v6103_v15 = vadd.f32 %v5751_v4, %v5928_v62 }
 0x28b   : > { %v1654_v30 = vpop.xlane.xlu1 %1653  ;;  %1970 = vadd.xlane.f32.xlu0 %v1874_v21 }
 0x28c   : > { %v1650_v18 = vpop.xlane.xlu0 %1649  ;;  %v6097_v61 = vmul.f32 0.0078125, %v1654_v30  ;;  %7312 = vst [vmem:[#allocation29_spill] sm:$0xff] %v6103_v15 }
 0x28d   : > { %v6119_v37 = vmul.f32 0.0078125, %v1650_v18  ;;  %v1879_v18 = vmul.f32 %v6103_v15, %v6103_v15 }
 0x28e   : > { %1727 = vadd.xlane.f32.xlu1 %v6091_v39  ;;  %v2100_v56 = vmul.f32 %v6097_v61, %v6097_v61 }
 0x28f   : > { %v1656_v3 = vpop.xlane.xlu1 %1655  ;;  %1725 = vadd.xlane.f32.xlu0 %v6095_v50 }
 0x290   : > { %v6105_v21 = vmul.f32 0.0078125, %v1656_v3  ;;  %v1911_v44 = vpop.xlane.xlu0 %1910 }
 0x291   : > { %v2036_v30 = vmul.f32 0.0078125, %v1911_v44  ;;  %v1880_v44 = vmul.f32 %v6095_v50, %v6095_v50 }
 0x292   : > { %1723 = vadd.xlane.f32.xlu1 %v6103_v15  ;;  %v2101_v62 = vmul.f32 %v6105_v21, %v6105_v21 }
 0x293   : > { %v2164_v14 = vsub.f32 %v2036_v30, %v2100_v56  ;;  %v1913_v13 = vpop.xlane.xlu1 %1912  ;;  %1721 = vadd.xlane.f32.xlu0 %v6109_v38 }
 0x294   : > { %v2037_v3 = vmul.f32 0.0078125, %v1913_v13  ;;  %v1652_v46 = vpop.xlane.xlu0 %1651 }
 0x295   : > { %v2228_v28 = vmax.f32 %v2164_v14, 0.0  ;;  %v6121_v20 = vmul.f32 0.0078125, %v1652_v46  ;;  %v2098_v46 = vmul.f32 %v6119_v37, %v6119_v37 }
 0x296   : > { %v2165_v56 = vsub.f32 %v2037_v3, %v2101_v62  ;;  %1984 = vadd.xlane.f32.xlu1 %v1881_v0  ;;  %v1878_v0 = vmul.f32 %v6109_v38, %v6109_v38 }
 0x297   : > { %v2356_v30 = vadd.f32 1e-05, %v2228_v28  ;;  %v2099_v1 = vmul.f32 %v6121_v20, %v6121_v20  ;;  %v1909_v26 = vpop.xlane.xlu1 %1908  ;;  %1982 = vadd.xlane.f32.xlu0 %v1880_v44 }
 0x298   : > { %v2229_v13 = vmax.f32 %v2165_v56, 0.0  ;;  %v2035_v10 = vmul.f32 0.0078125, %v1909_v26  ;;  %v1907_v6 = vpop.xlane.xlu0 %1906  ;;  %v6135_v26 = vadd.f32 %v5947_v19, %v5751_v4  ;;  %v6149_v19 = vadd.f32 %v5751_v4, %v5953_v11 }
 0x299   : > { %4665 = vrsqrt.f32 %v2356_v30  ;;  %v2034_v14 = vmul.f32 0.0078125, %v1907_v6  ;;  %v6139_v30 = vadd.f32 %v5938_v40, %v5751_v4 }
 0x29a   : > { %v2357_v28 = vadd.f32 1e-05, %v2229_v13  ;;  %v2163_v62 = vsub.f32 %v2035_v10, %v2099_v1  ;;  %1980 = vadd.xlane.f32.xlu1 %v1879_v18  ;;  %7314 = vst [vmem:[#allocation41_spill] sm:$0xff] %v6135_v26  ;;  %v6144_v10 = vadd.f32 %v5751_v4, %v5941_v49  ;;  %7317 = vst [vmem:[#allocation64_spill] sm:$0xff] %v6149_v19 }
 0x29b   : > { %v2162_v3 = vsub.f32 %v2034_v14, %v2098_v46  ;;  %v1664_v50 = vpop.xlane.xlu1 %1663  ;;  %1978 = vadd.xlane.f32.xlu0 %v1878_v0  ;;  %7315 = vst [vmem:[#allocation52_spill] sm:$0xff] %v6139_v30  ;;  %v2292_v14 = vsub.f32 %v5754_v35, %v6097_v61  ;;  %v6161_v0 = vld [vmem:[%s7016_s5] ss:$0 sm:$0xff] }
 0x29c   : > { %4667 = vrsqrt.f32 %v2357_v28  ;;  %v2227_v44 = vmax.f32 %v2163_v62, 0.0  ;;  %v1662_v56 = vpop.xlane.xlu0 %1661  ;;  %7316 = vst [vmem:[#allocation53_spill] sm:$0xff] %v6144_v10  ;;  %v6151_v18 = vmul.f32 0.0078125, %v1664_v50  ;;  %v1885_v50 = vmul.f32 %v6135_v26, %v6135_v26 }
 0x29d   : > { %v2226_v6 = vmax.f32 %v2162_v3, 0.0  ;;  %v6153_v46 = vmul.f32 0.0078125, %v1662_v56  ;;  %v1882_v35 = vmul.f32 %v6144_v10, %v6144_v10  ;;  %v2293_v56 = vsub.f32 %v5764_v22, %v6105_v21  ;;  %v4299_v21 = vpop.f32.mrb[32].mxu0 }
 0x29e   : > { %v2355_v15 = vadd.f32 1e-05, %v2227_v44  ;;  %1735 = vadd.xlane.f32.xlu1 %v6135_v26  ;;  %v2105_v28 = vmul.f32 %v6151_v18, %v6151_v18  ;;  %v1883_v22 = vmul.f32 %v6149_v19, %v6149_v19  ;;  %v2290_v26 = vsub.f32 %v5757_v58, %v6119_v37 }
 0x29f   : > { %v2354_v1 = vadd.f32 1e-05, %v2226_v6  ;;  %v1660_v13 = vpop.xlane.xlu1 %1659  ;;  %1733 = vadd.xlane.f32.xlu0 %v6139_v30  ;;  %v6179_v6 = vld [vmem:[%s7017_s6] ss:$0 sm:$0xff] }
 0x2a0   : > { %4669 = vrsqrt.f32 %v2355_v15  ;;  %v1658_v40 = vpop.xlane.xlu0 %1657  ;;  %v1884_v15 = vmul.f32 %v6139_v30, %v6139_v30  ;;  %v6172_v62 = vmul.f32 0.0078125, %v1660_v13  ;;  %v6187_v13 = vadd.f32 %v5961_v52, %v5751_v4  ;;  %v2912_v52 = vpop.f32.mrb[33].mxu0 }
 0x2a1   : > { %4671 = vrsqrt.f32 %v2354_v1  ;;  %v2104_v1 = vmul.f32 %v6153_v46, %v6153_v46  ;;  %v4300_v53 = vpop.f32.mrb[34].mxu0 }
 0x2a2   : > { %1731 = vadd.xlane.f32.xlu1 %v6149_v19 }
 0x2a3   : > { %v4666_v49 = vpop.eup %4665  ;;  %v1921_v11 = vpop.xlane.xlu1 %1920  ;;  %1729 = vadd.xlane.f32.xlu0 %v6144_v10  ;;  %v6183_v10 = vmul.f32 0.0078125, %v1658_v40 }
 0x2a4   : > { %v2484_v61 = vmul.f32 %v4666_v49, %v2292_v14  ;;  %v2041_v3 = vmul.f32 0.0078125, %v1921_v11  ;;  %v1919_v44 = vpop.xlane.xlu0 %1918 }
 0x2a5   : > { %v2040_v14 = vmul.f32 0.0078125, %v1919_v44  ;;  %v2291_v44 = vsub.f32 %v5770_v59, %v6121_v20  ;;  %v2102_v59 = vmul.f32 %v6183_v10, %v6183_v10 }
 0x2a6   : > { %v4668_v49 = vpop.eup %4667  ;;  %v2554_v11 = vmul.f32 %v6161_v0, %v2484_v61  ;;  %v2169_v30 = vsub.f32 %v2041_v3, %v2105_v28  ;;  %1992 = vadd.xlane.f32.xlu1 %v1885_v50  ;;  %v2103_v50 = vmul.f32 %v6172_v62, %v6172_v62 }
 0x2a7   : > { %v2485_v40 = vmul.f32 %v4668_v49, %v2293_v56  ;;  %v2168_v38 = vsub.f32 %v2040_v14, %v2104_v1  ;;  %v1917_v39 = vpop.xlane.xlu1 %1916  ;;  %1990 = vadd.xlane.f32.xlu0 %v1884_v15  ;;  %v2915_v15 = vpop.f32.mrb[35].mxu0  ;;  %v3818_v49 = vpack.c.bf16 %v4300_v53, %v4299_v21  ;;  %v7318_v21 = vld [vmem:[#allocation7_spill] sm:$0xff] }
 0x2a8   : > { %v2624_v61 = vadd.f32 %v6179_v6, %v2554_v11  ;;  %v2233_v28 = vmax.f32 %v2169_v30, 0.0  ;;  %v2039_v3 = vmul.f32 0.0078125, %v1917_v39  ;;  %v1915_v19 = vpop.xlane.xlu0 %1914  ;;  %v4794_v30 = vld [vmem:[%s4883_s21 + $0x10] sm:$0xff] }
 0x2a9   : > { %v2555_v58 = vmul.f32 %v6161_v0, %v2485_v40  ;;  %v2232_v20 = vmax.f32 %v2168_v38, 0.0  ;;  %v2038_v37 = vmul.f32 0.0078125, %v1915_v19  ;;  %v6219_v38 = vadd.f32 %v5967_v41, %v5751_v4  ;;  %3970 = vst [vmem:[%s6215_s28 + $0x8] sm:$0xff] %v3818_v49   ;;  %v4303_v41 = vpop.f32.mrb[36].mxu0 }
 0x2aa   : > { %v4670_v56 = vpop.eup %4669  ;;  %v2688_v39 = vadd.f32 %v4794_v30, %v2624_v61  ;;  %v2361_v1 = vadd.f32 1e-05, %v2233_v28  ;;  %v2167_v14 = vsub.f32 %v2039_v3, %v2103_v50  ;;  %1988 = vadd.xlane.f32.xlu1 %v1883_v22  ;;  %v6229_v3 = vadd.f32 %v5751_v4, %v5963_v55  ;;  %v7319_v30 = vld [vmem:[#allocation3_spill] sm:$0xff] }
 0x2ab   : > { %v4672_v11 = vpop.eup %4671  ;;  %v2625_v45 = vadd.f32 %v6179_v6, %v2555_v58  ;;  %v2483_v33 = vmul.f32 %v4670_v56, %v2291_v44  ;;  %v2360_v40 = vadd.f32 1e-05, %v2232_v20  ;;  %v2166_v36 = vsub.f32 %v2038_v37, %v2102_v59  ;;  %v1672_v54 = vpop.xlane.xlu1 %1671  ;;  %1986 = vadd.xlane.f32.xlu0 %v1882_v35 }
 0x2ac   : > { %2752 = vst [vmem:[%s6204_s25 + $0x10] sm:$0xff] %v2688_v39  ;;  %v2482_v53 = vmul.f32 %v4672_v11, %v2290_v26  ;;  %4673 = vrsqrt.f32 %v2361_v1  ;;  %v2231_v19 = vmax.f32 %v2167_v14, 0.0  ;;  %v1670_v22 = vpop.xlane.xlu0 %1669  ;;  %v6236_v59 = vadd.f32 %v5751_v4, %v5971_v25 }
 0x2ad   : > { %v2689_v44 = vadd.f32 %v2625_v45, %v7318_v21  ;;  %v2553_v35 = vmul.f32 %v6161_v0, %v2483_v33  ;;  %4675 = vrsqrt.f32 %v2360_v40  ;;  %v2230_v61 = vmax.f32 %v2166_v36, 0.0  ;;  %v2928_v36 = vpop.f32.mrb[37].mxu0 }
 0x2ae   : > { %v2552_v50 = vmul.f32 %v6161_v0, %v2482_v53  ;;  %v2359_v28 = vadd.f32 1e-05, %v2231_v19  ;;  %1743 = vadd.xlane.f32.xlu1 %v6219_v38  ;;  %v3813_v33 = vpack.c.bf16 %v2915_v15, %v2912_v52  ;;  %v6239_v55 = vmul.f32 0.0078125, %v1672_v54  ;;  %v4304_v56 = vpop.f32.mrb[38].mxu0  ;;  %v7320_v15 = vld [vmem:[#allocation2_spill] sm:$0xff] }
 0x2af   : > { %2753 = vst [vmem:[%s6204_s25 + $0x18] sm:$0xff] %v2689_v44  ;;  %v2623_v26 = vadd.f32 %v6179_v6, %v2553_v35  ;;  %v2358_v58 = vadd.f32 1e-05, %v2230_v61  ;;  %v1668_v45 = vpop.xlane.xlu1 %1667  ;;  %1741 = vadd.xlane.f32.xlu0 %v6187_v13  ;;  %v6242_v1 = vmul.f32 0.0078125, %v1670_v22  ;;  %v2931_v52 = vpop.f32.mrb[39].mxu0  ;;  %v1888_v25 = vmul.f32 %v6187_v13, %v6187_v13 }
 0x2b0   : > { %v2622_v20 = vadd.f32 %v6179_v6, %v2552_v50  ;;  %4677 = vrsqrt.f32 %v2359_v28  ;;  %v1666_v37 = vpop.xlane.xlu0 %1665  ;;  %3814 = vst [vmem:[%s6215_s28] sm:$0xff] %v3813_v33   ;;  %v1889_v49 = vmul.f32 %v6219_v38, %v6219_v38  ;;  %v1886_v11 = vmul.f32 %v6229_v3, %v6229_v3  ;;  %v4307_v33 = vpop.f32.mrb[40].mxu0 }
 0x2b1   : > { %v2687_v39 = vadd.f32 %v2623_v26, %v7319_v30  ;;  %4679 = vrsqrt.f32 %v2358_v58  ;;  %v3828_v40 = vpack.c.bf16 %v4304_v56, %v4303_v41  ;;  %v3823_v53 = vpack.c.bf16 %v2931_v52, %v2928_v36 }
 0x2b2   : > { %v2686_v14 = vadd.f32 %v2622_v20, %v7320_v15  ;;  %1739 = vadd.xlane.f32.xlu1 %v6236_v59  ;;  %v2109_v19 = vmul.f32 %v6239_v55, %v6239_v55  ;;  %v6258_v22 = vmul.f32 0.0078125, %v1668_v45  ;;  %v1887_v35 = vmul.f32 %v6236_v59, %v6236_v59 }
 0x2b3   : > { %2751 = vst [vmem:[%s6204_s25 + $0x8] sm:$0xff] %v2687_v39  ;;  %v1929_v54 = vpop.xlane.xlu1 %1928  ;;  %1737 = vadd.xlane.f32.xlu0 %v6229_v3  ;;  %v2297_v61 = vsub.f32 %v5782_v34, %v6151_v18  ;;  %v2108_v50 = vmul.f32 %v6242_v1, %v6242_v1  ;;  %v6266_v28 = vmul.f32 0.0078125, %v1666_v37  ;;  %3972 = vst [vmem:[%s6215_s28 + $0x18] sm:$0xff] %v3828_v40   ;;  %v2944_v39 = vpop.f32.mrb[41].mxu0 }
 0x2b4   : > { %2750 = vst [vmem:[%s6204_s25] sm:$0xff] %v2686_v14  ;;  %v2045_v21 = vmul.f32 0.0078125, %v1929_v54  ;;  %v1927_v44 = vpop.xlane.xlu0 %1926  ;;  %3971 = vst [vmem:[%s6215_s28 + $0x10] sm:$0xff] %v3823_v53   ;;  %v6272_v58 = vadd.f32 %v5982_v63, %v5751_v4  ;;  %v6276_v45 = vadd.f32 %v5991_v12, %v5751_v4  ;;  %v2296_v34 = vsub.f32 %v5785_v32, %v6153_v46  ;;  %v4308_v14 = vpop.f32.mrb[42].mxu0 }
 0x2b5   : > { %v2044_v41 = vmul.f32 0.0078125, %v1927_v44  ;;  %v2295_v20 = vsub.f32 %v5792_v5, %v6172_v62  ;;  %v2294_v37 = vsub.f32 %v5795_v7, %v6183_v10  ;;  %v2107_v52 = vmul.f32 %v6258_v22, %v6258_v22  ;;  %v2947_v10 = vpop.f32.mrb[43].mxu0 }
 0x2b6   : > { %v4674_v26 = vpop.eup %4673  ;;  %v2173_v18 = vsub.f32 %v2045_v21, %v2109_v19  ;;  %2000 = vadd.xlane.f32.xlu1 %v1889_v49  ;;  %v2106_v5 = vmul.f32 %v6266_v28, %v6266_v28  ;;  %v3838_v19 = vpack.c.bf16 %v4308_v14, %v4307_v33 }
 0x2b7   : > { %v4676_v36 = vpop.eup %4675  ;;  %v2489_v56 = vmul.f32 %v4674_v26, %v2297_v61  ;;  %v2172_v63 = vsub.f32 %v2044_v41, %v2108_v50  ;;  %v1925_v30 = vpop.xlane.xlu1 %1924  ;;  %1998 = vadd.xlane.f32.xlu0 %v1888_v25 }
 0x2b8   : > { %v2488_v12 = vmul.f32 %v4676_v36, %v2296_v34  ;;  %v2237_v32 = vmax.f32 %v2173_v18, 0.0  ;;  %v2043_v46 = vmul.f32 0.0078125, %v1925_v30  ;;  %v1923_v15 = vpop.xlane.xlu0 %1922  ;;  %3974 = vst [vmem:[%s6215_s28 + $0x28] sm:$0xff] %v3838_v19  }
 0x2b9   : > { %v2559_v54 = vmul.f32 %v6161_v0, %v2489_v56  ;;  %v2236_v62 = vmax.f32 %v2172_v63, 0.0  ;;  %v2042_v7 = vmul.f32 0.0078125, %v1923_v15  ;;  %v7321_v63 = vld [vmem:[#allocation19_spill] sm:$0xff] }
 0x2ba   : > { %v4678_v49 = vpop.eup %4677  ;;  %v2558_v25 = vmul.f32 %v6161_v0, %v2488_v12  ;;  %v2365_v40 = vadd.f32 1e-05, %v2237_v32  ;;  %v2171_v53 = vsub.f32 %v2043_v46, %v2107_v52  ;;  %1996 = vadd.xlane.f32.xlu1 %v1887_v35  ;;  %v4311_v32 = vpop.f32.mrb[44].mxu0 }
 0x2bb   : > { %v4680_v21 = vpop.eup %4679  ;;  %v2629_v44 = vadd.f32 %v6179_v6, %v2559_v54  ;;  %v2487_v61 = vmul.f32 %v4678_v49, %v2295_v20  ;;  %v2364_v50 = vadd.f32 1e-05, %v2236_v62  ;;  %v2170_v41 = vsub.f32 %v2042_v7, %v2106_v5  ;;  %v1680_v26 = vpop.xlane.xlu1 %1679  ;;  %1994 = vadd.xlane.f32.xlu0 %v1886_v11  ;;  %v7322_v20 = vld [vmem:[#allocation18_spill] sm:$0xff] }
 0x2bc   : > { %v2628_v34 = vadd.f32 %v6179_v6, %v2558_v25  ;;  %v2486_v18 = vmul.f32 %v4680_v21, %v2294_v37  ;;  %4681 = vrsqrt.f32 %v2365_v40  ;;  %v2235_v36 = vmax.f32 %v2171_v53, 0.0  ;;  %v1678_v56 = vpop.xlane.xlu0 %1677  ;;  %v2960_v5 = vpop.f32.mrb[45].mxu0  ;;  %v7323_v25 = vld [vmem:[#allocation9_spill] sm:$0xff] }
 0x2bd   : > { %v2693_v30 = vadd.f32 %v2629_v44, %v7321_v63  ;;  %v2557_v35 = vmul.f32 %v6161_v0, %v2487_v61  ;;  %4683 = vrsqrt.f32 %v2364_v50  ;;  %v2234_v33 = vmax.f32 %v2170_v41, 0.0  ;;  %v4312_v49 = vpop.f32.mrb[46].mxu0 }
 0x2be   : > { %v2692_v12 = vadd.f32 %v2628_v34, %v7322_v20  ;;  %v2556_v52 = vmul.f32 %v6161_v0, %v2486_v18  ;;  %v2363_v11 = vadd.f32 1e-05, %v2235_v36  ;;  %1751 = vadd.xlane.f32.xlu1 %v6276_v45  ;;  %v6300_v37 = vadd.f32 %v5751_v4, %v5985_v23 }
 0x2bf   : > { %2757 = vst [vmem:[%s6204_s25 + $0x38] sm:$0xff] %v2693_v30  ;;  %v2627_v46 = vadd.f32 %v6179_v6, %v2557_v35  ;;  %v2362_v15 = vadd.f32 1e-05, %v2234_v33  ;;  %v1676_v14 = vpop.xlane.xlu1 %1675  ;;  %1749 = vadd.xlane.f32.xlu0 %v6272_v58  ;;  %v3833_v54 = vpack.c.bf16 %v2947_v10, %v2944_v39  ;;  %v6307_v62 = vadd.f32 %v5751_v4, %v5997_v48  ;;  %v2963_v39 = vpop.f32.mrb[47].mxu0  ;;  %v7324_v10 = vld [vmem:[#allocation8_spill] sm:$0xff] }
 0x2c0   : > { %2756 = vst [vmem:[%s6204_s25 + $0x30] sm:$0xff] %v2692_v12  ;;  %v2626_v7 = vadd.f32 %v6179_v6, %v2556_v52  ;;  %4685 = vrsqrt.f32 %v2363_v11  ;;  %v1674_v23 = vpop.xlane.xlu0 %1673  ;;  %v6312_v53 = vmul.f32 0.0078125, %v1680_v26  ;;  %v6314_v19 = vmul.f32 0.0078125, %v1678_v56  ;;  %v4315_v11 = vpop.f32.mrb[48].mxu0 }
 0x2c1   : > { %v2691_v40 = vadd.f32 %v2627_v46, %v7323_v25  ;;  %4687 = vrsqrt.f32 %v2362_v15  ;;  %3973 = vst [vmem:[%s6215_s28 + $0x20] sm:$0xff] %v3833_v54   ;;  %v3848_v21 = vpack.c.bf16 %v4312_v49, %v4311_v32  ;;  %v1892_v61 = vmul.f32 %v6272_v58, %v6272_v58 }
 0x2c2   : > { %v2690_v48 = vadd.f32 %v2626_v7, %v7324_v10  ;;  %1747 = vadd.xlane.f32.xlu1 %v6307_v62  ;;  %v1890_v50 = vmul.f32 %v6300_v37, %v6300_v37  ;;  %v3843_v41 = vpack.c.bf16 %v2963_v39, %v2960_v5  ;;  %v2301_v26 = vsub.f32 %v5810_v31, %v6239_v55 }
 0x2c3   : > { %2755 = vst [vmem:[%s6204_s25 + $0x28] sm:$0xff] %v2691_v40  ;;  %v1937_v44 = vpop.xlane.xlu1 %1936  ;;  %1745 = vadd.xlane.f32.xlu0 %v6300_v37  ;;  %v6328_v34 = vmul.f32 0.0078125, %v1676_v14  ;;  %v6330_v18 = vmul.f32 0.0078125, %v1674_v23  ;;  %v1893_v56 = vmul.f32 %v6276_v45, %v6276_v45  ;;  %3976 = vst [vmem:[%s6215_s28 + $0x38] sm:$0xff] %v3848_v21   ;;  %v2113_v63 = vmul.f32 %v6312_v53, %v6312_v53 }
 0x2c4   : > { %2754 = vst [vmem:[%s6204_s25 + $0x20] sm:$0xff] %v2690_v48  ;;  %v1935_v36 = vpop.xlane.xlu0 %1934  ;;  %v2112_v30 = vmul.f32 %v6314_v19, %v6314_v19  ;;  %v2049_v35 = vmul.f32 0.0078125, %v1937_v44  ;;  %3975 = vst [vmem:[%s6215_s28 + $0x30] sm:$0xff] %v3843_v41   ;;  %v6342_v31 = vadd.f32 %v6011_v42, %v5751_v4  ;;  %v2300_v55 = vsub.f32 %v5813_v57, %v6242_v1  ;;  %v2976_v42 = vpop.f32.mrb[49].mxu0 }
 0x2c5   : > { %v2048_v33 = vmul.f32 0.0078125, %v1935_v36  ;;  %v2299_v12 = vsub.f32 %v5820_v16, %v6258_v22  ;;  %v1891_v52 = vmul.f32 %v6307_v62, %v6307_v62  ;;  %v2298_v46 = vsub.f32 %v5823_v8, %v6266_v28  ;;  %v4316_v7 = vpop.f32.mrb[50].mxu0 }
 0x2c6   : > { %v4682_v20 = vpop.eup %4681  ;;  %2008 = vadd.xlane.f32.xlu1 %v1893_v56  ;;  %v2177_v14 = vsub.f32 %v2049_v35, %v2113_v63  ;;  %v2111_v57 = vmul.f32 %v6328_v34, %v6328_v34  ;;  %v2110_v16 = vmul.f32 %v6330_v18, %v6330_v18  ;;  %v2979_v25 = vpop.f32.mrb[51].mxu0  ;;  %v3858_v48 = vpack.c.bf16 %v4316_v7, %v4315_v11 }
 0x2c7   : > { %v4684_v32 = vpop.eup %4683  ;;  %v2493_v15 = vmul.f32 %v4682_v20, %v2301_v26  ;;  %v2176_v54 = vsub.f32 %v2048_v33, %v2112_v30  ;;  %v1933_v4 = vpop.xlane.xlu1 %1932  ;;  %2006 = vadd.xlane.f32.xlu0 %v1892_v61  ;;  %v3853_v21 = vpack.c.bf16 %v2979_v25, %v2976_v42 }
 0x2c8   : > { %v2492_v5 = vmul.f32 %v4684_v32, %v2300_v55  ;;  %v2047_v1 = vmul.f32 0.0078125, %v1933_v4  ;;  %v1931_v22 = vpop.xlane.xlu0 %1930  ;;  %v2241_v49 = vmax.f32 %v2177_v14, 0.0  ;;  %3978 = vst [vmem:[%s6215_s28 + $0x48] sm:$0xff] %v3858_v48   ;;  %v6365_v55 = vld [vmem:[%s7015_s4] ss:$0 sm:$0xff] }
 0x2c9   : > { %v2563_v23 = vmul.f32 %v6161_v0, %v2493_v15  ;;  %v2240_v8 = vmax.f32 %v2176_v54, 0.0  ;;  %v2046_v28 = vmul.f32 0.0078125, %v1931_v22  ;;  %3977 = vst [vmem:[%s6215_s28 + $0x40] sm:$0xff] %v3853_v21   ;;  %v7326_v32 = vld [vmem:[#allocation30_spill] sm:$0xff]  ;;  %v4319_v54 = vpop.f32.mrb[52].mxu0  ;;  %v6378_v4 = vadd.f32 %v6365_v55, %v6007_v60 }
 0x2ca   : > { %v4686_v40 = vpop.eup %4685  ;;  %v2562_v39 = vmul.f32 %v6161_v0, %v2492_v5  ;;  %v2175_v10 = vsub.f32 %v2047_v1, %v2111_v57  ;;  %2004 = vadd.xlane.f32.xlu1 %v1891_v52  ;;  %v2369_v26 = vadd.f32 1e-05, %v2241_v49  ;;  %v7325_v52 = vld [vmem:[#allocation31_spill] sm:$0xff]  ;;  %v6387_v1 = vadd.f32 %v6365_v55, %v6015_v9 }
 0x2cb   : > { %v4688_v44 = vpop.eup %4687  ;;  %v2633_v61 = vadd.f32 %v6179_v6, %v2563_v23  ;;  %v2491_v41 = vmul.f32 %v4686_v40, %v2299_v12  ;;  %v2368_v36 = vadd.f32 1e-05, %v2240_v8  ;;  %v1688_v56 = vpop.xlane.xlu1 %1687  ;;  %2002 = vadd.xlane.f32.xlu0 %v1890_v50  ;;  %v2174_v33 = vsub.f32 %v2046_v28, %v2110_v16  ;;  %v7327_v23 = vld [vmem:[#allocation21_spill] sm:$0xff]  ;;  %v7328_v40 = vld [vmem:[#allocation20_spill] sm:$0xff] }
 0x2cc   : > { %v2632_v63 = vadd.f32 %v6179_v6, %v2562_v39  ;;  %v2490_v30 = vmul.f32 %v4688_v44, %v2298_v46  ;;  %v2239_v35 = vmax.f32 %v2175_v10, 0.0  ;;  %v1686_v20 = vpop.xlane.xlu0 %1685  ;;  %v6369_v12 = vadd.f32 %v6365_v55, %v6005_v24  ;;  %v2992_v16 = vpop.f32.mrb[53].mxu0 }
 0x2cd   : > { %v2697_v50 = vadd.f32 %v2633_v61, %v7325_v52  ;;  %v2561_v11 = vmul.f32 %v6161_v0, %v2491_v41  ;;  %4689 = vrsqrt.f32 %v2369_v26  ;;  %v2238_v42 = vmax.f32 %v2174_v33, 0.0  ;;  %v4320_v7 = vpop.f32.mrb[54].mxu0 }
 0x2ce   : > { %v2696_v46 = vadd.f32 %v2632_v63, %v7326_v32  ;;  %v2560_v15 = vmul.f32 %v6161_v0, %v2490_v30  ;;  %4691 = vrsqrt.f32 %v2368_v36  ;;  %v2367_v14 = vadd.f32 1e-05, %v2239_v35  ;;  %1759 = vadd.xlane.f32.xlu1 %v6342_v31  ;;  %v2995_v25 = vpop.f32.mrb[55].mxu0 }
 0x2cf   : > { %2761 = vst [vmem:[%s6204_s25 + $0x58] sm:$0xff] %v2697_v50  ;;  %v2631_v24 = vadd.f32 %v6179_v6, %v2561_v11  ;;  %v6382_v5 = vmul.f32 0.0078125, %v1688_v56  ;;  %v1684_v57 = vpop.xlane.xlu1 %1683  ;;  %1757 = vadd.xlane.f32.xlu0 %v6369_v12  ;;  %v2366_v8 = vadd.f32 1e-05, %v2238_v42  ;;  %v6392_v28 = vmul.f32 0.0078125, %v1686_v20  ;;  %v4323_v32 = vpop.f32.mrb[56].mxu0 }
 0x2d0   : > { %2760 = vst [vmem:[%s6204_s25 + $0x50] sm:$0xff] %v2696_v46  ;;  %v2630_v22 = vadd.f32 %v6179_v6, %v2560_v15  ;;  %4693 = vrsqrt.f32 %v2367_v14  ;;  %v1682_v60 = vpop.xlane.xlu0 %1681  ;;  %v1896_v9 = vmul.f32 %v6369_v12, %v6369_v12  ;;  %v1897_v21 = vmul.f32 %v6342_v31, %v6342_v31 }
 0x2d1   : > { %v2695_v49 = vadd.f32 %v2631_v24, %v7327_v23  ;;  %4695 = vrsqrt.f32 %v2366_v8  ;;  %v2117_v10 = vmul.f32 %v6382_v5, %v6382_v5  ;;  %v1894_v44 = vmul.f32 %v6378_v4, %v6378_v4 }
 0x2d2   : > { %v2694_v39 = vadd.f32 %v2630_v22, %v7328_v40  ;;  %1755 = vadd.xlane.f32.xlu1 %v6387_v1  ;;  %v6407_v61 = vmul.f32 0.0078125, %v1684_v57  ;;  %v3868_v36 = vpack.c.bf16 %v4320_v7, %v4319_v54  ;;  %v3863_v56 = vpack.c.bf16 %v2995_v25, %v2992_v16 }
 0x2d3   : > { %2759 = vst [vmem:[%s6204_s25 + $0x48] sm:$0xff] %v2695_v49  ;;  %v1945_v48 = vpop.xlane.xlu1 %1944  ;;  %1753 = vadd.xlane.f32.xlu0 %v6378_v4  ;;  %v2116_v63 = vmul.f32 %v6392_v28, %v6392_v28  ;;  %v6411_v30 = vmul.f32 0.0078125, %v1682_v60  ;;  %v1895_v33 = vmul.f32 %v6387_v1, %v6387_v1  ;;  %v6417_v20 = vadd.f32 %v6365_v55, %v6026_v27 }
 0x2d4   : > { %2758 = vst [vmem:[%s6204_s25 + $0x40] sm:$0xff] %v2694_v39  ;;  %v2053_v41 = vmul.f32 0.0078125, %v1945_v48  ;;  %v1943_v26 = vpop.xlane.xlu0 %1942  ;;  %v6421_v52 = vadd.f32 %v6365_v55, %v6029_v51  ;;  %v2305_v50 = vsub.f32 %v5844_v29, %v6312_v53  ;;  %3980 = vst [vmem:[%s6215_s28 + $0x58] sm:$0xff] %v3868_v36   ;;  %v6429_v15 = vadd.f32 %v6365_v55, %v6035_v47  ;;  %v6435_v29 = vpop.f32.mrb[57].mxu0 }
 0x2d5   : > { %v2052_v35 = vmul.f32 0.0078125, %v1943_v26  ;;  %3979 = vst [vmem:[%s6215_s28 + $0x50] sm:$0xff] %v3863_v56   ;;  %v2304_v27 = vsub.f32 %v5847_v43, %v6314_v19  ;;  %v2303_v51 = vsub.f32 %v5858_v2, %v6328_v34  ;;  %v2115_v42 = vmul.f32 %v6407_v61, %v6407_v61  ;;  %v4324_v22 = vpop.f32.mrb[58].mxu0 }
 0x2d6   : > { %v2181_v11 = vsub.f32 %v2053_v41, %v2117_v10  ;;  %2016 = vadd.xlane.f32.xlu1 %v1897_v21  ;;  %v2114_v43 = vmul.f32 %v6411_v30, %v6411_v30  ;;  %v3011_v34 = vpop.f32.mrb[59].mxu0  ;;  %v3878_v25 = vpack.c.bf16 %v4324_v22, %v4323_v32  ;;  %v2302_v21 = vsub.f32 %v5863_v17, %v6330_v18  ;;  %v7332_v22 = vld [vmem:[#allocation33_spill] sm:$0xff] }
 0x2d7   : > { %v4690_v46 = vpop.eup %4689  ;;  %v2180_v14 = vsub.f32 %v2052_v35, %v2116_v63  ;;  %v1941_v54 = vpop.xlane.xlu1 %1940  ;;  %2014 = vadd.xlane.f32.xlu0 %v1896_v9 }
 0x2d8   : > { %v4692_v53 = vpop.eup %4691  ;;  %v2497_v24 = vmul.f32 %v4690_v46, %v2305_v50  ;;  %v2245_v57 = vmax.f32 %v2181_v11, 0.0  ;;  %v2051_v16 = vmul.f32 0.0078125, %v1941_v54  ;;  %v1939_v47 = vpop.xlane.xlu0 %1938  ;;  %3982 = vst [vmem:[%s6215_s28 + $0x68] sm:$0xff] %v3878_v25   ;;  %v7329_v50 = vld [vmem:[#allocation62_spill] sm:$0xff]  ;;  %v7330_v11 = vld [vmem:[#allocation43_spill] sm:$0xff] }
 0x2d9   : > { %v2496_v60 = vmul.f32 %v4692_v53, %v2304_v27  ;;  %v2244_v19 = vmax.f32 %v2180_v14, 0.0  ;;  %v2050_v2 = vmul.f32 0.0078125, %v1939_v47  ;;  %v4327_v46 = vpop.f32.mrb[60].mxu0  ;;  %v7331_v27 = vld [vmem:[#allocation42_spill] sm:$0xff] }
 0x2da   : > { %v4694_v7 = vpop.eup %4693  ;;  %v2567_v23 = vmul.f32 %v6161_v0, %v2497_v24  ;;  %v2373_v49 = vadd.f32 1e-05, %v2245_v57  ;;  %v2179_v8 = vsub.f32 %v2051_v16, %v2115_v42  ;;  %2012 = vadd.xlane.f32.xlu1 %v1895_v33  ;;  %v3024_v42 = vpop.f32.mrb[61].mxu0 }
 0x2db   : > { %v2566_v40 = vmul.f32 %v6161_v0, %v2496_v60  ;;  %v2495_v39 = vmul.f32 %v4694_v7, %v2303_v51  ;;  %v2372_v9 = vadd.f32 1e-05, %v2244_v19  ;;  %v2178_v10 = vsub.f32 %v2050_v2, %v2114_v43  ;;  %v1696_v48 = vpop.xlane.xlu1 %1695  ;;  %2010 = vadd.xlane.f32.xlu0 %v1894_v44  ;;  %v4696_v56 = vpop.eup %4695 }
 0x2dc   : > { %v2637_v41 = vadd.f32 %v6179_v6, %v2567_v23  ;;  %4697 = vrsqrt.f32 %v2373_v49  ;;  %v2243_v26 = vmax.f32 %v2179_v8, 0.0  ;;  %v1694_v36 = vpop.xlane.xlu0 %1693  ;;  %v6451_v44 = vadd.f32 %v6365_v55, %v7329_v50  ;;  %v4328_v47 = vpop.f32.mrb[62].mxu0  ;;  %v7335_v50 = vld [vmem:[#allocation63_spill] sm:$0xff] }
 0x2dd   : > { %v2636_v63 = vadd.f32 %v6179_v6, %v2566_v40  ;;  %v2565_v35 = vmul.f32 %v6161_v0, %v2495_v39  ;;  %4699 = vrsqrt.f32 %v2372_v9  ;;  %v2242_v33 = vmax.f32 %v2178_v10, 0.0  ;;  %v3027_v2 = vpop.f32.mrb[63].mxu0  ;;  %v7333_v39 = vld [vmem:[#allocation32_spill] sm:$0xff] }
 0x2de   : > { %v2701_v17 = vadd.f32 %v2637_v41, %v7330_v11  ;;  %v2494_v18 = vmul.f32 %v4696_v56, %v2302_v21  ;;  %v2371_v32 = vadd.f32 1e-05, %v2243_v26  ;;  %1767 = vadd.xlane.f32.xlu1 %v6429_v15  ;;  %v6457_v53 = vmul.f32 0.0078125, %v1696_v48  ;;  %v7334_v26 = vld [vmem:[#allocation96_spill] sm:$0xff] }
 0x2df   : > { %v2700_v51 = vadd.f32 %v2636_v63, %v7331_v27  ;;  %v2635_v14 = vadd.f32 %v6179_v6, %v2565_v35  ;;  %v2370_v54 = vadd.f32 1e-05, %v2242_v33  ;;  %v1692_v24 = vpop.xlane.xlu1 %1691  ;;  %1765 = vadd.xlane.f32.xlu0 %v6417_v20  ;;  %v6464_v43 = vmul.f32 0.0078125, %v1694_v36  ;;  %v4331_v27 = vpop.f32.mrb[64].mxu0 }
 0x2e0   : > { %2765 = vst [vmem:[%s6204_s25 + $0x78] sm:$0xff] %v2701_v17  ;;  %v2564_v57 = vmul.f32 %v6161_v0, %v2494_v18  ;;  %4701 = vrsqrt.f32 %v2371_v32  ;;  %v1690_v16 = vpop.xlane.xlu0 %1689  ;;  %v3873_v19 = vpack.c.bf16 %v3011_v34, %v6435_v29  ;;  %v1900_v23 = vmul.f32 %v6417_v20, %v6417_v20  ;;  %v7336_v17 = vld [vmem:[#allocation75_spill] sm:$0xff]  ;;  %v7337_v32 = vld [vmem:[#allocation97_spill] sm:$0xff] }
 0x2e1   : > { %2764 = vst [vmem:[%s6204_s25 + $0x70] sm:$0xff] %v2700_v51  ;;  %v2699_v60 = vadd.f32 %v2635_v14, %v7332_v22  ;;  %4703 = vrsqrt.f32 %v2370_v54  ;;  %v1898_v49 = vmul.f32 %v6421_v52, %v6421_v52  ;;  %v2121_v8 = vmul.f32 %v6457_v53, %v6457_v53  ;;  %v7338_v14 = vld [vmem:[#allocation98_spill] sm:$0xff]  ;;  %v3040_v22 = vpop.f32.mrb[65].mxu0 }
 0x2e2   : > { %v2634_v7 = vadd.f32 %v6179_v6, %v2564_v57  ;;  %1763 = vadd.xlane.f32.xlu1 %v6451_v44  ;;  %v1901_v29 = vmul.f32 %v6429_v15, %v6429_v15  ;;  %v1899_v34 = vmul.f32 %v6451_v44, %v6451_v44  ;;  %3981 = vst [vmem:[%s6215_s28 + $0x60] sm:$0xff] %v3873_v19   ;;  %v6483_v10 = vmul.f32 0.0078125, %v1692_v24  ;;  %v7339_v24 = vld [vmem:[#allocation99_spill] sm:$0xff] }
 0x2e3   : > { %2763 = vst [vmem:[%s6204_s25 + $0x68] sm:$0xff] %v2699_v60  ;;  %v1953_v25 = vpop.xlane.xlu1 %1952  ;;  %1761 = vadd.xlane.f32.xlu0 %v6421_v52  ;;  %v3888_v40 = vpack.c.bf16 %v4328_v47, %v4327_v46  ;;  %v3883_v41 = vpack.c.bf16 %v3027_v2, %v3024_v42  ;;  %v2309_v36 = vsub.f32 %v7334_v26, %v6382_v5  ;;  %v6489_v63 = vmul.f32 0.0078125, %v1690_v16 }
 0x2e4   : > { %v2698_v9 = vadd.f32 %v2634_v7, %v7333_v39  ;;  %v2057_v48 = vmul.f32 0.0078125, %v1953_v25  ;;  %v1951_v21 = vpop.xlane.xlu0 %1950  ;;  %v2120_v56 = vmul.f32 %v6464_v43, %v6464_v43  ;;  %v6495_v11 = vadd.f32 %v6365_v55, %v7335_v50 }
 0x2e5   : > { %v2056_v35 = vmul.f32 0.0078125, %v1951_v21  ;;  %3984 = vst [vmem:[%s6215_s28 + $0x78] sm:$0xff] %v3888_v40   ;;  %v6499_v18 = vadd.f32 %v6365_v55, %v7336_v17  ;;  %v2308_v5 = vsub.f32 %v7337_v32, %v6392_v28  ;;  %3983 = vst [vmem:[%s6215_s28 + $0x70] sm:$0xff] %v3883_v41   ;;  %v2307_v54 = vsub.f32 %v7338_v14, %v6407_v61  ;;  %v7341_v14 = vld [vmem:[#allocation54_spill] sm:$0xff] }
 0x2e6   : > { %v4698_v33 = vpop.eup %4697  ;;  %2762 = vst [vmem:[%s6204_s25 + $0x60] sm:$0xff] %v2698_v9  ;;  %v2185_v46 = vsub.f32 %v2057_v48, %v2121_v8  ;;  %2024 = vadd.xlane.f32.xlu1 %v1901_v29  ;;  %v2306_v42 = vsub.f32 %v7339_v24, %v6411_v30  ;;  %v2119_v28 = vmul.f32 %v6483_v10, %v6483_v10  ;;  %v4332_v8 = vpop.f32.mrb[66].mxu0 }
 0x2e7   : > { %v4700_v51 = vpop.eup %4699  ;;  %v2501_v57 = vmul.f32 %v4698_v33, %v2309_v36  ;;  %v2184_v16 = vsub.f32 %v2056_v35, %v2120_v56  ;;  %v1949_v47 = vpop.xlane.xlu1 %1948  ;;  %2022 = vadd.xlane.f32.xlu0 %v1900_v23  ;;  %v2118_v61 = vmul.f32 %v6489_v63, %v6489_v63  ;;  %v3898_v21 = vpack.c.bf16 %v4332_v8, %v4331_v27 }
 0x2e8   : > { %v2500_v60 = vmul.f32 %v4700_v51, %v2308_v5  ;;  %v2249_v19 = vmax.f32 %v2185_v46, 0.0  ;;  %v2055_v2 = vmul.f32 0.0078125, %v1949_v47  ;;  %v1947_v7 = vpop.xlane.xlu0 %1946  ;;  %v3043_v40 = vpop.f32.mrb[67].mxu0  ;;  %v7340_v46 = vld [vmem:[#allocation55_spill] sm:$0xff] }
 0x2e9   : > { %v2571_v25 = vmul.f32 %v6161_v0, %v2501_v57  ;;  %v2248_v29 = vmax.f32 %v2184_v16, 0.0  ;;  %v2054_v30 = vmul.f32 0.0078125, %v1947_v7  ;;  %3986 = vst [vmem:[%s6215_s28 + $0x88] sm:$0xff] %v3898_v21   ;;  %v4335_v57 = vpop.f32.mrb[68].mxu0  ;;  %v7343_v7 = vld [vmem:[#allocation86_spill] sm:$0xff] }
 0x2ea   : > { %v4702_v39 = vpop.eup %4701  ;;  %v2570_v23 = vmul.f32 %v6161_v0, %v2500_v60  ;;  %v2377_v9 = vadd.f32 1e-05, %v2249_v19  ;;  %v2183_v48 = vsub.f32 %v2055_v2, %v2119_v28  ;;  %2020 = vadd.xlane.f32.xlu1 %v1899_v34  ;;  %v3893_v19 = vpack.c.bf16 %v3043_v40, %v3040_v22  ;;  %v3056_v2 = vpop.f32.mrb[69].mxu0  ;;  %v7345_v40 = vld [vmem:[#allocation44_spill] sm:$0xff] }
 0x2eb   : > { %v4704_v41 = vpop.eup %4703  ;;  %v2641_v26 = vadd.f32 %v6179_v6, %v2571_v25  ;;  %v2499_v36 = vmul.f32 %v4702_v39, %v2307_v54  ;;  %v2376_v56 = vadd.f32 1e-05, %v2248_v29  ;;  %v2182_v35 = vsub.f32 %v2054_v30, %v2118_v61  ;;  %v1704_v33 = vpop.xlane.xlu1 %1703  ;;  %2018 = vadd.xlane.f32.xlu0 %v1898_v49  ;;  %v7344_v29 = vld [vmem:[#allocation45_spill] sm:$0xff] }
 0x2ec   : > { %v2640_v50 = vadd.f32 %v6179_v6, %v2570_v23  ;;  %v2498_v17 = vmul.f32 %v4704_v41, %v2306_v42  ;;  %4705 = vrsqrt.f32 %v2377_v9  ;;  %v2247_v32 = vmax.f32 %v2183_v48, 0.0  ;;  %v1702_v5 = vpop.xlane.xlu0 %1701  ;;  %v7342_v42 = vld [vmem:[#allocation74_spill] sm:$0xff]  ;;  %v4336_v61 = vpop.f32.mrb[70].mxu0  ;;  %3985 = vst [vmem:[%s6215_s28 + $0x80] sm:$0xff] %v3893_v19   ;;  %v7346_v41 = vld [vmem:[#allocation100_spill] sm:$0xff] }
 0x2ed   : > { %v2705_v51 = vadd.f32 %v2641_v26, %v7340_v46  ;;  %v2569_v34 = vmul.f32 %v6161_v0, %v2499_v36  ;;  %4707 = vrsqrt.f32 %v2376_v56  ;;  %v2246_v27 = vmax.f32 %v2182_v35, 0.0  ;;  %v3059_v22 = vpop.f32.mrb[71].mxu0 }
 0x2ee   : > { %v2704_v54 = vadd.f32 %v2640_v50, %v7341_v14  ;;  %v2568_v24 = vmul.f32 %v6161_v0, %v2498_v17  ;;  %v2375_v49 = vadd.f32 1e-05, %v2247_v32  ;;  %1775 = vadd.xlane.f32.xlu1 %v6499_v18  ;;  %v6524_v16 = vadd.f32 %v6365_v55, %v7342_v42 }
 0x2ef   : > { %2769 = vst [vmem:[%s6204_s25 + $0x98] sm:$0xff] %v2705_v51  ;;  %v2639_v47 = vadd.f32 %v6179_v6, %v2569_v34  ;;  %v2374_v60 = vadd.f32 1e-05, %v2246_v27  ;;  %v1700_v28 = vpop.xlane.xlu1 %1699  ;;  %1773 = vadd.xlane.f32.xlu0 %v6495_v11  ;;  %v6531_v0 = vadd.f32 %v6365_v55, %v7343_v7  ;;  %v6536_v39 = vmul.f32 0.0078125, %v1704_v33  ;;  %v7348_v34 = vld [vmem:[#allocation102_spill] sm:$0xff] }
 0x2f0   : > { %2768 = vst [vmem:[%s6204_s25 + $0x90] sm:$0xff] %v2704_v54  ;;  %v2638_v8 = vadd.f32 %v6179_v6, %v2568_v24  ;;  %4709 = vrsqrt.f32 %v2375_v49  ;;  %v1698_v25 = vpop.xlane.xlu0 %1697  ;;  %v6538_v23 = vmul.f32 0.0078125, %v1702_v5  ;;  %v3908_v9 = vpack.c.bf16 %v4336_v61, %v4335_v57  ;;  %v4339_v24 = vpop.f32.mrb[72].mxu0  ;;  %v7349_v57 = vld [vmem:[#allocation103_spill] sm:$0xff] }
 0x2f1   : > { %v2703_v30 = vadd.f32 %v2639_v47, %v7344_v29  ;;  %4711 = vrsqrt.f32 %v2374_v60  ;;  %v1902_v48 = vmul.f32 %v6524_v16, %v6524_v16  ;;  %v3903_v21 = vpack.c.bf16 %v3059_v22, %v3056_v2 }
 0x2f2   : > { %v2702_v55 = vadd.f32 %v2638_v8, %v7345_v40  ;;  %1771 = vadd.xlane.f32.xlu1 %v6531_v0  ;;  %v2313_v26 = vsub.f32 %v7346_v41, %v6457_v53  ;;  %v6550_v36 = vmul.f32 0.0078125, %v1700_v28  ;;  %v6552_v56 = vmul.f32 0.0078125, %v1698_v25  ;;  %3988 = vst [vmem:[%s6215_s28 + $0x98] sm:$0xff] %v3908_v9   ;;  %v7347_v53 = vld [vmem:[#allocation101_spill] sm:$0xff] }
 0x2f3   : > { %2767 = vst [vmem:[%s6204_s25 + $0x88] sm:$0xff] %v2703_v30  ;;  %v1961_v6 = vpop.xlane.xlu1 %1960  ;;  %1769 = vadd.xlane.f32.xlu0 %v6524_v16  ;;  %v1903_v33 = vmul.f32 %v6531_v0, %v6531_v0  ;;  %v2125_v50 = vmul.f32 %v6536_v39, %v6536_v39  ;;  %v2124_v17 = vmul.f32 %v6538_v23, %v6538_v23  ;;  %3987 = vst [vmem:[%s6215_s28 + $0x90] sm:$0xff] %v3903_v21  }
 0x2f4   : > { %2766 = vst [vmem:[%s6204_s25 + $0x80] sm:$0xff] %v2702_v55  ;;  %v1959_v35 = vpop.xlane.xlu0 %1958  ;;  %v2061_v32 = vmul.f32 0.0078125, %v1961_v6  ;;  %v2312_v51 = vsub.f32 %v7347_v53, %v6464_v43  ;;  %v2311_v27 = vsub.f32 %v7348_v34, %v6483_v10  ;;  %v1905_v14 = vmul.f32 %v6499_v18, %v6499_v18  ;;  %v3072_v43 = vpop.f32.mrb[73].mxu0 }
 0x2f5   : > { %v2060_v5 = vmul.f32 0.0078125, %v1959_v35  ;;  %v1904_v54 = vmul.f32 %v6495_v11, %v6495_v11  ;;  %v2310_v42 = vsub.f32 %v7349_v57, %v6489_v63  ;;  %v2123_v10 = vmul.f32 %v6550_v36, %v6550_v36  ;;  %v4340_v61 = vpop.f32.mrb[74].mxu0  ;;  %v6579_v63 = vld [vmem:[%s7016_s5] ss:$0 sm:$0xff] }
 0x2f6   : > { %v4706_v46 = vpop.eup %4705  ;;  %2028 = vadd.xlane.f32.xlu1 %v1903_v33  ;;  %v2189_v60 = vsub.f32 %v2061_v32, %v2125_v50  ;;  %v2122_v7 = vmul.f32 %v6552_v56, %v6552_v56  ;;  %v3075_v55 = vpop.f32.mrb[75].mxu0  ;;  %v3918_v21 = vpack.c.bf16 %v4340_v61, %v4339_v24  ;;  %v6586_v35 = vld [vmem:[%s7017_s6] ss:$0 sm:$0xff]  ;;  %v7350_v24 = vld [vmem:[#allocation67_spill] sm:$0xff]  ;;  %v7352_v61 = vld [vmem:[#allocation57_spill] sm:$0xff] }
 0x2f7   : > { %v4708_v49 = vpop.eup %4707  ;;  %v2505_v47 = vmul.f32 %v4706_v46, %v2313_v26  ;;  %v2188_v28 = vsub.f32 %v2060_v5, %v2124_v17  ;;  %v1957_v19 = vpop.xlane.xlu1 %1956  ;;  %2026 = vadd.xlane.f32.xlu0 %v1902_v48  ;;  %v3913_v41 = vpack.c.bf16 %v3075_v55, %v3072_v43  ;;  %v7353_v55 = vld [vmem:[#allocation56_spill] sm:$0xff] }
 0x2f8   : > { %v2504_v2 = vmul.f32 %v4708_v49, %v2312_v51  ;;  %v2059_v8 = vmul.f32 0.0078125, %v1957_v19  ;;  %v1955_v25 = vpop.xlane.xlu0 %1954  ;;  %v2253_v30 = vmax.f32 %v2189_v60, 0.0  ;;  %3990 = vst [vmem:[%s6215_s28 + $0xa8] sm:$0xff] %v3918_v21  }
 0x2f9   : > { %v2575_v29 = vmul.f32 %v6579_v63, %v2505_v47  ;;  %v2252_v22 = vmax.f32 %v2188_v28, 0.0  ;;  %v2058_v40 = vmul.f32 0.0078125, %v1955_v25  ;;  %3989 = vst [vmem:[%s6215_s28 + $0xa0] sm:$0xff] %v3913_v41   ;;  %v4343_v28 = vpop.f32.mrb[76].mxu0 }
 0x2fa   : > { %v4710_v9 = vpop.eup %4709  ;;  %v2574_v6 = vmul.f32 %v6579_v63, %v2504_v2  ;;  %v2187_v48 = vsub.f32 %v2059_v8, %v2123_v10  ;;  %2032 = vadd.xlane.f32.xlu1 %v1905_v14  ;;  %v2381_v17 = vadd.f32 1e-05, %v2253_v30  ;;  %v3088_v10 = vpop.f32.mrb[77].mxu0 }
 0x2fb   : > { %v4712_v26 = vpop.eup %4711  ;;  %v2645_v33 = vadd.f32 %v6586_v35, %v2575_v29  ;;  %v2503_v50 = vmul.f32 %v4710_v9, %v2311_v27  ;;  %v2380_v32 = vadd.f32 1e-05, %v2252_v22  ;;  %v1712_v5 = vpop.xlane.xlu1 %1711  ;;  %2030 = vadd.xlane.f32.xlu0 %v1904_v54  ;;  %v2186_v34 = vsub.f32 %v2058_v40, %v2122_v7  ;;  %v7351_v27 = vld [vmem:[#allocation66_spill] sm:$0xff] }
 0x2fc   : > { %v2644_v46 = vadd.f32 %v6586_v35, %v2574_v6  ;;  %v2502_v53 = vmul.f32 %v4712_v26, %v2310_v42  ;;  %v2251_v51 = vmax.f32 %v2187_v48, 0.0  ;;  %v1710_v14 = vpop.xlane.xlu0 %1709  ;;  %4713 = vrsqrt.f32 %v2381_v17  ;;  %v4344_v25 = vpop.f32.mrb[78].mxu0 }
 0x2fd   : > { %v2709_v49 = vadd.f32 %v2645_v33, %v7350_v24  ;;  %v2573_v57 = vmul.f32 %v6579_v63, %v2503_v50  ;;  %4715 = vrsqrt.f32 %v2380_v32  ;;  %v2250_v19 = vmax.f32 %v2186_v34, 0.0  ;;  %v3091_v40 = vpop.f32.mrb[79].mxu0  ;;  %v7355_v24 = vld [vmem:[#allocation15_spill] sm:$0xff] }
 0x2fe   : > { %v2708_v47 = vadd.f32 %v2644_v46, %v7351_v27  ;;  %v2572_v60 = vmul.f32 %v6579_v63, %v2502_v53  ;;  %v2379_v54 = vadd.f32 1e-05, %v2251_v51  ;;  %v6598_v43 = vmul.f32 0.0078125, %v1712_v5  ;;  %v7354_v46 = vld [vmem:[#allocation14_spill] sm:$0xff]  ;;  %v4347_v34 = vpop.f32.mrb[80].mxu0 }
 0x2ff   : > { %2773 = vst [vmem:[%s6204_s25 + $0xb8] sm:$0xff] %v2709_v49  ;;  %v2643_v42 = vadd.f32 %v6586_v35, %v2573_v57  ;;  %v1708_v2 = vpop.xlane.xlu1 %1707  ;;  %v2378_v30 = vadd.f32 1e-05, %v2250_v19  ;;  %v6603_v22 = vmul.f32 0.0078125, %v1710_v14  ;;  %v3928_v33 = vpack.c.bf16 %v4344_v25, %v4343_v28  ;;  %v7356_v57 = vld [vmem:[#allocation26_spill] sm:$0xff] }
 0x300   : > { %2772 = vst [vmem:[%s6204_s25 + $0xb0] sm:$0xff] %v2708_v47  ;;  %v2642_v7 = vadd.f32 %v6586_v35, %v2572_v60  ;;  %4717 = vrsqrt.f32 %v2379_v54  ;;  %v1706_v8 = vpop.xlane.xlu0 %1705  ;;  %v2129_v6 = vmul.f32 %v6598_v43, %v6598_v43  ;;  %v6610_v21 = vmul.f32 0.0078125, %v1708_v2  ;;  %v3104_v54 = vpop.f32.mrb[81].mxu0 }
 0x301   : > { %v2707_v29 = vadd.f32 %v2643_v42, %v7352_v61  ;;  %4719 = vrsqrt.f32 %v2378_v30  ;;  %v3923_v50 = vpack.c.bf16 %v3091_v40, %v3088_v10  ;;  %v2128_v17 = vmul.f32 %v6603_v22, %v6603_v22  ;;  %3992 = vst [vmem:[%s6215_s28 + $0xb8] sm:$0xff] %v3928_v33  }
 0x302   : > { %v2706_v9 = vadd.f32 %v2642_v7, %v7353_v55  ;;  %v6614_v32 = vmul.f32 0.0078125, %v1706_v8  ;;  %v2317_v53 = vsub.f32 %v7354_v46, %v6536_v39  ;;  %v2316_v49 = vsub.f32 %v7355_v24, %v6538_v23  ;;  %v4348_v7 = vpop.f32.mrb[82].mxu0 }
 0x303   : > { %2771 = vst [vmem:[%s6204_s25 + $0xa8] sm:$0xff] %v2707_v29  ;;  %v1969_v48 = vpop.xlane.xlu1 %1968  ;;  %3991 = vst [vmem:[%s6215_s28 + $0xb0] sm:$0xff] %v3923_v50   ;;  %v2315_v27 = vsub.f32 %v7356_v57, %v6550_v36  ;;  %v2127_v19 = vmul.f32 %v6610_v21, %v6610_v21  ;;  %v3107_v29 = vpop.f32.mrb[83].mxu0  ;;  %v7357_v50 = vld [vmem:[#allocation27_spill] sm:$0xff] }
 0x304   : > { %2770 = vst [vmem:[%s6204_s25 + $0xa0] sm:$0xff] %v2706_v9  ;;  %v2065_v41 = vmul.f32 0.0078125, %v1969_v48  ;;  %v1967_v26 = vpop.xlane.xlu0 %1966  ;;  %v2126_v25 = vmul.f32 %v6614_v32, %v6614_v32  ;;  %v3938_v9 = vpack.c.bf16 %v4348_v7, %v4347_v34 }
 0x305   : > { %v2064_v5 = vmul.f32 0.0078125, %v1967_v26 }
 0x306   : > { %v2193_v51 = vsub.f32 %v2065_v41, %v2129_v6  ;;  %v4714_v14 = vpop.eup %4713  ;;  %3994 = vst [vmem:[%s6215_s28 + $0xc8] sm:$0xff] %v3938_v9  }
 0x307   : > { %v2192_v47 = vsub.f32 %v2064_v5, %v2128_v17  ;;  %v1965_v60 = vpop.xlane.xlu1 %1964  ;;  %v4716_v28 = vpop.eup %4715  ;;  %v2509_v42 = vmul.f32 %v4714_v14, %v2317_v53  ;;  %v2314_v17 = vsub.f32 %v7357_v50, %v6552_v56 }
 0x308   : > { %v2257_v39 = vmax.f32 %v2193_v51, 0.0  ;;  %v2063_v2 = vmul.f32 0.0078125, %v1965_v60  ;;  %v1963_v10 = vpop.xlane.xlu0 %1962  ;;  %v2508_v8 = vmul.f32 %v4716_v28, %v2316_v49  ;;  %v7358_v49 = vld [vmem:[#allocation79_spill] sm:$0xff]  ;;  %v4351_v56 = vpop.f32.mrb[84].mxu0  ;;  %v7359_v60 = vld [vmem:[#allocation78_spill] sm:$0xff] }
 0x309   : > { %v2256_v23 = vmax.f32 %v2192_v47, 0.0  ;;  %v2062_v61 = vmul.f32 0.0078125, %v1963_v10  ;;  %v2579_v30 = vmul.f32 %v6579_v63, %v2509_v42  ;;  %v3120_v10 = vpop.f32.mrb[85].mxu0 }
 0x30a   : > { %v4718_v36 = vpop.eup %4717  ;;  %v2385_v40 = vadd.f32 1e-05, %v2257_v39  ;;  %v2191_v55 = vsub.f32 %v2063_v2, %v2127_v19  ;;  %v2578_v6 = vmul.f32 %v6579_v63, %v2508_v8 }
 0x30b   : > { %v2507_v48 = vmul.f32 %v4718_v36, %v2315_v27  ;;  %v2384_v41 = vadd.f32 1e-05, %v2256_v23  ;;  %v2190_v26 = vsub.f32 %v2062_v61, %v2126_v25  ;;  %v1720_v33 = vpop.xlane.xlu1 %1719  ;;  %v2649_v5 = vadd.f32 %v6586_v35, %v2579_v30  ;;  %v4720_v51 = vpop.eup %4719  ;;  %v7360_v23 = vld [vmem:[#allocation69_spill] sm:$0xff] }
 0x30c   : > { %4721 = vrsqrt.f32 %v2385_v40  ;;  %v2255_v46 = vmax.f32 %v2191_v55, 0.0  ;;  %v1718_v53 = vpop.xlane.xlu0 %1717  ;;  %v2648_v14 = vadd.f32 %v6586_v35, %v2578_v6  ;;  %v2506_v27 = vmul.f32 %v4720_v51, %v2314_v17  ;;  %v4352_v25 = vpop.f32.mrb[86].mxu0 }
 0x30d   : > { %v2577_v34 = vmul.f32 %v6579_v63, %v2507_v48  ;;  %4723 = vrsqrt.f32 %v2384_v41  ;;  %v2254_v24 = vmax.f32 %v2190_v26, 0.0  ;;  %v2713_v57 = vadd.f32 %v2649_v5, %v7358_v49  ;;  %v3123_v40 = vpop.f32.mrb[87].mxu0  ;;  %v7361_v41 = vld [vmem:[#allocation68_spill] sm:$0xff] }
 0x30e   : > { %v2383_v47 = vadd.f32 1e-05, %v2255_v46  ;;  %v2712_v28 = vadd.f32 %v2648_v14, %v7359_v60  ;;  %v6639_v39 = vmul.f32 0.0078125, %v1720_v33  ;;  %v2576_v7 = vmul.f32 %v6579_v63, %v2506_v27 }
 0x30f   : > { %v2647_v42 = vadd.f32 %v6586_v35, %v2577_v34  ;;  %v2382_v19 = vadd.f32 1e-05, %v2254_v24  ;;  %v1716_v2 = vpop.xlane.xlu1 %1715  ;;  %2777 = vst [vmem:[%s6204_s25 + $0xd8] sm:$0xff] %v2713_v57  ;;  %v6645_v36 = vmul.f32 0.0078125, %v1718_v53  ;;  %v3933_v30 = vpack.c.bf16 %v3107_v29, %v3104_v54  ;;  %v7362_v29 = vld [vmem:[#allocation38_spill] sm:$0xff]  ;;  %v7363_v34 = vld [vmem:[#allocation39_spill] sm:$0xff] }
 0x310   : > { %4725 = vrsqrt.f32 %v2383_v47  ;;  %v1714_v8 = vpop.xlane.xlu0 %1713  ;;  %2776 = vst [vmem:[%s6204_s25 + $0xd0] sm:$0xff] %v2712_v28  ;;  %v2646_v55 = vadd.f32 %v6586_v35, %v2576_v7  ;;  %v2133_v9 = vmul.f32 %v6639_v39, %v6639_v39  ;;  %v3948_v48 = vpack.c.bf16 %v4352_v25, %v4351_v56  ;;  %v4355_v57 = vpop.f32.mrb[88].mxu0  ;;  %v7364_v47 = vld [vmem:[#allocation50_spill] sm:$0xff] }
 0x311   : > { %v2711_v61 = vadd.f32 %v2647_v42, %v7360_v23  ;;  %4727 = vrsqrt.f32 %v2382_v19  ;;  %3993 = vst [vmem:[%s6215_s28 + $0xc0] sm:$0xff] %v3933_v30   ;;  %v6653_v33 = vmul.f32 0.0078125, %v1716_v2  ;;  %v3943_v54 = vpack.c.bf16 %v3123_v40, %v3120_v10  ;;  %v3136_v2 = vpop.f32.mrb[89].mxu0 }
 0x312   : > { %v2710_v26 = vadd.f32 %v2646_v55, %v7361_v41  ;;  %v2321_v5 = vsub.f32 %v7362_v29, %v6598_v43  ;;  %v2132_v46 = vmul.f32 %v6645_v36, %v6645_v36  ;;  %v6659_v53 = vmul.f32 0.0078125, %v1714_v8  ;;  %3996 = vst [vmem:[%s6215_s28 + $0xd8] sm:$0xff] %v3948_v48   ;;  %v7365_v43 = vld [vmem:[#allocation51_spill] sm:$0xff]  ;;  %v4356_v23 = vpop.f32.mrb[90].mxu0 }
 0x313   : > { %2775 = vst [vmem:[%s6204_s25 + $0xc8] sm:$0xff] %v2711_v61  ;;  %v1977_v6 = vpop.xlane.xlu1 %1976  ;;  %v2320_v24 = vsub.f32 %v7363_v34, %v6603_v22  ;;  %3995 = vst [vmem:[%s6215_s28 + $0xd0] sm:$0xff] %v3943_v54   ;;  %v2319_v56 = vsub.f32 %v7364_v47, %v6610_v21  ;;  %v2318_v60 = vsub.f32 %v7365_v43, %v6614_v32  ;;  %v3139_v32 = vpop.f32.mrb[91].mxu0  ;;  %v7367_v47 = vld [vmem:[#allocation90_spill] sm:$0xff] }
 0x314   : > { %v2069_v50 = vmul.f32 0.0078125, %v1977_v6  ;;  %v1975_v17 = vpop.xlane.xlu0 %1974  ;;  %2774 = vst [vmem:[%s6204_s25 + $0xc0] sm:$0xff] %v2710_v26  ;;  %v2131_v7 = vmul.f32 %v6653_v33, %v6653_v33  ;;  %v2130_v21 = vmul.f32 %v6659_v53, %v6659_v53  ;;  %v3958_v41 = vpack.c.bf16 %v4356_v23, %v4355_v57 }
 0x315   : > { %v2068_v51 = vmul.f32 0.0078125, %v1975_v17 }
 0x316   : > { %v4722_v14 = vpop.eup %4721  ;;  %v2197_v49 = vsub.f32 %v2069_v50, %v2133_v9  ;;  %3998 = vst [vmem:[%s6215_s28 + $0xe8] sm:$0xff] %v3958_v41   ;;  %v7370_v41 = vld [vmem:[#allocation87_spill] sm:$0xff] }
 0x317   : > { %v4724_v27 = vpop.eup %4723  ;;  %v2513_v28 = vmul.f32 %v4722_v14, %v2321_v5  ;;  %v2196_v42 = vsub.f32 %v2068_v51, %v2132_v46  ;;  %v1973_v19 = vpop.xlane.xlu1 %1972 }
 0x318   : > { %v2512_v10 = vmul.f32 %v4724_v27, %v2320_v24  ;;  %v2261_v8 = vmax.f32 %v2197_v49, 0.0  ;;  %v2067_v22 = vmul.f32 0.0078125, %v1973_v19  ;;  %v1971_v25 = vpop.xlane.xlu0 %1970  ;;  %v7366_v24 = vld [vmem:[#allocation91_spill] sm:$0xff] }
 0x319   : > { %v2583_v61 = vmul.f32 %v6579_v63, %v2513_v28  ;;  %v2260_v30 = vmax.f32 %v2196_v42, 0.0  ;;  %v2066_v40 = vmul.f32 0.0078125, %v1971_v25  ;;  %v4359_v42 = vpop.f32.mrb[92].mxu0 }
 0x31a   : > { %v4726_v55 = vpop.eup %4725  ;;  %v2582_v9 = vmul.f32 %v6579_v63, %v2512_v10  ;;  %v2389_v6 = vadd.f32 1e-05, %v2261_v8  ;;  %v2195_v48 = vsub.f32 %v2067_v22, %v2131_v7  ;;  %v3953_v7 = vpack.c.bf16 %v3139_v32, %v3136_v2  ;;  %v3152_v8 = vpop.f32.mrb[93].mxu0  ;;  %v7369_v2 = vld [vmem:[#allocation80_spill] sm:$0xff] }
 0x31b   : > { %v4728_v26 = vpop.eup %4727  ;;  %v2653_v50 = vadd.f32 %v6586_v35, %v2583_v61  ;;  %v2511_v17 = vmul.f32 %v4726_v55, %v2319_v56  ;;  %v2388_v54 = vadd.f32 1e-05, %v2260_v30  ;;  %v2194_v29 = vsub.f32 %v2066_v40, %v2130_v21  ;;  %v1728_v5 = vpop.xlane.xlu1 %1727  ;;  %v7368_v61 = vld [vmem:[#allocation81_spill] sm:$0xff] }
 0x31c   : > { %v2652_v46 = vadd.f32 %v6586_v35, %v2582_v9  ;;  %v2510_v51 = vmul.f32 %v4728_v26, %v2318_v60  ;;  %4729 = vrsqrt.f32 %v2389_v6  ;;  %v2259_v14 = vmax.f32 %v2195_v48, 0.0  ;;  %v1726_v34 = vpop.xlane.xlu0 %1725  ;;  %v4360_v23 = vpop.f32.mrb[94].mxu0  ;;  %3997 = vst [vmem:[%s6215_s28 + $0xe0] sm:$0xff] %v3953_v7  }
 0x31d   : > { %v2717_v49 = vadd.f32 %v2653_v50, %v7366_v24  ;;  %v2581_v57 = vmul.f32 %v6579_v63, %v2511_v17  ;;  %4731 = vrsqrt.f32 %v2388_v54  ;;  %v2258_v27 = vmax.f32 %v2194_v29, 0.0  ;;  %v3155_v55 = vpop.f32.mrb[95].mxu0 }
 0x31e   : > { %v2716_v56 = vadd.f32 %v2652_v46, %v7367_v47  ;;  %v2580_v43 = vmul.f32 %v6579_v63, %v2510_v51  ;;  %v2387_v28 = vadd.f32 1e-05, %v2259_v14  ;;  %v6688_v30 = vmul.f32 0.0078125, %v1728_v5  ;;  %v7371_v14 = vld [vmem:[#allocation94_spill] sm:$0xff] }
 0x31f   : > { %2781 = vst [vmem:[%s6204_s25 + $0xf8] sm:$0xff] %v2717_v49  ;;  %v2651_v60 = vadd.f32 %v6586_v35, %v2581_v57  ;;  %v2386_v19 = vadd.f32 1e-05, %v2258_v27  ;;  %v1724_v10 = vpop.xlane.xlu1 %1723  ;;  %v6690_v40 = vmul.f32 0.0078125, %v1726_v34  ;;  %v3968_v9 = vpack.c.bf16 %v4360_v23, %v4359_v42 }
 0x320   : > { %2780 = vst [vmem:[%s6204_s25 + $0xf0] sm:$0xff] %v2716_v56  ;;  %v2650_v22 = vadd.f32 %v6586_v35, %v2580_v43  ;;  %4733 = vrsqrt.f32 %v2387_v28  ;;  %v1722_v25 = vpop.xlane.xlu0 %1721  ;;  %v3963_v48 = vpack.c.bf16 %v3155_v55, %v3152_v8  ;;  %v2325_v26 = vsub.f32 %v7370_v41, %v6639_v39  ;;  %v7372_v56 = vld [vmem:[#allocation6_spill] sm:$0xff] }
 0x321   : > { %v2715_v21 = vadd.f32 %v2651_v60, %v7368_v61  ;;  %4735 = vrsqrt.f32 %v2386_v19  ;;  %v6698_v50 = vmul.f32 0.0078125, %v1724_v10  ;;  %4000 = vst [vmem:[%s6215_s28 + $0xf8] sm:$0xff] %v3968_v9   ;;  %v2137_v54 = vmul.f32 %v6688_v30, %v6688_v30 }
 0x322   : > { %v2714_v32 = vadd.f32 %v2650_v22, %v7369_v2  ;;  %v2136_v29 = vmul.f32 %v6690_v40, %v6690_v40  ;;  %3999 = vst [vmem:[%s6215_s28 + $0xf0] sm:$0xff] %v3963_v48   ;;  %v2324_v34 = vsub.f32 %v7371_v14, %v6645_v36  ;;  %v6708_v24 = vmul.f32 0.0078125, %v1722_v25  ;;  %v7373_v25 = vld [vmem:[#allocation16_spill] sm:$0xff] }
 0x323   : > { %2779 = vst [vmem:[%s6204_s25 + $0xe8] sm:$0xff] %v2715_v21  ;;  %v1985_v6 = vpop.xlane.xlu1 %1984  ;;  %v2323_v43 = vsub.f32 %v7372_v56, %v6653_v33  ;;  %v2135_v42 = vmul.f32 %v6698_v50, %v6698_v50  ;;  %v2322_v23 = vsub.f32 %v7373_v25, %v6659_v53 }
 0x324   : > { %2778 = vst [vmem:[%s6204_s25 + $0xe0] sm:$0xff] %v2714_v32  ;;  %v1983_v17 = vpop.xlane.xlu0 %1982  ;;  %v2073_v5 = vmul.f32 0.0078125, %v1985_v6  ;;  %v2134_v33 = vmul.f32 %v6708_v24, %v6708_v24 }
 0x325   : > { %v2072_v46 = vmul.f32 0.0078125, %v1983_v17 }
 0x326   : > { %v4730_v51 = vpop.eup %4729  ;;  %v2201_v57 = vsub.f32 %v2073_v5, %v2137_v54 }
 0x327   : > { %v4732_v39 = vpop.eup %4731  ;;  %v2517_v49 = vmul.f32 %v4730_v51, %v2325_v26  ;;  %v2200_v27 = vsub.f32 %v2072_v46, %v2136_v29  ;;  %v1981_v47 = vpop.xlane.xlu1 %1980  ;;  %v7374_v29 = vld [vmem:[#allocation11_spill] sm:$0xff]  ;;  %v7375_v51 = vld [vmem:[#allocation10_spill] sm:$0xff] }
 0x328   : > { %v2516_v28 = vmul.f32 %v4732_v39, %v2324_v34  ;;  %v2071_v60 = vmul.f32 0.0078125, %v1981_v47  ;;  %v1979_v19 = vpop.xlane.xlu0 %1978  ;;  %v2265_v7 = vmax.f32 %v2201_v57, 0.0 }
 0x329   : > { %v2587_v10 = vmul.f32 %v6579_v63, %v2517_v49  ;;  %v2264_v36 = vmax.f32 %v2200_v27, 0.0  ;;  %v2070_v8 = vmul.f32 0.0078125, %v1979_v19 }
 0x32a   : > { %v4734_v22 = vpop.eup %4733  ;;  %v2586_v61 = vmul.f32 %v6579_v63, %v2516_v28  ;;  %v2199_v21 = vsub.f32 %v2071_v60, %v2135_v42  ;;  %v2393_v9 = vadd.f32 1e-05, %v2265_v7  ;;  %v7376_v28 = vld [vmem:[#allocation5_spill] sm:$0xff] }
 0x32b   : > { %v4736_v55 = vpop.eup %4735  ;;  %v2657_v2 = vadd.f32 %v6586_v35, %v2587_v10  ;;  %v2515_v32 = vmul.f32 %v4734_v22, %v2323_v43  ;;  %v2392_v6 = vadd.f32 1e-05, %v2264_v36  ;;  %v1736_v48 = vpop.xlane.xlu1 %1735  ;;  %v2198_v53 = vsub.f32 %v2070_v8, %v2134_v33  ;;  %v7377_v10 = vld [vmem:[#allocation4_spill] sm:$0xff] }
 0x32c   : > { %v2656_v41 = vadd.f32 %v6586_v35, %v2586_v61  ;;  %v2514_v26 = vmul.f32 %v4736_v55, %v2322_v23  ;;  %v2263_v17 = vmax.f32 %v2199_v21, 0.0  ;;  %v1734_v54 = vpop.xlane.xlu0 %1733  ;;  %4737 = vrsqrt.f32 %v2393_v9  ;;  %v7378_v55 = vld [vmem:[#allocation17_spill] sm:$0xff] }
 0x32d   : > { %v2721_v5 = vadd.f32 %v2657_v2, %v7374_v29  ;;  %v2585_v46 = vmul.f32 %v6579_v63, %v2515_v32  ;;  %4739 = vrsqrt.f32 %v2392_v6  ;;  %v2262_v57 = vmax.f32 %v2198_v53, 0.0  ;;  %v7379_v6 = vld [vmem:[#allocation28_spill] sm:$0xff] }
 0x32e   : > { %v2720_v14 = vadd.f32 %v2656_v41, %v7375_v51  ;;  %v2584_v34 = vmul.f32 %v6579_v63, %v2514_v26  ;;  %v2391_v39 = vadd.f32 1e-05, %v2263_v17  ;;  %v6730_v56 = vmul.f32 0.0078125, %v1736_v48  ;;  %v7380_v41 = vld [vmem:[#allocation29_spill] sm:$0xff] }
 0x32f   : > { %2785 = vst [vmem:[%s6204_s25 + $0x118] sm:$0xff] %v2721_v5  ;;  %v2655_v49 = vadd.f32 %v6586_v35, %v2585_v46  ;;  %v1732_v27 = vpop.xlane.xlu1 %1731  ;;  %v2390_v60 = vadd.f32 1e-05, %v2262_v57  ;;  %v6733_v19 = vmul.f32 0.0078125, %v1734_v54  ;;  %v2329_v2 = vsub.f32 %v7378_v55, %v6688_v30 }
 0x330   : > { %2784 = vst [vmem:[%s6204_s25 + $0x110] sm:$0xff] %v2720_v14  ;;  %v2654_v47 = vadd.f32 %v6586_v35, %v2584_v34  ;;  %4741 = vrsqrt.f32 %v2391_v39  ;;  %v1730_v43 = vpop.xlane.xlu0 %1729  ;;  %v2141_v8 = vmul.f32 %v6730_v56, %v6730_v56  ;;  %v6740_v22 = vmul.f32 0.0078125, %v1732_v27 }
 0x331   : > { %v2719_v42 = vadd.f32 %v2655_v49, %v7376_v28  ;;  %4743 = vrsqrt.f32 %v2390_v60  ;;  %v2140_v61 = vmul.f32 %v6733_v19, %v6733_v19  ;;  %v6744_v33 = vmul.f32 0.0078125, %v1730_v43 }
 0x332   : > { %v2718_v7 = vadd.f32 %v2654_v47, %v7377_v10  ;;  %v2328_v48 = vsub.f32 %v7379_v6, %v6690_v40  ;;  %v2327_v26 = vsub.f32 %v7380_v41, %v6698_v50  ;;  %v2139_v5 = vmul.f32 %v6740_v22, %v6740_v22  ;;  %v7381_v10 = vld [vmem:[#allocation40_spill] sm:$0xff] }
 0x333   : > { %2783 = vst [vmem:[%s6204_s25 + $0x108] sm:$0xff] %v2719_v42  ;;  %v1993_v36 = vpop.xlane.xlu1 %1992  ;;  %v2138_v30 = vmul.f32 %v6744_v33, %v6744_v33 }
 0x334   : > { %2782 = vst [vmem:[%s6204_s25 + $0x100] sm:$0xff] %v2718_v7  ;;  %v2077_v25 = vmul.f32 0.0078125, %v1993_v36  ;;  %v1991_v23 = vpop.xlane.xlu0 %1990  ;;  %v2326_v7 = vsub.f32 %v7381_v10, %v6708_v24  ;;  %v7383_v24 = vld [vmem:[#allocation22_spill] sm:$0xff]  ;;  %v7387_v10 = vld [vmem:[#allocation52_spill] sm:$0xff] }
 0x335   : > { %v2076_v21 = vmul.f32 0.0078125, %v1991_v23 }
 0x336   : > { %v2205_v32 = vsub.f32 %v2077_v25, %v2141_v8  ;;  %v4738_v9 = vpop.eup %4737 }
 0x337   : > { %v2204_v17 = vsub.f32 %v2076_v21, %v2140_v61  ;;  %v1989_v53 = vpop.xlane.xlu1 %1988  ;;  %v4740_v54 = vpop.eup %4739  ;;  %v2521_v29 = vmul.f32 %v4738_v9, %v2329_v2  ;;  %v7382_v2 = vld [vmem:[#allocation23_spill] sm:$0xff] }
 0x338   : > { %v2269_v46 = vmax.f32 %v2205_v32, 0.0  ;;  %v2075_v51 = vmul.f32 0.0078125, %v1989_v53  ;;  %v1987_v14 = vpop.xlane.xlu0 %1986  ;;  %v2520_v34 = vmul.f32 %v4740_v54, %v2328_v48 }
 0x339   : > { %v2268_v39 = vmax.f32 %v2204_v17, 0.0  ;;  %v2074_v49 = vmul.f32 0.0078125, %v1987_v14  ;;  %v2591_v57 = vmul.f32 %v6579_v63, %v2521_v29 }
 0x33a   : > { %v4742_v40 = vpop.eup %4741  ;;  %v2397_v50 = vadd.f32 1e-05, %v2269_v46  ;;  %v2203_v27 = vsub.f32 %v2075_v51, %v2139_v5  ;;  %v2590_v47 = vmul.f32 %v6579_v63, %v2520_v34  ;;  %v7384_v5 = vld [vmem:[#allocation13_spill] sm:$0xff] }
 0x33b   : > { %v2519_v43 = vmul.f32 %v4742_v40, %v2327_v26  ;;  %v2396_v28 = vadd.f32 1e-05, %v2268_v39  ;;  %v2202_v42 = vsub.f32 %v2074_v49, %v2138_v30  ;;  %v1744_v60 = vpop.xlane.xlu1 %1743  ;;  %v2661_v36 = vadd.f32 %v6586_v35, %v2591_v57  ;;  %v4744_v23 = vpop.eup %4743  ;;  %v7385_v30 = vld [vmem:[#allocation12_spill] sm:$0xff] }
 0x33c   : > { %4745 = vrsqrt.f32 %v2397_v50  ;;  %v2267_v8 = vmax.f32 %v2203_v27, 0.0  ;;  %v1742_v25 = vpop.xlane.xlu0 %1741  ;;  %v2660_v61 = vadd.f32 %v6586_v35, %v2590_v47  ;;  %v2518_v9 = vmul.f32 %v4744_v23, %v2326_v7  ;;  %v7386_v27 = vld [vmem:[#allocation41_spill] sm:$0xff] }
 0x33d   : > { %v2589_v21 = vmul.f32 %v6579_v63, %v2519_v43  ;;  %4747 = vrsqrt.f32 %v2396_v28  ;;  %v2266_v55 = vmax.f32 %v2202_v42, 0.0  ;;  %v2725_v32 = vadd.f32 %v2661_v36, %v7382_v2 }
 0x33e   : > { %v2395_v6 = vadd.f32 1e-05, %v2267_v8  ;;  %v2724_v48 = vadd.f32 %v2660_v61, %v7383_v24  ;;  %v2588_v53 = vmul.f32 %v6579_v63, %v2518_v9  ;;  %v6768_v54 = vmul.f32 0.0078125, %v1744_v60 }
 0x33f   : > { %v2659_v41 = vadd.f32 %v6586_v35, %v2589_v21  ;;  %v2394_v26 = vadd.f32 1e-05, %v2266_v55  ;;  %v1740_v17 = vpop.xlane.xlu1 %1739  ;;  %2789 = vst [vmem:[%s6204_s25 + $0x138] sm:$0xff] %v2725_v32  ;;  %v6772_v51 = vmul.f32 0.0078125, %v1742_v25  ;;  %v2333_v47 = vsub.f32 %v7386_v27, %v6730_v56  ;;  %v7388_v25 = vld [vmem:[#allocation64_spill] sm:$0xff] }
 0x340   : > { %4749 = vrsqrt.f32 %v2395_v6  ;;  %v1738_v29 = vpop.xlane.xlu0 %1737  ;;  %2788 = vst [vmem:[%s6204_s25 + $0x130] sm:$0xff] %v2724_v48  ;;  %v2658_v14 = vadd.f32 %v6586_v35, %v2588_v53  ;;  %v2145_v49 = vmul.f32 %v6768_v54, %v6768_v54  ;;  %v6779_v40 = vmul.f32 0.0078125, %v1740_v17 }
 0x341   : > { %v2723_v46 = vadd.f32 %v2659_v41, %v7384_v5  ;;  %4751 = vrsqrt.f32 %v2394_v26  ;;  %v2144_v43 = vmul.f32 %v6772_v51, %v6772_v51  ;;  %v6785_v28 = vmul.f32 0.0078125, %v1738_v29 }
 0x342   : > { %v2722_v39 = vadd.f32 %v2658_v14, %v7385_v30  ;;  %v2332_v7 = vsub.f32 %v7387_v10, %v6733_v19  ;;  %v2331_v23 = vsub.f32 %v7388_v25, %v6740_v22  ;;  %v2143_v2 = vmul.f32 %v6779_v40, %v6779_v40  ;;  %v7389_v22 = vld [vmem:[#allocation53_spill] sm:$0xff]  ;;  %v7391_v10 = vld [vmem:[#allocation34_spill] sm:$0xff] }
 0x343   : > { %2787 = vst [vmem:[%s6204_s25 + $0x128] sm:$0xff] %v2723_v46  ;;  %v2001_v34 = vpop.xlane.xlu1 %2000  ;;  %v2142_v19 = vmul.f32 %v6785_v28, %v6785_v28  ;;  %v2330_v17 = vsub.f32 %v7389_v22, %v6744_v33  ;;  %v7390_v33 = vld [vmem:[#allocation35_spill] sm:$0xff] }
 0x344   : > { %v2081_v57 = vmul.f32 0.0078125, %v2001_v34  ;;  %v1999_v50 = vpop.xlane.xlu0 %1998  ;;  %2786 = vst [vmem:[%s6204_s25 + $0x120] sm:$0xff] %v2722_v39 }
 0x345   : > { %v2080_v42 = vmul.f32 0.0078125, %v1999_v50 }
 0x346   : > { %v4746_v60 = vpop.eup %4745  ;;  %v2209_v36 = vsub.f32 %v2081_v57, %v2145_v49 }
 0x347   : > { %v4748_v8 = vpop.eup %4747  ;;  %v2525_v61 = vmul.f32 %v4746_v60, %v2333_v47  ;;  %v2208_v21 = vsub.f32 %v2080_v42, %v2144_v43  ;;  %v1997_v55 = vpop.xlane.xlu1 %1996 }
 0x348   : > { %v2524_v56 = vmul.f32 %v4748_v8, %v2332_v7  ;;  %v2273_v32 = vmax.f32 %v2209_v36, 0.0  ;;  %v2079_v9 = vmul.f32 0.0078125, %v1997_v55  ;;  %v1995_v6 = vpop.xlane.xlu0 %1994 }
 0x349   : > { %v2595_v24 = vmul.f32 %v6579_v63, %v2525_v61  ;;  %v2272_v48 = vmax.f32 %v2208_v21, 0.0  ;;  %v2078_v41 = vmul.f32 0.0078125, %v1995_v6  ;;  %v7393_v6 = vld [vmem:[#allocation24_spill] sm:$0xff] }
 0x34a   : > { %v4750_v26 = vpop.eup %4749  ;;  %v2594_v53 = vmul.f32 %v6579_v63, %v2524_v56  ;;  %v2401_v29 = vadd.f32 1e-05, %v2273_v32  ;;  %v2207_v5 = vsub.f32 %v2079_v9, %v2143_v2  ;;  %v7392_v56 = vld [vmem:[#allocation25_spill] sm:$0xff] }
 0x34b   : > { %v4752_v46 = vpop.eup %4751  ;;  %v2665_v14 = vadd.f32 %v6586_v35, %v2595_v24  ;;  %v2523_v34 = vmul.f32 %v4750_v26, %v2331_v23  ;;  %v2400_v30 = vadd.f32 1e-05, %v2272_v48  ;;  %v2206_v39 = vsub.f32 %v2078_v41, %v2142_v19  ;;  %v1752_v49 = vpop.xlane.xlu1 %1751 }
 0x34c   : > { %v2664_v57 = vadd.f32 %v6586_v35, %v2594_v53  ;;  %v2522_v50 = vmul.f32 %v4752_v46, %v2330_v17  ;;  %4753 = vrsqrt.f32 %v2401_v29  ;;  %v2271_v27 = vmax.f32 %v2207_v5, 0.0  ;;  %v1750_v47 = vpop.xlane.xlu0 %1749 }
 0x34d   : > { %v2729_v43 = vadd.f32 %v2665_v14, %v7390_v33  ;;  %v2593_v42 = vmul.f32 %v6579_v63, %v2523_v34  ;;  %4755 = vrsqrt.f32 %v2400_v30  ;;  %v2270_v60 = vmax.f32 %v2206_v39, 0.0 }
 0x34e   : > { %v2728_v7 = vadd.f32 %v2664_v57, %v7391_v10  ;;  %v2592_v36 = vmul.f32 %v6579_v63, %v2522_v50  ;;  %v2399_v8 = vadd.f32 1e-05, %v2271_v27  ;;  %v6811_v32 = vmul.f32 0.0078125, %v1752_v49 }
 0x34f   : > { %2793 = vst [vmem:[%s6204_s25 + $0x158] sm:$0xff] %v2729_v43  ;;  %v2663_v25 = vadd.f32 %v6586_v35, %v2593_v42  ;;  %v2398_v23 = vadd.f32 1e-05, %v2270_v60  ;;  %v1748_v61 = vpop.xlane.xlu1 %1747  ;;  %v6813_v9 = vmul.f32 0.0078125, %v1750_v47  ;;  %v2337_v48 = vsub.f32 %v6219_v38, %v6768_v54 }
 0x350   : > { %2792 = vst [vmem:[%s6204_s25 + $0x150] sm:$0xff] %v2728_v7  ;;  %v2662_v21 = vadd.f32 %v6586_v35, %v2592_v36  ;;  %4757 = vrsqrt.f32 %v2399_v8  ;;  %v1746_v55 = vpop.xlane.xlu0 %1745  ;;  %v6820_v41 = vmul.f32 0.0078125, %v1748_v61  ;;  %v2149_v22 = vmul.f32 %v6811_v32, %v6811_v32 }
 0x351   : > { %v2727_v2 = vadd.f32 %v2663_v25, %v7392_v56  ;;  %4759 = vrsqrt.f32 %v2398_v23  ;;  %v2148_v17 = vmul.f32 %v6813_v9, %v6813_v9  ;;  %v2336_v46 = vsub.f32 %v6187_v13, %v6772_v51 }
 0x352   : > { %v2726_v24 = vadd.f32 %v2662_v21, %v7393_v6  ;;  %v6828_v14 = vmul.f32 0.0078125, %v1746_v55  ;;  %v2335_v49 = vsub.f32 %v6236_v59, %v6779_v40  ;;  %v2147_v50 = vmul.f32 %v6820_v41, %v6820_v41 }
 0x353   : > { %2791 = vst [vmem:[%s6204_s25 + $0x148] sm:$0xff] %v2727_v2  ;;  %v2009_v19 = vpop.xlane.xlu1 %2008  ;;  %v2334_v60 = vsub.f32 %v6229_v3, %v6785_v28  ;;  %v7394_v2 = vld [vmem:[#allocation47_spill] sm:$0xff] }
 0x354   : > { %2790 = vst [vmem:[%s6204_s25 + $0x140] sm:$0xff] %v2726_v24  ;;  %v2007_v26 = vpop.xlane.xlu0 %2006  ;;  %v2085_v53 = vmul.f32 0.0078125, %v2009_v19  ;;  %v2146_v59 = vmul.f32 %v6828_v14, %v6828_v14  ;;  %v7395_v19 = vld [vmem:[#allocation46_spill] sm:$0xff] }
 0x355   : > { %v2084_v29 = vmul.f32 0.0078125, %v2007_v26 }
 0x356   : > { %v4754_v5 = vpop.eup %4753  ;;  %v2213_v38 = vsub.f32 %v2085_v53, %v2149_v22 }
 0x357   : > { %v4756_v34 = vpop.eup %4755  ;;  %v2529_v30 = vmul.f32 %v4754_v5, %v2337_v48  ;;  %v2212_v54 = vsub.f32 %v2084_v29, %v2148_v17  ;;  %v2005_v39 = vpop.xlane.xlu1 %2004 }
 0x358   : > { %v2528_v57 = vmul.f32 %v4756_v34, %v2336_v46  ;;  %v2083_v27 = vmul.f32 0.0078125, %v2005_v39  ;;  %v2003_v47 = vpop.xlane.xlu0 %2002  ;;  %v2277_v43 = vmax.f32 %v2213_v38, 0.0 }
 0x359   : > { %v2599_v33 = vmul.f32 %v6579_v63, %v2529_v30  ;;  %v2276_v13 = vmax.f32 %v2212_v54, 0.0  ;;  %v2082_v51 = vmul.f32 0.0078125, %v2003_v47  ;;  %v7396_v30 = vld [vmem:[#allocation37_spill] sm:$0xff] }
 0x35a   : > { %v4758_v42 = vpop.eup %4757  ;;  %v2598_v10 = vmul.f32 %v6579_v63, %v2528_v57  ;;  %v2211_v40 = vsub.f32 %v2083_v27, %v2147_v50  ;;  %v2405_v25 = vadd.f32 1e-05, %v2277_v43 }
 0x35b   : > { %v4760_v7 = vpop.eup %4759  ;;  %v2669_v36 = vadd.f32 %v6586_v35, %v2599_v33  ;;  %v2527_v8 = vmul.f32 %v4758_v42, %v2335_v49  ;;  %v2404_v23 = vadd.f32 1e-05, %v2276_v13  ;;  %v1760_v61 = vpop.xlane.xlu1 %1759  ;;  %v2210_v3 = vsub.f32 %v2082_v51, %v2146_v59  ;;  %v7397_v49 = vld [vmem:[#allocation36_spill] sm:$0xff] }
 0x35c   : > { %v2668_v21 = vadd.f32 %v6586_v35, %v2598_v10  ;;  %v2526_v55 = vmul.f32 %v4760_v7, %v2334_v60  ;;  %v2275_v56 = vmax.f32 %v2211_v40, 0.0  ;;  %v1758_v28 = vpop.xlane.xlu0 %1757  ;;  %4761 = vrsqrt.f32 %v2405_v25 }
 0x35d   : > { %v2733_v6 = vadd.f32 %v2669_v36, %v7394_v2  ;;  %v2597_v24 = vmul.f32 %v6579_v63, %v2527_v8  ;;  %4763 = vrsqrt.f32 %v2404_v23  ;;  %v2274_v53 = vmax.f32 %v2210_v3, 0.0 }
 0x35e   : > { %v2732_v48 = vadd.f32 %v2668_v21, %v7395_v19  ;;  %v2596_v26 = vmul.f32 %v6579_v63, %v2526_v55  ;;  %v2403_v22 = vadd.f32 1e-05, %v2275_v56  ;;  %v6850_v46 = vmul.f32 0.0078125, %v1760_v61 }
 0x35f   : > { %2797 = vst [vmem:[%s6204_s25 + $0x178] sm:$0xff] %v2733_v6  ;;  %v2667_v17 = vadd.f32 %v6586_v35, %v2597_v24  ;;  %v1756_v29 = vpop.xlane.xlu1 %1755  ;;  %v2402_v54 = vadd.f32 1e-05, %v2274_v53  ;;  %v6853_v39 = vmul.f32 0.0078125, %v1758_v28  ;;  %v2341_v60 = vsub.f32 %v6276_v45, %v6811_v32 }
 0x360   : > { %2796 = vst [vmem:[%s6204_s25 + $0x170] sm:$0xff] %v2732_v48  ;;  %v2666_v5 = vadd.f32 %v6586_v35, %v2596_v26  ;;  %4765 = vrsqrt.f32 %v2403_v22  ;;  %v1754_v34 = vpop.xlane.xlu0 %1753  ;;  %v2153_v27 = vmul.f32 %v6850_v46, %v6850_v46  ;;  %v6860_v47 = vmul.f32 0.0078125, %v1756_v29 }
 0x361   : > { %v2731_v38 = vadd.f32 %v2667_v17, %v7396_v30  ;;  %4767 = vrsqrt.f32 %v2402_v54  ;;  %v2152_v13 = vmul.f32 %v6853_v39, %v6853_v39  ;;  %v6864_v51 = vmul.f32 0.0078125, %v1754_v34 }
 0x362   : > { %v2730_v57 = vadd.f32 %v2666_v5, %v7397_v49  ;;  %v2340_v40 = vsub.f32 %v6272_v58, %v6813_v9  ;;  %v2339_v7 = vsub.f32 %v6307_v62, %v6820_v41  ;;  %v2151_v61 = vmul.f32 %v6860_v47, %v6860_v47  ;;  %v7399_v49 = vld [vmem:[#allocation58_spill] sm:$0xff] }
 0x363   : > { %2795 = vst [vmem:[%s6204_s25 + $0x168] sm:$0xff] %v2731_v38  ;;  %v2017_v50 = vpop.xlane.xlu1 %2016  ;;  %v2150_v45 = vmul.f32 %v6864_v51, %v6864_v51  ;;  %v2338_v26 = vsub.f32 %v6300_v37, %v6828_v14  ;;  %v7398_v37 = vld [vmem:[#allocation59_spill] sm:$0xff] }
 0x364   : > { %2794 = vst [vmem:[%s6204_s25 + $0x160] sm:$0xff] %v2730_v57  ;;  %v2089_v33 = vmul.f32 0.0078125, %v2017_v50  ;;  %v2015_v43 = vpop.xlane.xlu0 %2014 }
 0x365   : > { %v2088_v42 = vmul.f32 0.0078125, %v2015_v43 }
 0x366   : > { %v2217_v10 = vsub.f32 %v2089_v33, %v2153_v27  ;;  %v4762_v59 = vpop.eup %4761 }
 0x367   : > { %v2216_v36 = vsub.f32 %v2088_v42, %v2152_v13  ;;  %v2013_v8 = vpop.xlane.xlu1 %2012  ;;  %v4764_v25 = vpop.eup %4763  ;;  %v2533_v23 = vmul.f32 %v4762_v59, %v2341_v60  ;;  %v7400_v60 = vld [vmem:[#allocation49_spill] sm:$0xff] }
 0x368   : > { %v2281_v21 = vmax.f32 %v2217_v10, 0.0  ;;  %v2087_v55 = vmul.f32 0.0078125, %v2013_v8  ;;  %v2011_v56 = vpop.xlane.xlu0 %2010  ;;  %v2532_v3 = vmul.f32 %v4764_v25, %v2340_v40 }
 0x369   : > { %v2280_v32 = vmax.f32 %v2216_v36, 0.0  ;;  %v2086_v28 = vmul.f32 0.0078125, %v2011_v56  ;;  %v2603_v9 = vmul.f32 %v6579_v63, %v2533_v23  ;;  %v7401_v36 = vld [vmem:[#allocation48_spill] sm:$0xff] }
 0x36a   : > { %v4766_v58 = vpop.eup %4765  ;;  %v2409_v62 = vadd.f32 1e-05, %v2281_v21  ;;  %v2215_v41 = vsub.f32 %v2087_v55, %v2151_v61  ;;  %v2602_v2 = vmul.f32 %v6579_v63, %v2532_v3  ;;  %v6885_v63 = vld [vmem:[%s7016_s5] ss:$0 sm:$0xff]  ;;  %v2345_v55 = vsub.f32 %v6342_v31, %v6850_v46 }
 0x36b   : > { %v2531_v6 = vmul.f32 %v4766_v58, %v2339_v7  ;;  %v2408_v24 = vadd.f32 1e-05, %v2280_v32  ;;  %v2214_v19 = vsub.f32 %v2086_v28, %v2150_v45  ;;  %v1768_v48 = vpop.xlane.xlu1 %1767  ;;  %v2673_v22 = vadd.f32 %v6586_v35, %v2603_v9  ;;  %v4768_v29 = vpop.eup %4767 }
 0x36c   : > { %4769 = vrsqrt.f32 %v2409_v62  ;;  %v2279_v17 = vmax.f32 %v2215_v41, 0.0  ;;  %v1766_v53 = vpop.xlane.xlu0 %1765  ;;  %v2672_v5 = vadd.f32 %v6586_v35, %v2602_v2  ;;  %v2530_v38 = vmul.f32 %v4768_v29, %v2338_v26 }
 0x36d   : > { %v2601_v34 = vmul.f32 %v6885_v63, %v2531_v6  ;;  %4771 = vrsqrt.f32 %v2408_v24  ;;  %v2278_v30 = vmax.f32 %v2214_v19, 0.0  ;;  %v2737_v14 = vadd.f32 %v2673_v22, %v7398_v37 }
 0x36e   : > { %v2407_v54 = vadd.f32 1e-05, %v2279_v17  ;;  %v2736_v57 = vadd.f32 %v2672_v5, %v7399_v49  ;;  %v2600_v43 = vmul.f32 %v6885_v63, %v2530_v38  ;;  %v6893_v13 = vmul.f32 0.0078125, %v1768_v48 }
 0x36f   : > { %v2671_v50 = vadd.f32 %v6586_v35, %v2601_v34  ;;  %v2406_v27 = vadd.f32 1e-05, %v2278_v30  ;;  %v1764_v33 = vpop.xlane.xlu1 %1763  ;;  %2801 = vst [vmem:[%s6204_s25 + $0x198] sm:$0xff] %v2737_v14  ;;  %v6897_v59 = vmul.f32 0.0078125, %v1766_v53  ;;  %v6902_v35 = vld [vmem:[%s7017_s6] ss:$0 sm:$0xff]  ;;  %v2344_v28 = vsub.f32 %v6369_v12, %v6853_v39 }
 0x370   : > { %4773 = vrsqrt.f32 %v2407_v54  ;;  %v1762_v42 = vpop.xlane.xlu0 %1761  ;;  %2800 = vst [vmem:[%s6204_s25 + $0x190] sm:$0xff] %v2736_v57  ;;  %v2670_v40 = vadd.f32 %v6902_v35, %v2600_v43  ;;  %v2157_v25 = vmul.f32 %v6893_v13, %v6893_v13  ;;  %v6909_v23 = vmul.f32 0.0078125, %v1764_v33  ;;  %v7403_v43 = vld [vmem:[#allocation70_spill] sm:$0xff] }
 0x371   : > { %v2735_v10 = vadd.f32 %v2671_v50, %v7400_v60  ;;  %4775 = vrsqrt.f32 %v2406_v27  ;;  %v2156_v56 = vmul.f32 %v6897_v59, %v6897_v59  ;;  %v6915_v3 = vmul.f32 0.0078125, %v1762_v42 }
 0x372   : > { %v2734_v8 = vadd.f32 %v2670_v40, %v7401_v36  ;;  %v2343_v62 = vsub.f32 %v6387_v1, %v6860_v47  ;;  %v2155_v46 = vmul.f32 %v6909_v23, %v6909_v23  ;;  %v2342_v1 = vsub.f32 %v6378_v4, %v6864_v51  ;;  %v7402_v4 = vld [vmem:[#allocation71_spill] sm:$0xff] }
 0x373   : > { %2799 = vst [vmem:[%s6204_s25 + $0x188] sm:$0xff] %v2735_v10  ;;  %v2025_v7 = vpop.xlane.xlu1 %2024  ;;  %v2154_v12 = vmul.f32 %v6915_v3, %v6915_v3 }
 0x374   : > { %v2093_v61 = vmul.f32 0.0078125, %v2025_v7  ;;  %v2023_v21 = vpop.xlane.xlu0 %2022  ;;  %2798 = vst [vmem:[%s6204_s25 + $0x180] sm:$0xff] %v2734_v8 }
 0x375   : > { %v2092_v45 = vmul.f32 0.0078125, %v2023_v21 }
 0x376   : > { %v4770_v32 = vpop.eup %4769  ;;  %v2221_v58 = vsub.f32 %v2093_v61, %v2157_v25  ;;  %v7404_v61 = vld [vmem:[#allocation61_spill] sm:$0xff] }
 0x377   : > { %v4772_v9 = vpop.eup %4771  ;;  %v2537_v41 = vmul.f32 %v4770_v32, %v2345_v55  ;;  %v2220_v2 = vsub.f32 %v2092_v45, %v2156_v56  ;;  %v2021_v6 = vpop.xlane.xlu1 %2020  ;;  %v7405_v55 = vld [vmem:[#allocation60_spill] sm:$0xff] }
 0x378   : > { %v2536_v31 = vmul.f32 %v4772_v9, %v2344_v28  ;;  %v2285_v24 = vmax.f32 %v2221_v58, 0.0  ;;  %v2091_v19 = vmul.f32 0.0078125, %v2021_v6  ;;  %v2019_v48 = vpop.xlane.xlu0 %2018  ;;  %v2349_v58 = vsub.f32 %v6429_v15, %v6893_v13 }
 0x379   : > { %v2607_v26 = vmul.f32 %v6885_v63, %v2537_v41  ;;  %v2284_v39 = vmax.f32 %v2220_v2, 0.0  ;;  %v2090_v22 = vmul.f32 0.0078125, %v2019_v48 }
 0x37a   : > { %v4774_v17 = vpop.eup %4773  ;;  %v2606_v47 = vmul.f32 %v6885_v63, %v2536_v31  ;;  %v2413_v53 = vadd.f32 1e-05, %v2285_v24  ;;  %v2219_v29 = vsub.f32 %v2091_v19, %v2155_v46  ;;  %v2348_v24 = vsub.f32 %v6417_v20, %v6897_v59 }
 0x37b   : > { %v4776_v5 = vpop.eup %4775  ;;  %v2677_v34 = vadd.f32 %v6902_v35, %v2607_v26  ;;  %v2535_v30 = vmul.f32 %v4774_v17, %v2343_v62  ;;  %v2412_v37 = vadd.f32 1e-05, %v2284_v39  ;;  %v2218_v14 = vsub.f32 %v2090_v22, %v2154_v12  ;;  %v1776_v38 = vpop.xlane.xlu1 %1775 }
 0x37c   : > { %v2676_v54 = vadd.f32 %v6902_v35, %v2606_v47  ;;  %v2534_v49 = vmul.f32 %v4776_v5, %v2342_v1  ;;  %4777 = vrsqrt.f32 %v2413_v53  ;;  %v2283_v57 = vmax.f32 %v2219_v29, 0.0  ;;  %v1774_v50 = vpop.xlane.xlu0 %1773 }
 0x37d   : > { %v2741_v51 = vadd.f32 %v2677_v34, %v7402_v4  ;;  %v2605_v27 = vmul.f32 %v6885_v63, %v2535_v30  ;;  %4779 = vrsqrt.f32 %v2412_v37  ;;  %v2282_v33 = vmax.f32 %v2218_v14, 0.0 }
 0x37e   : > { %v2740_v42 = vadd.f32 %v2676_v54, %v7403_v43  ;;  %v2604_v60 = vmul.f32 %v6885_v63, %v2534_v49  ;;  %v2411_v10 = vadd.f32 1e-05, %v2283_v57  ;;  %v6950_v9 = vmul.f32 0.0078125, %v1776_v38 }
 0x37f   : > { %2805 = vst [vmem:[%s6204_s25 + $0x1b8] sm:$0xff] %v2741_v51  ;;  %v2675_v40 = vadd.f32 %v6902_v35, %v2605_v27  ;;  %v2410_v7 = vadd.f32 1e-05, %v2282_v33  ;;  %v1772_v36 = vpop.xlane.xlu1 %1771  ;;  %v6958_v19 = vmul.f32 0.0078125, %v1774_v50  ;;  %v2347_v39 = vsub.f32 %v6451_v44, %v6909_v23  ;;  %v7407_v33 = vld [vmem:[#allocation82_spill] sm:$0xff] }
 0x380   : > { %2804 = vst [vmem:[%s6204_s25 + $0x1b0] sm:$0xff] %v2740_v42  ;;  %v2674_v8 = vadd.f32 %v6902_v35, %v2604_v60  ;;  %4781 = vrsqrt.f32 %v2411_v10  ;;  %v1770_v25 = vpop.xlane.xlu0 %1769  ;;  %v6942_v45 = vmul.f32 0.0078125, %v1772_v36  ;;  %v2161_v17 = vmul.f32 %v6950_v9, %v6950_v9  ;;  %v7408_v36 = vld [vmem:[#allocation73_spill] sm:$0xff] }
 0x381   : > { %v2739_v21 = vadd.f32 %v2675_v40, %v7404_v61  ;;  %4783 = vrsqrt.f32 %v2410_v7  ;;  %v6944_v32 = vmul.f32 0.0078125, %v1770_v25  ;;  %v2346_v34 = vsub.f32 %v6421_v52, %v6915_v3  ;;  %v7406_v52 = vld [vmem:[#allocation83_spill] sm:$0xff]  ;;  %v7409_v61 = vld [vmem:[#allocation72_spill] sm:$0xff] }
 0x382   : > { %v2738_v56 = vadd.f32 %v2674_v8, %v7405_v55  ;;  %v2159_v41 = vmul.f32 %v6942_v45, %v6942_v45  ;;  %v2160_v44 = vmul.f32 %v6958_v19, %v6958_v19  ;;  %v2351_v55 = vsub.f32 %v6531_v0, %v6942_v45 }
 0x383   : > { %2803 = vst [vmem:[%s6204_s25 + $0x1a8] sm:$0xff] %v2739_v21  ;;  %v2029_v28 = vpop.xlane.xlu1 %2028  ;;  %v2158_v2 = vmul.f32 %v6944_v32, %v6944_v32  ;;  %v2352_v0 = vsub.f32 %v6495_v11, %v6958_v19  ;;  %v7412_v11 = vld [vmem:[#allocation93_spill] sm:$0xff] }
 0x384   : > { %2802 = vst [vmem:[%s6204_s25 + $0x1a0] sm:$0xff] %v2738_v56  ;;  %v2027_v62 = vpop.xlane.xlu0 %2026  ;;  %v2095_v6 = vmul.f32 0.0078125, %v2029_v28  ;;  %v2350_v28 = vsub.f32 %v6524_v16, %v6944_v32 }
 0x385   : > { %v2094_v31 = vmul.f32 0.0078125, %v2027_v62 }
 0x386   : > { %v4778_v46 = vpop.eup %4777  ;;  %v2223_v15 = vsub.f32 %v2095_v6, %v2159_v41  ;;  %v2353_v41 = vsub.f32 %v6499_v18, %v6950_v9  ;;  %v7410_v9 = vld [vmem:[#allocation85_spill] sm:$0xff] }
 0x387   : > { %v4780_v48 = vpop.eup %4779  ;;  %v2541_v26 = vmul.f32 %v4778_v46, %v2349_v58  ;;  %v2222_v13 = vsub.f32 %v2094_v31, %v2158_v2  ;;  %v2033_v12 = vpop.xlane.xlu1 %2032 }
 0x388   : > { %v2540_v22 = vmul.f32 %v4780_v48, %v2348_v24  ;;  %v2097_v1 = vmul.f32 0.0078125, %v2033_v12  ;;  %v2031_v47 = vpop.xlane.xlu0 %2030  ;;  %v2287_v29 = vmax.f32 %v2223_v15, 0.0  ;;  %v7411_v15 = vld [vmem:[#allocation84_spill] sm:$0xff] }
 0x389   : > { %v2611_v53 = vmul.f32 %v6885_v63, %v2541_v26  ;;  %v2286_v20 = vmax.f32 %v2222_v13, 0.0  ;;  %v2096_v59 = vmul.f32 0.0078125, %v2031_v47 }
 0x38a   : > { %v4782_v5 = vpop.eup %4781  ;;  %v2610_v30 = vmul.f32 %v6885_v63, %v2540_v22  ;;  %v2225_v23 = vsub.f32 %v2097_v1, %v2161_v17  ;;  %v2415_v54 = vadd.f32 1e-05, %v2287_v29  ;;  %v7413_v17 = vld [vmem:[#allocation92_spill] sm:$0xff] }
 0x38b   : > { %v4784_v37 = vpop.eup %4783  ;;  %v2681_v14 = vadd.f32 %v6902_v35, %v2611_v53  ;;  %v2539_v38 = vmul.f32 %v4782_v5, %v2347_v39  ;;  %v2414_v49 = vadd.f32 1e-05, %v2286_v20  ;;  %v2224_v51 = vsub.f32 %v2096_v59, %v2160_v44 }
 0x38c   : > { %v2680_v57 = vadd.f32 %v6902_v35, %v2610_v30  ;;  %v2538_v50 = vmul.f32 %v4784_v37, %v2346_v34  ;;  %v2289_v4 = vmax.f32 %v2225_v23, 0.0  ;;  %4785 = vrsqrt.f32 %v2415_v54 }
 0x38d   : > { %v2745_v3 = vadd.f32 %v2681_v14, %v7406_v52  ;;  %v2609_v27 = vmul.f32 %v6885_v63, %v2539_v38  ;;  %4787 = vrsqrt.f32 %v2414_v49  ;;  %v2288_v40 = vmax.f32 %v2224_v51, 0.0 }
 0x38e   : > { %v2744_v43 = vadd.f32 %v2680_v57, %v7407_v33  ;;  %v2608_v42 = vmul.f32 %v6885_v63, %v2538_v50  ;;  %v2417_v60 = vadd.f32 1e-05, %v2289_v4 }
 0x38f   : > { %2809 = vst [vmem:[%s6204_s25 + $0x1d8] sm:$0xff] %v2745_v3  ;;  %v2679_v10 = vadd.f32 %v6902_v35, %v2609_v27  ;;  %v2416_v25 = vadd.f32 1e-05, %v2288_v40 }
 0x390   : > { %2808 = vst [vmem:[%s6204_s25 + $0x1d0] sm:$0xff] %v2744_v43  ;;  %v2678_v7 = vadd.f32 %v6902_v35, %v2608_v42  ;;  %4789 = vrsqrt.f32 %v2417_v60 }
 0x391   : > { %v2743_v8 = vadd.f32 %v2679_v10, %v7408_v36  ;;  %4791 = vrsqrt.f32 %v2416_v25 }
 0x392   : > { %v2742_v21 = vadd.f32 %v2678_v7, %v7409_v61 }
 0x393   : > { %2807 = vst [vmem:[%s6204_s25 + $0x1c8] sm:$0xff] %v2743_v8 }
 0x394   : > { %2806 = vst [vmem:[%s6204_s25 + $0x1c0] sm:$0xff] %v2742_v21 }
 0x396   : > { %v4786_v56 = vpop.eup %4785 }
 0x397   : > { %v4788_v58 = vpop.eup %4787  ;;  %v2543_v62 = vmul.f32 %v4786_v56, %v2351_v55 }
 0x398   : > { %v2542_v2 = vmul.f32 %v4788_v58, %v2350_v28 }
 0x399   : > { %v2613_v31 = vmul.f32 %v6885_v63, %v2543_v62 }
 0x39a   : > { %v4790_v6 = vpop.eup %4789  ;;  %v2612_v46 = vmul.f32 %v6885_v63, %v2542_v2 }
 0x39b   : > { %v2545_v24 = vmul.f32 %v4790_v6, %v2353_v41  ;;  %v2683_v16 = vadd.f32 %v6902_v35, %v2613_v31  ;;  %v4792_v45 = vpop.eup %4791 }
 0x39c   : > { %v2682_v32 = vadd.f32 %v6902_v35, %v2612_v46  ;;  %v2544_v26 = vmul.f32 %v4792_v45, %v2352_v0 }
 0x39d   : > { %v2615_v18 = vmul.f32 %v6885_v63, %v2545_v24  ;;  %v2747_v48 = vadd.f32 %v2683_v16, %v7410_v9 }
 0x39e   : > { %v2746_v13 = vadd.f32 %v2682_v32, %v7411_v15  ;;  %v2614_v39 = vmul.f32 %v6885_v63, %v2544_v26 }
 0x39f   : > { %v2685_v12 = vadd.f32 %v6902_v35, %v2615_v18  ;;  %2811 = vst [vmem:[%s6204_s25 + $0x1e8] sm:$0xff] %v2747_v48 }
 0x3a0   : > { %2810 = vst [vmem:[%s6204_s25 + $0x1e0] sm:$0xff] %v2746_v13  ;;  %v2684_v22 = vadd.f32 %v6902_v35, %v2614_v39 }
 0x3a1   : > { %v2749_v19 = vadd.f32 %v2685_v12, %v7412_v11 }
 0x3a2   : > { %v2748_v1 = vadd.f32 %v2684_v22, %v7413_v17 }
 0x3a3   : > { %2813 = vst [vmem:[%s6204_s25 + $0x1f8] sm:$0xff] %v2749_v19 }
 0x3a4   : > { %2812 = vst [vmem:[%s6204_s25 + $0x1f0] sm:$0xff] %v2748_v1 }
 0x3a5 PF: > { %s20_s30 = sadd.s32 1, %s4806_s30  }
 0x3a6   : > { %p17_p4 = scmp.ge.s32.totalorder %s20_s30, 4  }
 0x3a8   :  { %19 = sbr.rel (!%p17_p4) target bundleno = 1 (0x1), region = 94 }

// kernel: mesh_graph_encoder_forward.3
= control target key start
LH: loop header
LB: loop body
LE: loop exit
PB: predicated region body
PF: predicated region fallthrough
CT: control target
= control target key end

     0   :  { %s7490_s27 = smov 0   ;;  %s10284_s0 = inlined_call_operand.vmem [shape: bf16[1024,128], index: 0, kind: input, shape index: {}]   ;;  %s10285_s1 = inlined_call_operand.vmem [shape: bf16[1024,128], index: 1, kind: input, shape index: {}]   ;;  %s10286_s2 = inlined_call_operand.vmem [shape: s32[1,1024], index: 2, kind: input, shape index: {}]   ;;  %s10287_s3 = inlined_call_operand.vmem [shape: s32[1024,1], index: 3, kind: input, shape index: {}]   ;;  %s10288_s4 = inlined_call_operand.vmem [shape: f32[64,128], index: 4, kind: input, shape index: {}, may-alias: {4,18}]   ;;  %s10289_s5 = inlined_call_operand.vmem [shape: bf16[128,128], index: 5, kind: input, shape index: {}]   ;;  %s10290_s6 = inlined_call_operand.vmem [shape: bf16[128,128], index: 6, kind: input, shape index: {}]   ;;  %s10291_s7 = inlined_call_operand.vmem [shape: f32[1,128], index: 7, kind: input, shape index: {}]   ;;  %s10292_s8 = inlined_call_operand.vmem [shape: bf16[128,128], index: 8, kind: input, shape index: {}]   ;;  %s10293_s9 = inlined_call_operand.vmem [shape: f32[1,128], index: 9, kind: input, shape index: {}]   ;;  %s10294_s10 = inlined_call_operand.vmem [shape: f32[1,128], index: 10, kind: input, shape index: {}]   ;;  %s10295_s11 = inlined_call_operand.vmem [shape: f32[1,128], index: 11, kind: input, shape index: {}]   ;;  %s10296_s12 = inlined_call_operand.vmem [shape: bf16[256,128], index: 12, kind: input, shape index: {}]   ;;  %s10297_s13 = inlined_call_operand.vmem [shape: f32[1,128], index: 13, kind: input, shape index: {}]   ;;  %s10298_s14 = inlined_call_operand.vmem [shape: bf16[128,128], index: 14, kind: input, shape index: {}]   ;;  %s10299_s15 = inlined_call_operand.vmem [shape: f32[1,128], index: 15, kind: input, shape index: {}]   ;;  %s10300_s16 = inlined_call_operand.vmem [shape: f32[1,128], index: 16, kind: input, shape index: {}]   ;;  %s10301_s17 = inlined_call_operand.vmem [shape: f32[1,128], index: 17, kind: input, shape index: {}]   ;;  %s10302_s18 = inlined_call_operand.vmem [shape: f32[64,128], index: 18, kind: output, shape index: {}, may-alias: {4,18}]  }
   0x1   :  { %10361 = sst [smem:[#allocation36_spill]] %s10284_s0 }
   0x2   :  { %10362 = sst [smem:[#allocation37_spill]] %s10285_s1 }
   0x3   :  { %10363 = sst [smem:[#allocation38_spill]] %s10286_s2 }
   0x4   :  { %10364 = sst [smem:[#allocation39_spill]] %s10297_s13 }
   0x5   :  { %10365 = sst [smem:[#allocation40_spill]] %s10299_s15 }
   0x6   :  { %10366 = sst [smem:[#allocation41_spill]] %s10300_s16 }
   0x7   :  { %10367 = sst [smem:[#allocation42_spill]] %s10301_s17 }
   0x8   :  { %10368 = sst [smem:[#allocation43_spill]] %s10302_s18 }
   0x9 LB: > { %10369 = sst [smem:[#allocation4_spill]] %s7389_s27  ;;  %s7496_s28 = sadd.s32 4294967295, %s7389_s27   ;;  %s7389_s27 = sphi %s7490_s27, %s28_s27  }
   0xa   : > { %p5577_p0 = scmp.ge.s32.totalorder %s7389_s27, 1  ;;  %p540_p1 = scmp.lt.s32.totalorder %s7389_s27, 3 }
   0xc   : > { %p541_p2 = pnand %p5577_p0, %p540_p1 }
   0xe   : > { %544 = sbr.rel (%p541_p2) target bundleno = 2270 (0x8de), region = 92 }
  0x15   : > { %s5578_s29 = sshll.u32 %s7496_s28, 6  ;;  %s5582_s30 = sshll.u32 %s7496_s28, 2 }
  0x16   : > { %p604_p3 = scmp.lt.s32.totalorder %s5578_s29, 127  ;;  %p616_p4 = scmp.lt.s32.totalorder %s5582_s30, 7 }
  0x17   : > { %s10370_s21 = sld [smem:[#allocation36_spill]]  ;;  %s10371_s24 = sld [smem:[#allocation37_spill]] }
  0x18   : > { %s10569_s29 = smov (!%p604_p3, %s5578_s29), 127  ;;  %s10571_s30 = smov (!%p616_p4, %s5582_s30), 7 }
  0x19   : > { %s5579_s0 = sshll.u32 %s10569_s29, 2  ;;  %s5584_s19 = sshll.u32 %s10569_s29, 3 }
  0x1a   : > { %s10372_s18 = sld [smem:[#allocation38_spill]]  ;;  %s7521_s13 = scalar_lea.vmem %s10287_s3, %s5584_s19 }
  0x1b   : > { %p5585_p5 = scmp.ne.s32.totalorder %s7496_s28, 0 }
  0x1c   : > { %v6864_v0 = vld [vmem:[%s10290_s6] sm:$0xff] (!%p5585_p5)   ;;  %v7391_v1 = vmov (!%p5585_p5), 0.0   ;;  %v6865_v2 = vld [vmem:[%s10290_s6 + $0x8] sm:$0xff] (!%p5585_p5)   ;;  %v6866_v3 = vld [vmem:[%s10290_s6 + $0x10] sm:$0xff] (!%p5585_p5)  }
  0x1d   : > { %s7507_s22 = scalar_lea.vmem %s10370_s21, %s5579_s0  ;;  %s7512_s25 = scalar_lea.vmem %s10371_s24, %s5579_s0  ;;  %631 = vst [vmem:[#allocation2] sm:$0xff] (!%p5585_p5), %v7391_v1  ;;  %632 = vst [vmem:[#allocation2 + $0x8] sm:$0xff] (!%p5585_p5), %v7391_v1  ;;  %6428 = vmatprep.subr.bf16.mxu0 (!%p5585_p5), %v6864_v0  ;;  %6828 = vmatprep.subr.bf16.mxu1 (!%p5585_p5), %v6864_v0  ;;  %v6867_v4 = vld [vmem:[%s10290_s6 + $0x18] sm:$0xff] (!%p5585_p5)   ;;  %v639_v5 = vld [vmem:[%s10288_s4] sm:$0xff] (!%p5585_p5) }
  0x1e   : > { %630 = sbr.rel (%p5585_p5) target bundleno = 277 (0x115), region = 96  ;;  %633 = vst [vmem:[#allocation2 + $0x10] sm:$0xff] (!%p5585_p5), %v7391_v1  ;;  %634 = vst [vmem:[#allocation2 + $0x18] sm:$0xff] (!%p5585_p5), %v7391_v1  ;;  %6429 = vmatpush3.bf16.msra.mxu0 (!%p5585_p5), %v6864_v0  ;;  %6836 = vmatpush3.bf16.msra.mxu1 (!%p5585_p5), %v6864_v0  ;;  %v640_v6 = vld [vmem:[%s10288_s4 + $0x8] sm:$0xff] (!%p5585_p5)  ;;  %v643_v7 = vld [vmem:[%s10288_s4 + $0x20] sm:$0xff] (!%p5585_p5) }
  0x1f   : > { %635 = vst [vmem:[#allocation2 + $0x20] sm:$0xff] (!%p5585_p5), %v7391_v1  ;;  %636 = vst [vmem:[#allocation2 + $0x28] sm:$0xff] (!%p5585_p5), %v7391_v1  ;;  %6430 = vmatprep.subr.bf16.mxu0 (!%p5585_p5), %v6865_v2  ;;  %6829 = vmatprep.subr.bf16.mxu1 (!%p5585_p5), %v6865_v2  ;;  %v647_v8 = vpack.c.bf16 (!%p5585_p5), %v640_v6, %v639_v5  ;;  %v644_v9 = vld [vmem:[%s10288_s4 + $0x28] sm:$0xff] (!%p5585_p5)  ;;  %v6868_v11 = vld [vmem:[%s10290_s6 + $0x20] sm:$0xff] (!%p5585_p5)  }
  0x20   : > { %s618_s17 = scalar_lea.vmem %s10372_s18, %s10571_s30  ;;  %637 = vst [vmem:[#allocation2 + $0x30] sm:$0xff] (!%p5585_p5), %v7391_v1  ;;  %638 = vst [vmem:[#allocation2 + $0x38] sm:$0xff] (!%p5585_p5), %v7391_v1  ;;  %v649_v10 = vpack.c.bf16 (!%p5585_p5), %v644_v9, %v643_v7  ;;  %v6869_v12 = vld [vmem:[%s10290_s6 + $0x28] sm:$0xff] (!%p5585_p5)   ;;  %v6870_v13 = vld [vmem:[%s10290_s6 + $0x30] sm:$0xff] (!%p5585_p5)  }
  0x21   : > { %6444 = vmatprep.mubr.bf16.mxu0 (!%p5585_p5), %v647_v8  ;;  %v6871_v14 = vld [vmem:[%s10290_s6 + $0x38] sm:$0xff] (!%p5585_p5)   ;;  %v641_v15 = vld [vmem:[%s10288_s4 + $0x10] sm:$0xff] (!%p5585_p5) }
  0x22   : > { %6431 = vmatpush3.bf16.msra.mxu0 (!%p5585_p5), %v6865_v2  ;;  %6837 = vmatpush3.bf16.msra.mxu1 (!%p5585_p5), %v6865_v2  ;;  %v642_v16 = vld [vmem:[%s10288_s4 + $0x18] sm:$0xff] (!%p5585_p5)  ;;  %v645_v17 = vld [vmem:[%s10288_s4 + $0x30] sm:$0xff] (!%p5585_p5) }
  0x23   : > { %6432 = vmatprep.subr.bf16.mxu0 (!%p5585_p5), %v6866_v3  ;;  %6830 = vmatprep.subr.bf16.mxu1 (!%p5585_p5), %v6866_v3  ;;  %v646_v18 = vld [vmem:[%s10288_s4 + $0x38] sm:$0xff] (!%p5585_p5)  ;;  %v648_v19 = vpack.c.bf16 (!%p5585_p5), %v642_v16, %v641_v15 }
  0x24   : > { %6448 = vmatprep.mubr.bf16.mxu1 (!%p5585_p5), %v649_v10  ;;  %v650_v20 = vpack.c.bf16 (!%p5585_p5), %v646_v18, %v645_v17 }
  0x26   : > { %6433 = vmatpush3.bf16.msra.mxu0 %v6866_v3  ;;  %6838 = vmatpush3.bf16.msra.mxu1 %v6866_v3 }
  0x27   : > { %6434 = vmatprep.subr.bf16.mxu0 %v6867_v4  ;;  %6831 = vmatprep.subr.bf16.mxu1 %v6867_v4 }
  0x2a   : > { %6435 = vmatpush3.bf16.msra.mxu0 %v6867_v4  ;;  %6839 = vmatpush3.bf16.msra.mxu1 %v6867_v4 }
  0x2b   : > { %6436 = vmatprep.subr.bf16.mxu0 %v6868_v11  ;;  %6832 = vmatprep.subr.bf16.mxu1 %v6868_v11 }
  0x2e   : > { %6437 = vmatpush3.bf16.msra.mxu0 %v6868_v11  ;;  %6840 = vmatpush3.bf16.msra.mxu1 %v6868_v11 }
  0x2f   : > { %6438 = vmatprep.subr.bf16.mxu0 %v6869_v12  ;;  %6833 = vmatprep.subr.bf16.mxu1 %v6869_v12 }
  0x32   : > { %6439 = vmatpush3.bf16.msra.mxu0 %v6869_v12  ;;  %6841 = vmatpush3.bf16.msra.mxu1 %v6869_v12 }
  0x33   : > { %6440 = vmatprep.subr.bf16.mxu0 %v6870_v13  ;;  %6834 = vmatprep.subr.bf16.mxu1 %v6870_v13 }
  0x36   : > { %6441 = vmatpush3.bf16.msra.mxu0 %v6870_v13  ;;  %6842 = vmatpush3.bf16.msra.mxu1 %v6870_v13 }
  0x37   : > { %6442 = vmatprep.subr.bf16.mxu0 %v6871_v14  ;;  %6835 = vmatprep.subr.bf16.mxu1 %v6871_v14 }
  0x3a   : > { %6443 = vmatpush3.bf16.msra.mxu0 %v6871_v14  ;;  %6843 = vmatpush3.bf16.msra.mxu1 %v6871_v14 }
  0x3d   : > { %6445 = vmatmul.mubr.bf16.vlgmr.msra.gmra.mrb[0].mxu0 %v648_v19  ;;  %6449 = vmatmul.mubr.bf16.vlgmr.msra.gmra.mrb[0].mxu1 %v650_v20 }
 0x110   : > { %v6446_v21 = vpop.f32.mrb[0].mxu0  ;;  %v6450_v22 = vpop.f32.mrb[0].mxu1 }
 0x111   : > { %782 = vst [vmem:[#allocation3 + $0x10] sm:$0xff] %v6446_v21  ;;  %786 = vst [vmem:[#allocation3 + $0x30] sm:$0xff] %v6450_v22  ;;  %v749_v23 = vpop.f32.mrb[1].mxu0  ;;  %v765_v24 = vpop.f32.mrb[1].mxu1 }
 0x112   : > { %780 = vst [vmem:[#allocation3] sm:$0xff] %v749_v23  ;;  %784 = vst [vmem:[#allocation3 + $0x20] sm:$0xff] %v765_v24  ;;  %v6447_v25 = vpop.f32.mrb[2].mxu0  ;;  %v6451_v26 = vpop.f32.mrb[2].mxu1 }
 0x113   : > { %783 = vst [vmem:[#allocation3 + $0x18] sm:$0xff] %v6447_v25  ;;  %787 = vst [vmem:[#allocation3 + $0x38] sm:$0xff] %v6451_v26  ;;  %v752_v27 = vpop.f32.mrb[3].mxu0  ;;  %v768_v28 = vpop.f32.mrb[3].mxu1 }
 0x114   : > { %781 = vst [vmem:[#allocation3 + $0x8] sm:$0xff] %v752_v27  ;;  %785 = vst [vmem:[#allocation3 + $0x28] sm:$0xff] %v768_v28 }
 0x115 PF: > { %v840_v29 = vld [vmem:[%s7521_s13 + $0x190] sm:$0xff]  ;;  %v838_v30 = vld [vmem:[%s7521_s13 + $0x180] sm:$0xff]  ;;  %v7392_v31 = vmov 0   ;;  %v841_v32 = vld [vmem:[%s7521_s13 + $0x198] sm:$0xff]  ;;  %vm1246_vm0 = vcmask 523264   ;;  %p5902_p6 = scmp.ne.s32.totalorder %s7496_s28, 1 }
 0x116   : > { %6873 = vset.pattern.permute.xlu1 %v7392_v31  ;;  %6872 = vset.pattern.permute.xlu0 %v7392_v31  ;;  %v839_v33 = vld [vmem:[%s7521_s13 + $0x188] sm:$0xff]  ;;  %v842_v35 = vld [vmem:[%s7521_s13 + $0x1a0] sm:$0xff]  ;;  %v845_v36 = vld [vmem:[%s7521_s13 + $0x1b8] sm:$0xff]  ;;  %s10562_s21 = sld [smem:[#allocation39_spill]] (!%p5902_p6)  ;;  %s10563_s23 = sld [smem:[#allocation40_spill]] (!%p5902_p6) }
 0x117   : > { %1005 = vperm.xlu1 %6873, %v840_v29   ;;  %999 = vperm.xlu0 %6872, %v838_v30   ;;  %v843_v34 = vld [vmem:[%s7521_s13 + $0x1a8] sm:$0xff]  ;;  %v844_v37 = vld [vmem:[%s7521_s13 + $0x1b0] sm:$0xff]  ;;  %v846_v39 = vld [vmem:[%s7521_s13 + $0x1c0] sm:$0xff]  ;;  %s10564_s29 = sld [smem:[#allocation41_spill]] (!%p5902_p6)  ;;  %s10565_s15 = sld [smem:[#allocation42_spill]] (!%p5902_p6) }
 0x118   : > { %v847_v38 = vld [vmem:[%s7521_s13 + $0x1c8] sm:$0xff]  ;;  %v849_v40 = vld [vmem:[%s7521_s13 + $0x1d8] sm:$0xff]  ;;  %v848_v41 = vld [vmem:[%s7521_s13 + $0x1d0] sm:$0xff]  ;;  %s10566_s16 = sld [smem:[#allocation43_spill]] (!%p5902_p6) }
 0x119   : > { %v1238_v42 = vld [vmem:[#allocation3] sm:$0xff]  ;;  %v1240_v45 = vld [vmem:[#allocation3 + $0x10] sm:$0xff]  ;;  %v851_v49 = vld [vmem:[%s7521_s13 + $0x1e8] sm:$0xff] }
 0x11a   : > { %v1241_v46 = vld [vmem:[#allocation3 + $0x18] sm:$0xff]  ;;  %v1242_v48 = vld [vmem:[#allocation3 + $0x20] sm:$0xff]  ;;  %v1244_v54 = vld [vmem:[#allocation3 + $0x30] sm:$0xff] }
 0x11b   : > { %1008 = vperm.xlu1 %6873, %v841_v32   ;;  %1002 = vperm.xlu0 %6872, %v839_v33   ;;  %v1239_v43 = vld [vmem:[#allocation3 + $0x8] sm:$0xff]  ;;  %v6752_v47 = vpack.c.bf16 %v1241_v46, %v1240_v45  ;;  %v850_v50 = vld [vmem:[%s7521_s13 + $0x1e0] sm:$0xff]  ;;  %v853_v52 = vld [vmem:[%s7521_s13 + $0x1f8] sm:$0xff] }
 0x11c   : > { %v6748_v44 = vpack.c.bf16 %v1239_v43, %v1238_v42  ;;  %v1243_v51 = vld [vmem:[#allocation3 + $0x28] sm:$0xff]  ;;  %v1245_v55 = vld [vmem:[#allocation3 + $0x38] sm:$0xff]  ;;  %v852_v56 = vld [vmem:[%s7521_s13 + $0x1f0] sm:$0xff] }
 0x11d   : > { %v6756_v53 = vpack.c.bf16 %v1243_v51, %v1242_v48  ;;  %v791_v57 = vld [vmem:[%s7521_s13 + $0x8] sm:$0xff]  ;;  %v6760_v58 = vpack.c.bf16 %v1245_v55, %v1244_v54  ;;  %v790_v59 = vld [vmem:[%s7521_s13] sm:$0xff]  ;;  %v793_v61 = vld [vmem:[%s7521_s13 + $0x18] sm:$0xff] }
 0x11e   : > { %6844 = vmatprep.subr.bf16.mxu1 %v6748_v44  ;;  %6749 = vmatprep.subr.bf16.mxu0 %v6748_v44  ;;  %v7593_v60 = vld [vmem:[%s10289_s5] sm:$0xff]   ;;  %v792_v62 = vld [vmem:[%s7521_s13 + $0x10] sm:$0xff]  ;;  %v795_v63 = vld [vmem:[%s7521_s13 + $0x28] sm:$0xff] }
 0x11f   : > { %1014 = vperm.xlu1 %6873, %v843_v34   ;;  %1011 = vperm.xlu0 %6872, %v842_v35   ;;  %v794_v0 = vld [vmem:[%s7521_s13 + $0x20] sm:$0xff]  ;;  %v797_v1 = vld [vmem:[%s7521_s13 + $0x38] sm:$0xff]  ;;  %v796_v2 = vld [vmem:[%s7521_s13 + $0x30] sm:$0xff] }
 0x120   : > { %6848 = vmatpush3.bf16.msra.mxu1 %v6748_v44  ;;  %6751 = vmatpush3.bf16.msra.mxu0 %v6748_v44  ;;  %v799_v3 = vld [vmem:[%s7521_s13 + $0x48] sm:$0xff]  ;;  %v798_v4 = vld [vmem:[%s7521_s13 + $0x40] sm:$0xff]  ;;  %v801_v5 = vld [vmem:[%s7521_s13 + $0x58] sm:$0xff] }
 0x121   : > { %6845 = vmatprep.subr.bf16.mxu1 %v6752_v47  ;;  %6753 = vmatprep.subr.bf16.mxu0 %v6752_v47  ;;  %v800_v6 = vld [vmem:[%s7521_s13 + $0x50] sm:$0xff]  ;;  %v803_v7 = vld [vmem:[%s7521_s13 + $0x68] sm:$0xff]  ;;  %v802_v8 = vld [vmem:[%s7521_s13 + $0x60] sm:$0xff] }
 0x122   : > { %v805_v9 = vld [vmem:[%s7521_s13 + $0x78] sm:$0xff]  ;;  %v804_v10 = vld [vmem:[%s7521_s13 + $0x70] sm:$0xff]  ;;  %v807_v11 = vld [vmem:[%s7521_s13 + $0x88] sm:$0xff] }
 0x123   : > { %1020 = vperm.xlu1 %6873, %v845_v36   ;;  %1017 = vperm.xlu0 %6872, %v844_v37   ;;  %v806_v12 = vld [vmem:[%s7521_s13 + $0x80] sm:$0xff]  ;;  %v809_v13 = vld [vmem:[%s7521_s13 + $0x98] sm:$0xff]  ;;  %v808_v14 = vld [vmem:[%s7521_s13 + $0x90] sm:$0xff] }
 0x124   : > { %6849 = vmatpush3.bf16.msra.mxu1 %v6752_v47  ;;  %6755 = vmatpush3.bf16.msra.mxu0 %v6752_v47  ;;  %v811_v15 = vld [vmem:[%s7521_s13 + $0xa8] sm:$0xff]  ;;  %v810_v16 = vld [vmem:[%s7521_s13 + $0xa0] sm:$0xff]  ;;  %v813_v17 = vld [vmem:[%s7521_s13 + $0xb8] sm:$0xff]  ;;  %v7393_v47 = vmov 0.0  }
 0x125   : > { %6846 = vmatprep.subr.bf16.mxu1 %v6756_v53  ;;  %6757 = vmatprep.subr.bf16.mxu0 %v6756_v53  ;;  %v812_v18 = vld [vmem:[%s7521_s13 + $0xb0] sm:$0xff]  ;;  %v815_v19 = vld [vmem:[%s7521_s13 + $0xc8] sm:$0xff]  ;;  %v814_v20 = vld [vmem:[%s7521_s13 + $0xc0] sm:$0xff] }
 0x126   : > { %v817_v21 = vld [vmem:[%s7521_s13 + $0xd8] sm:$0xff]  ;;  %v816_v22 = vld [vmem:[%s7521_s13 + $0xd0] sm:$0xff]  ;;  %v819_v23 = vld [vmem:[%s7521_s13 + $0xe8] sm:$0xff] }
 0x127   : > { %1026 = vperm.xlu1 %6873, %v847_v38   ;;  %1023 = vperm.xlu0 %6872, %v846_v39   ;;  %v818_v24 = vld [vmem:[%s7521_s13 + $0xe0] sm:$0xff]  ;;  %v821_v25 = vld [vmem:[%s7521_s13 + $0xf8] sm:$0xff]  ;;  %v820_v26 = vld [vmem:[%s7521_s13 + $0xf0] sm:$0xff] }
 0x128   : > { %6850 = vmatpush3.bf16.msra.mxu1 %v6756_v53  ;;  %6759 = vmatpush3.bf16.msra.mxu0 %v6756_v53  ;;  %v823_v27 = vld [vmem:[%s7521_s13 + $0x108] sm:$0xff]  ;;  %v822_v28 = vld [vmem:[%s7521_s13 + $0x100] sm:$0xff]  ;;  %v825_v29 = vld [vmem:[%s7521_s13 + $0x118] sm:$0xff] }
 0x129   : > { %6847 = vmatprep.subr.bf16.mxu1 %v6760_v58  ;;  %6761 = vmatprep.subr.bf16.mxu0 %v6760_v58  ;;  %v824_v30 = vld [vmem:[%s7521_s13 + $0x110] sm:$0xff]  ;;  %v827_v31 = vld [vmem:[%s7521_s13 + $0x128] sm:$0xff]  ;;  %v826_v32 = vld [vmem:[%s7521_s13 + $0x120] sm:$0xff] }
 0x12a   : > { %v829_v33 = vld [vmem:[%s7521_s13 + $0x138] sm:$0xff]  ;;  %v828_v34 = vld [vmem:[%s7521_s13 + $0x130] sm:$0xff]  ;;  %v831_v35 = vld [vmem:[%s7521_s13 + $0x148] sm:$0xff] }
 0x12b   : > { %1032 = vperm.xlu1 %6873, %v849_v40   ;;  %1029 = vperm.xlu0 %6872, %v848_v41   ;;  %v830_v36 = vld [vmem:[%s7521_s13 + $0x140] sm:$0xff]  ;;  %v833_v37 = vld [vmem:[%s7521_s13 + $0x158] sm:$0xff]  ;;  %v832_v38 = vld [vmem:[%s7521_s13 + $0x150] sm:$0xff]  ;;  %v10305_v41 = vlaneseq }
 0x12c   : > { %6851 = vmatpush3.bf16.msra.mxu1 %v6760_v58  ;;  %6763 = vmatpush3.bf16.msra.mxu0 %v6760_v58  ;;  %v835_v39 = vld [vmem:[%s7521_s13 + $0x168] sm:$0xff]  ;;  %v834_v40 = vld [vmem:[%s7521_s13 + $0x160] sm:$0xff]  ;;  %v837_v42 = vld [vmem:[%s7521_s13 + $0x178] sm:$0xff] }
 0x12d   : > { %6564 = vmatprep.subr.bf16.mxu1 %v7593_v60  ;;  %v836_v43 = vld [vmem:[%s7521_s13 + $0x170] sm:$0xff]  ;;  %v7643_v44 = vand.u32 127, %v10305_v41  ;;  %v8023_v41 = vld [vmem:[%s7512_s25 + $0x88] sm:$0xff]  }
 0x12f   : > { %1038 = vperm.xlu1 %6873, %v851_v49   ;;  %1035 = vperm.xlu0 %6872, %v850_v50  }
 0x133   : > { %1044 = vperm.xlu1 %6873, %v853_v52   ;;  %1041 = vperm.xlu0 %6872, %v852_v56   ;;  %v6875_v52 = vld [vmem:[%s10289_s5 + $0x8] sm:$0xff]   ;;  %v6876_v56 = vld [vmem:[%s10289_s5 + $0x10] sm:$0xff]  }
 0x137   : > { %858 = vperm.xlu1 %6873, %v791_v57   ;;  %855 = vperm.xlu0 %6872, %v790_v59  }
 0x13b   : > { %864 = vperm.xlu1 %6873, %v793_v61   ;;  %861 = vperm.xlu0 %6872, %v792_v62  }
 0x13f   : > { %870 = vperm.xlu1 %6873, %v795_v63   ;;  %867 = vperm.xlu0 %6872, %v794_v0  }
 0x143   : > { %876 = vperm.xlu1 %6873, %v797_v1   ;;  %873 = vperm.xlu0 %6872, %v796_v2   ;;  %v6878_v2 = vld [vmem:[%s10289_s5 + $0x20] sm:$0xff]  }
 0x147   : > { %882 = vperm.xlu1 %6873, %v799_v3   ;;  %879 = vperm.xlu0 %6872, %v798_v4  }
 0x14b   : > { %888 = vperm.xlu1 %6873, %v801_v5   ;;  %885 = vperm.xlu0 %6872, %v800_v6  }
 0x14f   : > { %894 = vperm.xlu1 %6873, %v803_v7   ;;  %891 = vperm.xlu0 %6872, %v802_v8   ;;  %v6879_v7 = vld [vmem:[%s10289_s5 + $0x28] sm:$0xff]  }
 0x153   : > { %900 = vperm.xlu1 %6873, %v805_v9   ;;  %897 = vperm.xlu0 %6872, %v804_v10  }
 0x157   : > { %906 = vperm.xlu1 %6873, %v807_v11   ;;  %903 = vperm.xlu0 %6872, %v806_v12   ;;  %v6880_v12 = vld [vmem:[%s10289_s5 + $0x30] sm:$0xff]  }
 0x15b   : > { %912 = vperm.xlu1 %6873, %v809_v13   ;;  %909 = vperm.xlu0 %6872, %v808_v14  }
 0x15f   : > { %918 = vperm.xlu1 %6873, %v811_v15   ;;  %915 = vperm.xlu0 %6872, %v810_v16  }
 0x163   : > { %924 = vperm.xlu1 %6873, %v813_v17   ;;  %921 = vperm.xlu0 %6872, %v812_v18   ;;  %v6881_v17 = vld [vmem:[%s10289_s5 + $0x38] sm:$0xff]  }
 0x167   : > { %930 = vperm.xlu1 %6873, %v815_v19   ;;  %927 = vperm.xlu0 %6872, %v814_v20   ;;  %v6914_v20 = vld [vmem:[%s10292_s8] sm:$0xff]  }
 0x168   : > { %6644 = vmatprep.subr.bf16.mxu0 %v6914_v20 }
 0x16b   : > { %936 = vperm.xlu1 %6873, %v817_v21   ;;  %933 = vperm.xlu0 %6872, %v816_v22  }
 0x16f   : > { %942 = vperm.xlu1 %6873, %v819_v23   ;;  %939 = vperm.xlu0 %6872, %v818_v24   ;;  %v6882_v23 = vld [vmem:[%s7507_s22] sm:$0xff]  }
 0x173   : > { %948 = vperm.xlu1 %6873, %v821_v25   ;;  %945 = vperm.xlu0 %6872, %v820_v26  }
 0x177   : > { %954 = vperm.xlu1 %6873, %v823_v27   ;;  %951 = vperm.xlu0 %6872, %v822_v28   ;;  %v6915_v27 = vld [vmem:[%s10292_s8 + $0x8] sm:$0xff]  }
 0x178   : > { %v6883_v28 = vld [vmem:[%s7507_s22 + $0x8] sm:$0xff]  }
 0x17b   : > { %960 = vperm.xlu1 %6873, %v825_v29   ;;  %957 = vperm.xlu0 %6872, %v824_v30  }
 0x17f   : > { %966 = vperm.xlu1 %6873, %v827_v31   ;;  %963 = vperm.xlu0 %6872, %v826_v32   ;;  %v6884_v31 = vld [vmem:[%s7507_s22 + $0x10] sm:$0xff]  }
 0x183   : > { %972 = vperm.xlu1 %6873, %v829_v33   ;;  %969 = vperm.xlu0 %6872, %v828_v34  }
 0x187   : > { %978 = vperm.xlu1 %6873, %v831_v35   ;;  %975 = vperm.xlu0 %6872, %v830_v36  }
 0x18b   : > { %984 = vperm.xlu1 %6873, %v833_v37   ;;  %981 = vperm.xlu0 %6872, %v832_v38   ;;  %v6885_v38 = vld [vmem:[%s7507_s22 + $0x18] sm:$0xff]  }
 0x18f   : > { %990 = vperm.xlu1 %6873, %v835_v39   ;;  %987 = vperm.xlu0 %6872, %v834_v40  }
 0x193   : > { %996 = vperm.xlu1 %6873, %v837_v42   ;;  %993 = vperm.xlu0 %6872, %v836_v43   ;;  %v6886_v42 = vld [vmem:[%s7507_s22 + $0x20] sm:$0xff]  }
 0x196   : > { %v1006_v45 = vpop.permute.xlu1 %1005  ;;  %v1000_v46 = vpop.permute.xlu0 %999 }
 0x197   : > { %vm1094_vm1 = vcmp.eq.s32.totalorder %v7643_v44, %v1000_v46  ;;  %vm1096_vm2 = vcmp.eq.s32.totalorder %v7643_v44, %v1006_v45 }
 0x198   : > { %v5642_v48 = vsel %vm1094_vm1, 1.0, %v7393_v47  ;;  %v5644_v51 = vsel %vm1096_vm2, 1.0, %v7393_v47 }
 0x199   : > { %6540 = vmatprep.mubr.msk.f32.mxu1 %vm1246_vm0, %v5642_v48 }
 0x19a   : > { %v1009_v49 = vpop.permute.xlu1 %1008  ;;  %v1003_v50 = vpop.permute.xlu0 %1002 }
 0x19b   : > { %vm1095_vm3 = vcmp.eq.s32.totalorder %v7643_v44, %v1003_v50  ;;  %vm1097_vm4 = vcmp.eq.s32.totalorder %v7643_v44, %v1009_v49 }
 0x19c   : > { %v5643_v53 = vsel %vm1095_vm3, 1.0, %v7393_v47  ;;  %v5645_v57 = vsel %vm1097_vm4, 1.0, %v7393_v47 }
 0x19d   : > { %6541 = vmatmul.mubr.msk.f32.vlgmr.msra.gmra.mrb[0].mxu1 %vm1246_vm0, %v5643_v53 }
 0x19e   : > { %v1015_v54 = vpop.permute.xlu1 %1014  ;;  %v1012_v55 = vpop.permute.xlu0 %1011  ;;  %6543 = vmatprep.mubr.msk.f32.mxu1 %vm1246_vm0, %v5644_v51  ;;  %6565 = vmatpush3.bf16.msra.mxu1 %v7593_v60  ;;  %v6877_v60 = vld [vmem:[%s10289_s5 + $0x18] sm:$0xff]   ;;  %v6887_v51 = vld [vmem:[%s7507_s22 + $0x28] sm:$0xff]  }
 0x19f   : > { %vm1098_vm5 = vcmp.eq.s32.totalorder %v7643_v44, %v1012_v55  ;;  %6566 = vmatprep.subr.bf16.mxu1 %v6875_v52  ;;  %vm1099_vm6 = vcmp.eq.s32.totalorder %v7643_v44, %v1015_v54  ;;  %v6888_v54 = vld [vmem:[%s7507_s22 + $0x30] sm:$0xff]  }
 0x1a0   : > { %v5646_v58 = vsel %vm1098_vm5, 1.0, %v7393_v47  ;;  %v5647_v62 = vsel %vm1099_vm6, 1.0, %v7393_v47 }
 0x1a1   : > { %6544 = vmatmul.mubr.msk.f32.gmra.mrb[2].mxu1 %vm1246_vm0, %v5645_v57 }
 0x1a2   : > { %v1021_v59 = vpop.permute.xlu1 %1020  ;;  %v1018_v61 = vpop.permute.xlu0 %1017  ;;  %6546 = vmatprep.mubr.msk.f32.mxu1 %vm1246_vm0, %v5646_v58  ;;  %6567 = vmatpush3.bf16.msra.mxu1 %v6875_v52 }
 0x1a3   : > { %vm1100_vm7 = vcmp.eq.s32.totalorder %v7643_v44, %v1018_v61  ;;  %6568 = vmatprep.subr.bf16.mxu1 %v6876_v56  ;;  %vm1101_vm8 = vcmp.eq.s32.totalorder %v7643_v44, %v1021_v59 }
 0x1a4   : > { %v5648_v63 = vsel %vm1100_vm7, 1.0, %v7393_v47  ;;  %v5649_v3 = vsel %vm1101_vm8, 1.0, %v7393_v47 }
 0x1a5   : > { %6547 = vmatmul.mubr.msk.f32.gmra.mrb[4].mxu1 %vm1246_vm0, %v5647_v62 }
 0x1a6   : > { %v1027_v0 = vpop.permute.xlu1 %1026  ;;  %v1024_v1 = vpop.permute.xlu0 %1023  ;;  %6549 = vmatprep.mubr.msk.f32.mxu1 %vm1246_vm0, %v5648_v63  ;;  %6569 = vmatpush3.bf16.msra.mxu1 %v6876_v56 }
 0x1a7   : > { %vm1102_vm9 = vcmp.eq.s32.totalorder %v7643_v44, %v1024_v1  ;;  %6570 = vmatprep.subr.bf16.mxu1 %v6877_v60  ;;  %vm1103_vm10 = vcmp.eq.s32.totalorder %v7643_v44, %v1027_v0  ;;  %v6890_v0 = vld [vmem:[%s7507_s22 + $0x40] sm:$0xff]  }
 0x1a8   : > { %v5650_v4 = vsel %vm1102_vm9, 1.0, %v7393_v47  ;;  %v5651_v8 = vsel %vm1103_vm10, 1.0, %v7393_v47 }
 0x1a9   : > { %6550 = vmatmul.mubr.msk.f32.gmra.mrb[6].mxu1 %vm1246_vm0, %v5649_v3 }
 0x1aa   : > { %v1033_v5 = vpop.permute.xlu1 %1032  ;;  %v1030_v6 = vpop.permute.xlu0 %1029  ;;  %6552 = vmatprep.mubr.msk.f32.mxu1 %vm1246_vm0, %v5650_v4  ;;  %6571 = vmatpush3.bf16.msra.mxu1 %v6877_v60  ;;  %v6889_v60 = vld [vmem:[%s7507_s22 + $0x38] sm:$0xff]  }
 0x1ab   : > { %vm1104_vm11 = vcmp.eq.s32.totalorder %v7643_v44, %v1030_v6  ;;  %6572 = vmatprep.subr.bf16.mxu1 %v6878_v2  ;;  %vm1105_vm12 = vcmp.eq.s32.totalorder %v7643_v44, %v1033_v5 }
 0x1ac   : > { %v5652_v9 = vsel %vm1104_vm11, 1.0, %v7393_v47  ;;  %v5653_v13 = vsel %vm1105_vm12, 1.0, %v7393_v47 }
 0x1ad   : > { %6553 = vmatmul.mubr.msk.f32.gmra.mrb[8].mxu1 %vm1246_vm0, %v5651_v8 }
 0x1ae   : > { %v1039_v10 = vpop.permute.xlu1 %1038  ;;  %v1036_v11 = vpop.permute.xlu0 %1035  ;;  %6555 = vmatprep.mubr.msk.f32.mxu1 %vm1246_vm0, %v5652_v9  ;;  %6573 = vmatpush3.bf16.msra.mxu1 %v6878_v2 }
 0x1af   : > { %vm1106_vm13 = vcmp.eq.s32.totalorder %v7643_v44, %v1036_v11  ;;  %6574 = vmatprep.subr.bf16.mxu1 %v6879_v7  ;;  %vm1107_vm14 = vcmp.eq.s32.totalorder %v7643_v44, %v1039_v10  ;;  %v6892_v10 = vld [vmem:[%s7507_s22 + $0x50] sm:$0xff]  }
 0x1b0   : > { %v5654_v14 = vsel %vm1106_vm13, 1.0, %v7393_v47  ;;  %v5655_v18 = vsel %vm1107_vm14, 1.0, %v7393_v47 }
 0x1b1   : > { %6556 = vmatmul.mubr.msk.f32.gmra.mrb[10].mxu1 %vm1246_vm0, %v5653_v13 }
 0x1b2   : > { %v1045_v15 = vpop.permute.xlu1 %1044  ;;  %v1042_v16 = vpop.permute.xlu0 %1041  ;;  %6558 = vmatprep.mubr.msk.f32.mxu1 %vm1246_vm0, %v5654_v14  ;;  %6575 = vmatpush3.bf16.msra.mxu1 %v6879_v7  ;;  %v6891_v7 = vld [vmem:[%s7507_s22 + $0x48] sm:$0xff]  }
 0x1b3   : > { %vm1108_vm15 = vcmp.eq.s32.totalorder %v7643_v44, %v1042_v16  ;;  %6576 = vmatprep.subr.bf16.mxu1 %v6880_v12  ;;  %vm1109_vm1 = vcmp.eq.s32.totalorder %v7643_v44, %v1045_v15 }
 0x1b4   : > { %v5656_v19 = vsel %vm1108_vm15, 1.0, %v7393_v47  ;;  %v5657_v24 = vsel %vm1109_vm1, 1.0, %v7393_v47 }
 0x1b5   : > { %6559 = vmatmul.mubr.msk.f32.gmra.mrb[12].mxu1 %vm1246_vm0, %v5655_v18 }
 0x1b6   : > { %v859_v21 = vpop.permute.xlu1 %858  ;;  %v856_v22 = vpop.permute.xlu0 %855  ;;  %6561 = vmatprep.mubr.msk.f32.mxu1 %vm1246_vm0, %v5656_v19  ;;  %6577 = vmatpush3.bf16.msra.mxu1 %v6880_v12 }
 0x1b7   : > { %vm1047_vm2 = vcmp.eq.s32.totalorder %v7643_v44, %v859_v21  ;;  %vm1046_vm3 = vcmp.eq.s32.totalorder %v7643_v44, %v856_v22  ;;  %6578 = vmatprep.subr.bf16.mxu1 %v6881_v17 }
 0x1b8   : > { %v5595_v25 = vsel %vm1047_vm2, 1.0, %v7393_v47  ;;  %v5594_v26 = vsel %vm1046_vm3, 1.0, %v7393_v47 }
 0x1b9   : > { %6468 = vmatprep.mubr.msk.f32.mxu0 %vm1246_vm0, %v5594_v26  ;;  %6562 = vmatmul.mubr.msk.f32.gmra.mrb[14].mxu1 %vm1246_vm0, %v5657_v24 }
 0x1ba   : > { %v865_v29 = vpop.permute.xlu1 %864  ;;  %v862_v30 = vpop.permute.xlu0 %861  ;;  %6469 = vmatmul.mubr.msk.f32.vlgmr.msra.gmra.mrb[0].mxu0 %vm1246_vm0, %v5595_v25  ;;  %6579 = vmatpush3.bf16.msra.mxu1 %v6881_v17  ;;  %v6893_v17 = vld [vmem:[%s7507_s22 + $0x58] sm:$0xff]  }
 0x1bb   : > { %vm1049_vm4 = vcmp.eq.s32.totalorder %v7643_v44, %v865_v29  ;;  %vm1048_vm5 = vcmp.eq.s32.totalorder %v7643_v44, %v862_v30  ;;  %6580 = vmatprep.mubr.bf16.mxu1 %v6882_v23  ;;  %6645 = vmatpush3.bf16.msra.mxu0 %v6914_v20  ;;  %v6894_v20 = vld [vmem:[%s7507_s22 + $0x60] sm:$0xff]   ;;  %v6896_v30 = vld [vmem:[%s7507_s22 + $0x70] sm:$0xff]  }
 0x1bc   : > { %v5597_v32 = vsel %vm1049_vm4, 1.0, %v7393_v47  ;;  %v5596_v33 = vsel %vm1048_vm5, 1.0, %v7393_v47  ;;  %6646 = vmatprep.subr.bf16.mxu0 %v6915_v27 }
 0x1bd   : > { %6471 = vmatprep.mubr.msk.f32.mxu0 %vm1246_vm0, %v5596_v33  ;;  %6581 = vmatmul.mubr.bf16.vlgmr.msra.gmra.mrb[16].mxu1 %v6883_v28 }
 0x1be   : > { %v871_v34 = vpop.permute.xlu1 %870  ;;  %v868_v35 = vpop.permute.xlu0 %867  ;;  %6472 = vmatmul.mubr.msk.f32.gmra.mrb[2].mxu0 %vm1246_vm0, %v5597_v32  ;;  %6584 = vmatprep.mubr.bf16.mxu1 %v6884_v31 }
 0x1bf   : > { %vm1051_vm6 = vcmp.eq.s32.totalorder %v7643_v44, %v871_v34  ;;  %vm1050_vm7 = vcmp.eq.s32.totalorder %v7643_v44, %v868_v35  ;;  %6647 = vmatpush3.bf16.msra.mxu0 %v6915_v27  ;;  %v6895_v27 = vld [vmem:[%s7507_s22 + $0x68] sm:$0xff]  }
 0x1c0   : > { %v5599_v36 = vsel %vm1051_vm6, 1.0, %v7393_v47  ;;  %v5598_v37 = vsel %vm1050_vm7, 1.0, %v7393_v47 }
 0x1c1   : > { %6474 = vmatprep.mubr.msk.f32.mxu0 %vm1246_vm0, %v5598_v37  ;;  %v6897_v37 = vld [vmem:[%s7507_s22 + $0x78] sm:$0xff]  }
 0x1c2   : > { %v877_v39 = vpop.permute.xlu1 %876  ;;  %v874_v40 = vpop.permute.xlu0 %873  ;;  %6475 = vmatmul.mubr.msk.f32.gmra.mrb[4].mxu0 %vm1246_vm0, %v5599_v36 }
 0x1c3   : > { %vm1053_vm8 = vcmp.eq.s32.totalorder %v7643_v44, %v877_v39  ;;  %vm1052_vm9 = vcmp.eq.s32.totalorder %v7643_v44, %v874_v40 }
 0x1c4   : > { %v5601_v43 = vsel %vm1053_vm8, 1.0, %v7393_v47  ;;  %v5600_v45 = vsel %vm1052_vm9, 1.0, %v7393_v47 }
 0x1c5   : > { %6477 = vmatprep.mubr.msk.f32.mxu0 %vm1246_vm0, %v5600_v45  ;;  %6585 = vmatmul.mubr.bf16.gmra.mrb[20].mxu1 %v6885_v38  ;;  %v6916_v38 = vld [vmem:[%s10292_s8 + $0x10] sm:$0xff]  }
 0x1c6   : > { %v883_v46 = vpop.permute.xlu1 %882  ;;  %v880_v48 = vpop.permute.xlu0 %879  ;;  %6478 = vmatmul.mubr.msk.f32.gmra.mrb[6].mxu0 %vm1246_vm0, %v5601_v43  ;;  %6588 = vmatprep.mubr.bf16.mxu1 %v6886_v42  ;;  %v6898_v42 = vld [vmem:[%s7507_s22 + $0x80] sm:$0xff]  }
 0x1c7   : > { %vm1055_vm10 = vcmp.eq.s32.totalorder %v7643_v44, %v883_v46  ;;  %vm1054_vm11 = vcmp.eq.s32.totalorder %v7643_v44, %v880_v48  ;;  %6648 = vmatprep.subr.bf16.mxu0 %v6916_v38 }
 0x1c8   : > { %v5603_v49 = vsel %vm1055_vm10, 1.0, %v7393_v47  ;;  %v5602_v50 = vsel %vm1054_vm11, 1.0, %v7393_v47  ;;  %6649 = vmatpush3.bf16.msra.mxu0 %v6916_v38 }
 0x1c9   : > { %6480 = vmatprep.mubr.msk.f32.mxu0 %vm1246_vm0, %v5602_v50 }
 0x1ca   : > { %v889_v52 = vpop.permute.xlu1 %888  ;;  %v886_v53 = vpop.permute.xlu0 %885  ;;  %6481 = vmatmul.mubr.msk.f32.gmra.mrb[8].mxu0 %vm1246_vm0, %v5603_v49 }
 0x1cb   : > { %vm1057_vm12 = vcmp.eq.s32.totalorder %v7643_v44, %v889_v52  ;;  %vm1056_vm13 = vcmp.eq.s32.totalorder %v7643_v44, %v886_v53 }
 0x1cc   : > { %v5605_v55 = vsel %vm1057_vm12, 1.0, %v7393_v47  ;;  %v5604_v56 = vsel %vm1056_vm13, 1.0, %v7393_v47 }
 0x1cd   : > { %6483 = vmatprep.mubr.msk.f32.mxu0 %vm1246_vm0, %v5604_v56  ;;  %6589 = vmatmul.mubr.bf16.gmra.mrb[24].mxu1 %v6887_v51  ;;  %v6899_v51 = vld [vmem:[%s7507_s22 + $0x88] sm:$0xff]  }
 0x1ce   : > { %v895_v57 = vpop.permute.xlu1 %894  ;;  %v892_v58 = vpop.permute.xlu0 %891  ;;  %6484 = vmatmul.mubr.msk.f32.gmra.mrb[10].mxu0 %vm1246_vm0, %v5605_v55  ;;  %6592 = vmatprep.mubr.bf16.mxu1 %v6888_v54  ;;  %v6900_v54 = vld [vmem:[%s7507_s22 + $0x90] sm:$0xff]  }
 0x1cf   : > { %vm1059_vm14 = vcmp.eq.s32.totalorder %v7643_v44, %v895_v57  ;;  %vm1058_vm15 = vcmp.eq.s32.totalorder %v7643_v44, %v892_v58  ;;  %v6917_v57 = vld [vmem:[%s10292_s8 + $0x18] sm:$0xff]  }
 0x1d0   : > { %v5607_v59 = vsel %vm1059_vm14, 1.0, %v7393_v47  ;;  %v5606_v61 = vsel %vm1058_vm15, 1.0, %v7393_v47  ;;  %6650 = vmatprep.subr.bf16.mxu0 %v6917_v57 }
 0x1d1   : > { %6486 = vmatprep.mubr.msk.f32.mxu0 %vm1246_vm0, %v5606_v61  ;;  %6651 = vmatpush3.bf16.msra.mxu0 %v6917_v57 }
 0x1d2   : > { %v901_v62 = vpop.permute.xlu1 %900  ;;  %v898_v63 = vpop.permute.xlu0 %897  ;;  %6487 = vmatmul.mubr.msk.f32.gmra.mrb[12].mxu0 %vm1246_vm0, %v5607_v59 }
 0x1d3   : > { %vm1061_vm1 = vcmp.eq.s32.totalorder %v7643_v44, %v901_v62  ;;  %vm1060_vm2 = vcmp.eq.s32.totalorder %v7643_v44, %v898_v63  ;;  %v6901_v62 = vld [vmem:[%s7507_s22 + $0x98] sm:$0xff]  }
 0x1d4   : > { %v5609_v1 = vsel %vm1061_vm1, 1.0, %v7393_v47  ;;  %v5608_v2 = vsel %vm1060_vm2, 1.0, %v7393_v47 }
 0x1d5   : > { %6489 = vmatprep.mubr.msk.f32.mxu0 %vm1246_vm0, %v5608_v2  ;;  %6593 = vmatmul.mubr.bf16.gmra.mrb[28].mxu1 %v6889_v60 }
 0x1d6   : > { %v907_v3 = vpop.permute.xlu1 %906  ;;  %v904_v4 = vpop.permute.xlu0 %903  ;;  %6490 = vmatmul.mubr.msk.f32.gmra.mrb[14].mxu0 %vm1246_vm0, %v5609_v1  ;;  %6596 = vmatprep.mubr.bf16.mxu1 %v6890_v0  ;;  %v6902_v1 = vld [vmem:[%s7507_s22 + $0xa0] sm:$0xff]  }
 0x1d7   : > { %vm1063_vm3 = vcmp.eq.s32.totalorder %v7643_v44, %v907_v3  ;;  %vm1062_vm4 = vcmp.eq.s32.totalorder %v7643_v44, %v904_v4 }
 0x1d8   : > { %v5611_v5 = vsel %vm1063_vm3, 1.0, %v7393_v47  ;;  %v5610_v6 = vsel %vm1062_vm4, 1.0, %v7393_v47 }
 0x1d9   : > { %6492 = vmatprep.mubr.msk.f32.mxu0 %vm1246_vm0, %v5610_v6 }
 0x1da   : > { %v913_v8 = vpop.permute.xlu1 %912  ;;  %v910_v9 = vpop.permute.xlu0 %909  ;;  %6493 = vmatmul.mubr.msk.f32.gmra.mrb[16].mxu0 %vm1246_vm0, %v5611_v5 }
 0x1db   : > { %vm1065_vm5 = vcmp.eq.s32.totalorder %v7643_v44, %v913_v8  ;;  %vm1064_vm6 = vcmp.eq.s32.totalorder %v7643_v44, %v910_v9  ;;  %v6903_v8 = vld [vmem:[%s7507_s22 + $0xa8] sm:$0xff]   ;;  %v6918_v9 = vld [vmem:[%s10292_s8 + $0x20] sm:$0xff]  }
 0x1dc   : > { %v5613_v11 = vsel %vm1065_vm5, 1.0, %v7393_v47  ;;  %v5612_v12 = vsel %vm1064_vm6, 1.0, %v7393_v47  ;;  %6652 = vmatprep.subr.bf16.mxu0 %v6918_v9 }
 0x1dd   : > { %6495 = vmatprep.mubr.msk.f32.mxu0 %vm1246_vm0, %v5612_v12  ;;  %6597 = vmatmul.mubr.bf16.gmra.mrb[32].mxu1 %v6891_v7  ;;  %v6904_v12 = vld [vmem:[%s7507_s22 + $0xb0] sm:$0xff]  }
 0x1de   : > { %v919_v13 = vpop.permute.xlu1 %918  ;;  %v916_v14 = vpop.permute.xlu0 %915  ;;  %6496 = vmatmul.mubr.msk.f32.gmra.mrb[18].mxu0 %vm1246_vm0, %v5613_v11  ;;  %6600 = vmatprep.mubr.bf16.mxu1 %v6892_v10 }
 0x1df   : > { %vm1067_vm7 = vcmp.eq.s32.totalorder %v7643_v44, %v919_v13  ;;  %vm1066_vm8 = vcmp.eq.s32.totalorder %v7643_v44, %v916_v14  ;;  %6653 = vmatpush3.bf16.msra.mxu0 %v6918_v9  ;;  %v8106_v9 = vld [vmem:[%s7512_s25 + $0xd8] sm:$0xff]  }
 0x1e0   : > { %v5615_v15 = vsel %vm1067_vm7, 1.0, %v7393_v47  ;;  %v5614_v16 = vsel %vm1066_vm8, 1.0, %v7393_v47  ;;  %10386 = vst [vmem:[#allocation18_spill] sm:$0xff] %v8106_v9 }
 0x1e1   : > { %6498 = vmatprep.mubr.msk.f32.mxu0 %vm1246_vm0, %v5614_v16 }
 0x1e2   : > { %v925_v18 = vpop.permute.xlu1 %924  ;;  %v922_v19 = vpop.permute.xlu0 %921  ;;  %6499 = vmatmul.mubr.msk.f32.gmra.mrb[20].mxu0 %vm1246_vm0, %v5615_v15 }
 0x1e3   : > { %vm1069_vm9 = vcmp.eq.s32.totalorder %v7643_v44, %v925_v18  ;;  %vm1068_vm10 = vcmp.eq.s32.totalorder %v7643_v44, %v922_v19  ;;  %v6905_v19 = vld [vmem:[%s7507_s22 + $0xb8] sm:$0xff]  }
 0x1e4   : > { %v5617_v21 = vsel %vm1069_vm9, 1.0, %v7393_v47  ;;  %v5616_v22 = vsel %vm1068_vm10, 1.0, %v7393_v47 }
 0x1e5   : > { %6501 = vmatprep.mubr.msk.f32.mxu0 %vm1246_vm0, %v5616_v22  ;;  %6601 = vmatmul.mubr.bf16.gmra.mrb[36].mxu1 %v6893_v17  ;;  %v6906_v22 = vld [vmem:[%s7507_s22 + $0xc0] sm:$0xff]  }
 0x1e6   : > { %v931_v23 = vpop.permute.xlu1 %930  ;;  %v928_v24 = vpop.permute.xlu0 %927  ;;  %6502 = vmatmul.mubr.msk.f32.gmra.mrb[22].mxu0 %vm1246_vm0, %v5617_v21  ;;  %6604 = vmatprep.mubr.bf16.mxu1 %v6894_v20 }
 0x1e7   : > { %vm1071_vm11 = vcmp.eq.s32.totalorder %v7643_v44, %v931_v23  ;;  %vm1070_vm12 = vcmp.eq.s32.totalorder %v7643_v44, %v928_v24 }
 0x1e8   : > { %v5619_v25 = vsel %vm1071_vm11, 1.0, %v7393_v47  ;;  %v5618_v26 = vsel %vm1070_vm12, 1.0, %v7393_v47 }
 0x1e9   : > { %6504 = vmatprep.mubr.msk.f32.mxu0 %vm1246_vm0, %v5618_v26  ;;  %v6908_v26 = vld [vmem:[%s7507_s22 + $0xd0] sm:$0xff]  }
 0x1ea   : > { %v937_v28 = vpop.permute.xlu1 %936  ;;  %v934_v29 = vpop.permute.xlu0 %933  ;;  %6505 = vmatmul.mubr.msk.f32.gmra.mrb[24].mxu0 %vm1246_vm0, %v5619_v25  ;;  %v6907_v25 = vld [vmem:[%s7507_s22 + $0xc8] sm:$0xff]  }
 0x1eb   : > { %vm1073_vm13 = vcmp.eq.s32.totalorder %v7643_v44, %v937_v28  ;;  %vm1072_vm14 = vcmp.eq.s32.totalorder %v7643_v44, %v934_v29  ;;  %v6910_v28 = vld [vmem:[%s7507_s22 + $0xe0] sm:$0xff]   ;;  %v6912_v29 = vld [vmem:[%s7507_s22 + $0xf0] sm:$0xff]  }
 0x1ec   : > { %v5621_v31 = vsel %vm1073_vm13, 1.0, %v7393_v47  ;;  %v5620_v32 = vsel %vm1072_vm14, 1.0, %v7393_v47 }
 0x1ed   : > { %6507 = vmatprep.mubr.msk.f32.mxu0 %vm1246_vm0, %v5620_v32  ;;  %6605 = vmatmul.mubr.bf16.gmra.mrb[40].mxu1 %v6895_v27  ;;  %v6909_v27 = vld [vmem:[%s7507_s22 + $0xd8] sm:$0xff]  }
 0x1ee   : > { %v943_v33 = vpop.permute.xlu1 %942  ;;  %v940_v34 = vpop.permute.xlu0 %939  ;;  %6508 = vmatmul.mubr.msk.f32.gmra.mrb[26].mxu0 %vm1246_vm0, %v5621_v31  ;;  %6608 = vmatprep.mubr.bf16.mxu1 %v6896_v30  ;;  %v6920_v30 = vld [vmem:[%s10292_s8 + $0x30] sm:$0xff]   ;;  %v6913_v31 = vld [vmem:[%s7507_s22 + $0xf8] sm:$0xff]  }
 0x1ef   : > { %vm1075_vm15 = vcmp.eq.s32.totalorder %v7643_v44, %v943_v33  ;;  %vm1074_vm1 = vcmp.eq.s32.totalorder %v7643_v44, %v940_v34  ;;  %v6921_v32 = vld [vmem:[%s10292_s8 + $0x38] sm:$0xff]  }
 0x1f0   : > { %v5623_v35 = vsel %vm1075_vm15, 1.0, %v7393_v47  ;;  %v5622_v36 = vsel %vm1074_vm1, 1.0, %v7393_v47 }
 0x1f1   : > { %6510 = vmatprep.mubr.msk.f32.mxu0 %vm1246_vm0, %v5622_v36 }
 0x1f2   : > { %v949_v39 = vpop.permute.xlu1 %948  ;;  %v946_v40 = vpop.permute.xlu0 %945  ;;  %6511 = vmatmul.mubr.msk.f32.gmra.mrb[28].mxu0 %vm1246_vm0, %v5623_v35 }
 0x1f3   : > { %vm1077_vm2 = vcmp.eq.s32.totalorder %v7643_v44, %v949_v39  ;;  %vm1076_vm3 = vcmp.eq.s32.totalorder %v7643_v44, %v946_v40 }
 0x1f4   : > { %v5625_v43 = vsel %vm1077_vm2, 1.0, %v7393_v47  ;;  %v5624_v45 = vsel %vm1076_vm3, 1.0, %v7393_v47 }
 0x1f5   : > { %6513 = vmatprep.mubr.msk.f32.mxu0 %vm1246_vm0, %v5624_v45  ;;  %6609 = vmatmul.mubr.bf16.gmra.mrb[44].mxu1 %v6897_v37 }
 0x1f6   : > { %v955_v46 = vpop.permute.xlu1 %954  ;;  %v952_v48 = vpop.permute.xlu0 %951  ;;  %6514 = vmatmul.mubr.msk.f32.gmra.mrb[30].mxu0 %vm1246_vm0, %v5625_v43  ;;  %6612 = vmatprep.mubr.bf16.mxu1 %v6898_v42 }
 0x1f7   : > { %vm1079_vm4 = vcmp.eq.s32.totalorder %v7643_v44, %v955_v46  ;;  %vm1078_vm5 = vcmp.eq.s32.totalorder %v7643_v44, %v952_v48 }
 0x1f8   : > { %v5627_v49 = vsel %vm1079_vm4, 1.0, %v7393_v47  ;;  %v5626_v50 = vsel %vm1078_vm5, 1.0, %v7393_v47 }
 0x1f9   : > { %6516 = vmatprep.mubr.msk.f32.mxu0 %vm1246_vm0, %v5626_v50  ;;  %v7945_v50 = vld [vmem:[%s7512_s25] sm:$0xff]  }
 0x1fa   : > { %v961_v52 = vpop.permute.xlu1 %960  ;;  %v958_v53 = vpop.permute.xlu0 %957  ;;  %6517 = vmatmul.mubr.msk.f32.gmra.mrb[32].mxu0 %vm1246_vm0, %v5627_v49  ;;  %v7942_v49 = vld [vmem:[%s7512_s25 + $0x8] sm:$0xff]   ;;  %v5943_v57 = vunpack.c.l.bf16 %v7945_v50 }
 0x1fb   : > { %vm1081_vm6 = vcmp.eq.s32.totalorder %v7643_v44, %v961_v52  ;;  %vm1080_vm7 = vcmp.eq.s32.totalorder %v7643_v44, %v958_v53  ;;  %v7950_v52 = vld [vmem:[%s7512_s25 + $0x18] sm:$0xff]   ;;  %v7953_v53 = vld [vmem:[%s7512_s25 + $0x10] sm:$0xff]  }
 0x1fc   : > { %v5629_v55 = vsel %vm1081_vm6, 1.0, %v7393_v47  ;;  %v5628_v56 = vsel %vm1080_vm7, 1.0, %v7393_v47 }
 0x1fd   : > { %6519 = vmatprep.mubr.msk.f32.mxu0 %vm1246_vm0, %v5628_v56  ;;  %6613 = vmatmul.mubr.bf16.gmra.mrb[48].mxu1 %v6899_v51  ;;  %v5947_v56 = vunpack.c.l.bf16 %v7942_v49 }
 0x1fe   : > { %v967_v58 = vpop.permute.xlu1 %966  ;;  %v964_v59 = vpop.permute.xlu0 %963  ;;  %6520 = vmatmul.mubr.msk.f32.gmra.mrb[34].mxu0 %vm1246_vm0, %v5629_v55  ;;  %6616 = vmatprep.mubr.bf16.mxu1 %v6900_v54  ;;  %v7956_v54 = vld [vmem:[%s7512_s25 + $0x28] sm:$0xff]   ;;  %v7959_v55 = vld [vmem:[%s7512_s25 + $0x20] sm:$0xff]  }
 0x1ff   : > { %vm1083_vm8 = vcmp.eq.s32.totalorder %v7643_v44, %v967_v58  ;;  %vm1082_vm9 = vcmp.eq.s32.totalorder %v7643_v44, %v964_v59  ;;  %v5948_v58 = vunpack.c.h.bf16 %v7942_v49  ;;  %v5944_v59 = vunpack.c.h.bf16 %v7945_v50 }
 0x200   : > { %v5631_v61 = vsel %vm1083_vm8, 1.0, %v7393_v47  ;;  %v5630_v60 = vsel %vm1082_vm9, 1.0, %v7393_v47 }
 0x201   : > { %6522 = vmatprep.mubr.msk.f32.mxu0 %vm1246_vm0, %v5630_v60  ;;  %v7969_v60 = vld [vmem:[%s7512_s25 + $0x30] sm:$0xff]  }
 0x202   : > { %v973_v63 = vpop.permute.xlu1 %972  ;;  %v970_v0 = vpop.permute.xlu0 %969  ;;  %6523 = vmatmul.mubr.msk.f32.gmra.mrb[36].mxu0 %vm1246_vm0, %v5631_v61  ;;  %v7966_v61 = vld [vmem:[%s7512_s25 + $0x38] sm:$0xff]  }
 0x203   : > { %vm1085_vm10 = vcmp.eq.s32.totalorder %v7643_v44, %v973_v63  ;;  %vm1084_vm11 = vcmp.eq.s32.totalorder %v7643_v44, %v970_v0  ;;  %v5955_v63 = vunpack.c.l.bf16 %v7950_v52  ;;  %v5951_v0 = vunpack.c.l.bf16 %v7953_v53 }
 0x204   : > { %v5633_v2 = vsel %vm1085_vm10, 1.0, %v7393_v47  ;;  %v5632_v3 = vsel %vm1084_vm11, 1.0, %v7393_v47 }
 0x205   : > { %6525 = vmatprep.mubr.msk.f32.mxu0 %vm1246_vm0, %v5632_v3  ;;  %6617 = vmatmul.mubr.bf16.gmra.mrb[52].mxu1 %v6901_v62  ;;  %v7978_v3 = vld [vmem:[%s7512_s25 + $0x48] sm:$0xff]  }
 0x206   : > { %v979_v4 = vpop.permute.xlu1 %978  ;;  %v976_v5 = vpop.permute.xlu0 %975  ;;  %6526 = vmatmul.mubr.msk.f32.gmra.mrb[38].mxu0 %vm1246_vm0, %v5633_v2  ;;  %6620 = vmatprep.mubr.bf16.mxu1 %v6902_v1  ;;  %v5956_v1 = vunpack.c.h.bf16 %v7950_v52  ;;  %v5952_v2 = vunpack.c.h.bf16 %v7953_v53 }
 0x207   : > { %vm1087_vm12 = vcmp.eq.s32.totalorder %v7643_v44, %v979_v4  ;;  %vm1086_vm13 = vcmp.eq.s32.totalorder %v7643_v44, %v976_v5  ;;  %v7981_v4 = vld [vmem:[%s7512_s25 + $0x40] sm:$0xff]  }
 0x208   : > { %v5635_v6 = vsel %vm1087_vm12, 1.0, %v7393_v47  ;;  %v5634_v7 = vsel %vm1086_vm13, 1.0, %v7393_v47 }
 0x209   : > { %6528 = vmatprep.mubr.msk.f32.mxu0 %vm1246_vm0, %v5634_v7  ;;  %v5963_v7 = vunpack.c.l.bf16 %v7956_v54 }
 0x20a   : > { %v985_v10 = vpop.permute.xlu1 %984  ;;  %v982_v11 = vpop.permute.xlu0 %981  ;;  %6529 = vmatmul.mubr.msk.f32.gmra.mrb[40].mxu0 %vm1246_vm0, %v5635_v6 }
 0x20b   : > { %vm1089_vm14 = vcmp.eq.s32.totalorder %v7643_v44, %v985_v10  ;;  %vm1088_vm15 = vcmp.eq.s32.totalorder %v7643_v44, %v982_v11  ;;  %v7990_v11 = vld [vmem:[%s7512_s25 + $0x58] sm:$0xff]   ;;  %v8109_v10 = vld [vmem:[%s7512_s25 + $0xd0] sm:$0xff]  }
 0x20c   : > { %v5637_v13 = vsel %vm1089_vm14, 1.0, %v7393_v47  ;;  %v5636_v14 = vsel %vm1088_vm15, 1.0, %v7393_v47  ;;  %10387 = vst [vmem:[#allocation19_spill] sm:$0xff] %v8109_v10  ;;  %v10398_v10 = vunpack.c.h.bf16 %v7969_v60 }
 0x20d   : > { %6531 = vmatprep.mubr.msk.f32.mxu0 %vm1246_vm0, %v5636_v14  ;;  %6621 = vmatmul.mubr.bf16.gmra.mrb[56].mxu1 %v6903_v8  ;;  %v8095_v8 = vld [vmem:[%s7512_s25 + $0xc0] sm:$0xff]  }
 0x20e   : > { %v991_v15 = vpop.permute.xlu1 %990  ;;  %v988_v16 = vpop.permute.xlu0 %987  ;;  %6532 = vmatmul.mubr.msk.f32.gmra.mrb[42].mxu0 %vm1246_vm0, %v5637_v13  ;;  %6624 = vmatprep.mubr.bf16.mxu1 %v6904_v12  ;;  %v7993_v12 = vld [vmem:[%s7512_s25 + $0x50] sm:$0xff]  }
 0x20f   : > { %vm1091_vm1 = vcmp.eq.s32.totalorder %v7643_v44, %v991_v15  ;;  %vm1090_vm2 = vcmp.eq.s32.totalorder %v7643_v44, %v988_v16  ;;  %v8082_v15 = vld [vmem:[%s7512_s25 + $0xb0] sm:$0xff]  }
 0x210   : > { %v5639_v17 = vsel %vm1091_vm1, 1.0, %v7393_v47  ;;  %v5638_v18 = vsel %vm1090_vm2, 1.0, %v7393_v47 }
 0x211   : > { %6534 = vmatprep.mubr.msk.f32.mxu0 %vm1246_vm0, %v5638_v18  ;;  %v8000_v18 = vld [vmem:[%s7512_s25 + $0x68] sm:$0xff]  }
 0x212   : > { %v997_v20 = vpop.permute.xlu1 %996  ;;  %v994_v21 = vpop.permute.xlu0 %993  ;;  %6535 = vmatmul.mubr.msk.f32.gmra.mrb[44].mxu0 %vm1246_vm0, %v5639_v17 }
 0x213   : > { %vm1093_vm3 = vcmp.eq.s32.totalorder %v7643_v44, %v997_v20  ;;  %vm1092_vm4 = vcmp.eq.s32.totalorder %v7643_v44, %v994_v21  ;;  %v6911_v44 = vld [vmem:[%s7507_s22 + $0xe8] sm:$0xff]   ;;  %v8039_v21 = vld [vmem:[%s7512_s25 + $0x98] sm:$0xff]   ;;  %v8042_v20 = vld [vmem:[%s7512_s25 + $0x90] sm:$0xff]  }
 0x214   : > { %v5641_v23 = vsel %vm1093_vm3, 1.0, %v7393_v47  ;;  %v5640_v24 = vsel %vm1092_vm4, 1.0, %v7393_v47  ;;  %v6919_v47 = vld [vmem:[%s10292_s8 + $0x28] sm:$0xff]  }
 0x215   : > { %6537 = vmatprep.mubr.msk.f32.mxu0 %vm1246_vm0, %v5640_v24  ;;  %6625 = vmatmul.mubr.bf16.gmra.mrb[60].mxu1 %v6905_v19  ;;  %v8003_v19 = vld [vmem:[%s7512_s25 + $0x60] sm:$0xff]   ;;  %v8010_v24 = vld [vmem:[%s7512_s25 + $0x78] sm:$0xff]  }
 0x216   : > { %6538 = vmatmul.mubr.msk.f32.gmra.mrb[46].mxu0 %vm1246_vm0, %v5641_v23  ;;  %6628 = vmatprep.mubr.bf16.mxu1 %v6906_v22 }
 0x217   : > { %6654 = vmatprep.subr.bf16.mxu0 %v6919_v47 }
 0x218   : > { %6655 = vmatpush3.bf16.msra.mxu0 %v6919_v47 }
 0x219   : > { %6656 = vmatprep.subr.bf16.mxu0 %v6920_v30 }
 0x21c   : > { %6657 = vmatpush3.bf16.msra.mxu0 %v6920_v30 }
 0x21d   : > { %6629 = vmatmul.mubr.bf16.gmra.mrb[64].mxu1 %v6907_v25  ;;  %6658 = vmatprep.subr.bf16.mxu0 %v6921_v32  ;;  %v8013_v25 = vld [vmem:[%s7512_s25 + $0x70] sm:$0xff]  }
 0x21e   : > { %6632 = vmatprep.mubr.bf16.mxu1 %v6908_v26 }
 0x220   : > { %6659 = vmatpush3.bf16.msra.mxu0 %v6921_v32 }
 0x225   : > { %6633 = vmatmul.mubr.bf16.gmra.mrb[68].mxu1 %v6909_v27  ;;  %v8026_v27 = vld [vmem:[%s7512_s25 + $0x80] sm:$0xff]  }
 0x226   : > { %6636 = vmatprep.mubr.bf16.mxu1 %v6910_v28 }
 0x22d   : > { %6637 = vmatmul.mubr.bf16.gmra.mrb[72].mxu1 %v6911_v44  ;;  %v8055_v44 = vld [vmem:[%s7512_s25 + $0xa0] sm:$0xff]  }
 0x22e   : > { %6640 = vmatprep.mubr.bf16.mxu1 %v6912_v29  ;;  %v8031_v29 = vld [vmem:[%s10291_s7] ss:$0 sm:$0xff] }
 0x235   : > { %6641 = vmatmul.mubr.bf16.gmra.mrb[76].mxu1 %v6913_v31 }
 0x270   : > { %v7915_v33 = vpop.f32.mrb[0].mxu1 }
 0x271   : > { %10373 = vst [vmem:[#allocation5_spill] sm:$0xff] %v7915_v33  ;;  %v7917_v34 = vpop.f32.mrb[1].mxu1 }
 0x274   : > { %v7919_v35 = vpop.f32.mrb[2].mxu1 }
 0x275   : > { %v7921_v36 = vpop.f32.mrb[3].mxu1 }
 0x278   : > { %v7923_v37 = vpop.f32.mrb[4].mxu1 }
 0x279   : > { %10374 = vst [vmem:[#allocation6_spill] sm:$0xff] %v7923_v37  ;;  %v7925_v38 = vpop.f32.mrb[5].mxu1 }
 0x27a   : > { %10375 = vst [vmem:[#allocation7_spill] sm:$0xff] %v7925_v38 }
 0x27c   : > { %v7927_v39 = vpop.f32.mrb[6].mxu1 }
 0x27d   : > { %10376 = vst [vmem:[#allocation8_spill] sm:$0xff] %v7927_v39  ;;  %v7929_v40 = vpop.f32.mrb[7].mxu1 }
 0x27e   : > { %10377 = vst [vmem:[#allocation9_spill] sm:$0xff] %v7929_v40 }
 0x280   : > { %v7931_v42 = vpop.f32.mrb[8].mxu1 }
 0x281   : > { %10378 = vst [vmem:[#allocation10_spill] sm:$0xff] %v7931_v42  ;;  %v7933_v43 = vpop.f32.mrb[9].mxu1 }
 0x282   : > { %10379 = vst [vmem:[#allocation11_spill] sm:$0xff] %v7933_v43 }
 0x284   : > { %v7935_v45 = vpop.f32.mrb[10].mxu1 }
 0x285   : > { %10380 = vst [vmem:[#allocation12_spill] sm:$0xff] %v7935_v45  ;;  %v7937_v46 = vpop.f32.mrb[11].mxu1 }
 0x286   : > { %10381 = vst [vmem:[#allocation13_spill] sm:$0xff] %v7937_v46 }
 0x288   : > { %v7939_v48 = vpop.f32.mrb[12].mxu1 }
 0x289   : > { %10382 = vst [vmem:[#allocation14_spill] sm:$0xff] %v7939_v48  ;;  %v7947_v51 = vpop.f32.mrb[13].mxu1  ;;  %v10389_v48 = vunpack.c.l.bf16 %v7959_v55 }
 0x28a   : > { %10383 = vst [vmem:[#allocation15_spill] sm:$0xff] %v7947_v51 }
 0x28c   : > { %v7971_v62 = vpop.f32.mrb[14].mxu1 }
 0x28d   : > { %10384 = vst [vmem:[#allocation16_spill] sm:$0xff] %v7971_v62  ;;  %v6470_v5 = vpop.f32.mrb[0].mxu0  ;;  %v7983_v6 = vpop.f32.mrb[15].mxu1 }
 0x28e   : > { %10385 = vst [vmem:[#allocation17_spill] sm:$0xff] %v7983_v6  ;;  %v1505_v13 = vpop.f32.mrb[1].mxu0 }
 0x290   : > { %v6582_v26 = vpop.f32.mrb[16].mxu1 }
 0x291   : > { %v2315_v47 = vadd.f32 %v6582_v26, %v5947_v56  ;;  %v6473_v30 = vpop.f32.mrb[2].mxu0  ;;  %v2306_v31 = vpop.f32.mrb[17].mxu1 }
 0x292   : > { %v2307_v28 = vadd.f32 %v5943_v57, %v2306_v31  ;;  %v1515_v56 = vpop.f32.mrb[3].mxu0  ;;  %v6583_v26 = vpop.f32.mrb[18].mxu1  ;;  %v8052_v31 = vld [vmem:[%s7512_s25 + $0xa8] sm:$0xff]  }
 0x293   : > { %v2563_v50 = vadd.f32 %v2315_v47, %v1515_v56  ;;  %v2318_v23 = vadd.f32 %v6583_v26, %v5948_v58  ;;  %v2309_v22 = vpop.f32.mrb[19].mxu1 }
 0x294   : > { %v2561_v17 = vadd.f32 %v2307_v28, %v1505_v13  ;;  %v2310_v16 = vadd.f32 %v5944_v59, %v2309_v22  ;;  %v8075_v28 = vld [vmem:[%s7512_s25 + $0xb8] sm:$0xff]  }
 0x295   : > { %v8047_v47 = vadd.f32 %v8031_v29, %v2563_v50  ;;  %v2564_v58 = vadd.f32 %v6473_v30, %v2318_v23  ;;  %v6476_v56 = vpop.f32.mrb[4].mxu0 }
 0x296   : > { %v8058_v59 = vadd.f32 %v8031_v29, %v2561_v17  ;;  %v2562_v13 = vadd.f32 %v6470_v5, %v2310_v16  ;;  %v1525_v22 = vpop.f32.mrb[5].mxu0 }
 0x297   : > { %v5765_v23 = vmul.f32 -1.442695, %v8047_v47  ;;  %v8064_v30 = vadd.f32 %v8031_v29, %v2564_v58 }
 0x298   : > { %v5763_v49 = vmul.f32 -1.442695, %v8058_v59  ;;  %v8070_v17 = vadd.f32 %v8031_v29, %v2562_v13  ;;  %v6586_v5 = vpop.f32.mrb[20].mxu1 }
 0x299   : > { %6922 = vpow2.f32 %v5765_v23  ;;  %v5766_v58 = vmul.f32 -1.442695, %v8064_v30  ;;  %v2331_v57 = vadd.f32 %v6586_v5, %v5955_v63  ;;  %v6479_v26 = vpop.f32.mrb[6].mxu0  ;;  %v2322_v32 = vpop.f32.mrb[21].mxu1 }
 0x29a   : > { %6924 = vpow2.f32 %v5763_v49  ;;  %v5764_v16 = vmul.f32 -1.442695, %v8070_v17  ;;  %v2323_v50 = vadd.f32 %v5951_v0, %v2322_v32  ;;  %v1535_v23 = vpop.f32.mrb[7].mxu0  ;;  %v6587_v14 = vpop.f32.mrb[22].mxu1  ;;  %v8092_v49 = vld [vmem:[%s7512_s25 + $0xc8] sm:$0xff]  }
 0x29b   : > { %6926 = vpow2.f32 %v5766_v58  ;;  %v2567_v63 = vadd.f32 %v2331_v57, %v1535_v23  ;;  %v2334_v5 = vadd.f32 %v6587_v14, %v5956_v1  ;;  %v2325_v13 = vpop.f32.mrb[23].mxu1 }
 0x29c   : > { %6928 = vpow2.f32 %v5764_v16  ;;  %v2565_v0 = vadd.f32 %v2323_v50, %v1525_v22  ;;  %v2326_v32 = vadd.f32 %v5952_v2, %v2325_v13  ;;  %v8129_v50 = vld [vmem:[%s7512_s25 + $0xe8] sm:$0xff]  }
 0x29d   : > { %v8101_v57 = vadd.f32 %v8031_v29, %v2567_v63  ;;  %v2568_v52 = vadd.f32 %v6479_v26, %v2334_v5  ;;  %v6482_v23 = vpop.f32.mrb[8].mxu0  ;;  %10388 = vst [vmem:[#allocation20_spill] sm:$0xff] %v8129_v50  ;;  %v10397_v50 = vunpack.c.h.bf16 %v7966_v61 }
 0x29e   : > { %v8112_v22 = vadd.f32 %v8031_v29, %v2565_v0  ;;  %v2566_v53 = vadd.f32 %v6476_v56, %v2326_v32  ;;  %v1545_v2 = vpop.f32.mrb[9].mxu0 }
 0x29f   : > { %v5769_v26 = vmul.f32 -1.442695, %v8101_v57  ;;  %v8118_v13 = vadd.f32 %v8031_v29, %v2568_v52 }
 0x2a0   : > { %v5767_v14 = vmul.f32 -1.442695, %v8112_v22  ;;  %v8124_v0 = vadd.f32 %v8031_v29, %v2566_v53  ;;  %v6590_v56 = vpop.f32.mrb[24].mxu1 }
 0x2a1   : > { %6930 = vpow2.f32 %v5769_v26  ;;  %v5770_v52 = vmul.f32 -1.442695, %v8118_v13  ;;  %v2347_v63 = vadd.f32 %v6590_v56, %v5963_v7  ;;  %v6485_v5 = vpop.f32.mrb[10].mxu0  ;;  %v2338_v1 = vpop.f32.mrb[25].mxu1  ;;  %v8140_v26 = vld [vmem:[%s7512_s25 + $0xe0] sm:$0xff]   ;;  %v10391_v7 = vunpack.c.h.bf16 %v7956_v54 }
 0x2a2   : > { %6932 = vpow2.f32 %v5767_v14  ;;  %v5768_v53 = vmul.f32 -1.442695, %v8124_v0  ;;  %v2339_v32 = vadd.f32 %v10389_v48, %v2338_v1  ;;  %v1555_v62 = vpop.f32.mrb[11].mxu0  ;;  %v6591_v16 = vpop.f32.mrb[26].mxu1  ;;  %10390 = vst [vmem:[#allocation21_spill] sm:$0xff] %v8140_v26  ;;  %v10392_v48 = vunpack.c.h.bf16 %v7959_v55 }
 0x2a3   : > { %v6923_v6 = vpop.eup %6922  ;;  %6934 = vpow2.f32 %v5770_v52  ;;  %v2571_v42 = vadd.f32 %v2347_v63, %v1555_v62  ;;  %v2350_v56 = vadd.f32 %v6591_v16, %v10391_v7  ;;  %v2341_v45 = vpop.f32.mrb[27].mxu1 }
 0x2a4   : > { %v6925_v58 = vpop.eup %6924  ;;  %v2890_v43 = vadd.f32 1.0, %v6923_v6  ;;  %6936 = vpow2.f32 %v5768_v53  ;;  %v2569_v46 = vadd.f32 %v2339_v32, %v1545_v2  ;;  %v2342_v1 = vadd.f32 %v10392_v48, %v2341_v45 }
 0x2a5   : > { %v6927_v37 = vpop.eup %6926  ;;  %v2888_v51 = vadd.f32 1.0, %v6925_v58  ;;  %v8148_v39 = vadd.f32 %v8031_v29, %v2571_v42  ;;  %v2572_v62 = vadd.f32 %v6485_v5, %v2350_v56  ;;  %v6488_v63 = vpop.f32.mrb[12].mxu0  ;;  %v8159_v5 = vld [vmem:[%s7512_s25 + $0xf8] sm:$0xff]   ;;  %v10395_v53 = vunpack.c.l.bf16 %v7966_v61 }
 0x2a6   : > { %v6929_v16 = vpop.eup %6928  ;;  %6938 = vrcp.f32 %v2890_v43  ;;  %v2891_v52 = vadd.f32 1.0, %v6927_v37  ;;  %v8152_v6 = vadd.f32 %v8031_v29, %v2569_v46  ;;  %v2570_v2 = vadd.f32 %v6482_v23, %v2342_v1  ;;  %v1565_v55 = vpop.f32.mrb[13].mxu0  ;;  %10393 = vst [vmem:[#allocation22_spill] sm:$0xff] %v8159_v5  ;;  %v8167_v23 = vld [vmem:[%s7512_s25 + $0xf0] sm:$0xff]  }
 0x2a7   : > { %6940 = vrcp.f32 %v2888_v51  ;;  %v2889_v45 = vadd.f32 1.0, %v6929_v16  ;;  %v5773_v58 = vmul.f32 -1.442695, %v8148_v39  ;;  %v8156_v42 = vadd.f32 %v8031_v29, %v2572_v62  ;;  %10394 = vst [vmem:[#allocation23_spill] sm:$0xff] %v8167_v23 }
 0x2a8   : > { %6942 = vrcp.f32 %v2891_v52  ;;  %v5771_v32 = vmul.f32 -1.442695, %v8152_v6  ;;  %v8163_v43 = vadd.f32 %v8031_v29, %v2570_v2  ;;  %v6594_v37 = vpop.f32.mrb[28].mxu1  ;;  %v10396_v16 = vunpack.c.l.bf16 %v7969_v60 }
 0x2a9   : > { %6944 = vrcp.f32 %v2889_v45  ;;  %v5774_v51 = vmul.f32 -1.442695, %v8156_v42  ;;  %v2363_v7 = vadd.f32 %v6594_v37, %v10395_v53  ;;  %v6491_v56 = vpop.f32.mrb[14].mxu0  ;;  %v2354_v48 = vpop.f32.mrb[29].mxu1  ;;  %v10402_v5 = vunpack.c.h.bf16 %v7981_v4 }
 0x2aa   : > { %6946 = vpow2.f32 %v5771_v32  ;;  %v5772_v62 = vmul.f32 -1.442695, %v8163_v43  ;;  %v2355_v52 = vadd.f32 %v10396_v16, %v2354_v48  ;;  %v1575_v2 = vpop.f32.mrb[15].mxu0  ;;  %v6595_v46 = vpop.f32.mrb[30].mxu1 }
 0x2ab   : > { %v6931_v45 = vpop.eup %6930  ;;  %6948 = vpow2.f32 %v5773_v58  ;;  %v2575_v14 = vadd.f32 %v2363_v7, %v1575_v2  ;;  %v2366_v37 = vadd.f32 %v6595_v46, %v10397_v50  ;;  %v2357_v53 = vpop.f32.mrb[31].mxu1 }
 0x2ac   : > { %v6933_v1 = vpop.eup %6932  ;;  %v2894_v32 = vadd.f32 1.0, %v6931_v45  ;;  %6950 = vpow2.f32 %v5774_v51  ;;  %v2573_v26 = vadd.f32 %v2355_v52, %v1565_v55  ;;  %v2358_v48 = vadd.f32 %v10398_v10, %v2357_v53 }
 0x2ad   : > { %v6935_v16 = vpop.eup %6934  ;;  %v2892_v40 = vadd.f32 1.0, %v6933_v1  ;;  %6952 = vpow2.f32 %v5772_v62  ;;  %v8183_v54 = vadd.f32 %v8031_v29, %v2575_v14  ;;  %v2576_v58 = vadd.f32 %v6491_v56, %v2366_v37  ;;  %v6494_v7 = vpop.f32.mrb[16].mxu0 }
 0x2ae   : > { %v6937_v61 = vpop.eup %6936  ;;  %6954 = vrcp.f32 %v2894_v32  ;;  %v2895_v50 = vadd.f32 1.0, %v6935_v16  ;;  %v8186_v46 = vadd.f32 %v8031_v29, %v2573_v26  ;;  %v2574_v2 = vadd.f32 %v6488_v63, %v2358_v48  ;;  %v1585_v51 = vpop.f32.mrb[17].mxu0 }
 0x2af   : > { %6956 = vrcp.f32 %v2892_v40  ;;  %v2893_v55 = vadd.f32 1.0, %v6937_v61  ;;  %v5777_v60 = vmul.f32 -1.442695, %v8183_v54  ;;  %v8190_v10 = vadd.f32 %v8031_v29, %v2576_v58 }
 0x2b0   : > { %v6939_v1 = vpop.eup %6938  ;;  %6958 = vrcp.f32 %v2895_v50  ;;  %v5775_v14 = vmul.f32 -1.442695, %v8186_v46  ;;  %v8194_v56 = vadd.f32 %v8031_v29, %v2574_v2  ;;  %v6598_v62 = vpop.f32.mrb[32].mxu1  ;;  %v10399_v45 = vunpack.c.l.bf16 %v7978_v3 }
 0x2b1   : > { %v6941_v52 = vpop.eup %6940  ;;  %v3082_v63 = vmul.f32 %v6939_v1, %v8047_v47  ;;  %6960 = vrcp.f32 %v2893_v55  ;;  %v5778_v40 = vmul.f32 -1.442695, %v8190_v10  ;;  %v6497_v53 = vpop.f32.mrb[18].mxu0  ;;  %v10400_v58 = vunpack.c.l.bf16 %v7981_v4 }
 0x2b2   : > { %v2379_v37 = vadd.f32 %v6598_v62, %v10399_v45  ;;  %v2370_v32 = vpop.f32.mrb[33].mxu1  ;;  %v6943_v48 = vpop.eup %6942  ;;  %6962 = vpow2.f32 %v5775_v14  ;;  %v5776_v16 = vmul.f32 -1.442695, %v8194_v56  ;;  %v3080_v26 = vmul.f32 %v6941_v52, %v8058_v59 }
 0x2b3   : > { %v2371_v61 = vadd.f32 %v10400_v58, %v2370_v32  ;;  %v1595_v50 = vpop.f32.mrb[19].mxu0  ;;  %v6599_v2 = vpop.f32.mrb[34].mxu1  ;;  %v3083_v55 = vmul.f32 %v6943_v48, %v8064_v30  ;;  %6964 = vpow2.f32 %v5777_v60  ;;  %v10401_v62 = vunpack.c.h.bf16 %v7978_v3 }
 0x2b4   : > { %v6945_v47 = vpop.eup %6944  ;;  %v2579_v1 = vadd.f32 %v2379_v37, %v1595_v50  ;;  %v2373_v38 = vpop.f32.mrb[35].mxu1  ;;  %6966 = vpow2.f32 %v5778_v40 }
 0x2b5   : > { %v2382_v45 = vadd.f32 %v6599_v2, %v10401_v62  ;;  %v6947_v23 = vpop.eup %6946  ;;  %v2577_v14 = vadd.f32 %v2371_v61, %v1585_v51  ;;  %v2374_v9 = vadd.f32 %v10402_v5, %v2373_v38  ;;  %v3081_v32 = vmul.f32 %v6945_v47, %v8070_v17  ;;  %v6500_v60 = vpop.f32.mrb[20].mxu0 }
 0x2b6   : > { %v6949_v58 = vpop.eup %6948  ;;  %v3145_v33 = vpack.c.bf16 %v3083_v55, %v3082_v63  ;;  %v2896_v59 = vadd.f32 1.0, %v6947_v23  ;;  %6968 = vpow2.f32 %v5776_v16  ;;  %v8212_v30 = vadd.f32 %v8031_v29, %v2579_v1  ;;  %v1605_v48 = vpop.f32.mrb[21].mxu0 }
 0x2b7   : > { %v6951_v52 = vpop.eup %6950  ;;  %v2898_v3 = vadd.f32 1.0, %v6949_v58  ;;  %v8215_v37 = vadd.f32 %v8031_v29, %v2577_v14  ;;  %v2580_v40 = vadd.f32 %v6497_v53, %v2382_v45  ;;  %v2578_v51 = vadd.f32 %v6494_v7, %v2374_v9 }
 0x2b8   : > { %v6953_v4 = vpop.eup %6952  ;;  %6970 = vrcp.f32 %v2896_v59  ;;  %v2899_v38 = vadd.f32 1.0, %v6951_v52  ;;  %v5781_v17 = vmul.f32 -1.442695, %v8212_v30  ;;  %v3144_v5 = vpack.c.bf16 %v3081_v32, %v3080_v26  ;;  %v6602_v50 = vpop.f32.mrb[36].mxu1 }
 0x2b9   : > { %v6955_v23 = vpop.eup %6954  ;;  %6972 = vrcp.f32 %v2898_v3  ;;  %v2897_v63 = vadd.f32 1.0, %v6953_v4  ;;  %v5779_v16 = vmul.f32 -1.442695, %v8215_v37  ;;  %v8220_v61 = vadd.f32 %v8031_v29, %v2580_v40  ;;  %v6503_v47 = vpop.f32.mrb[22].mxu0 }
 0x2ba   : > { %v6957_v2 = vpop.eup %6956  ;;  %v8223_v53 = vmul.f32 %v6955_v23, %v8101_v57  ;;  %6974 = vrcp.f32 %v2899_v38  ;;  %v8226_v9 = vadd.f32 %v8031_v29, %v2578_v51  ;;  %v10403_v7 = vunpack.c.l.bf16 %v7990_v11  ;;  %6660 = vmatprep.mubr.bf16.mxu0 %v3144_v5  ;;  %v2386_v55 = vpop.f32.mrb[37].mxu1 }
 0x2bb   : > { %v6959_v1 = vpop.eup %6958  ;;  %6976 = vrcp.f32 %v2897_v63  ;;  %v5782_v62 = vmul.f32 -1.442695, %v8220_v61  ;;  %v10404_v45 = vunpack.c.l.bf16 %v7993_v12  ;;  %6661 = vmatmul.mubr.bf16.vlgmr.msra.gmra.mrb[48].mxu0 %v3145_v33  ;;  %v1615_v57 = vpop.f32.mrb[23].mxu0  ;;  %v3084_v58 = vmul.f32 %v6957_v2, %v8112_v22 }
 0x2bc   : > { %v2395_v26 = vadd.f32 %v6602_v50, %v10403_v7  ;;  %v6603_v32 = vpop.f32.mrb[38].mxu1  ;;  %v6961_v59 = vpop.eup %6960  ;;  %6978 = vpow2.f32 %v5779_v16  ;;  %v5780_v52 = vmul.f32 -1.442695, %v8226_v9  ;;  %v10405_v40 = vunpack.c.h.bf16 %v7990_v11 }
 0x2bd   : > { %v2387_v14 = vadd.f32 %v10404_v45, %v2386_v55  ;;  %v2389_v4 = vpop.f32.mrb[39].mxu1  ;;  %v6963_v38 = vpop.eup %6962  ;;  %6980 = vpow2.f32 %v5781_v17  ;;  %v10406_v23 = vunpack.c.h.bf16 %v7993_v12  ;;  %v3085_v33 = vmul.f32 %v6961_v59, %v8124_v0 }
 0x2be   : > { %v2583_v3 = vadd.f32 %v2395_v26, %v1615_v57  ;;  %v2398_v51 = vadd.f32 %v6603_v32, %v10405_v40  ;;  %v6965_v50 = vpop.eup %6964  ;;  %v2900_v7 = vadd.f32 1.0, %v6963_v38  ;;  %6982 = vpow2.f32 %v5782_v62  ;;  %v6506_v2 = vpop.f32.mrb[24].mxu0 }
 0x2bf   : > { %v2581_v5 = vadd.f32 %v2387_v14, %v1605_v48  ;;  %v2390_v63 = vadd.f32 %v10406_v23, %v2389_v4  ;;  %v6967_v26 = vpop.eup %6966  ;;  %v2902_v11 = vadd.f32 1.0, %v6965_v50  ;;  %6984 = vpow2.f32 %v5780_v52  ;;  %v1625_v17 = vpop.f32.mrb[25].mxu0 }
 0x2c0   : > { %v8241_v22 = vadd.f32 %v8031_v29, %v2583_v3  ;;  %v2584_v16 = vadd.f32 %v6503_v47, %v2398_v51  ;;  %v6969_v12 = vpop.eup %6968  ;;  %6986 = vrcp.f32 %v2900_v7  ;;  %v2903_v45 = vadd.f32 1.0, %v6967_v26  ;;  %v6606_v32 = vpop.f32.mrb[40].mxu1 }
 0x2c1   : > { %v8244_v55 = vadd.f32 %v8031_v29, %v2581_v5  ;;  %v2582_v48 = vadd.f32 %v6500_v60, %v2390_v63  ;;  %6988 = vrcp.f32 %v2902_v11  ;;  %v2901_v14 = vadd.f32 1.0, %v6969_v12  ;;  %v6509_v51 = vpop.f32.mrb[26].mxu0  ;;  %v2402_v4 = vpop.f32.mrb[41].mxu1 }
 0x2c2   : > { %v5785_v0 = vmul.f32 -1.442695, %v8241_v22  ;;  %v8248_v62 = vadd.f32 %v8031_v29, %v2584_v16  ;;  %v6971_v59 = vpop.eup %6970  ;;  %6990 = vrcp.f32 %v2903_v45  ;;  %v10407_v52 = vunpack.c.l.bf16 %v8000_v18  ;;  %v1635_v7 = vpop.f32.mrb[27].mxu0 }
 0x2c3   : > { %v5783_v47 = vmul.f32 -1.442695, %v8244_v55  ;;  %v8252_v57 = vadd.f32 %v8031_v29, %v2582_v48  ;;  %v3146_v40 = vpack.c.bf16 %v3085_v33, %v3084_v58  ;;  %v6973_v38 = vpop.eup %6972  ;;  %6992 = vrcp.f32 %v2901_v14  ;;  %v6607_v16 = vpop.f32.mrb[42].mxu1 }
 0x2c4   : > { %v5786_v60 = vmul.f32 -1.442695, %v8248_v62  ;;  %v2411_v3 = vadd.f32 %v6606_v32, %v10407_v52  ;;  %v10408_v23 = vunpack.c.l.bf16 %v8003_v19  ;;  %v3087_v50 = vmul.f32 %v6959_v1, %v8118_v13  ;;  %v6975_v26 = vpop.eup %6974  ;;  %v2405_v12 = vpop.f32.mrb[43].mxu1 }
 0x2c5   : > { %v5784_v5 = vmul.f32 -1.442695, %v8252_v57  ;;  %v8262_v11 = vmul.f32 %v6973_v38, %v8148_v39  ;;  %6994 = vpow2.f32 %v5783_v47  ;;  %6664 = vmatprep.mubr.bf16.mxu0 %v3146_v40  ;;  %v10409_v33 = vunpack.c.h.bf16 %v8000_v18  ;;  %v6977_v45 = vpop.eup %6976  ;;  %v8272_v40 = vpop.f32.mrb[28].mxu0 }
 0x2c6   : > { %v2403_v63 = vadd.f32 %v10408_v23, %v2402_v4  ;;  %v2587_v58 = vadd.f32 %v2411_v3, %v1635_v7  ;;  %6996 = vpow2.f32 %v5785_v0  ;;  %v3147_v32 = vpack.c.bf16 %v3087_v50, %v8223_v53  ;;  %v6979_v52 = vpop.eup %6978 }
 0x2c7   : > { %v2414_v48 = vadd.f32 %v6607_v16, %v10409_v33  ;;  %v10410_v13 = vunpack.c.h.bf16 %v8003_v19  ;;  %6998 = vpow2.f32 %v5786_v60  ;;  %v3088_v18 = vmul.f32 %v6971_v59, %v8152_v6  ;;  %v6981_v3 = vpop.eup %6980  ;;  %v1645_v19 = vpop.f32.mrb[29].mxu0 }
 0x2c8   : > { %v2585_v14 = vadd.f32 %v2403_v63, %v1625_v17  ;;  %v8270_v39 = vadd.f32 %v8031_v29, %v2587_v58  ;;  %v2904_v4 = vadd.f32 1.0, %v6979_v52  ;;  %7000 = vpow2.f32 %v5784_v5  ;;  %6665 = vmatmul.mubr.bf16.gmra.mrb[52].mxu0 %v3147_v32  ;;  %v6983_v0 = vpop.eup %6982  ;;  %v6610_v50 = vpop.f32.mrb[44].mxu1 }
 0x2c9   : > { %v2406_v1 = vadd.f32 %v10410_v13, %v2405_v12  ;;  %v2588_v47 = vadd.f32 %v6509_v51, %v2414_v48  ;;  %v2906_v38 = vadd.f32 1.0, %v6981_v3  ;;  %v3089_v51 = vmul.f32 %v6977_v45, %v8163_v43  ;;  %v6985_v63 = vpop.eup %6984  ;;  %v6515_v48 = vpop.f32.mrb[30].mxu0 }
 0x2ca   : > { %v8276_v17 = vadd.f32 %v8031_v29, %v2585_v14  ;;  %v5789_v60 = vmul.f32 -1.442695, %v8270_v39  ;;  %7002 = vrcp.f32 %v2904_v4  ;;  %v2907_v6 = vadd.f32 1.0, %v6983_v0  ;;  %v2418_v12 = vpop.f32.mrb[45].mxu1 }
 0x2cb   : > { %v2586_v53 = vadd.f32 %v6506_v2, %v2406_v1  ;;  %v8280_v23 = vadd.f32 %v8031_v29, %v2588_v47  ;;  %v6987_v2 = vpop.eup %6986  ;;  %7004 = vrcp.f32 %v2906_v38  ;;  %v2905_v7 = vadd.f32 1.0, %v6985_v63  ;;  %v1655_v1 = vpop.f32.mrb[31].mxu0 }
 0x2cc   : > { %v5787_v59 = vmul.f32 -1.442695, %v8276_v17  ;;  %v10411_v58 = vunpack.c.l.bf16 %v8010_v24  ;;  %v6989_v43 = vpop.eup %6988  ;;  %7006 = vrcp.f32 %v2907_v6  ;;  %v3148_v14 = vpack.c.bf16 %v3089_v51, %v3088_v18  ;;  %v6611_v52 = vpop.f32.mrb[46].mxu1 }
 0x2cd   : > { %v8285_v5 = vadd.f32 %v8031_v29, %v2586_v53  ;;  %v5790_v16 = vmul.f32 -1.442695, %v8280_v23  ;;  %v10412_v32 = vunpack.c.l.bf16 %v8013_v25  ;;  %v6991_v47 = vpop.eup %6990  ;;  %v8294_v3 = vmul.f32 %v6989_v43, %v8183_v54  ;;  %v2421_v0 = vpop.f32.mrb[47].mxu1 }
 0x2ce   : > { %v2427_v33 = vadd.f32 %v6610_v50, %v10411_v58  ;;  %7008 = vrcp.f32 %v2905_v7  ;;  %v3091_v4 = vmul.f32 %v6975_v26, %v8156_v42  ;;  %v6993_v38 = vpop.eup %6992  ;;  %6668 = vmatprep.mubr.bf16.mxu0 %v3148_v14  ;;  %v10413_v18 = vunpack.c.h.bf16 %v8010_v24  ;;  %v8305_v42 = vpop.f32.mrb[32].mxu0 }
 0x2cf   : > { %v5788_v45 = vmul.f32 -1.442695, %v8285_v5  ;;  %v2419_v13 = vadd.f32 %v10412_v32, %v2418_v12  ;;  %7010 = vpow2.f32 %v5787_v59  ;;  %v10414_v6 = vunpack.c.h.bf16 %v8013_v25  ;;  %v6995_v58 = vpop.eup %6994  ;;  %v1665_v25 = vpop.f32.mrb[33].mxu0 }
 0x2d0   : > { %v2591_v53 = vadd.f32 %v2427_v33, %v1655_v1  ;;  %v2430_v51 = vadd.f32 %v6611_v52, %v10413_v18  ;;  %7012 = vpow2.f32 %v5789_v60  ;;  %v3149_v54 = vpack.c.bf16 %v3091_v4, %v8262_v11  ;;  %v6997_v59 = vpop.eup %6996 }
 0x2d1   : > { %v2589_v63 = vadd.f32 %v2419_v13, %v1645_v19  ;;  %v2422_v50 = vadd.f32 %v10414_v6, %v2421_v0  ;;  %v3092_v26 = vmul.f32 %v6987_v2, %v8186_v46  ;;  %v2908_v33 = vadd.f32 1.0, %v6995_v58  ;;  %v6999_v12 = vpop.eup %6998  ;;  %v6521_v52 = vpop.f32.mrb[34].mxu0 }
 0x2d2   : > { %v8303_v7 = vadd.f32 %v8031_v29, %v2591_v53  ;;  %7014 = vpow2.f32 %v5790_v16  ;;  %v2592_v19 = vadd.f32 %v6515_v48, %v2430_v51  ;;  %v2910_v43 = vadd.f32 1.0, %v6997_v59  ;;  %6669 = vmatmul.mubr.bf16.gmra.mrb[56].mxu0 %v3149_v54  ;;  %v7001_v14 = vpop.eup %7000  ;;  %v6614_v16 = vpop.f32.mrb[48].mxu1 }
 0x2d3   : > { %v8309_v24 = vadd.f32 %v8031_v29, %v2589_v63  ;;  %7016 = vpow2.f32 %v5788_v45  ;;  %v2590_v60 = vadd.f32 %v8272_v40, %v2422_v50  ;;  %v2911_v32 = vadd.f32 1.0, %v6999_v12  ;;  %v2434_v4 = vpop.f32.mrb[49].mxu1  ;;  %v1675_v51 = vpop.f32.mrb[35].mxu0 }
 0x2d4   : > { %v5793_v11 = vmul.f32 -1.442695, %v8303_v7  ;;  %7018 = vrcp.f32 %v2908_v33  ;;  %v8315_v2 = vadd.f32 %v8031_v29, %v2592_v19  ;;  %v2909_v48 = vadd.f32 1.0, %v7001_v14  ;;  %v7003_v40 = vpop.eup %7002  ;;  %v6615_v6 = vpop.f32.mrb[50].mxu1 }
 0x2d5   : > { %v5791_v46 = vmul.f32 -1.442695, %v8309_v24  ;;  %7020 = vrcp.f32 %v2910_v43  ;;  %v8318_v13 = vadd.f32 %v8031_v29, %v2590_v60  ;;  %v10415_v45 = vunpack.c.l.bf16 %v8023_v41  ;;  %v7005_v50 = vpop.eup %7004  ;;  %v2437_v33 = vpop.f32.mrb[51].mxu1 }
 0x2d6   : > { %7022 = vrcp.f32 %v2911_v32  ;;  %v5794_v53 = vmul.f32 -1.442695, %v8315_v2  ;;  %v3093_v0 = vmul.f32 %v6993_v38, %v8194_v56  ;;  %v10416_v63 = vunpack.c.l.bf16 %v8026_v27  ;;  %v7007_v19 = vpop.eup %7006 }
 0x2d7   : > { %v2443_v1 = vadd.f32 %v6614_v16, %v10415_v45  ;;  %7024 = vrcp.f32 %v2909_v48  ;;  %v5792_v58 = vmul.f32 -1.442695, %v8318_v13  ;;  %v3095_v54 = vmul.f32 %v6991_v47, %v8190_v10  ;;  %v8337_v10 = vpop.f32.mrb[36].mxu0 }
 0x2d8   : > { %v2435_v18 = vadd.f32 %v10416_v63, %v2434_v4  ;;  %v8329_v12 = vmul.f32 %v7005_v50, %v8212_v30  ;;  %7026 = vpow2.f32 %v5791_v46  ;;  %v3150_v43 = vpack.c.bf16 %v3093_v0, %v3092_v26  ;;  %v7009_v38 = vpop.eup %7008  ;;  %v6618_v63 = vpop.f32.mrb[52].mxu1 }
 0x2d9   : > { %v2595_v59 = vadd.f32 %v2443_v1, %v1675_v51  ;;  %7028 = vpow2.f32 %v5793_v11  ;;  %v3151_v60 = vpack.c.bf16 %v3095_v54, %v8294_v3  ;;  %v10417_v32 = vunpack.c.h.bf16 %v8023_v41  ;;  %v7011_v47 = vpop.eup %7010  ;;  %v1685_v11 = vpop.f32.mrb[37].mxu0 }
 0x2da   : > { %v2593_v56 = vadd.f32 %v2435_v18, %v1665_v25  ;;  %7030 = vpow2.f32 %v5794_v53  ;;  %6672 = vmatprep.mubr.bf16.mxu0 %v3150_v43  ;;  %v10418_v26 = vunpack.c.h.bf16 %v8026_v27  ;;  %v3096_v3 = vmul.f32 %v7003_v40, %v8215_v37  ;;  %v7013_v46 = vpop.eup %7012  ;;  %v6527_v50 = vpop.f32.mrb[38].mxu0 }
 0x2db   : > { %v8333_v14 = vadd.f32 %v8031_v29, %v2595_v59  ;;  %v2446_v16 = vadd.f32 %v6615_v6, %v10417_v32  ;;  %v2912_v48 = vadd.f32 1.0, %v7011_v47  ;;  %7032 = vpow2.f32 %v5792_v58  ;;  %6673 = vmatmul.mubr.bf16.gmra.mrb[60].mxu0 %v3151_v60 }
 0x2dc   : > { %v8340_v30 = vadd.f32 %v8031_v29, %v2593_v56  ;;  %v2438_v25 = vadd.f32 %v10418_v26, %v2437_v33  ;;  %v7015_v1 = vpop.eup %7014  ;;  %v2914_v4 = vadd.f32 1.0, %v7013_v46  ;;  %v3097_v27 = vmul.f32 %v7009_v38, %v8226_v9  ;;  %v1695_v33 = vpop.f32.mrb[39].mxu0 }
 0x2dd   : > { %v5797_v41 = vmul.f32 -1.442695, %v8333_v14  ;;  %v2596_v45 = vadd.f32 %v6521_v52, %v2446_v16  ;;  %v7017_v18 = vpop.eup %7016  ;;  %7034 = vrcp.f32 %v2912_v48  ;;  %v2915_v51 = vadd.f32 1.0, %v7015_v1  ;;  %v2450_v52 = vpop.f32.mrb[53].mxu1 }
 0x2de   : > { %v5795_v53 = vmul.f32 -1.442695, %v8340_v30  ;;  %v2594_v0 = vadd.f32 %v8305_v42, %v2438_v25  ;;  %v10419_v40 = vunpack.c.l.bf16 %v8039_v21  ;;  %v7019_v58 = vpop.eup %7018  ;;  %7036 = vrcp.f32 %v2914_v4  ;;  %v6619_v9 = vpop.f32.mrb[54].mxu1 }
 0x2df   : > { %v8350_v37 = vadd.f32 %v8031_v29, %v2596_v45  ;;  %v2913_v54 = vadd.f32 1.0, %v7017_v18  ;;  %v3152_v42 = vpack.c.bf16 %v3097_v27, %v3096_v3  ;;  %v7021_v43 = vpop.eup %7020  ;;  %7038 = vrcp.f32 %v2915_v51  ;;  %v2453_v16 = vpop.f32.mrb[55].mxu1 }
 0x2e0   : > { %v2459_v6 = vadd.f32 %v6618_v63, %v10419_v40  ;;  %v8355_v59 = vadd.f32 %v8031_v29, %v2594_v0  ;;  %v10420_v38 = vunpack.c.l.bf16 %v8042_v20  ;;  %v3099_v32 = vmul.f32 %v7007_v19, %v8220_v61  ;;  %v7023_v47 = vpop.eup %7022  ;;  %v8368_v0 = vpop.f32.mrb[40].mxu0 }
 0x2e1   : > { %v5798_v56 = vmul.f32 -1.442695, %v8350_v37  ;;  %v8362_v26 = vmul.f32 %v7021_v43, %v8241_v22  ;;  %7040 = vrcp.f32 %v2913_v54  ;;  %6676 = vmatprep.mubr.bf16.mxu0 %v3152_v42  ;;  %v7025_v46 = vpop.eup %7024  ;;  %v10421_v1 = vunpack.c.h.bf16 %v8039_v21  ;;  %v1705_v27 = vpop.f32.mrb[41].mxu0 }
 0x2e2   : > { %v2451_v60 = vadd.f32 %v10420_v38, %v2450_v52  ;;  %v5796_v25 = vmul.f32 -1.442695, %v8355_v59  ;;  %v2599_v3 = vadd.f32 %v2459_v6, %v1695_v33  ;;  %7042 = vpow2.f32 %v5795_v53  ;;  %v7027_v61 = vpop.eup %7026  ;;  %v6533_v42 = vpop.f32.mrb[42].mxu0 }
 0x2e3   : > { %v3153_v45 = vpack.c.bf16 %v3099_v32, %v8329_v12  ;;  %v2462_v4 = vadd.f32 %v6619_v9, %v10421_v1  ;;  %7044 = vpow2.f32 %v5797_v41  ;;  %v10422_v19 = vunpack.c.h.bf16 %v8042_v20  ;;  %v7029_v53 = vpop.eup %7028  ;;  %v6622_v20 = vpop.f32.mrb[56].mxu1 }
 0x2e4   : > { %v2597_v48 = vadd.f32 %v2451_v60, %v1685_v11  ;;  %v8371_v22 = vadd.f32 %v8031_v29, %v2599_v3  ;;  %v3100_v18 = vmul.f32 %v7019_v58, %v8244_v55  ;;  %v2916_v11 = vadd.f32 1.0, %v7027_v61  ;;  %v7031_v51 = vpop.eup %7030  ;;  %v2466_v33 = vpop.f32.mrb[57].mxu1 }
 0x2e5   : > { %v2454_v63 = vadd.f32 %v10422_v19, %v2453_v16  ;;  %7046 = vpow2.f32 %v5798_v56  ;;  %6677 = vmatmul.mubr.bf16.gmra.mrb[64].mxu0 %v3153_v45  ;;  %v2600_v21 = vadd.f32 %v6527_v50, %v2462_v4  ;;  %v2918_v40 = vadd.f32 1.0, %v7029_v53  ;;  %v7033_v52 = vpop.eup %7032  ;;  %v6623_v38 = vpop.f32.mrb[58].mxu1 }
 0x2e6   : > { %v8377_v12 = vadd.f32 %v8031_v29, %v2597_v48  ;;  %7048 = vpow2.f32 %v5796_v25  ;;  %v5801_v41 = vmul.f32 -1.442695, %v8371_v22  ;;  %v2919_v54 = vadd.f32 1.0, %v7031_v51  ;;  %v2469_v48 = vpop.f32.mrb[59].mxu1 }
 0x2e7   : > { %v2598_v6 = vadd.f32 %v8337_v10, %v2454_v63  ;;  %7050 = vrcp.f32 %v2916_v11  ;;  %v8383_v58 = vadd.f32 %v8031_v29, %v2600_v21  ;;  %v2917_v50 = vadd.f32 1.0, %v7033_v52  ;;  %v1715_v10 = vpop.f32.mrb[43].mxu0  ;;  %v7035_v60 = vpop.eup %7034 }
 0x2e8   : > { %v5799_v55 = vmul.f32 -1.442695, %v8377_v12  ;;  %7052 = vrcp.f32 %v2918_v40  ;;  %v10423_v43 = vunpack.c.l.bf16 %v8052_v31  ;;  %v3101_v16 = vmul.f32 %v7025_v46, %v8252_v57  ;;  %v7037_v45 = vpop.eup %7036  ;;  %v8399_v21 = vpop.f32.mrb[44].mxu0 }
 0x2e9   : > { %v8386_v9 = vadd.f32 %v8031_v29, %v2598_v6  ;;  %7054 = vrcp.f32 %v2919_v54  ;;  %v5802_v32 = vmul.f32 -1.442695, %v8383_v58  ;;  %v10424_v25 = vunpack.c.l.bf16 %v8055_v44  ;;  %v7039_v19 = vpop.eup %7038  ;;  %v6626_v54 = vpop.f32.mrb[60].mxu1 }
 0x2ea   : > { %v2475_v56 = vadd.f32 %v6622_v20, %v10423_v43  ;;  %7056 = vrcp.f32 %v2917_v50  ;;  %v3103_v4 = vmul.f32 %v7023_v47, %v8248_v62  ;;  %v8397_v63 = vmul.f32 %v7037_v45, %v8270_v39  ;;  %v1725_v47 = vpop.f32.mrb[45].mxu0  ;;  %v8410_v39 = vld [vmem:[%s10291_s7] ss:$0 sm:$0xff] }
 0x2eb   : > { %v2467_v3 = vadd.f32 %v10424_v25, %v2466_v33  ;;  %v5800_v1 = vmul.f32 -1.442695, %v8386_v9  ;;  %7058 = vpow2.f32 %v5799_v55  ;;  %v3154_v53 = vpack.c.bf16 %v3101_v16, %v3100_v18  ;;  %v7041_v57 = vpop.eup %7040 }
 0x2ec   : > { %v2603_v61 = vadd.f32 %v2475_v56, %v1715_v10  ;;  %7060 = vpow2.f32 %v5801_v41  ;;  %v3155_v46 = vpack.c.bf16 %v3103_v4, %v8362_v26  ;;  %v10425_v40 = vunpack.c.h.bf16 %v8052_v31  ;;  %v7043_v6 = vpop.eup %7042  ;;  %v6539_v10 = vpop.f32.mrb[46].mxu0 }
 0x2ed   : > { %v2601_v11 = vadd.f32 %v2467_v3, %v1705_v27  ;;  %7062 = vpow2.f32 %v5802_v32  ;;  %6680 = vmatprep.mubr.bf16.mxu0 %v3154_v53  ;;  %v10426_v26 = vunpack.c.h.bf16 %v8055_v44  ;;  %v7045_v41 = vpop.eup %7044  ;;  %v2920_v31 = vadd.f32 1.0, %v7043_v6  ;;  %v1735_v16 = vpop.f32.mrb[47].mxu0 }
 0x2ee   : > { %v8403_v51 = vadd.f32 %v8031_v29, %v2603_v61  ;;  %v2478_v62 = vadd.f32 %v6623_v38, %v10425_v40  ;;  %v3104_v29 = vmul.f32 %v7035_v60, %v8276_v17  ;;  %7064 = vpow2.f32 %v5800_v1  ;;  %6681 = vmatmul.mubr.bf16.gmra.mrb[68].mxu0 %v3155_v46  ;;  %v2482_v38 = vpop.f32.mrb[61].mxu1 }
 0x2ef   : > { %v8413_v27 = vadd.f32 %v8410_v39, %v2601_v11  ;;  %v2470_v18 = vadd.f32 %v10426_v26, %v2469_v48  ;;  %v7047_v55 = vpop.eup %7046  ;;  %v2922_v33 = vadd.f32 1.0, %v7045_v41  ;;  %v10427_v56 = vunpack.c.l.bf16 %v8075_v28  ;;  %v6627_v25 = vpop.f32.mrb[62].mxu1 }
 0x2f0   : > { %v5805_v20 = vmul.f32 -1.442695, %v8403_v51  ;;  %v2604_v52 = vadd.f32 %v6533_v42, %v2478_v62  ;;  %v7049_v17 = vpop.eup %7048  ;;  %7066 = vrcp.f32 %v2920_v31  ;;  %v2923_v60 = vadd.f32 1.0, %v7047_v55  ;;  %v2485_v4 = vpop.f32.mrb[63].mxu1 }
 0x2f1   : > { %v5803_v50 = vmul.f32 -1.442695, %v8413_v27  ;;  %v2602_v43 = vadd.f32 %v8368_v0, %v2470_v18  ;;  %v2491_v44 = vadd.f32 %v6626_v54, %v10427_v56  ;;  %v3105_v42 = vmul.f32 %v7041_v57, %v8285_v5  ;;  %v7051_v3 = vpop.eup %7050 }
 0x2f2   : > { %v8424_v32 = vadd.f32 %v8410_v39, %v2604_v52  ;;  %7068 = vrcp.f32 %v2922_v33  ;;  %v2921_v48 = vadd.f32 1.0, %v7049_v17  ;;  %v10428_v45 = vunpack.c.l.bf16 %v8082_v15  ;;  %v7053_v61 = vpop.eup %7052 }
 0x2f3   : > { %v8428_v0 = vadd.f32 %v8410_v39, %v2602_v43  ;;  %7070 = vrcp.f32 %v2923_v60  ;;  %v3156_v11 = vpack.c.bf16 %v3105_v42, %v3104_v29  ;;  %v3107_v46 = vmul.f32 %v7039_v19, %v8280_v23  ;;  %v7055_v5 = vpop.eup %7054 }
 0x2f4   : > { %v2483_v1 = vadd.f32 %v10428_v45, %v2482_v38  ;;  %v5806_v53 = vmul.f32 -1.442695, %v8424_v32  ;;  %v8435_v57 = vmul.f32 %v7053_v61, %v8303_v7  ;;  %7072 = vrcp.f32 %v2921_v48  ;;  %v7057_v6 = vpop.eup %7056 }
 0x2f5   : > { %v5804_v40 = vmul.f32 -1.442695, %v8428_v0  ;;  %7074 = vpow2.f32 %v5803_v50  ;;  %6684 = vmatprep.mubr.bf16.mxu0 %v3156_v11  ;;  %v3157_v26 = vpack.c.bf16 %v3107_v46, %v8397_v63  ;;  %v2607_v18 = vadd.f32 %v2491_v44, %v1735_v16  ;;  %v7059_v29 = vpop.eup %7058 }
 0x2f6   : > { %v2605_v62 = vadd.f32 %v2483_v1, %v1725_v47  ;;  %v10429_v41 = vunpack.c.h.bf16 %v8075_v28  ;;  %7076 = vpow2.f32 %v5805_v20  ;;  %v10430_v7 = vunpack.c.h.bf16 %v8082_v15  ;;  %v7061_v47 = vpop.eup %7060  ;;  %v6630_v28 = vpop.f32.mrb[64].mxu1 }
 0x2f7   : > { %v3108_v52 = vmul.f32 %v7051_v3, %v8309_v24  ;;  %v2924_v54 = vadd.f32 1.0, %v7059_v29  ;;  %7078 = vpow2.f32 %v5806_v53  ;;  %6685 = vmatmul.mubr.bf16.gmra.mrb[72].mxu0 %v3157_v26  ;;  %v8448_v63 = vadd.f32 %v8410_v39, %v2607_v18  ;;  %v7063_v33 = vpop.eup %7062  ;;  %v2498_v15 = vpop.f32.mrb[65].mxu1 }
 0x2f8   : > { %v2494_v31 = vadd.f32 %v6627_v25, %v10429_v41  ;;  %v8442_v23 = vadd.f32 %v8410_v39, %v2605_v62  ;;  %v2486_v19 = vadd.f32 %v10430_v7, %v2485_v4  ;;  %v2926_v50 = vadd.f32 1.0, %v7061_v47  ;;  %v7065_v56 = vpop.eup %7064  ;;  %v6631_v17 = vpop.f32.mrb[66].mxu1 }
 0x2f9   : > { %7080 = vpow2.f32 %v5804_v40  ;;  %v2927_v24 = vadd.f32 1.0, %v7063_v33  ;;  %v5809_v44 = vmul.f32 -1.442695, %v8448_v63  ;;  %v10431_v42 = vunpack.c.l.bf16 %v8092_v49  ;;  %v2501_v25 = vpop.f32.mrb[67].mxu1 }
 0x2fa   : > { %v2608_v55 = vadd.f32 %v6539_v10, %v2494_v31  ;;  %v5807_v20 = vmul.f32 -1.442695, %v8442_v23  ;;  %v2606_v43 = vadd.f32 %v8399_v21, %v2486_v19  ;;  %7082 = vrcp.f32 %v2924_v54  ;;  %v7067_v21 = vpop.eup %7066 }
 0x2fb   : > { %7084 = vrcp.f32 %v2926_v50  ;;  %v2925_v10 = vadd.f32 1.0, %v7065_v56  ;;  %v2507_v16 = vadd.f32 %v6630_v28, %v10431_v42  ;;  %v3109_v48 = vmul.f32 %v7057_v6, %v8318_v13  ;;  %v10435_v28 = vld [vmem:[#allocation5_spill] sm:$0xff] }
 0x2fc   : > { %v8454_v38 = vadd.f32 %v8410_v39, %v2608_v55  ;;  %v8457_v60 = vadd.f32 %v8410_v39, %v2606_v43  ;;  %7086 = vrcp.f32 %v2927_v24  ;;  %v10432_v45 = vunpack.c.l.bf16 %v8095_v8  ;;  %v7069_v4 = vpop.eup %7068  ;;  %v10438_v42 = vld [vmem:[#allocation9_spill] sm:$0xff] }
 0x2fd   : > { %7088 = vrcp.f32 %v2925_v10  ;;  %v2611_v53 = vadd.f32 %v2507_v16, %v7921_v36  ;;  %v3111_v11 = vmul.f32 %v7055_v5, %v8315_v2  ;;  %v7071_v46 = vpop.eup %7070  ;;  %v8469_v40 = vmul.f32 %v7069_v4, %v8333_v14 }
 0x2fe   : > { %v5810_v3 = vmul.f32 -1.442695, %v8454_v38  ;;  %v2499_v1 = vadd.f32 %v10432_v45, %v2498_v15  ;;  %v5808_v61 = vmul.f32 -1.442695, %v8457_v60  ;;  %7090 = vpow2.f32 %v5807_v20  ;;  %v7073_v13 = vpop.eup %7072 }
 0x2ff   : > { %v3158_v62 = vpack.c.bf16 %v3109_v48, %v3108_v52  ;;  %7092 = vpow2.f32 %v5809_v44  ;;  %v8473_v6 = vadd.f32 %v8410_v39, %v2611_v53  ;;  %v3159_v18 = vpack.c.bf16 %v3111_v11, %v8435_v57  ;;  %v7075_v31 = vpop.eup %7074  ;;  %v10439_v48 = vld [vmem:[#allocation19_spill] sm:$0xff] }
 0x300   : > { %v2609_v26 = vadd.f32 %v2499_v1, %v7917_v34  ;;  %v10433_v41 = vunpack.c.h.bf16 %v8092_v49  ;;  %7094 = vpow2.f32 %v5810_v3  ;;  %v10434_v14 = vunpack.c.h.bf16 %v8095_v8  ;;  %v6634_v34 = vpop.f32.mrb[68].mxu1  ;;  %v7077_v7 = vpop.eup %7076  ;;  %v10436_v8 = vld [vmem:[#allocation18_spill] sm:$0xff] }
 0x301   : > { %6688 = vmatprep.mubr.bf16.mxu0 %v3158_v62  ;;  %v3112_v29 = vmul.f32 %v7067_v21, %v8340_v30  ;;  %v2928_v19 = vadd.f32 1.0, %v7075_v31  ;;  %7096 = vpow2.f32 %v5808_v61  ;;  %v5813_v57 = vmul.f32 -1.442695, %v8473_v6  ;;  %v2514_v52 = vpop.f32.mrb[69].mxu1  ;;  %v7079_v47 = vpop.eup %7078  ;;  %v10441_v62 = vld [vmem:[#allocation7_spill] sm:$0xff] }
 0x302   : > { %v2510_v36 = vadd.f32 %v6631_v17, %v10433_v41  ;;  %v8479_v2 = vadd.f32 %v8410_v39, %v2609_v26  ;;  %v2502_v5 = vadd.f32 %v10434_v14, %v2501_v25  ;;  %6689 = vmatmul.mubr.bf16.gmra.mrb[76].mxu0 %v3159_v18  ;;  %v2930_v54 = vadd.f32 1.0, %v7077_v7  ;;  %v6635_v43 = vpop.f32.mrb[70].mxu1 }
 0x303   : > { %v10437_v50 = vunpack.c.l.bf16 %v10436_v8  ;;  %v7081_v30 = vpop.eup %7080  ;;  %7098 = vrcp.f32 %v2928_v19  ;;  %v2931_v15 = vadd.f32 1.0, %v7079_v47  ;;  %v3113_v24 = vmul.f32 %v7073_v13, %v8355_v59 }
 0x304   : > { %v2612_v49 = vadd.f32 %v7919_v35, %v2510_v36  ;;  %v5811_v55 = vmul.f32 -1.442695, %v8479_v2  ;;  %v2610_v33 = vadd.f32 %v10435_v28, %v2502_v5  ;;  %v2517_v35 = vpop.f32.mrb[71].mxu1  ;;  %v7083_v44 = vpop.eup %7082  ;;  %7100 = vrcp.f32 %v2930_v54  ;;  %v10445_v54 = vld [vmem:[#allocation6_spill] sm:$0xff] }
 0x305   : > { %v2523_v20 = vadd.f32 %v6634_v34, %v10437_v50  ;;  %v2929_v17 = vadd.f32 1.0, %v7081_v30  ;;  %v7085_v25 = vpop.eup %7084  ;;  %7102 = vrcp.f32 %v2931_v15  ;;  %v3160_v3 = vpack.c.bf16 %v3113_v24, %v3112_v29  ;;  %v6638_v5 = vpop.f32.mrb[72].mxu1  ;;  %v10446_v50 = vld [vmem:[#allocation20_spill] sm:$0xff] }
 0x306   : > { %v8491_v56 = vadd.f32 %v8410_v39, %v2612_v49  ;;  %v8495_v10 = vadd.f32 %v8410_v39, %v2610_v33  ;;  %v10440_v45 = vunpack.c.l.bf16 %v10439_v48  ;;  %v7087_v4 = vpop.eup %7086  ;;  %v8502_v59 = vmul.f32 %v7085_v25, %v8371_v22 }
 0x307   : > { %v2615_v16 = vadd.f32 %v2523_v20, %v10438_v42  ;;  %7104 = vrcp.f32 %v2929_v17  ;;  %v7089_v11 = vpop.eup %7088  ;;  %6692 = vmatprep.mubr.bf16.mxu0 %v3160_v3  ;;  %v3115_v13 = vmul.f32 %v7071_v46, %v8350_v37  ;;  %v10442_v18 = vunpack.c.h.bf16 %v10436_v8  ;;  %v2530_v46 = vpop.f32.mrb[73].mxu1 }
 0x308   : > { %v5814_v21 = vmul.f32 -1.442695, %v8491_v56  ;;  %v2515_v1 = vadd.f32 %v10440_v45, %v2514_v52  ;;  %v5812_v61 = vmul.f32 -1.442695, %v8495_v10  ;;  %7106 = vpow2.f32 %v5813_v57  ;;  %v7091_v36 = vpop.eup %7090  ;;  %v10444_v52 = vld [vmem:[#allocation8_spill] sm:$0xff]  ;;  %v6639_v28 = vpop.f32.mrb[74].mxu1 }
 0x309   : > { %v8506_v53 = vadd.f32 %v8410_v39, %v2615_v16  ;;  %v2526_v41 = vadd.f32 %v6635_v43, %v10442_v18  ;;  %7108 = vpow2.f32 %v5811_v55  ;;  %v10443_v31 = vunpack.c.h.bf16 %v10439_v48  ;;  %v7093_v29 = vpop.eup %7092  ;;  %v2533_v30 = vpop.f32.mrb[75].mxu1  ;;  %v10449_v16 = vld [vmem:[#allocation21_spill] sm:$0xff] }
 0x30a   : > { %v2613_v26 = vadd.f32 %v2515_v1, %v10441_v62  ;;  %v3116_v34 = vmul.f32 %v7083_v44, %v8377_v12  ;;  %v2932_v7 = vadd.f32 1.0, %v7091_v36  ;;  %7110 = vpow2.f32 %v5814_v21  ;;  %v7095_v57 = vpop.eup %7094  ;;  %v10448_v44 = vld [vmem:[#allocation13_spill] sm:$0xff] }
 0x30b   : > { %v5817_v22 = vmul.f32 -1.442695, %v8506_v53  ;;  %v2518_v14 = vadd.f32 %v10443_v31, %v2517_v35  ;;  %v3161_v37 = vpack.c.bf16 %v3115_v13, %v8469_v40  ;;  %v2934_v49 = vadd.f32 1.0, %v7093_v29  ;;  %v7097_v33 = vpop.eup %7096  ;;  %v7307_v13 = vld [vmem:[%s7512_s25 + $0xf0] sm:$0xff]  }
 0x30c   : > { %v8517_v19 = vadd.f32 %v8410_v39, %v2613_v26  ;;  %7112 = vpow2.f32 %v5812_v61  ;;  %v2616_v47 = vadd.f32 %v10444_v52, %v2526_v41  ;;  %v2935_v12 = vadd.f32 1.0, %v7095_v57  ;;  %v10456_v52 = vld [vmem:[#allocation12_spill] sm:$0xff] }
 0x30d   : > { %v2614_v55 = vadd.f32 %v10445_v54, %v2518_v14  ;;  %7114 = vrcp.f32 %v2932_v7  ;;  %6693 = vmatmul.mubr.bf16.gmra.mrb[80].mxu0 %v3161_v37  ;;  %v10447_v20 = vunpack.c.l.bf16 %v10446_v50  ;;  %v2933_v40 = vadd.f32 1.0, %v7097_v33  ;;  %v7099_v35 = vpop.eup %7098  ;;  %v10457_v33 = vld [vmem:[#allocation10_spill] sm:$0xff] }
 0x30e   : > { %v5815_v8 = vmul.f32 -1.442695, %v8517_v19  ;;  %7116 = vrcp.f32 %v2934_v49  ;;  %v8526_v15 = vadd.f32 %v8410_v39, %v2616_v47  ;;  %v3117_v42 = vmul.f32 %v7089_v11, %v8386_v9  ;;  %v7101_v3 = vpop.eup %7100  ;;  %v10451_v11 = vld [vmem:[#allocation11_spill] sm:$0xff] }
 0x30f   : > { %v2539_v43 = vadd.f32 %v6638_v5, %v10447_v20  ;;  %v8529_v24 = vadd.f32 %v8410_v39, %v2614_v55  ;;  %7118 = vrcp.f32 %v2935_v12  ;;  %v10450_v25 = vunpack.c.l.bf16 %v10449_v16  ;;  %v7103_v61 = vpop.eup %7102  ;;  %v6642_v5 = vpop.f32.mrb[76].mxu1 }
 0x310   : > { %7120 = vrcp.f32 %v2933_v40  ;;  %v5818_v48 = vmul.f32 -1.442695, %v8526_v15  ;;  %v3119_v1 = vmul.f32 %v7087_v4, %v8383_v58  ;;  %v3162_v26 = vpack.c.bf16 %v3117_v42, %v3116_v34  ;;  %v10454_v34 = vld [vmem:[#allocation22_spill] sm:$0xff] }
 0x311   : > { %v2619_v17 = vadd.f32 %v2539_v43, %v10448_v44  ;;  %v2531_v21 = vadd.f32 %v10450_v25, %v2530_v46  ;;  %v5816_v45 = vmul.f32 -1.442695, %v8529_v24  ;;  %7122 = vpow2.f32 %v5817_v22  ;;  %v7105_v9 = vpop.eup %7104  ;;  %v2546_v46 = vpop.f32.mrb[77].mxu1 }
 0x312   : > { %v6064_v18 = vunpack.c.h.bf16 %v7307_v13  ;;  %7124 = vpow2.f32 %v5815_v8  ;;  %v3163_v36 = vpack.c.bf16 %v3119_v1, %v8502_v59  ;;  %v10452_v31 = vunpack.c.h.bf16 %v10446_v50  ;;  %v7107_v29 = vpop.eup %7106  ;;  %6696 = vmatprep.mubr.bf16.mxu0 %v3162_v26  ;;  %v6643_v54 = vpop.f32.mrb[78].mxu1  ;;  %v10458_v8 = vld [vmem:[#allocation17_spill] sm:$0xff] }
 0x313   : > { %v8539_v62 = vadd.f32 %v8410_v39, %v2619_v17  ;;  %v2617_v41 = vadd.f32 %v2531_v21, %v10451_v11  ;;  %7126 = vpow2.f32 %v5818_v48  ;;  %v10453_v4 = vunpack.c.h.bf16 %v10449_v16  ;;  %v7109_v57 = vpop.eup %7108  ;;  %v2549_v20 = vpop.f32.mrb[79].mxu1 }
 0x314   : > { %v2542_v14 = vadd.f32 %v6639_v28, %v10452_v31  ;;  %v10455_v7 = vunpack.c.l.bf16 %v10454_v34  ;;  %v2938_v49 = vadd.f32 1.0, %v7107_v29  ;;  %7128 = vpow2.f32 %v5816_v45  ;;  %v7111_v55 = vpop.eup %7110 }
 0x315   : > { %v5821_v58 = vmul.f32 -1.442695, %v8539_v62  ;;  %v2534_v22 = vadd.f32 %v10453_v4, %v2533_v30  ;;  %v8552_v59 = vadd.f32 %v8410_v39, %v2617_v41  ;;  %v2936_v28 = vadd.f32 1.0, %v7109_v57  ;;  %6697 = vmatmul.mubr.bf16.gmra.mrb[84].mxu0 %v3163_v36 }
 0x316   : > { %v2555_v37 = vadd.f32 %v6642_v5, %v10455_v7  ;;  %v2620_v47 = vadd.f32 %v10456_v52, %v2542_v14  ;;  %v7113_v43 = vpop.eup %7112  ;;  %v2939_v30 = vadd.f32 1.0, %v7111_v55  ;;  %v3120_v45 = vmul.f32 %v7099_v35, %v8413_v27  ;;  %v10459_v14 = vld [vmem:[#allocation23_spill] sm:$0xff] }
 0x317   : > { %7130 = vpow2.f32 %v5821_v58  ;;  %v2618_v12 = vadd.f32 %v10457_v33, %v2534_v22  ;;  %v5819_v40 = vmul.f32 -1.442695, %v8552_v59  ;;  %v7115_v17 = vpop.eup %7114  ;;  %v2937_v42 = vadd.f32 1.0, %v7113_v43  ;;  %v10462_v22 = vld [vmem:[#allocation15_spill] sm:$0xff] }
 0x318   : > { %v2623_v50 = vadd.f32 %v2555_v37, %v10458_v8  ;;  %7132 = vrcp.f32 %v2938_v49  ;;  %v8559_v44 = vadd.f32 %v8410_v39, %v2620_v47  ;;  %v7117_v21 = vpop.eup %7116  ;;  %v3121_v1 = vmul.f32 %v7105_v9, %v8428_v0 }
 0x319   : > { %7134 = vrcp.f32 %v2936_v28  ;;  %v8562_v16 = vadd.f32 %v8410_v39, %v2618_v12  ;;  %v7119_v26 = vpop.eup %7118  ;;  %v3122_v13 = vmul.f32 %v7101_v3, %v8403_v51  ;;  %v10460_v5 = vunpack.c.l.bf16 %v10459_v14 }
 0x31a   : > { %v8565_v25 = vadd.f32 %v8410_v39, %v2623_v50  ;;  %7136 = vrcp.f32 %v2939_v30  ;;  %v5822_v48 = vmul.f32 -1.442695, %v8559_v44  ;;  %v7121_v36 = vpop.eup %7120  ;;  %v3164_v31 = vpack.c.bf16 %v3121_v1, %v3120_v45 }
 0x31b   : > { %7138 = vrcp.f32 %v2937_v42  ;;  %v5820_v11 = vmul.f32 -1.442695, %v8562_v16  ;;  %v2547_v29 = vadd.f32 %v10460_v5, %v2546_v46  ;;  %v3123_v58 = vmul.f32 %v7103_v61, %v8424_v32  ;;  %v7123_v4 = vpop.eup %7122  ;;  %v10463_v46 = vld [vmem:[#allocation16_spill] sm:$0xff]  ;;  %v10464_v61 = vld [vmem:[#allocation14_spill] sm:$0xff] }
 0x31c   : > { %v5825_v41 = vmul.f32 -1.442695, %v8565_v25  ;;  %7140 = vpow2.f32 %v5819_v40  ;;  %v10461_v27 = vunpack.c.h.bf16 %v10454_v34  ;;  %v2550_v35 = vadd.f32 %v6064_v18, %v2549_v20  ;;  %v7125_v3 = vpop.eup %7124  ;;  %6700 = vmatprep.mubr.bf16.mxu0 %v3164_v31 }
 0x31d   : > { %7142 = vpow2.f32 %v5822_v48  ;;  %v3124_v51 = vmul.f32 %v7115_v17, %v8442_v23  ;;  %v2942_v9 = vadd.f32 1.0, %v7123_v4  ;;  %v2621_v7 = vadd.f32 %v2547_v29, %v10462_v22  ;;  %v7127_v57 = vpop.eup %7126 }
 0x31e   : > { %v2558_v0 = vadd.f32 %v6643_v54, %v10461_v27  ;;  %7144 = vpow2.f32 %v5820_v11  ;;  %v3165_v37 = vpack.c.bf16 %v3123_v58, %v3122_v13  ;;  %v2940_v49 = vadd.f32 1.0, %v7125_v3  ;;  %v7129_v47 = vpop.eup %7128 }
 0x31f   : > { %7146 = vpow2.f32 %v5825_v41  ;;  %v2622_v52 = vadd.f32 %v10464_v61, %v2550_v35  ;;  %v2943_v34 = vadd.f32 1.0, %v7127_v57  ;;  %v8583_v18 = vadd.f32 %v8410_v39, %v2621_v7 }
 0x320   : > { %v2624_v32 = vadd.f32 %v10463_v46, %v2558_v0  ;;  %7148 = vrcp.f32 %v2942_v9  ;;  %6701 = vmatmul.mubr.bf16.gmra.mrb[88].mxu0 %v3165_v37  ;;  %v3125_v23 = vmul.f32 %v7121_v36, %v8457_v60  ;;  %v2941_v55 = vadd.f32 1.0, %v7129_v47 }
 0x321   : > { %v7131_v54 = vpop.eup %7130  ;;  %7150 = vrcp.f32 %v2940_v49  ;;  %v8590_v33 = vadd.f32 %v8410_v39, %v2622_v52  ;;  %v3126_v8 = vmul.f32 %v7117_v21, %v8448_v63  ;;  %v5823_v50 = vmul.f32 -1.442695, %v8583_v18 }
 0x322   : > { %v8587_v28 = vadd.f32 %v8410_v39, %v2624_v32  ;;  %v7133_v12 = vpop.eup %7132  ;;  %7152 = vrcp.f32 %v2943_v34  ;;  %v3166_v20 = vpack.c.bf16 %v3125_v23, %v3124_v51  ;;  %v3127_v40 = vmul.f32 %v7119_v26, %v8454_v38 }
 0x323   : > { %v7135_v43 = vpop.eup %7134  ;;  %7154 = vrcp.f32 %v2941_v55  ;;  %v5824_v30 = vmul.f32 -1.442695, %v8590_v33  ;;  %v2946_v42 = vadd.f32 1.0, %v7131_v54  ;;  %v3130_v63 = vmul.f32 %v7133_v12, %v8473_v6 }
 0x324   : > { %v5826_v60 = vmul.f32 -1.442695, %v8587_v28  ;;  %v7137_v17 = vpop.eup %7136  ;;  %6704 = vmatprep.mubr.bf16.mxu0 %v3166_v20  ;;  %7156 = vpow2.f32 %v5823_v50  ;;  %v3167_v48 = vpack.c.bf16 %v3127_v40, %v3126_v8  ;;  %v3128_v1 = vmul.f32 %v7135_v43, %v8479_v2 }
 0x325   : > { %v7139_v39 = vpop.eup %7138  ;;  %v3131_v21 = vmul.f32 %v7137_v17, %v8491_v56 }
 0x326   : > { %v7141_v45 = vpop.eup %7140  ;;  %7158 = vpow2.f32 %v5826_v60  ;;  %v3129_v13 = vmul.f32 %v7139_v39, %v8495_v10 }
 0x327   : > { %v7143_v11 = vpop.eup %7142  ;;  %v2944_v41 = vadd.f32 1.0, %v7141_v45  ;;  %7160 = vpow2.f32 %v5824_v30  ;;  %v3169_v38 = vpack.c.bf16 %v3131_v21, %v3130_v63 }
 0x328   : > { %v7145_v26 = vpop.eup %7144  ;;  %7162 = vrcp.f32 %v2946_v42  ;;  %v2947_v36 = vadd.f32 1.0, %v7143_v11  ;;  %6705 = vmatmul.mubr.bf16.gmra.mrb[92].mxu0 %v3167_v48  ;;  %v3168_v31 = vpack.c.bf16 %v3129_v13, %v3128_v1 }
 0x329   : > { %v7147_v14 = vpop.eup %7146  ;;  %7164 = vrcp.f32 %v2944_v41  ;;  %v2945_v6 = vadd.f32 1.0, %v7145_v26 }
 0x32a   : > { %v7149_v5 = vpop.eup %7148  ;;  %7166 = vrcp.f32 %v2947_v36  ;;  %6708 = vmatprep.mubr.bf16.mxu0 %v3168_v31  ;;  %v2950_v10 = vadd.f32 1.0, %v7147_v14 }
 0x32b   : > { %v7151_v56 = vpop.eup %7150  ;;  %7168 = vrcp.f32 %v2945_v6  ;;  %v3134_v58 = vmul.f32 %v7149_v5, %v8506_v53 }
 0x32c   : > { %v7153_v2 = vpop.eup %7152  ;;  %v3132_v27 = vmul.f32 %v7151_v56, %v8517_v19  ;;  %7170 = vrcp.f32 %v2950_v10 }
 0x32d   : > { %v7155_v29 = vpop.eup %7154  ;;  %v3135_v4 = vmul.f32 %v7153_v2, %v8526_v15 }
 0x32e   : > { %v3133_v0 = vmul.f32 %v7155_v29, %v8529_v24  ;;  %v7157_v35 = vpop.eup %7156 }
 0x32f   : > { %v3171_v51 = vpack.c.bf16 %v3135_v4, %v3134_v58  ;;  %v2948_v9 = vadd.f32 1.0, %v7157_v35 }
 0x330   : > { %v7159_v3 = vpop.eup %7158  ;;  %6709 = vmatmul.mubr.bf16.gmra.mrb[96].mxu0 %v3169_v38  ;;  %v3170_v22 = vpack.c.bf16 %v3133_v0, %v3132_v27 }
 0x331   : > { %v7161_v7 = vpop.eup %7160  ;;  %v2951_v37 = vadd.f32 1.0, %v7159_v3  ;;  %7172 = vrcp.f32 %v2948_v9 }
 0x332   : > { %v7163_v57 = vpop.eup %7162  ;;  %v2949_v49 = vadd.f32 1.0, %v7161_v7  ;;  %6712 = vmatprep.mubr.bf16.mxu0 %v3170_v22 }
 0x333   : > { %v7165_v53 = vpop.eup %7164  ;;  %7174 = vrcp.f32 %v2951_v37  ;;  %v3138_v24 = vmul.f32 %v7163_v57, %v8539_v62 }
 0x334   : > { %v7167_v15 = vpop.eup %7166  ;;  %7176 = vrcp.f32 %v2949_v49  ;;  %v3136_v32 = vmul.f32 %v7165_v53, %v8552_v59 }
 0x335   : > { %v7169_v19 = vpop.eup %7168  ;;  %v3139_v46 = vmul.f32 %v7167_v15, %v8559_v44 }
 0x336   : > { %v3137_v61 = vmul.f32 %v7169_v19, %v8562_v16  ;;  %v7171_v34 = vpop.eup %7170  ;;  %v8616_v16 = vld [vmem:[%s10293_s9] ss:$0 sm:$0xff] }
 0x337   : > { %v3173_v52 = vpack.c.bf16 %v3139_v46, %v3138_v24  ;;  %v3142_v12 = vmul.f32 %v7171_v34, %v8565_v25 }
 0x338   : > { %6713 = vmatmul.mubr.bf16.gmra.mrb[100].mxu0 %v3171_v51  ;;  %v3172_v47 = vpack.c.bf16 %v3137_v61, %v3136_v32 }
 0x33a   : > { %6716 = vmatprep.mubr.bf16.mxu0 %v3172_v47 }
 0x33b   : > { %v7173_v23 = vpop.eup %7172 }
 0x33c   : > { %v3140_v62 = vmul.f32 %v7173_v23, %v8583_v18 }
 0x33d   : > { %v7175_v54 = vpop.eup %7174 }
 0x33e   : > { %v7177_v55 = vpop.eup %7176  ;;  %v3143_v8 = vmul.f32 %v7175_v54, %v8587_v28 }
 0x33f   : > { %v3141_v44 = vmul.f32 %v7177_v55, %v8590_v33 }
 0x340   : > { %6717 = vmatmul.mubr.bf16.gmra.mrb[104].mxu0 %v3173_v52  ;;  %v3175_v59 = vpack.c.bf16 %v3143_v8, %v3142_v12 }
 0x341   : > { %v3174_v50 = vpack.c.bf16 %v3141_v44, %v3140_v62 }
 0x343   : > { %6720 = vmatprep.mubr.bf16.mxu0 %v3174_v50 }
 0x348   : > { %6721 = vmatmul.mubr.bf16.gmra.mrb[108].mxu0 %v3175_v59 }
 0x38e   : > { %v6662_v20 = vpop.f32.mrb[48].mxu0 }
 0x38f   : > { %v8619_v43 = vadd.f32 %v6662_v20, %v8616_v16  ;;  %v3281_v25 = vpop.f32.mrb[49].mxu0 }
 0x390   : > { %v8622_v28 = vadd.f32 %v8616_v16, %v3281_v25  ;;  %v6663_v18 = vpop.f32.mrb[50].mxu0 }
 0x391   : > { %3542 = vadd.xlane.f32.xlu1 %v8619_v43  ;;  %v3284_v33 = vpop.f32.mrb[51].mxu0  ;;  %v3733_v60 = vmul.f32 %v8619_v43, %v8619_v43  ;;  %v8629_v30 = vadd.f32 %v6663_v18, %v8616_v16 }
 0x392   : > { %3538 = vadd.xlane.f32.xlu0 %v8622_v28  ;;  %v3731_v40 = vmul.f32 %v8622_v28, %v8622_v28  ;;  %v8635_v17 = vadd.f32 %v8616_v16, %v3284_v33 }
 0x393   : > { %v3734_v21 = vmul.f32 %v8629_v30, %v8629_v30 }
 0x394   : > { %v3732_v13 = vmul.f32 %v8635_v17, %v8635_v17 }
 0x395   : > { %3799 = vadd.xlane.f32.xlu1 %v3733_v60 }
 0x396   : > { %3544 = vadd.xlane.f32.xlu0 %v8629_v30 }
 0x399   : > { %3795 = vadd.xlane.f32.xlu1 %v3731_v40 }
 0x39a   : > { %3540 = vadd.xlane.f32.xlu0 %v8635_v17 }
 0x39b   : > { %v6666_v42 = vpop.f32.mrb[52].mxu0 }
 0x39c   : > { %v8639_v39 = vadd.f32 %v6666_v42, %v8616_v16  ;;  %v3297_v48 = vpop.f32.mrb[53].mxu0 }
 0x39d   : > { %v6667_v63 = vpop.f32.mrb[54].mxu0  ;;  %v8645_v1 = vadd.f32 %v8616_v16, %v3297_v48 }
 0x39e   : > { %v3300_v45 = vpop.f32.mrb[55].mxu0  ;;  %3550 = vadd.xlane.f32.xlu1 %v8639_v39  ;;  %3801 = vadd.xlane.f32.xlu0 %v3734_v21  ;;  %v3737_v41 = vmul.f32 %v8639_v39, %v8639_v39  ;;  %v8653_v38 = vadd.f32 %v6667_v63, %v8616_v16 }
 0x39f   : > { %v3735_v14 = vmul.f32 %v8645_v1, %v8645_v1  ;;  %v8659_v6 = vadd.f32 %v8616_v16, %v3300_v45 }
 0x3a0   : > { %v3738_v29 = vmul.f32 %v8653_v38, %v8653_v38 }
 0x3a1   : > { %v3736_v27 = vmul.f32 %v8659_v6, %v8659_v6 }
 0x3a2   : > { %3546 = vadd.xlane.f32.xlu1 %v8645_v1  ;;  %3797 = vadd.xlane.f32.xlu0 %v3732_v13 }
 0x3a5   : > { %v6670_v11 = vpop.f32.mrb[56].mxu0 }
 0x3a6   : > { %v3313_v26 = vpop.f32.mrb[57].mxu0  ;;  %3807 = vadd.xlane.f32.xlu1 %v3737_v41  ;;  %3552 = vadd.xlane.f32.xlu0 %v8653_v38  ;;  %v8663_v5 = vadd.f32 %v6670_v11, %v8616_v16 }
 0x3a7   : > { %v6671_v36 = vpop.f32.mrb[58].mxu0  ;;  %v8669_v4 = vadd.f32 %v8616_v16, %v3313_v26 }
 0x3a8   : > { %v3316_v31 = vpop.f32.mrb[59].mxu0  ;;  %v3741_v35 = vmul.f32 %v8663_v5, %v8663_v5  ;;  %v8677_v51 = vadd.f32 %v6671_v36, %v8616_v16 }
 0x3a9   : > { %v3739_v7 = vmul.f32 %v8669_v4, %v8669_v4  ;;  %v8683_v37 = vadd.f32 %v8616_v16, %v3316_v31 }
 0x3aa   : > { %3803 = vadd.xlane.f32.xlu1 %v3735_v14  ;;  %3548 = vadd.xlane.f32.xlu0 %v8659_v6  ;;  %v3742_v53 = vmul.f32 %v8677_v51, %v8677_v51 }
 0x3ab   : > { %v3740_v32 = vmul.f32 %v8683_v37, %v8683_v37 }
 0x3ae   : > { %v6674_v56 = vpop.f32.mrb[60].mxu0  ;;  %3558 = vadd.xlane.f32.xlu1 %v8663_v5  ;;  %3809 = vadd.xlane.f32.xlu0 %v3738_v29 }
 0x3af   : > { %v3329_v2 = vpop.f32.mrb[61].mxu0  ;;  %v8687_v57 = vadd.f32 %v6674_v56, %v8616_v16 }
 0x3b0   : > { %v6675_v10 = vpop.f32.mrb[62].mxu0  ;;  %v8693_v24 = vadd.f32 %v8616_v16, %v3329_v2 }
 0x3b1   : > { %v3332_v58 = vpop.f32.mrb[63].mxu0  ;;  %v3745_v61 = vmul.f32 %v8687_v57, %v8687_v57  ;;  %v8701_v52 = vadd.f32 %v6675_v10, %v8616_v16 }
 0x3b2   : > { %3554 = vadd.xlane.f32.xlu1 %v8669_v4  ;;  %3805 = vadd.xlane.f32.xlu0 %v3736_v27  ;;  %v3743_v55 = vmul.f32 %v8693_v24, %v8693_v24  ;;  %v8711_v12 = vadd.f32 %v8616_v16, %v3332_v58 }
 0x3b3   : > { %v3746_v62 = vmul.f32 %v8701_v52, %v8701_v52 }
 0x3b4   : > { %v3744_v18 = vmul.f32 %v8711_v12, %v8711_v12 }
 0x3b6   : > { %3815 = vadd.xlane.f32.xlu1 %v3741_v35  ;;  %3560 = vadd.xlane.f32.xlu0 %v8677_v51 }
 0x3b8   : > { %v6678_v0 = vpop.f32.mrb[64].mxu0 }
 0x3b9   : > { %v3345_v3 = vpop.f32.mrb[65].mxu0  ;;  %v8715_v8 = vadd.f32 %v6678_v0, %v8616_v16 }
 0x3ba   : > { %v6679_v9 = vpop.f32.mrb[66].mxu0  ;;  %3811 = vadd.xlane.f32.xlu1 %v3739_v7  ;;  %3556 = vadd.xlane.f32.xlu0 %v8683_v37  ;;  %v8733_v33 = vadd.f32 %v8616_v16, %v3345_v3 }
 0x3bb   : > { %v3348_v22 = vpop.f32.mrb[67].mxu0  ;;  %10465 = vst [vmem:[#allocation5_spill] sm:$0xff] %v8715_v8  ;;  %v3749_v20 = vmul.f32 %v8715_v8, %v8715_v8  ;;  %v8745_v48 = vadd.f32 %v6679_v9, %v8616_v16 }
 0x3bc   : > { %v8736_v60 = vadd.f32 %v8616_v16, %v3348_v22  ;;  %v3747_v42 = vmul.f32 %v8733_v33, %v8733_v33 }
 0x3bd   : > { %v3750_v11 = vmul.f32 %v8745_v48, %v8745_v48 }
 0x3be   : > { %3566 = vadd.xlane.f32.xlu1 %v8687_v57  ;;  %3817 = vadd.xlane.f32.xlu0 %v3742_v53  ;;  %10466 = vst [vmem:[#allocation18_spill] sm:$0xff] %v8736_v60  ;;  %v3748_v31 = vmul.f32 %v8736_v60, %v8736_v60 }
 0x3c1   : > { %v6682_v49 = vpop.f32.mrb[68].mxu0 }
 0x3c2   : > { %v3361_v15 = vpop.f32.mrb[69].mxu0  ;;  %3562 = vadd.xlane.f32.xlu1 %v8693_v24  ;;  %3813 = vadd.xlane.f32.xlu0 %v3740_v32  ;;  %v8755_v13 = vadd.f32 %v6682_v49, %v8616_v16 }
 0x3c3   : > { %v6683_v19 = vpop.f32.mrb[70].mxu0  ;;  %v8761_v41 = vadd.f32 %v8616_v16, %v3361_v15 }
 0x3c4   : > { %v3364_v46 = vpop.f32.mrb[71].mxu0  ;;  %10467 = vst [vmem:[#allocation9_spill] sm:$0xff] %v8755_v13  ;;  %v3753_v2 = vmul.f32 %v8755_v13, %v8755_v13  ;;  %v8777_v29 = vadd.f32 %v6683_v19, %v8616_v16 }
 0x3c5   : > { %10468 = vst [vmem:[#allocation19_spill] sm:$0xff] %v8761_v41  ;;  %v3751_v10 = vmul.f32 %v8761_v41, %v8761_v41  ;;  %v8783_v58 = vadd.f32 %v8616_v16, %v3364_v46 }
 0x3c6   : > { %3823 = vadd.xlane.f32.xlu1 %v3745_v61  ;;  %3568 = vadd.xlane.f32.xlu0 %v8701_v52  ;;  %10469 = vst [vmem:[#allocation7_spill] sm:$0xff] %v8777_v29  ;;  %v3754_v22 = vmul.f32 %v8777_v29, %v8777_v29 }
 0x3c7   : > { %10470 = vst [vmem:[#allocation8_spill] sm:$0xff] %v8783_v58  ;;  %v3752_v53 = vmul.f32 %v8783_v58, %v8783_v58 }
 0x3ca   : > { %v6686_v47 = vpop.f32.mrb[72].mxu0  ;;  %3819 = vadd.xlane.f32.xlu1 %v3743_v55  ;;  %3564 = vadd.xlane.f32.xlu0 %v8711_v12 }
 0x3cb   : > { %v3377_v34 = vpop.f32.mrb[73].mxu0  ;;  %v8793_v3 = vadd.f32 %v6686_v47, %v8616_v16 }
 0x3cc   : > { %v8703_v23 = vpop.f32.mrb[74].mxu0  ;;  %v8801_v7 = vadd.f32 %v8616_v16, %v3377_v34 }
 0x3cd   : > { %v8706_v54 = vpop.f32.mrb[75].mxu0  ;;  %10471 = vst [vmem:[#allocation6_spill] sm:$0xff] %v8793_v3  ;;  %v3757_v32 = vmul.f32 %v8793_v3, %v8793_v3  ;;  %v8818_v61 = vadd.f32 %v8703_v23, %v8616_v16 }
 0x3ce   : > { %3574 = vadd.xlane.f32.xlu1 %v8715_v8  ;;  %3825 = vadd.xlane.f32.xlu0 %v3746_v62  ;;  %10472 = vst [vmem:[#allocation20_spill] sm:$0xff] %v8801_v7  ;;  %v3755_v47 = vmul.f32 %v8801_v7, %v8801_v7  ;;  %v8825_v34 = vadd.f32 %v8616_v16, %v8706_v54 }
 0x3cf   : > { %10473 = vst [vmem:[#allocation13_spill] sm:$0xff] %v8818_v61 }
 0x3d0   : > { %10474 = vst [vmem:[#allocation21_spill] sm:$0xff] %v8825_v34 }
 0x3d2   : > { %3831 = vadd.xlane.f32.xlu1 %v3749_v20  ;;  %3821 = vadd.xlane.f32.xlu0 %v3744_v18 }
 0x3d5   : > { %v8719_v44 = vpop.f32.mrb[76].mxu0 }
 0x3d6   : > { %v8722_v59 = vpop.f32.mrb[77].mxu0  ;;  %3572 = vadd.xlane.f32.xlu1 %v8736_v60  ;;  %3570 = vadd.xlane.f32.xlu0 %v8733_v33  ;;  %v8836_v23 = vadd.f32 %v8719_v44, %v8616_v16 }
 0x3d7   : > { %v8724_v50 = vpop.f32.mrb[78].mxu0  ;;  %v8845_v54 = vadd.f32 %v8616_v16, %v8722_v59 }
 0x3d8   : > { %v8728_v25 = vpop.f32.mrb[79].mxu0  ;;  %10475 = vst [vmem:[#allocation11_spill] sm:$0xff] %v8836_v23  ;;  %v8862_v59 = vadd.f32 %v8724_v50, %v8616_v16 }
 0x3d9   : > { %10476 = vst [vmem:[#allocation22_spill] sm:$0xff] %v8845_v54 }
 0x3da   : > { %3827 = vadd.xlane.f32.xlu1 %v3747_v42  ;;  %3576 = vadd.xlane.f32.xlu0 %v8745_v48  ;;  %v3758_v42 = vmul.f32 %v8818_v61, %v8818_v61  ;;  %10477 = vst [vmem:[#allocation12_spill] sm:$0xff] %v8862_v59 }
 0x3de   : > { %3582 = vadd.xlane.f32.xlu1 %v8755_v13  ;;  %3833 = vadd.xlane.f32.xlu0 %v3750_v11 }
 0x3e0   : > { %v8740_v40 = vpop.f32.mrb[80].mxu0 }
 0x3e1   : > { %v8747_v63 = vpop.f32.mrb[81].mxu0  ;;  %v8880_v50 = vadd.f32 %v8740_v40, %v8616_v16 }
 0x3e2   : > { %v8749_v21 = vpop.f32.mrb[82].mxu0  ;;  %3578 = vadd.xlane.f32.xlu1 %v8761_v41  ;;  %3829 = vadd.xlane.f32.xlu0 %v3748_v31  ;;  %v3756_v31 = vmul.f32 %v8825_v34, %v8825_v34 }
 0x3e3   : > { %v8751_v45 = vpop.f32.mrb[83].mxu0  ;;  %10479 = vst [vmem:[#allocation17_spill] sm:$0xff] %v8880_v50 }
 0x3e6   : > { %3839 = vadd.xlane.f32.xlu1 %v3753_v2  ;;  %3584 = vadd.xlane.f32.xlu0 %v8777_v29 }
 0x3e8   : > { %v8763_v26 = vpop.f32.mrb[84].mxu0 }
 0x3e9   : > { %v8765_v36 = vpop.f32.mrb[85].mxu0 }
 0x3ea   : > { %v8769_v14 = vpop.f32.mrb[86].mxu0  ;;  %3835 = vadd.xlane.f32.xlu1 %v3751_v10  ;;  %3580 = vadd.xlane.f32.xlu0 %v8783_v58 }
 0x3eb   : > { %v8772_v56 = vpop.f32.mrb[87].mxu0 }
 0x3ee   : > { %3590 = vadd.xlane.f32.xlu1 %v8793_v3  ;;  %3841 = vadd.xlane.f32.xlu0 %v3754_v22  ;;  %v3761_v22 = vmul.f32 %v8836_v23, %v8836_v23  ;;  %v8913_v3 = vadd.f32 %v8616_v16, %v8751_v45 }
 0x3f0   : > { %10484 = vst [vmem:[#allocation24_spill] sm:$0xff] %v8913_v3 }
 0x3f2   : > { %3586 = vadd.xlane.f32.xlu1 %v8801_v7  ;;  %3837 = vadd.xlane.f32.xlu0 %v3752_v53  ;;  %v3759_v53 = vmul.f32 %v8845_v54, %v8845_v54 }
 0x3f3   : > { %v8785_v27 = vpop.f32.mrb[88].mxu0 }
 0x3f4   : > { %v8787_v0 = vpop.f32.mrb[89].mxu0 }
 0x3f5   : > { %v8789_v35 = vpop.f32.mrb[90].mxu0 }
 0x3f6   : > { %v8795_v9 = vpop.f32.mrb[91].mxu0  ;;  %3847 = vadd.xlane.f32.xlu1 %v3757_v32  ;;  %3592 = vadd.xlane.f32.xlu0 %v8818_v61  ;;  %v8869_v32 = vadd.f32 %v8616_v16, %v8728_v25  ;;  %v8889_v25 = vadd.f32 %v8616_v16, %v8747_v63  ;;  %v8906_v63 = vadd.f32 %v8749_v21, %v8616_v16 }
 0x3f8   : > { %10478 = vst [vmem:[#allocation10_spill] sm:$0xff] %v8869_v32  ;;  %10480 = vst [vmem:[#allocation23_spill] sm:$0xff] %v8889_v25  ;;  %v3766_v21 = vmul.f32 %v8906_v63, %v8906_v63 }
 0x3f9   : > { %10483 = vst [vmem:[#allocation14_spill] sm:$0xff] %v8906_v63 }
 0x3fa   : > { %3843 = vadd.xlane.f32.xlu1 %v3755_v47  ;;  %3588 = vadd.xlane.f32.xlu0 %v8825_v34 }
 0x3fb   : > { %v8803_v49 = vpop.f32.mrb[92].mxu0 }
 0x3fc   : > { %v8807_v15 = vpop.f32.mrb[93].mxu0 }
 0x3fd   : > { %v8810_v19 = vpop.f32.mrb[94].mxu0 }
 0x3fe   : > { %v8812_v46 = vpop.f32.mrb[95].mxu0  ;;  %3598 = vadd.xlane.f32.xlu1 %v8836_v23  ;;  %3849 = vadd.xlane.f32.xlu0 %v3758_v42  ;;  %v3762_v23 = vmul.f32 %v8862_v59, %v8862_v59 }
 0x402   : > { %3594 = vadd.xlane.f32.xlu1 %v8845_v54  ;;  %3845 = vadd.xlane.f32.xlu0 %v3756_v31  ;;  %v3760_v54 = vmul.f32 %v8869_v32, %v8869_v32 }
 0x403   : > { %v8827_v55 = vpop.f32.mrb[96].mxu0 }
 0x404   : > { %v8829_v62 = vpop.f32.mrb[97].mxu0 }
 0x405   : > { %v8831_v20 = vpop.f32.mrb[98].mxu0 }
 0x406   : > { %v8838_v18 = vpop.f32.mrb[99].mxu0  ;;  %3855 = vadd.xlane.f32.xlu1 %v3761_v22  ;;  %3600 = vadd.xlane.f32.xlu0 %v8862_v59 }
 0x40a   : > { %3851 = vadd.xlane.f32.xlu1 %v3759_v53  ;;  %3596 = vadd.xlane.f32.xlu0 %v8869_v32  ;;  %v3763_v32 = vmul.f32 %v8889_v25, %v8889_v25 }
 0x40b   : > { %v8847_v11 = vpop.f32.mrb[100].mxu0 }
 0x40c   : > { %v8851_v2 = vpop.f32.mrb[101].mxu0 }
 0x40d   : > { %v8854_v44 = vpop.f32.mrb[102].mxu0 }
 0x40e   : > { %v8856_v10 = vpop.f32.mrb[103].mxu0  ;;  %3606 = vadd.xlane.f32.xlu1 %v8880_v50  ;;  %3857 = vadd.xlane.f32.xlu0 %v3762_v23  ;;  %v3765_v23 = vmul.f32 %v8880_v50, %v8880_v50  ;;  %v3764_v50 = vmul.f32 %v8913_v3, %v8913_v3 }
 0x412   : > { %3602 = vadd.xlane.f32.xlu1 %v8889_v25  ;;  %3853 = vadd.xlane.f32.xlu0 %v3760_v54  ;;  %v8918_v54 = vadd.f32 %v8763_v26, %v8616_v16  ;;  %v8925_v25 = vadd.f32 %v8616_v16, %v8765_v36 }
 0x413   : > { %v8871_v47 = vpop.f32.mrb[104].mxu0 }
 0x414   : > { %v8873_v42 = vpop.f32.mrb[105].mxu0  ;;  %10485 = vst [vmem:[#allocation25_spill] sm:$0xff] %v8918_v54  ;;  %10486 = vst [vmem:[#allocation26_spill] sm:$0xff] %v8925_v25  ;;  %v3769_v36 = vmul.f32 %v8918_v54, %v8918_v54 }
 0x415   : > { %v8875_v31 = vpop.f32.mrb[106].mxu0 }
 0x416   : > { %v8882_v22 = vpop.f32.mrb[107].mxu0  ;;  %3863 = vadd.xlane.f32.xlu1 %v3765_v23  ;;  %3608 = vadd.xlane.f32.xlu0 %v8906_v63 }
 0x41a   : > { %3859 = vadd.xlane.f32.xlu1 %v3763_v32  ;;  %3604 = vadd.xlane.f32.xlu0 %v8913_v3 }
 0x41b   : > { %v8891_v53 = vpop.f32.mrb[108].mxu0 }
 0x41c   : > { %v8895_v34 = vpop.f32.mrb[109].mxu0 }
 0x41d   : > { %v8898_v40 = vpop.f32.mrb[110].mxu0 }
 0x41e   : > { %10481 = vst [vmem:[#allocation15_spill] sm:$0xff] %v8898_v40  ;;  %v8900_v59 = vpop.f32.mrb[111].mxu0  ;;  %3614 = vadd.xlane.f32.xlu1 %v8918_v54  ;;  %v3543_v23 = vpop.xlane.xlu1 %3542  ;;  %3865 = vadd.xlane.f32.xlu0 %v3766_v21  ;;  %v8949_v54 = vadd.f32 %v8616_v16, %v8772_v56 }
 0x41f   : > { %10482 = vst [vmem:[#allocation16_spill] sm:$0xff] %v8900_v59  ;;  %v8927_v45 = vmul.f32 0.0078125, %v3543_v23  ;;  %v3539_v32 = vpop.xlane.xlu0 %3538  ;;  %v8940_v23 = vadd.f32 %v8769_v14, %v8616_v16 }
 0x420   : > { %v8934_v61 = vmul.f32 0.0078125, %v3539_v32  ;;  %10488 = vst [vmem:[#allocation28_spill] sm:$0xff] %v8949_v54 }
 0x421   : > { %v3989_v63 = vmul.f32 %v8927_v45, %v8927_v45  ;;  %10487 = vst [vmem:[#allocation27_spill] sm:$0xff] %v8940_v23 }
 0x422   : > { %3610 = vadd.xlane.f32.xlu1 %v8925_v25  ;;  %v3800_v26 = vpop.xlane.xlu1 %3799  ;;  %3861 = vadd.xlane.f32.xlu0 %v3764_v50  ;;  %v3987_v50 = vmul.f32 %v8934_v61, %v8934_v61 }
 0x423   : > { %v3925_v21 = vmul.f32 0.0078125, %v3800_v26  ;;  %v3545_v7 = vpop.xlane.xlu0 %3544  ;;  %v3767_v26 = vmul.f32 %v8925_v25, %v8925_v25 }
 0x424   : > { %v8951_v14 = vmul.f32 0.0078125, %v3545_v7 }
 0x425   : > { %v4053_v58 = vsub.f32 %v3925_v21, %v3989_v63 }
 0x426   : > { %3871 = vadd.xlane.f32.xlu1 %v3769_v36  ;;  %3616 = vadd.xlane.f32.xlu0 %v8940_v23  ;;  %v3796_v3 = vpop.xlane.xlu1 %3795  ;;  %v3990_v25 = vmul.f32 %v8951_v14, %v8951_v14 }
 0x427   : > { %v4117_v13 = vmax.f32 %v4053_v58, 0.0  ;;  %v3923_v32 = vmul.f32 0.0078125, %v3796_v3  ;;  %v3541_v29 = vpop.xlane.xlu0 %3540  ;;  %v8956_v58 = vadd.f32 %v8785_v27, %v8616_v16  ;;  %v8967_v27 = vadd.f32 %v8616_v16, %v8787_v0 }
 0x428   : > { %v8960_v56 = vmul.f32 0.0078125, %v3541_v29 }
 0x429   : > { %v4245_v63 = vadd.f32 1e-05, %v4117_v13  ;;  %v4051_v21 = vsub.f32 %v3923_v32, %v3987_v50  ;;  %10489 = vst [vmem:[#allocation29_spill] sm:$0xff] %v8956_v58  ;;  %v3770_v13 = vmul.f32 %v8940_v23, %v8940_v23  ;;  %v3771_v40 = vmul.f32 %v8967_v27, %v8967_v27 }
 0x42a   : > { %3867 = vadd.xlane.f32.xlu1 %v3767_v26  ;;  %3612 = vadd.xlane.f32.xlu0 %v8949_v54 }
 0x42b   : > { %v3551_v36 = vpop.xlane.xlu1 %3550  ;;  %7178 = vrsqrt.f32 %v4245_v63  ;;  %v4115_v3 = vmax.f32 %v4051_v21, 0.0  ;;  %v3802_v41 = vpop.xlane.xlu0 %3801 }
 0x42c   : > { %v3926_v7 = vmul.f32 0.0078125, %v3802_v41  ;;  %v8969_v63 = vmul.f32 0.0078125, %v3551_v36  ;;  %v3988_v41 = vmul.f32 %v8960_v56, %v8960_v56 }
 0x42d   : > { %v4243_v50 = vadd.f32 1e-05, %v4115_v3  ;;  %v3768_v3 = vmul.f32 %v8949_v54, %v8949_v54 }
 0x42e   : > { %3622 = vadd.xlane.f32.xlu1 %v8956_v58  ;;  %v4054_v32 = vsub.f32 %v3926_v7, %v3990_v25  ;;  %3873 = vadd.xlane.f32.xlu0 %v3770_v13  ;;  %v3993_v0 = vmul.f32 %v8969_v63, %v8969_v63 }
 0x42f   : > { %v3547_v26 = vpop.xlane.xlu1 %3546  ;;  %7180 = vrsqrt.f32 %v4243_v50  ;;  %v3798_v21 = vpop.xlane.xlu0 %3797 }
 0x430   : > { %v4118_v29 = vmax.f32 %v4054_v32, 0.0  ;;  %v3924_v59 = vmul.f32 0.0078125, %v3798_v21  ;;  %v8978_v36 = vmul.f32 0.0078125, %v3547_v26  ;;  %v3773_v32 = vmul.f32 %v8956_v58, %v8956_v58 }
 0x431   : > { %v8984_v21 = vadd.f32 %v8789_v35, %v8616_v16 }
 0x432   : > { %3618 = vadd.xlane.f32.xlu1 %v8967_v27  ;;  %v4246_v25 = vadd.f32 1e-05, %v4118_v29  ;;  %v4052_v7 = vsub.f32 %v3924_v59, %v3988_v41  ;;  %3869 = vadd.xlane.f32.xlu0 %v3768_v3  ;;  %v4181_v29 = vsub.f32 %v8619_v43, %v8927_v45  ;;  %v3991_v58 = vmul.f32 %v8978_v36, %v8978_v36 }
 0x433   : > { %v3808_v13 = vpop.xlane.xlu1 %3807  ;;  %v3553_v23 = vpop.xlane.xlu0 %3552  ;;  %v8995_v43 = vadd.f32 %v8616_v16, %v8795_v9  ;;  %v4179_v45 = vsub.f32 %v8622_v28, %v8934_v61 }
 0x434   : > { %v3929_v50 = vmul.f32 0.0078125, %v3808_v13  ;;  %7182 = vrsqrt.f32 %v4246_v25  ;;  %v4116_v59 = vmax.f32 %v4052_v7, 0.0  ;;  %v8999_v25 = vmul.f32 0.0078125, %v3553_v23 }
 0x435   : > { %v7179_v41 = vpop.eup %7178  ;;  %v9019_v23 = vadd.f32 %v8616_v16, %v8807_v15 }
 0x436   : > { %v4057_v3 = vsub.f32 %v3929_v50, %v3993_v0  ;;  %3879 = vadd.xlane.f32.xlu1 %v3773_v32  ;;  %v4244_v54 = vadd.f32 1e-05, %v4116_v59  ;;  %3624 = vadd.xlane.f32.xlu0 %v8984_v21  ;;  %v4373_v13 = vmul.f32 %v7179_v41, %v4181_v29  ;;  %v9005_v29 = vld [vmem:[%s10294_s10] ss:$0 sm:$0xff]  ;;  %v9009_v59 = vadd.f32 %v8803_v49, %v8616_v16 }
 0x437   : > { %v3804_v26 = vpop.xlane.xlu1 %3803  ;;  %v3549_v35 = vpop.xlane.xlu0 %3548  ;;  %10491 = vst [vmem:[#allocation31_spill] sm:$0xff] %v9019_v23  ;;  %v4182_v49 = vsub.f32 %v8629_v30, %v8951_v14 }
 0x438   : > { %v4121_v60 = vmax.f32 %v4057_v3, 0.0  ;;  %v3927_v8 = vmul.f32 0.0078125, %v3804_v26  ;;  %7184 = vrsqrt.f32 %v4244_v54  ;;  %10490 = vst [vmem:[#allocation30_spill] sm:$0xff] %v9009_v59  ;;  %v3774_v54 = vmul.f32 %v8984_v21, %v8984_v21 }
 0x439   : > { %v7181_v7 = vpop.eup %7180  ;;  %v4443_v41 = vmul.f32 %v9005_v29, %v4373_v13  ;;  %v3772_v13 = vmul.f32 %v8995_v43, %v8995_v43 }
 0x43a   : > { %v4249_v0 = vadd.f32 1e-05, %v4121_v60  ;;  %v4055_v50 = vsub.f32 %v3927_v8, %v3991_v58  ;;  %3875 = vadd.xlane.f32.xlu1 %v3771_v40  ;;  %3620 = vadd.xlane.f32.xlu0 %v8995_v43  ;;  %v4371_v9 = vmul.f32 %v7181_v7, %v4179_v45  ;;  %v3994_v8 = vmul.f32 %v8999_v25, %v8999_v25  ;;  %v9030_v7 = vld [vmem:[%s10295_s11] ss:$0 sm:$0xff] }
 0x43b   : > { %v3559_v32 = vpop.xlane.xlu1 %3558  ;;  %v3810_v61 = vpop.xlane.xlu0 %3809  ;;  %v9013_v60 = vmul.f32 0.0078125, %v3549_v35 }
 0x43c   : > { %7186 = vrsqrt.f32 %v4249_v0  ;;  %v4119_v28 = vmax.f32 %v4055_v50, 0.0  ;;  %v3930_v40 = vmul.f32 0.0078125, %v3810_v61  ;;  %v9025_v26 = vmul.f32 0.0078125, %v3559_v32 }
 0x43d   : > { %v3992_v30 = vmul.f32 %v9013_v60, %v9013_v60  ;;  %v4180_v32 = vsub.f32 %v8635_v17, %v8960_v56  ;;  %v4441_v17 = vmul.f32 %v9005_v29, %v4371_v9 }
 0x43e   : > { %v4247_v58 = vadd.f32 1e-05, %v4119_v28  ;;  %3630 = vadd.xlane.f32.xlu1 %v9009_v59  ;;  %v7183_v3 = vpop.eup %7182  ;;  %v4058_v35 = vsub.f32 %v3930_v40, %v3994_v8  ;;  %3881 = vadd.xlane.f32.xlu0 %v3774_v54  ;;  %v3775_v28 = vmul.f32 %v9019_v23, %v9019_v23  ;;  %v9043_v8 = vadd.f32 %v9030_v7, %v4443_v41 }
 0x43f   : > { %v3555_v45 = vpop.xlane.xlu1 %3554  ;;  %v3806_v15 = vpop.xlane.xlu0 %3805  ;;  %v4374_v0 = vmul.f32 %v7183_v3, %v4182_v49  ;;  %v3997_v54 = vmul.f32 %v9025_v26, %v9025_v26  ;;  %v9055_v41 = vadd.f32 %v8810_v19, %v8616_v16 }
 0x440   : > { %7188 = vrsqrt.f32 %v4247_v58  ;;  %v4122_v14 = vmax.f32 %v4058_v35, 0.0  ;;  %v3928_v50 = vmul.f32 0.0078125, %v3806_v15  ;;  %v9048_v56 = vmul.f32 0.0078125, %v3555_v45 }
 0x441   : > { %v4444_v61 = vmul.f32 %v9005_v29, %v4374_v0 }
 0x442   : > { %3626 = vadd.xlane.f32.xlu1 %v9019_v23  ;;  %v7185_v40 = vpop.eup %7184  ;;  %v4250_v49 = vadd.f32 1e-05, %v4122_v14  ;;  %v4056_v58 = vsub.f32 %v3928_v50, %v3992_v30  ;;  %3877 = vadd.xlane.f32.xlu0 %v3772_v13  ;;  %v4185_v14 = vsub.f32 %v8639_v39, %v8969_v63  ;;  %v9068_v39 = vadd.f32 %v9030_v7, %v4441_v17 }
 0x443   : > { %v3816_v3 = vpop.xlane.xlu1 %3815  ;;  %v3561_v15 = vpop.xlane.xlu0 %3560  ;;  %v4372_v23 = vmul.f32 %v7185_v40, %v4180_v32  ;;  %v9051_v0 = vadd.f32 %v9030_v7, %v4444_v61  ;;  %v9064_v32 = vadd.f32 %v8827_v55, %v8616_v16  ;;  %v9077_v55 = vadd.f32 %v8616_v16, %v8812_v46 }
 0x444   : > { %v3933_v35 = vmul.f32 0.0078125, %v3816_v3  ;;  %7190 = vrsqrt.f32 %v4250_v49  ;;  %v4120_v30 = vmax.f32 %v4056_v58, 0.0  ;;  %v4183_v58 = vsub.f32 %v8645_v1, %v8978_v36 }
 0x445   : > { %v4442_v9 = vmul.f32 %v9005_v29, %v4372_v23  ;;  %10492 = vst [vmem:[#allocation32_spill] sm:$0xff] %v9077_v55  ;;  %v9081_v3 = vmul.f32 0.0078125, %v3561_v15  ;;  %v9089_v46 = vadd.f32 %v8616_v16, %v8829_v62 }
 0x446   : > { %v7187_v50 = vpop.eup %7186  ;;  %v4061_v13 = vsub.f32 %v3933_v35, %v3997_v54  ;;  %3883 = vadd.xlane.f32.xlu1 %v3775_v28  ;;  %v4248_v61 = vadd.f32 1e-05, %v4120_v30  ;;  %3632 = vadd.xlane.f32.xlu0 %v9055_v41  ;;  %v3995_v28 = vmul.f32 %v9048_v56, %v9048_v56 }
 0x447   : > { %v3812_v19 = vpop.xlane.xlu1 %3811  ;;  %v4377_v63 = vmul.f32 %v7187_v50, %v4185_v14  ;;  %v3557_v54 = vpop.xlane.xlu0 %3556  ;;  %v9073_v49 = vadd.f32 %v9030_v7, %v4442_v9  ;;  %v3998_v15 = vmul.f32 %v9081_v3, %v9081_v3 }
 0x448   : > { %v4125_v40 = vmax.f32 %v4061_v13, 0.0  ;;  %v3931_v23 = vmul.f32 0.0078125, %v3812_v19  ;;  %7192 = vrsqrt.f32 %v4248_v61  ;;  %v9093_v9 = vmul.f32 0.0078125, %v3557_v54 }
 0x449   : > { %v3776_v19 = vmul.f32 %v9077_v55, %v9077_v55  ;;  %v4447_v62 = vmul.f32 %v9005_v29, %v4377_v63 }
 0x44a   : > { %v7189_v17 = vpop.eup %7188  ;;  %v4253_v35 = vadd.f32 1e-05, %v4125_v40  ;;  %v4059_v14 = vsub.f32 %v3931_v23, %v3995_v28  ;;  %3638 = vadd.xlane.f32.xlu1 %v9064_v32  ;;  %3628 = vadd.xlane.f32.xlu0 %v9077_v55  ;;  %v4186_v28 = vsub.f32 %v8653_v38, %v8999_v25  ;;  %v9107_v38 = vadd.f32 %v8831_v20, %v8616_v16 }
 0x44b   : > { %v3567_v50 = vpop.xlane.xlu1 %3566  ;;  %v4375_v13 = vmul.f32 %v7189_v17, %v4183_v58  ;;  %v3818_v36 = vpop.xlane.xlu0 %3817  ;;  %v3996_v25 = vmul.f32 %v9093_v9, %v9093_v9 }
 0x44c   : > { %7194 = vrsqrt.f32 %v4253_v35  ;;  %v4123_v1 = vmax.f32 %v4059_v14, 0.0  ;;  %v3934_v61 = vmul.f32 0.0078125, %v3818_v36  ;;  %v9101_v58 = vmul.f32 0.0078125, %v3567_v50 }
 0x44d   : > { %v3781_v14 = vmul.f32 %v9064_v32, %v9064_v32  ;;  %v4184_v50 = vsub.f32 %v8659_v6, %v9013_v60  ;;  %v4445_v6 = vmul.f32 %v9005_v29, %v4375_v13 }
 0x44e   : > { %v4251_v40 = vadd.f32 1e-05, %v4123_v1  ;;  %3634 = vadd.xlane.f32.xlu1 %v9089_v46  ;;  %v7191_v23 = vpop.eup %7190  ;;  %v4062_v17 = vsub.f32 %v3934_v61, %v3998_v15  ;;  %3885 = vadd.xlane.f32.xlu0 %v3776_v19  ;;  %v3779_v15 = vmul.f32 %v9089_v46, %v9089_v46  ;;  %v9117_v19 = vadd.f32 %v9030_v7, %v4447_v62 }
 0x44f   : > { %v3563_v35 = vpop.xlane.xlu1 %3562  ;;  %v3814_v54 = vpop.xlane.xlu0 %3813  ;;  %v4378_v36 = vmul.f32 %v7191_v23, %v4186_v28  ;;  %v4001_v20 = vmul.f32 %v9101_v58, %v9101_v58  ;;  %v9130_v62 = vadd.f32 %v8616_v16, %v8838_v18 }
 0x450   : > { %7196 = vrsqrt.f32 %v4251_v40  ;;  %v4126_v63 = vmax.f32 %v4062_v17, 0.0  ;;  %v3932_v1 = vmul.f32 0.0078125, %v3814_v54  ;;  %v9123_v60 = vmul.f32 0.0078125, %v3563_v35 }
 0x451   : > { %v4448_v61 = vmul.f32 %v9005_v29, %v4378_v36 }
 0x452   : > { %3895 = vadd.xlane.f32.xlu1 %v3781_v14  ;;  %v7193_v28 = vpop.eup %7192  ;;  %v4254_v40 = vadd.f32 1e-05, %v4126_v63  ;;  %v4060_v23 = vsub.f32 %v3932_v1, %v3996_v25  ;;  %3640 = vadd.xlane.f32.xlu0 %v9107_v38  ;;  %v4189_v25 = vsub.f32 %v8663_v5, %v9025_v26  ;;  %v9143_v5 = vadd.f32 %v9030_v7, %v4445_v6 }
 0x453   : > { %v3824_v17 = vpop.xlane.xlu1 %3823  ;;  %v3569_v14 = vpop.xlane.xlu0 %3568  ;;  %v4376_v45 = vmul.f32 %v7193_v28, %v4184_v50  ;;  %v9126_v36 = vadd.f32 %v9030_v7, %v4448_v61  ;;  %v9139_v50 = vadd.f32 %v8847_v11, %v8616_v16  ;;  %v4187_v11 = vsub.f32 %v8669_v4, %v9048_v56 }
 0x454   : > { %v3937_v54 = vmul.f32 0.0078125, %v3824_v17  ;;  %7198 = vrsqrt.f32 %v4254_v40  ;;  %v4124_v63 = vmax.f32 %v4060_v23, 0.0  ;;  %v9152_v23 = vmul.f32 0.0078125, %v3569_v14 }
 0x455   : > { %v4446_v13 = vmul.f32 %v9005_v29, %v4376_v45  ;;  %v3782_v17 = vmul.f32 %v9107_v38, %v9107_v38  ;;  %v9161_v4 = vadd.f32 %v8616_v16, %v8851_v2 }
 0x456   : > { %v7195_v1 = vpop.eup %7194  ;;  %v4065_v30 = vsub.f32 %v3937_v54, %v4001_v20  ;;  %3891 = vadd.xlane.f32.xlu1 %v3779_v15  ;;  %v4252_v61 = vadd.f32 1e-05, %v4124_v63  ;;  %3636 = vadd.xlane.f32.xlu0 %v9130_v62  ;;  %v3999_v15 = vmul.f32 %v9123_v60, %v9123_v60 }
 0x457   : > { %v3820_v18 = vpop.xlane.xlu1 %3819  ;;  %v4381_v26 = vmul.f32 %v7195_v1, %v4189_v25  ;;  %v3565_v20 = vpop.xlane.xlu0 %3564  ;;  %v9148_v40 = vadd.f32 %v9030_v7, %v4446_v13  ;;  %v4002_v13 = vmul.f32 %v9152_v23, %v9152_v23 }
 0x458   : > { %v4129_v28 = vmax.f32 %v4065_v30, 0.0  ;;  %v3935_v45 = vmul.f32 0.0078125, %v3820_v18  ;;  %7200 = vrsqrt.f32 %v4252_v61  ;;  %v9165_v61 = vmul.f32 0.0078125, %v3565_v20 }
 0x45a   : > { %v7197_v6 = vpop.eup %7196  ;;  %v4257_v54 = vadd.f32 1e-05, %v4129_v28  ;;  %v4063_v25 = vsub.f32 %v3935_v45, %v3999_v15  ;;  %3646 = vadd.xlane.f32.xlu1 %v9139_v50  ;;  %3897 = vadd.xlane.f32.xlu0 %v3782_v17  ;;  %v3780_v15 = vmul.f32 %v9130_v62, %v9130_v62  ;;  %v4190_v28 = vsub.f32 %v8677_v51, %v9081_v3 }
 0x45b   : > { %v3575_v63 = vpop.xlane.xlu1 %3574  ;;  %v4379_v1 = vmul.f32 %v7197_v6, %v4187_v11  ;;  %v3826_v14 = vpop.xlane.xlu0 %3825  ;;  %v9174_v11 = vadd.f32 %v8854_v44, %v8616_v16  ;;  %v4451_v51 = vmul.f32 %v9005_v29, %v4381_v26  ;;  %v4000_v3 = vmul.f32 %v9165_v61, %v9165_v61 }
 0x45c   : > { %7202 = vrsqrt.f32 %v4257_v54  ;;  %v4127_v56 = vmax.f32 %v4063_v25, 0.0  ;;  %v3938_v18 = vmul.f32 0.0078125, %v3826_v14  ;;  %v9176_v17 = vmul.f32 0.0078125, %v3575_v63 }
 0x45d   : > { %v3785_v25 = vmul.f32 %v9139_v50, %v9139_v50  ;;  %v9185_v63 = vadd.f32 %v8616_v16, %v8856_v10 }
 0x45e   : > { %v4255_v45 = vadd.f32 1e-05, %v4127_v56  ;;  %3642 = vadd.xlane.f32.xlu1 %v9161_v4  ;;  %v7199_v2 = vpop.eup %7198  ;;  %v4066_v6 = vsub.f32 %v3938_v18, %v4002_v13  ;;  %3893 = vadd.xlane.f32.xlu0 %v3780_v15  ;;  %v4188_v13 = vsub.f32 %v8683_v37, %v9093_v9  ;;  %v4005_v26 = vmul.f32 %v9176_v17, %v9176_v17 }
 0x45f   : > { %v3832_v20 = vpop.xlane.xlu1 %3831  ;;  %v3822_v54 = vpop.xlane.xlu0 %3821  ;;  %v4382_v14 = vmul.f32 %v7199_v2, %v4190_v28  ;;  %v9197_v37 = vadd.f32 %v9030_v7, %v4451_v51  ;;  %v9211_v51 = vadd.f32 %v8871_v47, %v8616_v16  ;;  %v4191_v47 = vsub.f32 %v8693_v24, %v9123_v60 }
 0x460   : > { %7204 = vrsqrt.f32 %v4255_v45  ;;  %v4130_v56 = vmax.f32 %v4066_v6, 0.0  ;;  %v3941_v35 = vmul.f32 0.0078125, %v3832_v20  ;;  %v3936_v44 = vmul.f32 0.0078125, %v3822_v54 }
 0x461   : > { %v4452_v18 = vmul.f32 %v9005_v29, %v4382_v14  ;;  %v3783_v6 = vmul.f32 %v9161_v4, %v9161_v4  ;;  %v4449_v54 = vmul.f32 %v9005_v29, %v4379_v1  ;;  %10493 = vst [vmem:[#allocation33_spill] sm:$0xff] %v9211_v51 }
 0x462   : > { %3903 = vadd.xlane.f32.xlu1 %v3785_v25  ;;  %v7201_v15 = vpop.eup %7200  ;;  %v4258_v28 = vadd.f32 1e-05, %v4130_v56  ;;  %v4064_v45 = vsub.f32 %v3936_v44, %v4000_v3  ;;  %3648 = vadd.xlane.f32.xlu0 %v9174_v11  ;;  %v4069_v25 = vsub.f32 %v3941_v35, %v4005_v26  ;;  %v4193_v44 = vsub.f32 %v8687_v57, %v9101_v58 }
 0x463   : > { %v3573_v2 = vpop.xlane.xlu1 %3572  ;;  %v3571_v10 = vpop.xlane.xlu0 %3570  ;;  %v4380_v20 = vmul.f32 %v7201_v15, %v4188_v13  ;;  %v9200_v9 = vadd.f32 %v9030_v7, %v4452_v18  ;;  %v3786_v13 = vmul.f32 %v9174_v11, %v9174_v11 }
 0x464   : > { %7206 = vrsqrt.f32 %v4258_v28  ;;  %v4128_v14 = vmax.f32 %v4064_v45, 0.0  ;;  %v9202_v3 = vmul.f32 0.0078125, %v3571_v10  ;;  %v9219_v28 = vadd.f32 %v9030_v7, %v4449_v54 }
 0x465   : > { %v4450_v1 = vmul.f32 %v9005_v29, %v4380_v20 }
 0x466   : > { %v7203_v56 = vpop.eup %7202  ;;  %3899 = vadd.xlane.f32.xlu1 %v3783_v6  ;;  %v4256_v18 = vadd.f32 1e-05, %v4128_v14  ;;  %v4003_v35 = vmul.f32 %v9202_v3, %v9202_v3  ;;  %3644 = vadd.xlane.f32.xlu0 %v9185_v63  ;;  %v4133_v6 = vmax.f32 %v4069_v25, 0.0 }
 0x467   : > { %v3828_v15 = vpop.xlane.xlu1 %3827  ;;  %v3577_v26 = vpop.xlane.xlu0 %3576  ;;  %v9222_v45 = vadd.f32 %v9030_v7, %v4450_v1  ;;  %v4385_v16 = vmul.f32 %v7203_v56, %v4193_v44  ;;  %v9234_v56 = vld [vmem:[%s10293_s9] ss:$0 sm:$0xff]  ;;  %v3784_v44 = vmul.f32 %v9185_v63, %v9185_v63 }
 0x468   : > { %v3939_v58 = vmul.f32 0.0078125, %v3828_v15  ;;  %7208 = vrsqrt.f32 %v4256_v18  ;;  %v9226_v10 = vmul.f32 0.0078125, %v3577_v26  ;;  %v9238_v24 = vadd.f32 %v9234_v56, %v8873_v42 }
 0x469   : > { %v4261_v1 = vadd.f32 1e-05, %v4133_v6  ;;  %v9242_v18 = vmul.f32 0.0078125, %v3573_v2  ;;  %v4455_v42 = vmul.f32 %v9005_v29, %v4385_v16  ;;  %v9254_v2 = vadd.f32 %v9234_v56, %v8875_v31 }
 0x46a   : > { %v7205_v20 = vpop.eup %7204  ;;  %v4067_v14 = vsub.f32 %v3939_v58, %v4003_v35  ;;  %3654 = vadd.xlane.f32.xlu1 %v9211_v51  ;;  %3905 = vadd.xlane.f32.xlu0 %v3786_v13  ;;  %v4006_v13 = vmul.f32 %v9226_v10, %v9226_v10  ;;  %v4194_v58 = vsub.f32 %v8701_v52, %v9152_v23 }
 0x46b   : > { %v3583_v54 = vpop.xlane.xlu1 %3582  ;;  %v4383_v57 = vmul.f32 %v7205_v20, %v4191_v47  ;;  %v3834_v25 = vpop.xlane.xlu0 %3833  ;;  %10494 = vst [vmem:[#allocation34_spill] sm:$0xff] %v9254_v2  ;;  %v3787_v52 = vmul.f32 %v9238_v24, %v9238_v24  ;;  %7210 = vrsqrt.f32 %v4261_v1  ;;  %v4004_v16 = vmul.f32 %v9242_v18, %v9242_v18 }
 0x46c   : > { %v4131_v60 = vmax.f32 %v4067_v14, 0.0  ;;  %v3942_v35 = vmul.f32 0.0078125, %v3834_v25  ;;  %v9250_v20 = vmul.f32 0.0078125, %v3583_v54  ;;  %v3789_v25 = vmul.f32 %v9211_v51, %v9211_v51 }
 0x46e   : > { %v4259_v26 = vadd.f32 1e-05, %v4131_v60  ;;  %3650 = vadd.xlane.f32.xlu1 %v9238_v24  ;;  %v7207_v47 = vpop.eup %7206  ;;  %v4070_v14 = vsub.f32 %v3942_v35, %v4006_v13  ;;  %3901 = vadd.xlane.f32.xlu0 %v3784_v44  ;;  %v4192_v44 = vsub.f32 %v8711_v12, %v9165_v61  ;;  %v9266_v13 = vadd.f32 %v9030_v7, %v4455_v42 }
 0x46f   : > { %v3579_v15 = vpop.xlane.xlu1 %3578  ;;  %v3830_v6 = vpop.xlane.xlu0 %3829  ;;  %v4386_v23 = vmul.f32 %v7207_v47, %v4194_v58  ;;  %v4009_v58 = vmul.f32 %v9250_v20, %v9250_v20  ;;  %v9279_v42 = vadd.f32 %v9234_v56, %v8882_v22 }
 0x470   : > { %v4134_v54 = vmax.f32 %v4070_v14, 0.0  ;;  %v3940_v60 = vmul.f32 0.0078125, %v3830_v6  ;;  %7212 = vrsqrt.f32 %v4259_v26  ;;  %v4453_v14 = vmul.f32 %v9005_v29, %v4383_v57 }
 0x471   : > { %v4456_v31 = vmul.f32 %v9005_v29, %v4386_v23  ;;  %v9272_v6 = vmul.f32 0.0078125, %v3579_v15  ;;  %10495 = vst [vmem:[#allocation35_spill] sm:$0xff] %v9279_v42 }
 0x472   : > { %3911 = vadd.xlane.f32.xlu1 %v3789_v25  ;;  %v7209_v35 = vpop.eup %7208  ;;  %v4262_v1 = vadd.f32 1e-05, %v4134_v54  ;;  %v4068_v47 = vsub.f32 %v3940_v60, %v4004_v16  ;;  %3656 = vadd.xlane.f32.xlu0 %v9254_v2 }
 0x473   : > { %v3840_v30 = vpop.xlane.xlu1 %3839  ;;  %v3585_v61 = vpop.xlane.xlu0 %3584  ;;  %v4384_v26 = vmul.f32 %v7209_v35, %v4192_v44  ;;  %v9275_v25 = vadd.f32 %v9030_v7, %v4456_v31  ;;  %v4007_v22 = vmul.f32 %v9272_v6, %v9272_v6 }
 0x474   : > { %v3945_v12 = vmul.f32 0.0078125, %v3840_v30  ;;  %7214 = vrsqrt.f32 %v4262_v1  ;;  %v4132_v23 = vmax.f32 %v4068_v47, 0.0  ;;  %v9286_v30 = vadd.f32 %v9234_v56, %v8891_v53 }
 0x475   : > { %v4454_v54 = vmul.f32 %v9005_v29, %v4384_v26  ;;  %v9297_v1 = vmul.f32 0.0078125, %v3585_v61  ;;  %v3790_v53 = vmul.f32 %v9254_v2, %v9254_v2  ;;  %v7211_v26 = vpop.eup %7210  ;;  %v4195_v61 = vsub.f32 %v8733_v33, %v9202_v3 }
 0x476   : > { %v4073_v16 = vsub.f32 %v3945_v12, %v4009_v58  ;;  %3907 = vadd.xlane.f32.xlu1 %v3787_v52  ;;  %v4260_v15 = vadd.f32 1e-05, %v4132_v23  ;;  %3652 = vadd.xlane.f32.xlu0 %v9279_v42  ;;  %v9292_v52 = vadd.f32 %v9030_v7, %v4453_v14  ;;  %v4198_v12 = vsub.f32 %v8745_v48, %v9226_v10 }
 0x477   : > { %v3836_v60 = vpop.xlane.xlu1 %3835  ;;  %v3581_v31 = vpop.xlane.xlu0 %3580  ;;  %v9295_v35 = vadd.f32 %v9030_v7, %v4454_v54  ;;  %v9306_v54 = vadd.f32 %v9234_v56, %v8895_v34 }
 0x478   : > { %v3943_v44 = vmul.f32 0.0078125, %v3836_v60  ;;  %7216 = vrsqrt.f32 %v4260_v15  ;;  %v4137_v58 = vmax.f32 %v4073_v16, 0.0  ;;  %v3788_v60 = vmul.f32 %v9279_v42, %v9279_v42 }
 0x479   : > { %v9314_v57 = vmul.f32 0.0078125, %v3581_v31  ;;  %v10498_v31 = vld [vmem:[#allocation5_spill] sm:$0xff]  ;;  %v3791_v48 = vmul.f32 %v9306_v54, %v9306_v54 }
 0x47a   : > { %v4071_v47 = vsub.f32 %v3943_v44, %v4007_v22  ;;  %3662 = vadd.xlane.f32.xlu1 %v9286_v30  ;;  %3913 = vadd.xlane.f32.xlu0 %v3790_v53  ;;  %v7213_v14 = vpop.eup %7212  ;;  %v4265_v22 = vadd.f32 1e-05, %v4137_v58  ;;  %v4010_v44 = vmul.f32 %v9297_v1, %v9297_v1  ;;  %v10496_v58 = vld [vmem:[#allocation15_spill] sm:$0xff] }
 0x47b   : > { %v3591_v23 = vpop.xlane.xlu1 %3590  ;;  %v3842_v15 = vpop.xlane.xlu0 %3841  ;;  %v4387_v42 = vmul.f32 %v7213_v14, %v4195_v61  ;;  %v9323_v51 = vadd.f32 %v9234_v56, %v10496_v58  ;;  %v10499_v14 = vld [vmem:[#allocation18_spill] sm:$0xff] }
 0x47c   : > { %v4135_v16 = vmax.f32 %v4071_v47, 0.0  ;;  %v3946_v53 = vmul.f32 0.0078125, %v3842_v15  ;;  %v9319_v33 = vmul.f32 0.0078125, %v3591_v23  ;;  %v4197_v15 = vsub.f32 %v10498_v31, %v9176_v17 }
 0x47d   : > { %10497 = vst [vmem:[#allocation15_spill] sm:$0xff] %v9323_v51  ;;  %7218 = vrsqrt.f32 %v4265_v22  ;;  %v4008_v23 = vmul.f32 %v9314_v57, %v9314_v57  ;;  %v4196_v61 = vsub.f32 %v10499_v14, %v9242_v18  ;;  %v10500_v14 = vld [vmem:[#allocation16_spill] sm:$0xff] }
 0x47e   : > { %v4263_v34 = vadd.f32 1e-05, %v4135_v16  ;;  %3658 = vadd.xlane.f32.xlu1 %v9306_v54  ;;  %v7215_v55 = vpop.eup %7214  ;;  %v4074_v3 = vsub.f32 %v3946_v53, %v4010_v44  ;;  %3909 = vadd.xlane.f32.xlu0 %v3788_v60  ;;  %v3793_v60 = vmul.f32 %v9286_v30, %v9286_v30  ;;  %v4389_v17 = vmul.f32 %v7211_v26, %v4197_v15 }
 0x47f   : > { %v3587_v47 = vpop.xlane.xlu1 %3586  ;;  %v3838_v2 = vpop.xlane.xlu0 %3837  ;;  %v4390_v10 = vmul.f32 %v7215_v55, %v4198_v12  ;;  %v4013_v58 = vmul.f32 %v9319_v33, %v9319_v33  ;;  %v9344_v26 = vadd.f32 %v9234_v56, %v10500_v14 }
 0x480   : > { %v4138_v16 = vmax.f32 %v4074_v3, 0.0  ;;  %v3944_v44 = vmul.f32 0.0078125, %v3838_v2  ;;  %7220 = vrsqrt.f32 %v4263_v34  ;;  %v4457_v2 = vmul.f32 %v9005_v29, %v4387_v42 }
 0x481   : > { %v9339_v3 = vmul.f32 0.0078125, %v3587_v47  ;;  %10501 = vst [vmem:[#allocation5_spill] sm:$0xff] %v9344_v26 }
 0x482   : > { %3915 = vadd.xlane.f32.xlu1 %v3791_v48  ;;  %v7217_v53 = vpop.eup %7216  ;;  %v4266_v55 = vadd.f32 1e-05, %v4138_v16  ;;  %v4072_v12 = vsub.f32 %v3944_v44, %v4008_v23  ;;  %3664 = vadd.xlane.f32.xlu0 %v9323_v51  ;;  %v4460_v48 = vmul.f32 %v9005_v29, %v4390_v10  ;;  %v4459_v44 = vmul.f32 %v9005_v29, %v4389_v17 }
 0x483   : > { %v3848_v22 = vpop.xlane.xlu1 %3847  ;;  %v3593_v34 = vpop.xlane.xlu0 %3592  ;;  %v4388_v31 = vmul.f32 %v7217_v53, %v4196_v61  ;;  %v3777_v61 = vmul.f32 %v9009_v59, %v9009_v59  ;;  %v4527_v10 = vadd.f32 %v9030_v7, %v4457_v2  ;;  %v4011_v56 = vmul.f32 %v9339_v3, %v9339_v3 }
 0x484   : > { %v3949_v18 = vmul.f32 0.0078125, %v3848_v22  ;;  %7222 = vrsqrt.f32 %v4266_v55  ;;  %v4136_v15 = vmax.f32 %v4072_v12, 0.0  ;;  %v9356_v12 = vmul.f32 0.0078125, %v3593_v34 }
 0x485   : > { %v4458_v23 = vmul.f32 %v9005_v29, %v4388_v31  ;;  %v3792_v22 = vmul.f32 %v9344_v26, %v9344_v26  ;;  %v4529_v2 = vadd.f32 %v9030_v7, %v4459_v44 }
 0x486   : > { %v4077_v16 = vsub.f32 %v3949_v18, %v4013_v58  ;;  %3919 = vadd.xlane.f32.xlu1 %v3793_v60  ;;  %v4264_v42 = vadd.f32 1e-05, %v4136_v15  ;;  %3660 = vadd.xlane.f32.xlu0 %v9344_v26  ;;  %v4530_v58 = vadd.f32 %v9030_v7, %v4460_v48  ;;  %v4014_v44 = vmul.f32 %v9356_v12, %v9356_v12 }
 0x487   : > { %v3844_v47 = vpop.xlane.xlu1 %3843  ;;  %v3589_v55 = vpop.xlane.xlu0 %3588  ;;  %v4528_v60 = vadd.f32 %v9030_v7, %v4458_v23  ;;  %v3794_v23 = vmul.f32 %v9323_v51, %v9323_v51 }
 0x488   : > { %v3947_v53 = vmul.f32 0.0078125, %v3844_v47  ;;  %7224 = vrsqrt.f32 %v4264_v42  ;;  %v4141_v17 = vmax.f32 %v4077_v16, 0.0  ;;  %v7219_v14 = vpop.eup %7218  ;;  %v10502_v16 = vld [vmem:[#allocation19_spill] sm:$0xff]  ;;  %v6768_v59 = vpack.c.bf16 %v4530_v58, %v4529_v2 }
 0x489   : > { %v6764_v31 = vpack.c.bf16 %v4528_v60, %v4527_v10  ;;  %v4199_v34 = vsub.f32 %v10502_v16, %v9272_v6  ;;  %v9380_v6 = vld [vmem:[%s618_s17] sm:$0xf]  ;;  %v10506_v58 = vld [vmem:[#allocation7_spill] sm:$0xff] }
 0x48a   : > { %v4075_v18 = vsub.f32 %v3947_v53, %v4011_v56  ;;  %3887 = vadd.xlane.f32.xlu1 %v3777_v61  ;;  %3917 = vadd.xlane.f32.xlu0 %v3792_v22  ;;  %v7221_v48 = vpop.eup %7220  ;;  %v10503_v56 = vlaneseq  ;;  %v4269_v10 = vadd.f32 1e-05, %v4141_v17  ;;  %v9370_v53 = vmul.f32 0.0078125, %v3589_v55 }
 0x48b   : > { %v3599_v15 = vpop.xlane.xlu1 %3598  ;;  %v3850_v47 = vpop.xlane.xlu0 %3849  ;;  %6765 = vmatprep.subr.bf16.mxu1 %v6764_v31  ;;  %v10504_v22 = vpack.c.bf16 %v9073_v49, %v9068_v39  ;;  %v3778_v39 = vmul.f32 %v9055_v41, %v9055_v41  ;;  %v4391_v49 = vmul.f32 %v7221_v48, %v4199_v34  ;;  %v10509_v48 = vld [vmem:[#allocation8_spill] sm:$0xff] }
 0x48c   : > { %v4139_v42 = vmax.f32 %v4075_v18, 0.0  ;;  %v9366_v61 = vshrl.u32 %v10503_v56, 7  ;;  %v3950_v60 = vmul.f32 0.0078125, %v3850_v47  ;;  %v4202_v18 = vsub.f32 %v10506_v58, %v9297_v1  ;;  %v10507_v56 = vld [vmem:[#allocation9_spill] sm:$0xff] }
 0x48d   : > { %6767 = vmatpush3.bf16.msra.mxu1 %v10504_v22  ;;  %v9385_v2 = vmul.f32 0.0078125, %v3599_v15  ;;  %v4201_v22 = vsub.f32 %v10507_v56, %v9250_v20  ;;  %7226 = vrsqrt.f32 %v4269_v10  ;;  %v4200_v34 = vsub.f32 %v10509_v48, %v9314_v57 }
 0x48e   : > { %v4267_v17 = vadd.f32 1e-05, %v4139_v42  ;;  %6769 = vmatprep.subr.bf16.mxu1 %v6768_v59  ;;  %v4591_v31 = vsub.s32 1, %v9366_v61  ;;  %v7223_v55 = vpop.eup %7222  ;;  %v4078_v16 = vsub.f32 %v3950_v60, %v4014_v44  ;;  %3921 = vadd.xlane.f32.xlu0 %v3794_v23  ;;  %v4012_v59 = vmul.f32 %v9370_v53, %v9370_v53 }
 0x48f   : > { %v3595_v47 = vpop.xlane.xlu1 %3594  ;;  %v3846_v51 = vpop.xlane.xlu0 %3845  ;;  %v4394_v26 = vmul.f32 %v7223_v55, %v4202_v18  ;;  %v10508_v23 = vpack.c.bf16 %v9051_v0, %v9043_v8  ;;  %v4393_v20 = vmul.f32 %v7219_v14, %v4201_v22  ;;  %v4017_v10 = vmul.f32 %v9385_v2, %v9385_v2 }
 0x490   : > { %v9392_v1 = vrot.slane %v9380_v6, %v4591_v31  ;;  %v4142_v15 = vmax.f32 %v4078_v16, 0.0  ;;  %v3948_v42 = vmul.f32 0.0078125, %v3846_v51  ;;  %7228 = vrsqrt.f32 %v4267_v17 }
 0x491   : > { %6771 = vmatpush3.bf16.msra.mxu1 %v10508_v23  ;;  %v4461_v51 = vmul.f32 %v9005_v29, %v4391_v49  ;;  %v10349_v8 = vmov 1.0   ;;  %v9407_v0 = vmul.f32 0.0078125, %v3595_v47  ;;  %v4464_v31 = vmul.f32 %v9005_v29, %v4394_v26 }
 0x492   : > { %vm4602_vm0 = vcmp.eq.s32.totalorder %v9366_v61, %v9392_v1  ;;  %v7225_v44 = vpop.eup %7224  ;;  %v4270_v60 = vadd.f32 1e-05, %v4142_v15  ;;  %v4076_v58 = vsub.f32 %v3948_v42, %v4012_v59  ;;  %3889 = vadd.xlane.f32.xlu0 %v3778_v39  ;;  %v4463_v22 = vmul.f32 %v9005_v29, %v4393_v20 }
 0x493   : > { %v3856_v18 = vpop.xlane.xlu1 %3855  ;;  %5870 = vmatprep.mubr.msk.f32.mxu1 %vm4602_vm0, %v10349_v8  ;;  %v3601_v14 = vpop.xlane.xlu0 %3600  ;;  %v4392_v17 = vmul.f32 %v7225_v44, %v4200_v34  ;;  %v4531_v49 = vadd.f32 %v9030_v7, %v4461_v51  ;;  %v4015_v47 = vmul.f32 %v9407_v0, %v9407_v0  ;;  %v4534_v26 = vadd.f32 %v9030_v7, %v4464_v31 }
 0x494   : > { %v3953_v57 = vmul.f32 0.0078125, %v3856_v18  ;;  %7230 = vrsqrt.f32 %v4270_v60  ;;  %v4140_v55 = vmax.f32 %v4076_v58, 0.0  ;;  %v9417_v48 = vmul.f32 0.0078125, %v3601_v14 }
 0x495   : > { %v4462_v56 = vmul.f32 %v9005_v29, %v4392_v17  ;;  %v4533_v20 = vadd.f32 %v9030_v7, %v4463_v22  ;;  %v10512_v22 = vld [vmem:[#allocation13_spill] sm:$0xff] }
 0x496   : > { %v4081_v16 = vsub.f32 %v3953_v57, %v4017_v10  ;;  %v4268_v39 = vadd.f32 1e-05, %v4140_v55  ;;  %v10510_v55 = vld [vmem:[#allocation20_spill] sm:$0xff]  ;;  %v4018_v31 = vmul.f32 %v9417_v48, %v9417_v48 }
 0x497   : > { %v3852_v59 = vpop.xlane.xlu1 %3851  ;;  %v3597_v42 = vpop.xlane.xlu0 %3596  ;;  %v4532_v23 = vadd.f32 %v9030_v7, %v4462_v56  ;;  %v6776_v17 = vpack.c.bf16 %v4534_v26, %v4533_v20  ;;  %v4203_v56 = vsub.f32 %v10510_v55, %v9339_v3 }
 0x498   : > { %v3951_v15 = vmul.f32 0.0078125, %v3852_v59  ;;  %7232 = vrsqrt.f32 %v4268_v39  ;;  %v4145_v34 = vmax.f32 %v4081_v16, 0.0  ;;  %v7227_v60 = vpop.eup %7226  ;;  %v9424_v14 = vmul.f32 0.0078125, %v3597_v42 }
 0x499   : > { %v6772_v10 = vpack.c.bf16 %v4532_v23, %v4531_v49  ;;  %v10511_v39 = vpack.c.bf16 %v9148_v40, %v9143_v5  ;;  %v4206_v59 = vsub.f32 %v10512_v22, %v9356_v12 }
 0x49a   : > { %v4079_v44 = vsub.f32 %v3951_v15, %v4015_v47  ;;  %v7229_v18 = vpop.eup %7228  ;;  %v4273_v49 = vadd.f32 1e-05, %v4145_v34  ;;  %v4016_v5 = vmul.f32 %v9424_v14, %v9424_v14  ;;  %v10514_v34 = vpack.c.bf16 %v9126_v36, %v9117_v19 }
 0x49b   : > { %v3607_v58 = vpop.xlane.xlu1 %3606  ;;  %v3858_v57 = vpop.xlane.xlu0 %3857  ;;  %6773 = vmatprep.subr.bf16.mxu1 %v6772_v10  ;;  %v4395_v3 = vmul.f32 %v7229_v18, %v4203_v56 }
 0x49c   : > { %v4143_v51 = vmax.f32 %v4079_v44, 0.0  ;;  %v3954_v16 = vmul.f32 0.0078125, %v3858_v57  ;;  %6775 = vmatpush3.bf16.msra.mxu1 %v10511_v39  ;;  %v10513_v44 = vld [vmem:[#allocation6_spill] sm:$0xff]  ;;  %v9433_v42 = vmul.f32 0.0078125, %v3607_v58 }
 0x49d   : > { %6777 = vmatprep.subr.bf16.mxu1 %v6776_v17  ;;  %v4205_v10 = vsub.f32 %v10513_v44, %v9319_v33 }
 0x49e   : > { %v4271_v47 = vadd.f32 1e-05, %v4143_v51  ;;  %v7231_v15 = vpop.eup %7230  ;;  %v4082_v23 = vsub.f32 %v3954_v16, %v4018_v31  ;;  %v10515_v51 = vld [vmem:[#allocation21_spill] sm:$0xff]  ;;  %v4465_v16 = vmul.f32 %v9005_v29, %v4395_v3  ;;  %v4021_v39 = vmul.f32 %v9433_v42, %v9433_v42 }
 0x49f   : > { %v3603_v26 = vpop.xlane.xlu1 %3602  ;;  %v3854_v20 = vpop.xlane.xlu0 %3853  ;;  %v4398_v57 = vmul.f32 %v7231_v15, %v4206_v59  ;;  %v4204_v18 = vsub.f32 %v10515_v51, %v9370_v53  ;;  %v4397_v17 = vmul.f32 %v7227_v60, %v4205_v10 }
 0x4a0   : > { %7234 = vrsqrt.f32 %v4271_v47  ;;  %v4146_v40 = vmax.f32 %v4082_v23, 0.0  ;;  %v3952_v12 = vmul.f32 0.0078125, %v3854_v20  ;;  %6779 = vmatpush3.bf16.msra.mxu1 %v10514_v34  ;;  %v9442_v55 = vmul.f32 0.0078125, %v3603_v26 }
 0x4a1   : > { %7236 = vrsqrt.f32 %v4273_v49  ;;  %v4468_v36 = vmul.f32 %v9005_v29, %v4398_v57  ;;  %v4467_v47 = vmul.f32 %v9005_v29, %v4397_v17  ;;  %v4535_v3 = vadd.f32 %v9030_v7, %v4465_v16 }
 0x4a2   : > { %v7233_v33 = vpop.eup %7232  ;;  %v4274_v58 = vadd.f32 1e-05, %v4146_v40  ;;  %v4080_v56 = vsub.f32 %v3952_v12, %v4016_v5  ;;  %v4019_v15 = vmul.f32 %v9442_v55, %v9442_v55 }
 0x4a3   : > { %v3864_v31 = vpop.xlane.xlu1 %3863  ;;  %v3609_v59 = vpop.xlane.xlu0 %3608  ;;  %v4396_v19 = vmul.f32 %v7233_v33, %v4204_v18  ;;  %v4538_v57 = vadd.f32 %v9030_v7, %v4468_v36  ;;  %v4537_v51 = vadd.f32 %v9030_v7, %v4467_v47  ;;  %v4587_v33 = vsub.s32 0, %v9366_v61 }
 0x4a4   : > { %v3957_v22 = vmul.f32 0.0078125, %v3864_v31  ;;  %7238 = vrsqrt.f32 %v4274_v58  ;;  %v4144_v53 = vmax.f32 %v4080_v56, 0.0  ;;  %v9455_v40 = vmul.f32 0.0078125, %v3609_v59  ;;  %v10516_v56 = vld [vmem:[#allocation22_spill] sm:$0xff]  ;;  %v10517_v59 = vld [vmem:[#allocation11_spill] sm:$0xff] }
 0x4a5   : > { %v4466_v60 = vmul.f32 %v9005_v29, %v4396_v19  ;;  %v4207_v31 = vsub.f32 %v10516_v56, %v9407_v0  ;;  %v4209_v19 = vsub.f32 %v10517_v59, %v9385_v2  ;;  %v10519_v0 = vld [vmem:[#allocation12_spill] sm:$0xff] }
 0x4a6   : > { %v4085_v49 = vsub.f32 %v3957_v22, %v4021_v39  ;;  %v4272_v23 = vadd.f32 1e-05, %v4144_v53  ;;  %v6784_v22 = vpack.c.bf16 %v4538_v57, %v4537_v51  ;;  %v4022_v36 = vmul.f32 %v9455_v40, %v9455_v40  ;;  %v10522_v57 = vld [vmem:[#allocation17_spill] sm:$0xff] }
 0x4a7   : > { %v3860_v26 = vpop.xlane.xlu1 %3859  ;;  %v3605_v20 = vpop.xlane.xlu0 %3604  ;;  %v4536_v5 = vadd.f32 %v9030_v7, %v4466_v60  ;;  %v4210_v60 = vsub.f32 %v10519_v0, %v9417_v48  ;;  %v9480_v48 = vadd.s32 40, %v9366_v61  ;;  %v10523_v51 = vpack.c.bf16 %v9200_v9, %v9197_v37 }
 0x4a8   : > { %v4149_v44 = vmax.f32 %v4085_v49, 0.0  ;;  %v3955_v10 = vmul.f32 0.0078125, %v3860_v26  ;;  %7240 = vrsqrt.f32 %v4272_v23  ;;  %v9465_v7 = vmul.f32 0.0078125, %v3605_v20  ;;  %v10520_v26 = vld [vmem:[#allocation10_spill] sm:$0xff] }
 0x4a9   : > { %v6780_v29 = vpack.c.bf16 %v4536_v5, %v4535_v3  ;;  %v10518_v49 = vpack.c.bf16 %v9222_v45, %v9219_v28  ;;  %v4208_v2 = vsub.f32 %v10520_v26, %v9424_v14  ;;  %v9475_v20 = vrot.slane %v9380_v6, %v4587_v33  ;;  %10521 = vst [vmem:[#allocation18_spill] sm:$0xff] %v9480_v48  ;;  %v10525_v33 = vld [vmem:[#allocation14_spill] sm:$0xff]  ;;  %v9517_v26 = vld [vmem:[%s10295_s11] ss:$0 sm:$0xff] }
 0x4aa   : > { %v4277_v12 = vadd.f32 1e-05, %v4149_v44  ;;  %v4083_v34 = vsub.f32 %v3955_v10, %v4019_v15  ;;  %v7235_v18 = vpop.eup %7234  ;;  %v4020_v14 = vmul.f32 %v9465_v7, %v9465_v7  ;;  %vm4622_vm5 = vcmp.eq.s32.totalorder %v9480_v48, %v9392_v1 }
 0x4ab   : > { %v3615_v17 = vpop.xlane.xlu1 %3614  ;;  %v7237_v58 = vpop.eup %7236  ;;  %6781 = vmatprep.subr.bf16.mxu1 %v6780_v29  ;;  %v4399_v15 = vmul.f32 %v7235_v18, %v4207_v31  ;;  %v10524_v18 = vld [vmem:[#allocation23_spill] sm:$0xff]  ;;  %v9508_v0 = vadd.s32 8, %v9366_v61  ;;  %vm4601_vm7 = vcmp.eq.s32.totalorder %v9366_v61, %v9475_v20 }
 0x4ac   : > { %7242 = vrsqrt.f32 %v4277_v12  ;;  %v4147_v16 = vmax.f32 %v4083_v34, 0.0  ;;  %v3866_v39 = vpop.xlane.xlu0 %3865  ;;  %6783 = vmatpush3.bf16.msra.mxu1 %v10518_v49  ;;  %v4401_v10 = vmul.f32 %v7237_v58, %v4209_v19  ;;  %v9477_v5 = vmul.f32 0.0078125, %v3615_v17 }
 0x4ad   : > { %v3958_v53 = vmul.f32 0.0078125, %v3866_v39  ;;  %6785 = vmatprep.subr.bf16.mxu1 %v6784_v22  ;;  %v4213_v12 = vsub.f32 %v10522_v57, %v9433_v42  ;;  %v4211_v17 = vsub.f32 %v10524_v18, %v9442_v55  ;;  %v4214_v58 = vsub.f32 %v10525_v33, %v9455_v40  ;;  %v9498_v42 = vld [vmem:[%s10294_s10] ss:$0 sm:$0xff]  ;;  %v10527_v18 = vld [vmem:[#allocation24_spill] sm:$0xff] }
 0x4ae   : > { %v4275_v47 = vadd.f32 1e-05, %v4147_v16  ;;  %v7239_v23 = vpop.eup %7238  ;;  %v4469_v31 = vmul.f32 %v9498_v42, %v4399_v15  ;;  %v4025_v55 = vmul.f32 %v9477_v5, %v9477_v5  ;;  %vm4606_vm9 = vcmp.eq.s32.totalorder %v9508_v0, %v9392_v1 }
 0x4af   : > { %v4086_v3 = vsub.f32 %v3958_v53, %v4022_v36  ;;  %v3611_v44 = vpop.xlane.xlu1 %3610  ;;  %v4402_v45 = vmul.f32 %v7239_v23, %v4210_v60  ;;  %v4471_v53 = vmul.f32 %v9498_v42, %v4401_v10  ;;  %v9511_v60 = vadd.s32 48, %v9366_v61 }
 0x4b0   : > { %7244 = vrsqrt.f32 %v4275_v47  ;;  %v3862_v28 = vpop.xlane.xlu0 %3861  ;;  %6787 = vmatpush3.bf16.msra.mxu1 %v10523_v51  ;;  %v9493_v56 = vmul.f32 0.0078125, %v3611_v44  ;;  %vm4605_vm10 = vcmp.eq.s32.totalorder %v9508_v0, %v9475_v20 }
 0x4b1   : > { %v4150_v34 = vmax.f32 %v4086_v3, 0.0  ;;  %v3956_v29 = vmul.f32 0.0078125, %v3862_v28  ;;  %v4472_v9 = vmul.f32 %v9498_v42, %v4402_v45  ;;  %10526 = vst [vmem:[#allocation16_spill] sm:$0xff] %v9511_v60  ;;  %v9521_v3 = vadd.s32 16, %v9366_v61 }
 0x4b2   : > { %v7241_v16 = vpop.eup %7240  ;;  %v4023_v44 = vmul.f32 %v9493_v56, %v9493_v56  ;;  %vm4626_vm6 = vcmp.eq.s32.totalorder %v9511_v60, %v9392_v1 }
 0x4b3   : > { %v4278_v39 = vadd.f32 1e-05, %v4150_v34  ;;  %v4084_v22 = vsub.f32 %v3956_v29, %v4020_v14  ;;  %v3872_v37 = vpop.xlane.xlu1 %3871  ;;  %v4400_v36 = vmul.f32 %v7241_v16, %v4208_v2  ;;  %v4539_v2 = vadd.f32 %v9517_v26, %v4469_v31 }
 0x4b4   : > { %v3961_v59 = vmul.f32 0.0078125, %v3872_v37  ;;  %v3617_v19 = vpop.xlane.xlu0 %3616  ;;  %v4542_v45 = vadd.f32 %v9517_v26, %v4472_v9  ;;  %v4212_v31 = vsub.f32 %v10527_v18, %v9465_v7  ;;  %vm4610_vm11 = vcmp.eq.s32.totalorder %v9521_v3, %v9392_v1 }
 0x4b5   : > { %7246 = vrsqrt.f32 %v4278_v39  ;;  %v4148_v49 = vmax.f32 %v4084_v22, 0.0  ;;  %v4470_v23 = vmul.f32 %v9498_v42, %v4400_v36  ;;  %v9531_v16 = vmul.f32 0.0078125, %v3617_v19 }
 0x4b6   : > { %v7243_v47 = vpop.eup %7242  ;;  %v4089_v15 = vsub.f32 %v3961_v59, %v4025_v55  ;;  %v4541_v39 = vadd.f32 %v9517_v26, %v4471_v53  ;;  %v9537_v55 = vadd.s32 56, %v9366_v61  ;;  %vm4609_vm3 = vcmp.eq.s32.totalorder %v9521_v3, %v9475_v20 }
 0x4b7   : > { %v4276_v10 = vadd.f32 1e-05, %v4148_v49  ;;  %v3868_v28 = vpop.xlane.xlu1 %3867  ;;  %v4405_v57 = vmul.f32 %v7243_v47, %v4213_v12  ;;  %v4540_v51 = vadd.f32 %v9517_v26, %v4470_v23  ;;  %v4026_v23 = vmul.f32 %v9531_v16, %v9531_v16 }
 0x4b8   : > { %v4153_v14 = vmax.f32 %v4089_v15, 0.0  ;;  %v3959_v34 = vmul.f32 0.0078125, %v3868_v28  ;;  %v3613_v29 = vpop.xlane.xlu0 %3612  ;;  %10528 = vst [vmem:[#allocation19_spill] sm:$0xff] %v9537_v55  ;;  %v6792_v49 = vpack.c.bf16 %v4542_v45, %v4541_v39  ;;  %vm4630_vm8 = vcmp.eq.s32.totalorder %v9537_v55, %v9392_v1 }
 0x4b9   : > { %7248 = vrsqrt.f32 %v4276_v10  ;;  %v6788_v9 = vpack.c.bf16 %v4540_v51, %v4539_v2  ;;  %v9539_v59 = vmul.f32 0.0078125, %v3613_v29  ;;  %v4475_v19 = vmul.f32 %v9498_v42, %v4405_v57 }
 0x4ba   : > { %v7245_v12 = vpop.eup %7244  ;;  %v4281_v22 = vadd.f32 1e-05, %v4153_v14  ;;  %v4087_v37 = vsub.f32 %v3959_v34, %v4023_v44  ;;  %v10529_v44 = vpack.c.bf16 %v9295_v35, %v9292_v52  ;;  %v4595_v28 = vsub.s32 2, %v9366_v61 }
 0x4bb   : > { %v3623_v36 = vpop.xlane.xlu1 %3622  ;;  %v4403_v7 = vmul.f32 %v7245_v12, %v4211_v17  ;;  %6789 = vmatprep.subr.bf16.mxu1 %v6788_v9  ;;  %v4599_v17 = vsub.s32 3, %v9366_v61  ;;  %v4024_v52 = vmul.f32 %v9539_v59, %v9539_v59  ;;  %v9562_v14 = vadd.f32 %v9517_v26, %v4475_v19 }
 0x4bc   : > { %7250 = vrsqrt.f32 %v4281_v22  ;;  %v4151_v47 = vmax.f32 %v4087_v37, 0.0  ;;  %v9542_v53 = vmul.f32 0.0078125, %v3623_v36  ;;  %v3874_v15 = vpop.xlane.xlu0 %3873  ;;  %6791 = vmatpush3.bf16.msra.mxu1 %v10529_v44  ;;  %v9574_v12 = vrot.slane %v9380_v6, %v4595_v28 }
 0x4bd   : > { %v3962_v2 = vmul.f32 0.0078125, %v3874_v15  ;;  %6793 = vmatprep.subr.bf16.mxu1 %v6792_v49  ;;  %v9565_v34 = vrot.slane %v9380_v6, %v4599_v17  ;;  %v4473_v18 = vmul.f32 %v9498_v42, %v4403_v7  ;;  %v10530_v9 = vpack.c.bf16 %v9275_v25, %v9266_v13 }
 0x4be   : > { %v4279_v10 = vadd.f32 1e-05, %v4151_v47  ;;  %v4029_v29 = vmul.f32 %v9542_v53, %v9542_v53  ;;  %vm4603_vm14 = vcmp.eq.s32.totalorder %v9366_v61, %v9574_v12  ;;  %vm4607_vm15 = vcmp.eq.s32.totalorder %v9508_v0, %v9574_v12  ;;  %v10531_v47 = vld [vmem:[#allocation25_spill] sm:$0xff] }
 0x4bf   : > { %v7247_v45 = vpop.eup %7246  ;;  %v4090_v35 = vsub.f32 %v3962_v2, %v4026_v23  ;;  %v3619_v57 = vpop.xlane.xlu1 %3618  ;;  %vm4604_vm12 = vcmp.eq.s32.totalorder %v9366_v61, %v9565_v34  ;;  %vm4608_vm13 = vcmp.eq.s32.totalorder %v9508_v0, %v9565_v34  ;;  %vm4612_vm1 = vcmp.eq.s32.totalorder %v9521_v3, %v9565_v34  ;;  %v10556_v0 = vld [vmem:[#allocation18_spill] sm:$0xff] }
 0x4c0   : > { %v3870_v51 = vpop.xlane.xlu0 %3869  ;;  %v4406_v39 = vmul.f32 %v7247_v45, %v4214_v58  ;;  %6795 = vmatpush3.bf16.msra.mxu1 %v10530_v9  ;;  %7252 = vrsqrt.f32 %v4279_v10  ;;  %v9583_v36 = vmul.f32 0.0078125, %v3619_v57  ;;  %vm4611_vm2 = vcmp.eq.s32.totalorder %v9521_v3, %v9574_v12  ;;  %v4703_v3 = vld [vmem:[#allocation2 + $0x30] sm:$0xff] }
 0x4c1   : > { %v4154_v22 = vmax.f32 %v4090_v35, 0.0  ;;  %v3960_v37 = vmul.f32 0.0078125, %v3870_v51  ;;  %v4217_v15 = vsub.f32 %v10531_v47, %v9477_v5  ;;  %v9613_v10 = vadd.s32 24, %v9366_v61  ;;  %v10534_v47 = vld [vmem:[#allocation26_spill] sm:$0xff] }
 0x4c2   : > { %v4476_v40 = vmul.f32 %v9498_v42, %v4406_v39  ;;  %v4027_v5 = vmul.f32 %v9583_v36, %v9583_v36 }
 0x4c3   : > { %v7249_v6 = vpop.eup %7248  ;;  %v4282_v33 = vadd.f32 1e-05, %v4154_v22  ;;  %v4088_v58 = vsub.f32 %v3960_v37, %v4024_v52  ;;  %v3880_v49 = vpop.xlane.xlu1 %3879  ;;  %5871 = vmatmul.mubr.msk.f32.vlgmr.msra.gmra.mrb[80].mxu1 %vm4601_vm7, %v10349_v8  ;;  %10532 = vst [vmem:[#allocation7_spill] sm:$0xff] %v9613_v10  ;;  %v9618_v52 = vadd.f32 %v9517_v26, %v4473_v18  ;;  %vm4616_vm4 = vcmp.eq.s32.totalorder %v9613_v10, %v9565_v34 }
 0x4c4   : > { %v3965_v13 = vmul.f32 0.0078125, %v3880_v49  ;;  %v3625_v25 = vpop.xlane.xlu0 %3624  ;;  %v4404_v7 = vmul.f32 %v7249_v6, %v4212_v31  ;;  %v9597_v19 = vadd.f32 %v9517_v26, %v4476_v40  ;;  %5872 = vmatprep.mubr.msk.f32.mxu1 %vm4606_vm9, %v10349_v8  ;;  %v9636_v18 = vadd.s32 32, %v9366_v61 }
 0x4c5   : > { %7254 = vrsqrt.f32 %v4282_v33  ;;  %v4152_v23 = vmax.f32 %v4088_v58, 0.0  ;;  %v9629_v22 = vmul.f32 0.0078125, %v3625_v25  ;;  %vm4615_vm0 = vcmp.eq.s32.totalorder %v9613_v10, %v9574_v12 }
 0x4c6   : > { %v7251_v31 = vpop.eup %7250  ;;  %v4093_v2 = vsub.f32 %v3965_v13, %v4029_v29  ;;  %v4474_v44 = vmul.f32 %v9498_v42, %v4404_v7  ;;  %10533 = vst [vmem:[#allocation9_spill] sm:$0xff] %v9636_v18  ;;  %vm4614_vm7 = vcmp.eq.s32.totalorder %v9613_v10, %v9392_v1  ;;  %vm4613_vm9 = vcmp.eq.s32.totalorder %v9613_v10, %v9475_v20 }
 0x4c7   : > { %v4280_v28 = vadd.f32 1e-05, %v4152_v23  ;;  %v3876_v45 = vpop.xlane.xlu1 %3875  ;;  %v4409_v35 = vmul.f32 %v7251_v31, %v4217_v15  ;;  %5873 = vmatmul.mubr.msk.f32.gmra.mrb[82].mxu1 %vm4605_vm10, %v10349_v8  ;;  %vm4620_vm10 = vcmp.eq.s32.totalorder %v9636_v18, %v9565_v34  ;;  %v4030_v13 = vmul.f32 %v9629_v22, %v9629_v22  ;;  %v10535_v23 = vld [vmem:[#allocation27_spill] sm:$0xff] }
 0x4c8   : > { %v4157_v57 = vmax.f32 %v4093_v2, 0.0  ;;  %v3963_v51 = vmul.f32 0.0078125, %v3876_v45  ;;  %v3621_v29 = vpop.xlane.xlu0 %3620  ;;  %v9621_v39 = vadd.f32 %v9517_v26, %v4474_v44  ;;  %5874 = vmatprep.mubr.msk.f32.mxu1 %vm4610_vm11, %v10349_v8  ;;  %v4215_v15 = vsub.f32 %v10534_v47, %v9493_v56 }
 0x4c9   : > { %7256 = vrsqrt.f32 %v4280_v28  ;;  %v9656_v25 = vmul.f32 0.0078125, %v3621_v29  ;;  %v4218_v31 = vsub.f32 %v10535_v23, %v9531_v16  ;;  %v4479_v45 = vmul.f32 %v9498_v42, %v4409_v35  ;;  %v10536_v35 = vld [vmem:[#allocation28_spill] sm:$0xff] }
 0x4ca   : > { %v4285_v37 = vadd.f32 1e-05, %v4157_v57  ;;  %v4091_v9 = vsub.f32 %v3963_v51, %v4027_v5  ;;  %v7253_v33 = vpop.eup %7252  ;;  %vm4623_vm11 = vcmp.eq.s32.totalorder %v9480_v48, %v9574_v12 }
 0x4cb   : > { %v9644_v6 = vpop.xlane.xlu1 %3630  ;;  %5875 = vmatmul.mubr.msk.f32.gmra.mrb[84].mxu1 %vm4609_vm3, %v10349_v8  ;;  %vm4618_vm3 = vcmp.eq.s32.totalorder %v9636_v18, %v9392_v1  ;;  %v4407_v51 = vmul.f32 %v7253_v33, %v4215_v15  ;;  %v4028_v56 = vmul.f32 %v9656_v25, %v9656_v25  ;;  %v9689_v47 = vadd.f32 %v9517_v26, %v4479_v45 }
 0x4cc   : > { %7258 = vrsqrt.f32 %v4285_v37  ;;  %v4155_v58 = vmax.f32 %v4091_v9, 0.0  ;;  %v3882_v49 = vpop.xlane.xlu0 %3881  ;;  %5876 = vmatprep.mubr.msk.f32.mxu1 %vm4614_vm7, %v10349_v8  ;;  %vm4617_vm7 = vcmp.eq.s32.totalorder %v9636_v18, %v9475_v20  ;;  %v4216_v9 = vsub.f32 %v10536_v35, %v9539_v59 }
 0x4cd   : > { %v3966_v7 = vmul.f32 0.0078125, %v3882_v49 }
 0x4ce   : > { %v4283_v2 = vadd.f32 1e-05, %v4155_v58 }
 0x4cf   : > { %v7255_v44 = vpop.eup %7254  ;;  %v4094_v5 = vsub.f32 %v3966_v7, %v4030_v13  ;;  %v9667_v28 = vpop.xlane.xlu1 %3626  ;;  %5877 = vmatmul.mubr.msk.f32.gmra.mrb[86].mxu1 %vm4613_vm9, %v10349_v8  ;;  %vm4621_vm9 = vcmp.eq.s32.totalorder %v9480_v48, %v9475_v20 }
 0x4d0   : > { %v3878_v57 = vpop.xlane.xlu0 %3877  ;;  %v4410_v29 = vmul.f32 %v7255_v44, %v4218_v31  ;;  %5878 = vmatprep.mubr.msk.f32.mxu1 %vm4618_vm3, %v10349_v8  ;;  %7260 = vrsqrt.f32 %v4283_v2  ;;  %v4477_v31 = vmul.f32 %v9498_v42, %v4407_v51  ;;  %v10537_v2 = vld [vmem:[#allocation29_spill] sm:$0xff]  ;;  %vm4631_vm3 = vcmp.eq.s32.totalorder %v9537_v55, %v9574_v12 }
 0x4d1   : > { %v4158_v16 = vmax.f32 %v4094_v5, 0.0  ;;  %v3964_v37 = vmul.f32 0.0078125, %v3878_v57  ;;  %v4221_v44 = vsub.f32 %v10537_v2, %v9542_v53 }
 0x4d2   : > { %v4480_v33 = vmul.f32 %v9498_v42, %v4410_v29 }
 0x4d3   : > { %v7257_v58 = vpop.eup %7256  ;;  %v4286_v49 = vadd.f32 1e-05, %v4158_v16  ;;  %v4092_v13 = vsub.f32 %v3964_v37, %v4028_v56  ;;  %v9686_v7 = vpop.xlane.xlu1 %3883  ;;  %5879 = vmatmul.mubr.msk.f32.gmra.mrb[88].mxu1 %vm4617_vm7, %v10349_v8  ;;  %v9716_v37 = vadd.f32 %v9517_v26, %v4477_v31  ;;  %vm4625_vm7 = vcmp.eq.s32.totalorder %v9511_v60, %v9475_v20 }
 0x4d4   : > { %v9693_v15 = vpop.xlane.xlu0 %3632  ;;  %v4408_v23 = vmul.f32 %v7257_v58, %v4216_v9  ;;  %v9697_v59 = vadd.f32 %v9517_v26, %v4480_v33  ;;  %5880 = vmatprep.mubr.msk.f32.mxu1 %vm4622_vm5, %v10349_v8  ;;  %vm4632_vm5 = vcmp.eq.s32.totalorder %v9537_v55, %v9565_v34 }
 0x4d5   : > { %7262 = vrsqrt.f32 %v4286_v49  ;;  %v4156_v5 = vmax.f32 %v4092_v13, 0.0  ;;  %v4219_v13 = vsub.f32 %v8967_v27, %v9583_v36 }
 0x4d6   : > { %v7259_v45 = vpop.eup %7258  ;;  %v4478_v57 = vmul.f32 %v9498_v42, %v4408_v23  ;;  %v4222_v23 = vsub.f32 %v8984_v21, %v9629_v22  ;;  %v4220_v21 = vsub.f32 %v8995_v43, %v9656_v25 }
 0x4d7   : > { %v4284_v29 = vadd.f32 1e-05, %v4156_v5  ;;  %v3639_v56 = vpop.xlane.xlu1 %3638  ;;  %v4413_v16 = vmul.f32 %v7259_v45, %v4221_v44  ;;  %5881 = vmatmul.mubr.msk.f32.gmra.mrb[90].mxu1 %vm4621_vm9, %v10349_v8 }
 0x4d8   : > { %v9713_v53 = vpop.xlane.xlu0 %3628  ;;  %v9719_v35 = vadd.f32 %v9517_v26, %v4478_v57  ;;  %5882 = vmatprep.mubr.msk.f32.mxu1 %vm4626_vm6, %v10349_v8  ;;  %vm4629_vm6 = vcmp.eq.s32.totalorder %v9537_v55, %v9475_v20  ;;  %v9747_v31 = vmul.f32 0.0078125, %v3639_v56 }
 0x4d9   : > { %7264 = vrsqrt.f32 %v4284_v29  ;;  %v4483_v27 = vmul.f32 %v9498_v42, %v4413_v16 }
 0x4da   : > { %v7261_v58 = vpop.eup %7260  ;;  %v4037_v1 = vmul.f32 %v9747_v31, %v9747_v31 }
 0x4db   : > { %v3635_v33 = vpop.xlane.xlu1 %3634  ;;  %5883 = vmatmul.mubr.msk.f32.gmra.mrb[92].mxu1 %vm4625_vm7, %v10349_v8  ;;  %v4411_v45 = vmul.f32 %v7261_v58, %v4219_v13  ;;  %v9766_v58 = vadd.f32 %v9517_v26, %v4483_v27 }
 0x4dc   : > { %v9734_v49 = vpop.xlane.xlu0 %3885  ;;  %5884 = vmatprep.mubr.msk.f32.mxu1 %vm4630_vm8, %v10349_v8  ;;  %v9749_v44 = vmul.f32 0.0078125, %v3635_v33 }
 0x4dd   : > { %v4481_v33 = vmul.f32 %v9498_v42, %v4411_v45 }
 0x4de   : > { %v4035_v56 = vmul.f32 %v9749_v44, %v9749_v44 }
 0x4df   : > { %v7263_v2 = vpop.eup %7262  ;;  %v3896_v5 = vpop.xlane.xlu1 %3895  ;;  %5885 = vmatmul.mubr.msk.f32.gmra.mrb[94].mxu1 %vm4629_vm6, %v10349_v8 }
 0x4e0   : > { %v3973_v36 = vmul.f32 0.0078125, %v3896_v5  ;;  %v3641_v57 = vpop.xlane.xlu0 %3640  ;;  %v4414_v29 = vmul.f32 %v7263_v2, %v4222_v23  ;;  %5886 = vmatprep.mubr.msk.f32.mxu1 %vm4604_vm12, %v10349_v8  ;;  %vm10557_vm12 = vcmp.eq.s32.totalorder %v10556_v0, %v9565_v34 }
 0x4e1   : > { %v9771_v25 = vmul.f32 0.0078125, %v3641_v57 }
 0x4e2   : > { %v4484_v20 = vmul.f32 %v9498_v42, %v4414_v29  ;;  %v4101_v13 = vsub.f32 %v3973_v36, %v4037_v1  ;;  %v9777_v36 = vadd.f32 %v9517_v26, %v4481_v33 }
 0x4e3   : > { %v7265_v22 = vpop.eup %7264  ;;  %v3892_v16 = vpop.xlane.xlu1 %3891  ;;  %v4038_v57 = vmul.f32 %v9771_v25, %v9771_v25 }
 0x4e4   : > { %v3971_v23 = vmul.f32 0.0078125, %v3892_v16  ;;  %v3637_v2 = vpop.xlane.xlu0 %3636  ;;  %v4412_v5 = vmul.f32 %v7265_v22, %v4220_v21  ;;  %v9769_v43 = vadd.f32 %v9517_v26, %v4484_v20  ;;  %v4165_v45 = vmax.f32 %v4101_v13, 0.0 }
 0x4e5   : > { %v9784_v1 = vmul.f32 0.0078125, %v3637_v2 }
 0x4e6   : > { %v4099_v29 = vsub.f32 %v3971_v23, %v4035_v56  ;;  %v4482_v8 = vmul.f32 %v9498_v42, %v4412_v5  ;;  %v4293_v23 = vadd.f32 1e-05, %v4165_v45 }
 0x4e7   : > { %v3647_v9 = vpop.xlane.xlu1 %3646 }
 0x4e8   : > { %v4163_v17 = vmax.f32 %v4099_v29, 0.0  ;;  %v3898_v27 = vpop.xlane.xlu0 %3897  ;;  %v9780_v21 = vadd.f32 %v9517_v26, %v4482_v8  ;;  %v9788_v5 = vmul.f32 0.0078125, %v3647_v9  ;;  %v4036_v8 = vmul.f32 %v9784_v1, %v9784_v1 }
 0x4e9   : > { %v3974_v20 = vmul.f32 0.0078125, %v3898_v27 }
 0x4ea   : > { %v4291_v22 = vadd.f32 1e-05, %v4163_v17  ;;  %v4041_v17 = vmul.f32 %v9788_v5, %v9788_v5 }
 0x4eb   : > { %v4102_v16 = vsub.f32 %v3974_v20, %v4038_v57  ;;  %v3643_v13 = vpop.xlane.xlu1 %3642 }
 0x4ec   : > { %v3894_v33 = vpop.xlane.xlu0 %3893  ;;  %7266 = vrsqrt.f32 %v4291_v22  ;;  %v9794_v27 = vmul.f32 0.0078125, %v3643_v13 }
 0x4ed   : > { %v4166_v29 = vmax.f32 %v4102_v16, 0.0  ;;  %v3972_v51 = vmul.f32 0.0078125, %v3894_v33  ;;  %7268 = vrsqrt.f32 %v4293_v23 }
 0x4ee   : > { %v4039_v16 = vmul.f32 %v9794_v27, %v9794_v27 }
 0x4ef   : > { %v4294_v40 = vadd.f32 1e-05, %v4166_v29  ;;  %v4100_v2 = vsub.f32 %v3972_v51, %v4036_v8  ;;  %v3904_v55 = vpop.xlane.xlu1 %3903 }
 0x4f0   : > { %v3977_v57 = vmul.f32 0.0078125, %v3904_v55  ;;  %v3649_v45 = vpop.xlane.xlu0 %3648  ;;  %v4227_v55 = vsub.f32 %v9089_v46, %v9749_v44  ;;  %v4229_v44 = vsub.f32 %v9064_v32, %v9747_v31 }
 0x4f1   : > { %7270 = vrsqrt.f32 %v4294_v40  ;;  %v4164_v9 = vmax.f32 %v4100_v2, 0.0  ;;  %v9798_v23 = vmul.f32 0.0078125, %v3649_v45 }
 0x4f2   : > { %v4105_v20 = vsub.f32 %v3977_v57, %v4041_v17 }
 0x4f3   : > { %v4292_v56 = vadd.f32 1e-05, %v4164_v9  ;;  %v3900_v60 = vpop.xlane.xlu1 %3899  ;;  %v4042_v57 = vmul.f32 %v9798_v23, %v9798_v23 }
 0x4f4   : > { %v3975_v22 = vmul.f32 0.0078125, %v3900_v60  ;;  %v3645_v33 = vpop.xlane.xlu0 %3644  ;;  %v4169_v51 = vmax.f32 %v4105_v20, 0.0 }
 0x4f5   : > { %7272 = vrsqrt.f32 %v4292_v56  ;;  %v9804_v9 = vmul.f32 0.0078125, %v3645_v33  ;;  %v4230_v56 = vsub.f32 %v9107_v38, %v9771_v25  ;;  %v4228_v38 = vsub.f32 %v9130_v62, %v9784_v1 }
 0x4f6   : > { %v4103_v8 = vsub.f32 %v3975_v22, %v4039_v16  ;;  %v7267_v13 = vpop.eup %7266  ;;  %v4297_v17 = vadd.f32 1e-05, %v4169_v51 }
 0x4f7   : > { %v3655_v29 = vpop.xlane.xlu1 %3654  ;;  %v7269_v48 = vpop.eup %7268  ;;  %v4419_v46 = vmul.f32 %v7267_v13, %v4227_v55  ;;  %v4040_v33 = vmul.f32 %v9804_v9, %v9804_v9 }
 0x4f8   : > { %v4167_v40 = vmax.f32 %v4103_v8, 0.0  ;;  %v3906_v2 = vpop.xlane.xlu0 %3905  ;;  %v9808_v16 = vmul.f32 0.0078125, %v3655_v29  ;;  %7274 = vrsqrt.f32 %v4297_v17  ;;  %v4421_v25 = vmul.f32 %v7269_v48, %v4229_v44 }
 0x4f9   : > { %v3978_v60 = vmul.f32 0.0078125, %v3906_v2  ;;  %v4489_v31 = vmul.f32 %v9498_v42, %v4419_v46 }
 0x4fa   : > { %v4295_v45 = vadd.f32 1e-05, %v4167_v40  ;;  %v4045_v13 = vmul.f32 %v9808_v16, %v9808_v16 }
 0x4fb   : > { %v7271_v20 = vpop.eup %7270  ;;  %v4106_v22 = vsub.f32 %v3978_v60, %v4042_v57  ;;  %v3651_v18 = vpop.xlane.xlu1 %3650 }
 0x4fc   : > { %v3902_v51 = vpop.xlane.xlu0 %3901  ;;  %v4422_v8 = vmul.f32 %v7271_v20, %v4230_v56  ;;  %7276 = vrsqrt.f32 %v4295_v45  ;;  %v9819_v17 = vmul.f32 0.0078125, %v3651_v18  ;;  %v4491_v45 = vmul.f32 %v9498_v42, %v4421_v25 }
 0x4fd   : > { %v4170_v2 = vmax.f32 %v4106_v22, 0.0  ;;  %v3976_v10 = vmul.f32 0.0078125, %v3902_v51 }
 0x4fe   : > { %v4492_v20 = vmul.f32 %v9498_v42, %v4422_v8  ;;  %v4043_v18 = vmul.f32 %v9819_v17, %v9819_v17 }
 0x4ff   : > { %v7273_v29 = vpop.eup %7272  ;;  %v4298_v55 = vadd.f32 1e-05, %v4170_v2  ;;  %v4104_v40 = vsub.f32 %v3976_v10, %v4040_v33  ;;  %v3912_v32 = vpop.xlane.xlu1 %3911  ;;  %v4559_v10 = vadd.f32 %v9517_v26, %v4489_v31  ;;  %v9830_v2 = vmul.f32 0.0078125, %v9667_v28 }
 0x500   : > { %v3981_v57 = vmul.f32 0.0078125, %v3912_v32  ;;  %v3657_v60 = vpop.xlane.xlu0 %3656  ;;  %v4420_v56 = vmul.f32 %v7273_v29, %v4228_v38  ;;  %v4562_v8 = vadd.f32 %v9517_v26, %v4492_v20  ;;  %v9836_v32 = vmul.f32 0.0078125, %v9713_v53 }
 0x501   : > { %7278 = vrsqrt.f32 %v4298_v55  ;;  %v4168_v62 = vmax.f32 %v4104_v40, 0.0  ;;  %v9832_v38 = vmul.f32 0.0078125, %v3657_v60  ;;  %v4561_v55 = vadd.f32 %v9517_v26, %v4491_v45 }
 0x502   : > { %v4109_v1 = vsub.f32 %v3981_v57, %v4045_v13  ;;  %v4490_v48 = vmul.f32 %v9498_v42, %v4420_v56  ;;  %v7275_v40 = vpop.eup %7274  ;;  %v3967_v56 = vmul.f32 0.0078125, %v9686_v7  ;;  %v3968_v20 = vmul.f32 0.0078125, %v9734_v49 }
 0x503   : > { %v4296_v22 = vadd.f32 1e-05, %v4168_v62  ;;  %v3908_v44 = vpop.xlane.xlu1 %3907  ;;  %v6800_v60 = vpack.c.bf16 %v4562_v8, %v4561_v55  ;;  %v4031_v7 = vmul.f32 %v9830_v2, %v9830_v2  ;;  %v4234_v49 = vsub.f32 %v9174_v11, %v9798_v23 }
 0x504   : > { %v3979_v46 = vmul.f32 0.0078125, %v3908_v44  ;;  %v3653_v51 = vpop.xlane.xlu0 %3652  ;;  %v4560_v33 = vadd.f32 %v9517_v26, %v4490_v48  ;;  %v4173_v25 = vmax.f32 %v4109_v1, 0.0  ;;  %v4231_v1 = vsub.f32 %v9161_v4, %v9794_v27 }
 0x505   : > { %7280 = vrsqrt.f32 %v4296_v22  ;;  %v4046_v48 = vmul.f32 %v9832_v38, %v9832_v38  ;;  %v9844_v45 = vmul.f32 0.0078125, %v3653_v51  ;;  %v10538_v22 = vpack.c.bf16 %v9621_v39, %v9618_v52 }
 0x506   : > { %v4107_v29 = vsub.f32 %v3979_v46, %v4043_v18  ;;  %v6796_v13 = vpack.c.bf16 %v4560_v33, %v4559_v10  ;;  %v7277_v57 = vpop.eup %7276  ;;  %v4301_v44 = vadd.f32 1e-05, %v4173_v25  ;;  %v4032_v4 = vmul.f32 %v9836_v32, %v9836_v32 }
 0x507   : > { %v3663_v31 = vpop.xlane.xlu1 %3662  ;;  %v4423_v51 = vmul.f32 %v7277_v57, %v4231_v1  ;;  %v4095_v33 = vsub.f32 %v3967_v56, %v4031_v7  ;;  %v4233_v52 = vsub.f32 %v9139_v50, %v9788_v5  ;;  %v4044_v11 = vmul.f32 %v9844_v45, %v9844_v45 }
 0x508   : > { %v4171_v28 = vmax.f32 %v4107_v29, 0.0  ;;  %v3914_v62 = vpop.xlane.xlu0 %3913  ;;  %6797 = vmatprep.subr.bf16.mxu1 %v6796_v13  ;;  %v4096_v13 = vsub.f32 %v3968_v20, %v4032_v4  ;;  %v10539_v55 = vpack.c.bf16 %v9597_v19, %v9562_v14  ;;  %v4232_v57 = vsub.f32 %v9185_v63, %v9804_v9 }
 0x509   : > { %v3982_v53 = vmul.f32 0.0078125, %v3914_v62  ;;  %6799 = vmatpush3.bf16.msra.mxu1 %v10538_v22  ;;  %7282 = vrsqrt.f32 %v4301_v44  ;;  %v9866_v56 = vmul.f32 0.0078125, %v3663_v31  ;;  %v4425_v50 = vmul.f32 %v7275_v40, %v4233_v52 }
 0x50a   : > { %6801 = vmatprep.subr.bf16.mxu1 %v6800_v60  ;;  %v4299_v27 = vadd.f32 1e-05, %v4171_v28  ;;  %v4493_v60 = vmul.f32 %v9498_v42, %v4423_v51  ;;  %v4160_v63 = vmax.f32 %v4096_v13, 0.0  ;;  %v9873_v40 = vmul.f32 0.0078125, %v9644_v6 }
 0x50b   : > { %v7279_v10 = vpop.eup %7278  ;;  %v4110_v18 = vsub.f32 %v3982_v53, %v4046_v48  ;;  %v3659_v46 = vpop.xlane.xlu1 %3658  ;;  %v4495_v7 = vmul.f32 %v9498_v42, %v4425_v50  ;;  %v4049_v44 = vmul.f32 %v9866_v56, %v9866_v56 }
 0x50c   : > { %v9857_v39 = vmul.f32 0.0078125, %v3659_v46  ;;  %v3910_v8 = vpop.xlane.xlu0 %3909  ;;  %v4426_v29 = vmul.f32 %v7279_v10, %v4234_v49  ;;  %7284 = vrsqrt.f32 %v4299_v27  ;;  %v4159_v49 = vmax.f32 %v4095_v33, 0.0 }
 0x50d   : > { %v4174_v23 = vmax.f32 %v4110_v18, 0.0  ;;  %v3980_v25 = vmul.f32 0.0078125, %v3910_v8  ;;  %6803 = vmatpush3.bf16.msra.mxu1 %v10539_v55  ;;  %v4563_v27 = vadd.f32 %v9517_v26, %v4493_v60  ;;  %v4288_v8 = vadd.f32 1e-05, %v4160_v63 }
 0x50e   : > { %v4047_v1 = vmul.f32 %v9857_v39, %v9857_v39  ;;  %v4496_v53 = vmul.f32 %v9498_v42, %v4426_v29  ;;  %v4033_v50 = vmul.f32 %v9873_v40, %v9873_v40  ;;  %v4235_v63 = vsub.f32 %v9238_v24, %v9819_v17 }
 0x50f   : > { %v7281_v5 = vpop.eup %7280  ;;  %v4302_v28 = vadd.f32 1e-05, %v4174_v23  ;;  %v4108_v20 = vsub.f32 %v3980_v25, %v4044_v11  ;;  %v3916_v62 = vpop.xlane.xlu1 %3915  ;;  %v4565_v23 = vadd.f32 %v9517_v26, %v4495_v7  ;;  %v4287_v25 = vadd.f32 1e-05, %v4159_v49 }
 0x510   : > { %v3983_v48 = vmul.f32 0.0078125, %v3916_v62  ;;  %v3665_v14 = vpop.xlane.xlu0 %3664  ;;  %v4424_v19 = vmul.f32 %v7281_v5, %v4232_v57  ;;  %v4566_v6 = vadd.f32 %v9517_v26, %v4496_v53  ;;  %v10540_v53 = vpack.c.bf16 %v9719_v35, %v9716_v37 }
 0x511   : > { %7286 = vrsqrt.f32 %v4302_v28  ;;  %v4172_v9 = vmax.f32 %v4108_v20, 0.0 }
 0x512   : > { %v4111_v31 = vsub.f32 %v3983_v48, %v4047_v1  ;;  %v4494_v22 = vmul.f32 %v9498_v42, %v4424_v19  ;;  %v6808_v62 = vpack.c.bf16 %v4566_v6, %v4565_v23  ;;  %v9887_v1 = vmul.f32 0.0078125, %v3665_v14 }
 0x513   : > { %v4300_v10 = vadd.f32 1e-05, %v4172_v9  ;;  %v3920_v4 = vpop.xlane.xlu1 %3919  ;;  %v7283_v57 = vpop.eup %7282  ;;  %v10541_v9 = vld [vmem:[#allocation34_spill] sm:$0xff] }
 0x514   : > { %v4175_v18 = vmax.f32 %v4111_v31, 0.0  ;;  %v3985_v46 = vmul.f32 0.0078125, %v3920_v4  ;;  %v3661_v51 = vpop.xlane.xlu0 %3660  ;;  %v4564_v52 = vadd.f32 %v9517_v26, %v4494_v22  ;;  %v4238_v31 = vsub.f32 %v10541_v9, %v9832_v38 }
 0x515   : > { %7288 = vrsqrt.f32 %v4300_v10  ;;  %v9882_v29 = vmul.f32 0.0078125, %v3661_v51  ;;  %v4050_v24 = vmul.f32 %v9887_v1, %v9887_v1  ;;  %v10544_v51 = vld [vmem:[#allocation35_spill] sm:$0xff]  ;;  %v4239_v9 = vsub.f32 %v9306_v54, %v9857_v39 }
 0x516   : > { %v4303_v13 = vadd.f32 1e-05, %v4175_v18  ;;  %v4113_v33 = vsub.f32 %v3985_v46, %v4049_v44  ;;  %v6804_v11 = vpack.c.bf16 %v4564_v52, %v4563_v27  ;;  %v7285_v60 = vpop.eup %7284  ;;  %7290 = vrsqrt.f32 %v4288_v8  ;;  %v10542_v44 = vld [vmem:[#allocation33_spill] sm:$0xff] }
 0x517   : > { %v3888_v55 = vpop.xlane.xlu1 %3887  ;;  %v4048_v48 = vmul.f32 %v9882_v29, %v9882_v29  ;;  %v4237_v10 = vsub.f32 %v10542_v44, %v9808_v16  ;;  %v4427_v37 = vmul.f32 %v7285_v60, %v4235_v63  ;;  %v9901_v18 = vmul.f32 0.0078125, %v9693_v15 }
 0x518   : > { %v4177_v5 = vmax.f32 %v4113_v33, 0.0  ;;  %v3969_v28 = vmul.f32 0.0078125, %v3888_v55  ;;  %v3918_v20 = vpop.xlane.xlu0 %3917  ;;  %6805 = vmatprep.subr.bf16.mxu1 %v6804_v11  ;;  %7292 = vrsqrt.f32 %v4303_v13  ;;  %v10543_v46 = vpack.c.bf16 %v9697_v59, %v9689_v47 }
 0x519   : > { %v3984_v19 = vmul.f32 0.0078125, %v3918_v20  ;;  %6807 = vmatpush3.bf16.msra.mxu1 %v10540_v53  ;;  %7294 = vrsqrt.f32 %v4287_v25  ;;  %v4236_v52 = vsub.f32 %v10544_v51, %v9844_v45  ;;  %v4429_v16 = vmul.f32 %v7283_v57, %v4237_v10  ;;  %v10545_v53 = vld [vmem:[#allocation32_spill] sm:$0xff] }
 0x51a   : > { %v4097_v22 = vsub.f32 %v3969_v28, %v4033_v50  ;;  %6809 = vmatprep.subr.bf16.mxu1 %v6808_v62  ;;  %v4305_v14 = vadd.f32 1e-05, %v4177_v5  ;;  %v4497_v23 = vmul.f32 %v9498_v42, %v4427_v37  ;;  %v4034_v55 = vmul.f32 %v9901_v18, %v9901_v18 }
 0x51b   : > { %v7287_v7 = vpop.eup %7286  ;;  %v4112_v49 = vsub.f32 %v3984_v19, %v4048_v48  ;;  %v4499_v57 = vmul.f32 %v9498_v42, %v4429_v16  ;;  %v4224_v63 = vsub.f32 %v10545_v53, %v9836_v32  ;;  %v10547_v32 = vpack.c.bf16 %v9780_v21, %v9777_v36 }
 0x51c   : > { %v4161_v4 = vmax.f32 %v4097_v22, 0.0  ;;  %v3922_v27 = vpop.xlane.xlu0 %3921  ;;  %v4430_v35 = vmul.f32 %v7287_v7, %v4238_v31  ;;  %7296 = vrsqrt.f32 %v4305_v14  ;;  %v4567_v62 = vadd.f32 %v9517_v26, %v4497_v23  ;;  %v10546_v14 = vld [vmem:[#allocation31_spill] sm:$0xff] }
 0x51d   : > { %v4176_v17 = vmax.f32 %v4112_v49, 0.0  ;;  %v3986_v38 = vmul.f32 0.0078125, %v3922_v27  ;;  %6811 = vmatpush3.bf16.msra.mxu1 %v10543_v46  ;;  %v4569_v7 = vadd.f32 %v9517_v26, %v4499_v57  ;;  %v4223_v49 = vsub.f32 %v10546_v14, %v9830_v2 }
 0x51e   : > { %v4289_v8 = vadd.f32 1e-05, %v4161_v4  ;;  %v4500_v25 = vmul.f32 %v9498_v42, %v4430_v35  ;;  %v4241_v39 = vsub.f32 %v9286_v30, %v9866_v56  ;;  %v10548_v35 = vld [vmem:[#allocation5_spill] sm:$0xff]  ;;  %v10549_v36 = vpack.c.bf16 %v9769_v43, %v9766_v58  ;;  %v10550_v30 = vld [vmem:[#allocation30_spill] sm:$0xff] }
 0x51f   : > { %v7289_v6 = vpop.eup %7288  ;;  %v4304_v13 = vadd.f32 1e-05, %v4176_v17  ;;  %v4114_v33 = vsub.f32 %v3986_v38, %v4050_v24  ;;  %v4240_v24 = vsub.f32 %v10548_v35, %v9882_v29  ;;  %v4225_v56 = vsub.f32 %v10550_v30, %v9873_v40  ;;  %v10551_v29 = vld [vmem:[#allocation15_spill] sm:$0xff] }
 0x520   : > { %v3890_v15 = vpop.xlane.xlu0 %3889  ;;  %v4428_v11 = vmul.f32 %v7289_v6, %v4236_v52  ;;  %v7291_v50 = vpop.eup %7290  ;;  %v4570_v48 = vadd.f32 %v9517_v26, %v4500_v25  ;;  %v4242_v16 = vsub.f32 %v10551_v29, %v9887_v1  ;;  %v4226_v40 = vsub.f32 %v9055_v41, %v9901_v18  ;;  %v4698_v29 = vld [vmem:[#allocation2 + $0x8] sm:$0xff] }
 0x521   : > { %7298 = vrsqrt.f32 %v4304_v13  ;;  %v4178_v47 = vmax.f32 %v4114_v33, 0.0  ;;  %v3970_v59 = vmul.f32 0.0078125, %v3890_v15  ;;  %v4416_v4 = vmul.f32 %v7291_v50, %v4224_v63 }
 0x522   : > { %v4498_v45 = vmul.f32 %v9498_v42, %v4428_v11  ;;  %7300 = vrsqrt.f32 %v4289_v8  ;;  %v7293_v20 = vpop.eup %7292  ;;  %v6816_v27 = vpack.c.bf16 %v4570_v48, %v4569_v7 }
 0x523   : > { %v4306_v5 = vadd.f32 1e-05, %v4178_v47  ;;  %v4098_v28 = vsub.f32 %v3970_v59, %v4034_v55  ;;  %v7295_v19 = vpop.eup %7294  ;;  %v4431_v10 = vmul.f32 %v7293_v20, %v4239_v9  ;;  %v4486_v38 = vmul.f32 %v9498_v42, %v4416_v4 }
 0x524   : > { %v4568_v60 = vadd.f32 %v9517_v26, %v4498_v45  ;;  %v4415_v54 = vmul.f32 %v7295_v19, %v4223_v49 }
 0x525   : > { %7302 = vrsqrt.f32 %v4306_v5  ;;  %v4162_v31 = vmax.f32 %v4098_v28, 0.0  ;;  %v4501_v17 = vmul.f32 %v9498_v42, %v4431_v10  ;;  %v4556_v33 = vadd.f32 %v9517_v26, %v4486_v38 }
 0x526   : > { %v6812_v22 = vpack.c.bf16 %v4568_v60, %v4567_v62  ;;  %v7297_v37 = vpop.eup %7296  ;;  %v4485_v21 = vmul.f32 %v9498_v42, %v4415_v54  ;;  %v10552_v62 = vmov 1.0  }
 0x527   : > { %v4290_v44 = vadd.f32 1e-05, %v4162_v31  ;;  %v4433_v51 = vmul.f32 %v7297_v37, %v4241_v39  ;;  %v4571_v13 = vadd.f32 %v9517_v26, %v4501_v17 }
 0x528   : > { %6813 = vmatprep.subr.bf16.mxu1 %v6812_v22  ;;  %v4555_v23 = vadd.f32 %v9517_v26, %v4485_v21 }
 0x529   : > { %7304 = vrsqrt.f32 %v4290_v44  ;;  %6815 = vmatpush3.bf16.msra.mxu1 %v10547_v32  ;;  %v4503_v58 = vmul.f32 %v9498_v42, %v4433_v51  ;;  %v4697_v51 = vld [vmem:[#allocation2] sm:$0xff] }
 0x52a   : > { %6817 = vmatprep.subr.bf16.mxu1 %v6816_v27  ;;  %v6822_v47 = vpack.c.bf16 %v4556_v33, %v4555_v23 }
 0x52b   : > { %v7299_v2 = vpop.eup %7298  ;;  %v4573_v59 = vadd.f32 %v9517_v26, %v4503_v58 }
 0x52c   : > { %v4432_v46 = vmul.f32 %v7299_v2, %v4240_v24  ;;  %v7301_v52 = vpop.eup %7300 }
 0x52d   : > { %6819 = vmatpush3.bf16.msra.mxu1 %v10549_v36  ;;  %v4417_v43 = vmul.f32 %v7301_v52, %v4225_v56 }
 0x52e   : > { %v4502_v6 = vmul.f32 %v9498_v42, %v4432_v46 }
 0x52f   : > { %v7303_v8 = vpop.eup %7302  ;;  %v4487_v50 = vmul.f32 %v9498_v42, %v4417_v43 }
 0x530   : > { %v4572_v15 = vadd.f32 %v9517_v26, %v4502_v6  ;;  %v4434_v11 = vmul.f32 %v7303_v8, %v4242_v16 }
 0x531   : > { %v4557_v41 = vadd.f32 %v9517_v26, %v4487_v50 }
 0x532   : > { %v6820_v25 = vpack.c.bf16 %v4572_v15, %v4571_v13  ;;  %v4504_v1 = vmul.f32 %v9498_v42, %v4434_v11  ;;  %v4699_v15 = vld [vmem:[#allocation2 + $0x10] sm:$0xff] }
 0x533   : > { %v7305_v55 = vpop.eup %7304 }
 0x534   : > { %6821 = vmatprep.subr.bf16.mxu1 %v6820_v25  ;;  %v4574_v45 = vadd.f32 %v9517_v26, %v4504_v1  ;;  %v4418_v57 = vmul.f32 %v7305_v55, %v4226_v40  ;;  %v4700_v25 = vld [vmem:[#allocation2 + $0x18] sm:$0xff] }
 0x535   : > { %6823 = vmatpush3.bf16.msra.mxu1 %v6822_v47 }
 0x536   : > { %v6824_v5 = vpack.c.bf16 %v4574_v45, %v4573_v59  ;;  %v4488_v28 = vmul.f32 %v9498_v42, %v4418_v57  ;;  %v10554_v42 = vld [vmem:[#allocation9_spill] sm:$0xff] }
 0x537   : > { %vm10555_vm8 = vcmp.eq.s32.totalorder %v10554_v42, %v9574_v12  ;;  %v4701_v57 = vld [vmem:[#allocation2 + $0x20] sm:$0xff] }
 0x538   : > { %6825 = vmatprep.subr.bf16.mxu1 %v6824_v5  ;;  %v4558_v18 = vadd.f32 %v9517_v26, %v4488_v28  ;;  %v10558_v26 = vld [vmem:[#allocation16_spill] sm:$0xff] }
 0x53a   : > { %v6826_v20 = vpack.c.bf16 %v4558_v18, %v4557_v41 }
 0x53c   : > { %6827 = vmatpush3.bf16.msra.mxu1 %v6826_v20  ;;  %v4702_v20 = vld [vmem:[#allocation2 + $0x28] sm:$0xff] }
 0x53f   : > { %5887 = vmatmul.mubr.msk.f32.vlgmr.msra.gmra.mrb[96].mxu1 %vm4603_vm14, %v10552_v62  ;;  %vm10560_vm14 = vcmp.eq.s32.totalorder %v10558_v26, %v9574_v12 }
 0x540   : > { %5888 = vmatprep.mubr.msk.f32.mxu1 %vm4608_vm13, %v10552_v62  ;;  %vm10559_vm13 = vcmp.eq.s32.totalorder %v10558_v26, %v9565_v34 }
 0x543   : > { %5889 = vmatmul.mubr.msk.f32.gmra.mrb[98].mxu1 %vm4607_vm15, %v10552_v62 }
 0x544   : > { %5890 = vmatprep.mubr.msk.f32.mxu1 %vm4612_vm1, %v10552_v62 }
 0x547   : > { %5891 = vmatmul.mubr.msk.f32.gmra.mrb[100].mxu1 %vm4611_vm2, %v10552_v62 }
 0x548   : > { %5892 = vmatprep.mubr.msk.f32.mxu1 %vm4616_vm4, %v10552_v62 }
 0x54b   : > { %5893 = vmatmul.mubr.msk.f32.gmra.mrb[102].mxu1 %vm4615_vm0, %v10552_v62 }
 0x54c   : > { %5894 = vmatprep.mubr.msk.f32.mxu1 %vm4620_vm10, %v10552_v62 }
 0x54f   : > { %5895 = vmatmul.mubr.msk.f32.gmra.mrb[104].mxu1 %vm10555_vm8, %v10552_v62 }
 0x550   : > { %5896 = vmatprep.mubr.msk.f32.mxu1 %vm10557_vm12, %v10552_v62 }
 0x553   : > { %5897 = vmatmul.mubr.msk.f32.gmra.mrb[106].mxu1 %vm4623_vm11, %v10552_v62 }
 0x554   : > { %5898 = vmatprep.mubr.msk.f32.mxu1 %vm10559_vm13, %v10552_v62 }
 0x557   : > { %5899 = vmatmul.mubr.msk.f32.gmra.mrb[108].mxu1 %vm10560_vm14, %v10552_v62 }
 0x558   : > { %5900 = vmatprep.mubr.msk.f32.mxu1 %vm4632_vm5, %v10552_v62 }
 0x55b   : > { %5901 = vmatmul.mubr.msk.f32.gmra.mrb[110].mxu1 %vm4631_vm3, %v10552_v62 }
 0x596   : > { %v6296_v60 = vpop.f32.mrb[80].mxu1 }
 0x597   : > { %v6297_v48 = vpop.f32.mrb[81].mxu1 }
 0x598   : > { %v6298_v19 = vadd.f32 %v6297_v48, %v6296_v60 }
 0x59a   : > { %v6299_v53 = vpop.f32.mrb[82].mxu1 }
 0x59b   : > { %v6300_v63 = vpop.f32.mrb[83].mxu1 }
 0x59c   : > { %v6301_v9 = vadd.f32 %v6300_v63, %v6299_v53 }
 0x59e   : > { %v6302_v31 = vpop.f32.mrb[84].mxu1 }
 0x59f   : > { %v6303_v22 = vpop.f32.mrb[85].mxu1 }
 0x5a0   : > { %v6304_v7 = vadd.f32 %v6303_v22, %v6302_v31 }
 0x5a2   : > { %v6305_v14 = vpop.f32.mrb[86].mxu1 }
 0x5a3   : > { %v6306_v49 = vpop.f32.mrb[87].mxu1 }
 0x5a4   : > { %v6307_v44 = vadd.f32 %v6306_v49, %v6305_v14  ;;  %v7312_v14 = vld [vmem:[%s10296_s12] sm:$0xff] (!%p5902_p6)   ;;  %v7313_v49 = vld [vmem:[%s10296_s12 + $0x48] sm:$0xff] (!%p5902_p6)  }
 0x5a6   : > { %v6308_v10 = vpop.f32.mrb[88].mxu1 }
 0x5a7   : > { %v6309_v34 = vpop.f32.mrb[89].mxu1 }
 0x5a8   : > { %v6310_v4 = vadd.f32 %v6309_v34, %v6308_v10  ;;  %v7315_v10 = vld [vmem:[%s10296_s12 + $0x50] sm:$0xff] (!%p5902_p6)  }
 0x5a9   : > { %v7316_v34 = vld [vmem:[%s10296_s12 + $0x10] sm:$0xff] (!%p5902_p6)  }
 0x5aa   : > { %v6311_v27 = vpop.f32.mrb[90].mxu1 }
 0x5ab   : > { %v6312_v37 = vpop.f32.mrb[91].mxu1 }
 0x5ac   : > { %v6313_v32 = vadd.f32 %v6312_v37, %v6311_v27  ;;  %v7318_v27 = vld [vmem:[%s10296_s12 + $0x18] sm:$0xff] (!%p5902_p6)   ;;  %v7319_v37 = vld [vmem:[%s10296_s12 + $0x60] sm:$0xff] (!%p5902_p6)  }
 0x5ae   : > { %v6314_v12 = vpop.f32.mrb[92].mxu1 }
 0x5af   : > { %v6315_v54 = vpop.f32.mrb[93].mxu1 }
 0x5b0   : > { %v6316_v39 = vadd.f32 %v6315_v54, %v6314_v12  ;;  %v7321_v12 = vld [vmem:[%s10296_s12 + $0x68] sm:$0xff] (!%p5902_p6)   ;;  %v10055_v54 = vld [vmem:[%s10288_s4] sm:$0xff] (!%p5902_p6) }
 0x5b2   : > { %v6317_v35 = vpop.f32.mrb[94].mxu1 }
 0x5b3   : > { %v6318_v24 = vpop.f32.mrb[95].mxu1 }
 0x5b4   : > { %v6319_v2 = vadd.f32 %v6318_v24, %v6317_v35  ;;  %v7322_v24 = vld [vmem:[%s10296_s12 + $0x28] sm:$0xff] (!%p5902_p6)  }
 0x612   : > { %v6352_v17 = vpop.f32.mrb[96].mxu1 }
 0x613   : > { %v6353_v38 = vpop.f32.mrb[97].mxu1 }
 0x614   : > { %v6354_v46 = vadd.f32 %v6353_v38, %v6352_v17  ;;  %v7324_v17 = vld [vmem:[%s10296_s12 + $0x30] sm:$0xff] (!%p5902_p6)   ;;  %v7325_v38 = vld [vmem:[%s10296_s12 + $0x78] sm:$0xff] (!%p5902_p6)  }
 0x616   : > { %v4877_v52 = vadd.f32 %v6354_v46, %v6298_v19  ;;  %v6355_v36 = vpop.f32.mrb[98].mxu1  ;;  %v7326_v46 = vld [vmem:[%s10296_s12 + $0x38] sm:$0xff] (!%p5902_p6)  }
 0x617   : > { %v6356_v21 = vpop.f32.mrb[99].mxu1 }
 0x618   : > { %v4915_v30 = vadd.f32 %v4877_v52, %v4697_v51  ;;  %v6357_v56 = vadd.f32 %v6356_v21, %v6355_v36  ;;  %v10082_v36 = vld [vmem:[%s10288_s4 + $0x10] sm:$0xff] (!%p5902_p6)  ;;  %v10087_v21 = vld [vmem:[%s10288_s4 + $0x18] sm:$0xff] (!%p5902_p6) }
 0x61a   : > { %4923 = vst [vmem:[#allocation2] sm:$0xff] %v4915_v30  ;;  %v4882_v16 = vadd.f32 %v6357_v56, %v6301_v9  ;;  %v6358_v6 = vpop.f32.mrb[100].mxu1  ;;  %v4704_v9 = vld [vmem:[#allocation2 + $0x38] sm:$0xff]  ;;  %v4954_v56 = vpack.c.bf16 (!%p5902_p6), %v10087_v21, %v10082_v36 }
 0x61b   : > { %v6359_v8 = vpop.f32.mrb[101].mxu1 }
 0x61c   : > { %v4916_v13 = vadd.f32 %v4882_v16, %v4698_v29  ;;  %v6360_v33 = vadd.f32 %v6359_v8, %v6358_v6  ;;  %v10094_v6 = vld [vmem:[%s10288_s4 + $0x20] sm:$0xff] (!%p5902_p6)  ;;  %v10099_v8 = vld [vmem:[%s10288_s4 + $0x28] sm:$0xff] (!%p5902_p6) }
 0x61e   : > { %4924 = vst [vmem:[#allocation2 + $0x8] sm:$0xff] %v4916_v13  ;;  %v4887_v11 = vadd.f32 %v6360_v33, %v6304_v7  ;;  %v6361_v58 = vpop.f32.mrb[102].mxu1  ;;  %v7311_v7 = vld [vmem:[%s10296_s12 + $0x40] sm:$0xff] (!%p5902_p6)   ;;  %v4956_v33 = vpack.c.bf16 (!%p5902_p6), %v10099_v8, %v10094_v6 }
 0x61f   : > { %v6362_v43 = vpop.f32.mrb[103].mxu1  ;;  %6376 = vmatprep.subr.bf16.mxu0 (!%p5902_p6), %v7311_v7 }
 0x620   : > { %v4917_v23 = vadd.f32 %v4887_v11, %v4699_v15  ;;  %v6363_v40 = vadd.f32 %v6362_v43, %v6361_v58  ;;  %6377 = vmatpush3.bf16.msra.mxu0 (!%p5902_p6), %v7312_v14  ;;  %v10106_v58 = vld [vmem:[%s10288_s4 + $0x30] sm:$0xff] (!%p5902_p6)  ;;  %v10111_v43 = vld [vmem:[%s10288_s4 + $0x38] sm:$0xff] (!%p5902_p6) }
 0x621   : > { %6378 = vmatprep.subr.bf16.mxu0 (!%p5902_p6), %v7313_v49  ;;  %v4943_v51 = vld [vmem:[#allocation2] sm:$0xff] (!%p5902_p6) }
 0x622   : > { %4925 = vst [vmem:[#allocation2 + $0x10] sm:$0xff] %v4917_v23  ;;  %v4892_v1 = vadd.f32 %v6363_v40, %v6307_v44  ;;  %v6364_v55 = vpop.f32.mrb[104].mxu1  ;;  %v7314_v44 = vld [vmem:[%s10296_s12 + $0x8] sm:$0xff] (!%p5902_p6)   ;;  %v4958_v40 = vpack.c.bf16 (!%p5902_p6), %v10111_v43, %v10106_v58 }
 0x623   : > { %v6365_v47 = vpop.f32.mrb[105].mxu1 }
 0x624   : > { %v4918_v59 = vadd.f32 %v4892_v1, %v4700_v25  ;;  %v6366_v45 = vadd.f32 %v6365_v47, %v6364_v55  ;;  %6379 = vmatpush3.bf16.msra.mxu0 (!%p5902_p6), %v7314_v44  ;;  %v7327_v47 = vld [vmem:[%s10298_s14] sm:$0xff] (!%p5902_p6)  }
 0x625   : > { %6380 = vmatprep.subr.bf16.mxu0 (!%p5902_p6), %v7315_v10  ;;  %v4944_v52 = vld [vmem:[#allocation2 + $0x8] sm:$0xff] (!%p5902_p6)  ;;  %6724 = vmatprep.subr.bf16.mxu1 (!%p5902_p6), %v7327_v47 }
 0x626   : > { %4926 = vst [vmem:[#allocation2 + $0x18] sm:$0xff] %v4918_v59  ;;  %v4897_v50 = vadd.f32 %v6366_v45, %v6310_v4  ;;  %v6367_v5 = vpop.f32.mrb[106].mxu1  ;;  %v7317_v4 = vld [vmem:[%s10296_s12 + $0x58] sm:$0xff] (!%p5902_p6)   ;;  %v4951_v30 = vpack.c.bf16 (!%p5902_p6), %v4944_v52, %v4943_v51  ;;  %6725 = vmatpush3.bf16.msra.mxu1 (!%p5902_p6), %v7327_v47  ;;  %v7328_v59 = vld [vmem:[%s10298_s14 + $0x8] sm:$0xff] (!%p5902_p6)   ;;  %v7329_v45 = vld [vmem:[%s10298_s14 + $0x10] sm:$0xff] (!%p5902_p6)  }
 0x627   : > { %v6368_v28 = vpop.f32.mrb[107].mxu1  ;;  %6726 = vmatprep.subr.bf16.mxu1 (!%p5902_p6), %v7328_v59 }
 0x628   : > { %v4919_v41 = vadd.f32 %v4897_v50, %v4701_v57  ;;  %v6369_v18 = vadd.f32 %v6368_v28, %v6367_v5  ;;  %6381 = vmatpush3.bf16.msra.mxu0 (!%p5902_p6), %v7316_v34  ;;  %v7330_v57 = vld [vmem:[%s10298_s14 + $0x18] sm:$0xff] (!%p5902_p6)   ;;  %v7331_v50 = vld [vmem:[%s10298_s14 + $0x20] sm:$0xff] (!%p5902_p6)   ;;  %v7332_v5 = vld [vmem:[%s10298_s14 + $0x28] sm:$0xff] (!%p5902_p6)  }
 0x629   : > { %6382 = vmatprep.subr.bf16.mxu0 (!%p5902_p6), %v7317_v4  ;;  %v4945_v29 = vld [vmem:[#allocation2 + $0x10] sm:$0xff] (!%p5902_p6) }
 0x62a   : > { %4927 = vst [vmem:[#allocation2 + $0x20] sm:$0xff] %v4919_v41  ;;  %v4902_v62 = vadd.f32 %v6369_v18, %v6313_v32  ;;  %v6370_v61 = vpop.f32.mrb[108].mxu1  ;;  %v7320_v32 = vld [vmem:[%s10296_s12 + $0x20] sm:$0xff] (!%p5902_p6)   ;;  %6727 = vmatpush3.bf16.msra.mxu1 (!%p5902_p6), %v7328_v59  ;;  %v7333_v28 = vld [vmem:[%s10298_s14 + $0x30] sm:$0xff] (!%p5902_p6)   ;;  %v7334_v41 = vld [vmem:[%s10298_s14 + $0x38] sm:$0xff] (!%p5902_p6)  }
 0x62b   : > { %v6371_v42 = vpop.f32.mrb[109].mxu1  ;;  %6728 = vmatprep.subr.bf16.mxu1 (!%p5902_p6), %v7329_v45 }
 0x62c   : > { %v4920_v0 = vadd.f32 %v4902_v62, %v4702_v20  ;;  %v6372_v26 = vadd.f32 %v6371_v42, %v6370_v61  ;;  %6383 = vmatpush3.bf16.msra.mxu0 (!%p5902_p6), %v7318_v27  ;;  %v5903_v20 = vld [vmem:[%s10562_s21] ss:$0 sm:$0xff] (!%p5902_p6) }
 0x62d   : > { %6384 = vmatprep.subr.bf16.mxu0 (!%p5902_p6), %v7319_v37  ;;  %v4946_v16 = vld [vmem:[#allocation2 + $0x18] sm:$0xff] (!%p5902_p6) }
 0x62e   : > { %4928 = vst [vmem:[#allocation2 + $0x28] sm:$0xff] %v4920_v0  ;;  %v4907_v60 = vadd.f32 %v6372_v26, %v6316_v39  ;;  %v6373_v48 = vpop.f32.mrb[110].mxu1  ;;  %v10060_v39 = vld [vmem:[%s10288_s4 + $0x8] sm:$0xff] (!%p5902_p6)  ;;  %v4953_v13 = vpack.c.bf16 (!%p5902_p6), %v4946_v16, %v4945_v29  ;;  %6729 = vmatpush3.bf16.msra.mxu1 (!%p5902_p6), %v7329_v45 }
 0x62f   : > { %v6374_v19 = vpop.f32.mrb[111].mxu1  ;;  %v4952_v35 = vpack.c.bf16 (!%p5902_p6), %v10060_v39, %v10055_v54  ;;  %6730 = vmatprep.subr.bf16.mxu1 (!%p5902_p6), %v7330_v57 }
 0x630   : > { %v4921_v53 = vadd.f32 %v4907_v60, %v4703_v3  ;;  %v6375_v63 = vadd.f32 %v6374_v19, %v6373_v48  ;;  %4934 = sbr.rel (%p5902_p6) target bundleno = 2270 (0x8de), region = 100  ;;  %6385 = vmatpush3.bf16.msra.mxu0 (!%p5902_p6), %v7320_v32 }
 0x631   : > { %5126 = vmatprep.mubr.bf16.mxu0 (!%p5902_p6), %v4952_v35  ;;  %6386 = vmatprep.subr.bf16.mxu0 (!%p5902_p6), %v7321_v12  ;;  %v4947_v15 = vld [vmem:[#allocation2 + $0x20] sm:$0xff] (!%p5902_p6) }
 0x632   : > { %4929 = vst [vmem:[#allocation2 + $0x30] sm:$0xff] %v4921_v53  ;;  %v4912_v31 = vadd.f32 %v6375_v63, %v6319_v2  ;;  %v7323_v2 = vld [vmem:[%s10296_s12 + $0x70] sm:$0xff] (!%p5902_p6)   ;;  %6731 = vmatpush3.bf16.msra.mxu1 (!%p5902_p6), %v7330_v57 }
 0x633   : > { %6732 = vmatprep.subr.bf16.mxu1 (!%p5902_p6), %v7331_v50 }
 0x634   : > { %v4922_v22 = vadd.f32 %v4912_v31, %v4704_v9  ;;  %6387 = vmatpush3.bf16.msra.mxu0 (!%p5902_p6), %v7322_v24 }
 0x635   : > { %6388 = vmatprep.subr.bf16.mxu0 (!%p5902_p6), %v7323_v2  ;;  %v4948_v11 = vld [vmem:[#allocation2 + $0x28] sm:$0xff] (!%p5902_p6) }
 0x636   : > { %4930 = vst [vmem:[#allocation2 + $0x38] sm:$0xff] %v4922_v22  ;;  %v4955_v23 = vpack.c.bf16 (!%p5902_p6), %v4948_v11, %v4947_v15  ;;  %6733 = vmatpush3.bf16.msra.mxu1 (!%p5902_p6), %v7331_v50 }
 0x637   : > { %6734 = vmatprep.subr.bf16.mxu1 %v7332_v5 }
 0x638   : > { %6389 = vmatpush3.bf16.msra.mxu0 %v7324_v17 }
 0x639   : > { %6390 = vmatprep.subr.bf16.mxu0 %v7325_v38  ;;  %v4949_v25 = vld [vmem:[#allocation2 + $0x30] sm:$0xff] }
 0x63a   : > { %6735 = vmatpush3.bf16.msra.mxu1 %v7332_v5 }
 0x63b   : > { %6736 = vmatprep.subr.bf16.mxu1 %v7333_v28 }
 0x63c   : > { %6391 = vmatpush3.bf16.msra.mxu0 %v7326_v46 }
 0x63d   : > { %v4950_v1 = vld [vmem:[#allocation2 + $0x38] sm:$0xff] }
 0x63e   : > { %v4957_v55 = vpack.c.bf16 %v4950_v1, %v4949_v25  ;;  %6737 = vmatpush3.bf16.msra.mxu1 %v7333_v28 }
 0x63f   : > { %5127 = vmatmul.mubr.bf16.vlgmr.msra.gmra.mrb[0].mxu0 %v4951_v30  ;;  %6738 = vmatprep.subr.bf16.mxu1 %v7334_v41 }
 0x640   : > { %5134 = vmatprep.mubr.bf16.mxu0 %v4954_v56 }
 0x642   : > { %6739 = vmatpush3.bf16.msra.mxu1 %v7334_v41 }
 0x647   : > { %5135 = vmatmul.mubr.bf16.gmra.mrb[4].mxu0 %v4953_v13 }
 0x648   : > { %5142 = vmatprep.mubr.bf16.mxu0 %v4956_v33 }
 0x64f   : > { %5143 = vmatmul.mubr.bf16.gmra.mrb[8].mxu0 %v4955_v23 }
 0x650   : > { %5150 = vmatprep.mubr.bf16.mxu0 %v4958_v40 }
 0x657   : > { %5151 = vmatmul.mubr.bf16.gmra.mrb[12].mxu0 %v4957_v55 }
 0x712   : > { %v6392_v18 = vpop.f32.mrb[0].mxu0 }
 0x713   : > { %v6393_v62 = vpop.f32.mrb[1].mxu0 }
 0x714   : > { %v6394_v61 = vadd.f32 %v6393_v62, %v6392_v18  ;;  %v6395_v42 = vpop.f32.mrb[2].mxu0 }
 0x715   : > { %v6396_v0 = vpop.f32.mrb[3].mxu0 }
 0x716   : > { %v5129_v26 = vadd.f32 %v6394_v61, %v5903_v20  ;;  %v6397_v3 = vadd.f32 %v6396_v0, %v6395_v42 }
 0x718   : > { %v5920_v60 = vmul.f32 -1.442695, %v5129_v26  ;;  %v5132_v48 = vadd.f32 %v6397_v3, %v5903_v20 }
 0x71a   : > { %7335 = vpow2.f32 %v5920_v60  ;;  %v5921_v19 = vmul.f32 -1.442695, %v5132_v48  ;;  %v6398_v53 = vpop.f32.mrb[4].mxu0 }
 0x71b   : > { %v6399_v63 = vpop.f32.mrb[5].mxu0 }
 0x71c   : > { %7337 = vpow2.f32 %v5921_v19  ;;  %v6400_v9 = vadd.f32 %v6399_v63, %v6398_v53  ;;  %v6401_v31 = vpop.f32.mrb[6].mxu0 }
 0x71d   : > { %v6402_v22 = vpop.f32.mrb[7].mxu0 }
 0x71e   : > { %v5137_v7 = vadd.f32 %v6400_v9, %v5903_v20  ;;  %v6403_v14 = vadd.f32 %v6402_v22, %v6401_v31 }
 0x720   : > { %v5922_v49 = vmul.f32 -1.442695, %v5137_v7  ;;  %v5140_v44 = vadd.f32 %v6403_v14, %v5903_v20 }
 0x722   : > { %7339 = vpow2.f32 %v5922_v49  ;;  %v5923_v10 = vmul.f32 -1.442695, %v5140_v44  ;;  %v6404_v34 = vpop.f32.mrb[8].mxu0 }
 0x723   : > { %v6405_v4 = vpop.f32.mrb[9].mxu0 }
 0x724   : > { %v7336_v27 = vpop.eup %7335  ;;  %7341 = vpow2.f32 %v5923_v10  ;;  %v6406_v37 = vadd.f32 %v6405_v4, %v6404_v34  ;;  %v6407_v32 = vpop.f32.mrb[10].mxu0 }
 0x725   : > { %v5183_v12 = vadd.f32 1.0, %v7336_v27  ;;  %v6408_v35 = vpop.f32.mrb[11].mxu0 }
 0x726   : > { %v7338_v24 = vpop.eup %7337  ;;  %v5145_v2 = vadd.f32 %v6406_v37, %v5903_v20  ;;  %v6409_v17 = vadd.f32 %v6408_v35, %v6407_v32 }
 0x727   : > { %7343 = vrcp.f32 %v5183_v12  ;;  %v5184_v38 = vadd.f32 1.0, %v7338_v24 }
 0x728   : > { %v5924_v46 = vmul.f32 -1.442695, %v5145_v2  ;;  %v5148_v51 = vadd.f32 %v6409_v17, %v5903_v20 }
 0x729   : > { %7345 = vrcp.f32 %v5184_v38 }
 0x72a   : > { %7347 = vpow2.f32 %v5924_v46  ;;  %v5925_v52 = vmul.f32 -1.442695, %v5148_v51  ;;  %v6410_v30 = vpop.f32.mrb[12].mxu0 }
 0x72b   : > { %v6411_v56 = vpop.f32.mrb[13].mxu0 }
 0x72c   : > { %v7340_v29 = vpop.eup %7339  ;;  %7349 = vpow2.f32 %v5925_v52  ;;  %v6412_v16 = vadd.f32 %v6411_v56, %v6410_v30  ;;  %v6413_v13 = vpop.f32.mrb[14].mxu0 }
 0x72d   : > { %v5185_v33 = vadd.f32 1.0, %v7340_v29  ;;  %v6414_v15 = vpop.f32.mrb[15].mxu0 }
 0x72e   : > { %v7342_v11 = vpop.eup %7341  ;;  %v5153_v23 = vadd.f32 %v6412_v16, %v5903_v20  ;;  %v6415_v40 = vadd.f32 %v6414_v15, %v6413_v13 }
 0x72f   : > { %7351 = vrcp.f32 %v5185_v33  ;;  %v5186_v25 = vadd.f32 1.0, %v7342_v11 }
 0x730   : > { %v5926_v1 = vmul.f32 -1.442695, %v5153_v23  ;;  %v5156_v55 = vadd.f32 %v6415_v40, %v5903_v20 }
 0x731   : > { %v7344_v47 = vpop.eup %7343  ;;  %7353 = vrcp.f32 %v5186_v25 }
 0x732   : > { %7355 = vpow2.f32 %v5926_v1  ;;  %v5927_v59 = vmul.f32 -1.442695, %v5156_v55  ;;  %v5207_v50 = vmul.f32 %v7344_v47, %v5129_v26 }
 0x733   : > { %v7346_v45 = vpop.eup %7345 }
 0x734   : > { %v7348_v57 = vpop.eup %7347  ;;  %7357 = vpow2.f32 %v5927_v59  ;;  %v5208_v5 = vmul.f32 %v7346_v45, %v5132_v48 }
 0x735   : > { %v5187_v28 = vadd.f32 1.0, %v7348_v57 }
 0x736   : > { %v7350_v41 = vpop.eup %7349  ;;  %v5215_v18 = vpack.c.bf16 %v5208_v5, %v5207_v50 }
 0x737   : > { %7359 = vrcp.f32 %v5187_v28  ;;  %v5188_v62 = vadd.f32 1.0, %v7350_v41 }
 0x738   : > { %6740 = vmatprep.mubr.bf16.mxu1 %v5215_v18 }
 0x739   : > { %v7352_v61 = vpop.eup %7351  ;;  %7361 = vrcp.f32 %v5188_v62 }
 0x73a   : > { %v5209_v20 = vmul.f32 %v7352_v61, %v5137_v7  ;;  %v5928_v7 = vld [vmem:[%s10563_s23] ss:$0 sm:$0xff] }
 0x73b   : > { %v7354_v42 = vpop.eup %7353 }
 0x73c   : > { %v7356_v0 = vpop.eup %7355  ;;  %v5210_v3 = vmul.f32 %v7354_v42, %v5140_v44 }
 0x73d   : > { %v5189_v60 = vadd.f32 1.0, %v7356_v0 }
 0x73e   : > { %v7358_v19 = vpop.eup %7357  ;;  %v5216_v53 = vpack.c.bf16 %v5210_v3, %v5209_v20 }
 0x73f   : > { %7363 = vrcp.f32 %v5189_v60  ;;  %v5190_v63 = vadd.f32 1.0, %v7358_v19 }
 0x740   : > { %6741 = vmatmul.mubr.bf16.vlgmr.msra.gmra.mrb[0].mxu1 %v5216_v53 }
 0x741   : > { %v7360_v26 = vpop.eup %7359  ;;  %7365 = vrcp.f32 %v5190_v63 }
 0x742   : > { %v5211_v9 = vmul.f32 %v7360_v26, %v5145_v2 }
 0x743   : > { %v7362_v48 = vpop.eup %7361 }
 0x744   : > { %v5212_v31 = vmul.f32 %v7362_v48, %v5148_v51 }
 0x746   : > { %v5217_v22 = vpack.c.bf16 %v5212_v31, %v5211_v9 }
 0x748   : > { %6744 = vmatprep.mubr.bf16.mxu1 %v5217_v22 }
 0x749   : > { %v7364_v14 = vpop.eup %7363 }
 0x74a   : > { %v5213_v10 = vmul.f32 %v7364_v14, %v5153_v23 }
 0x74b   : > { %v7366_v49 = vpop.eup %7365 }
 0x74c   : > { %v5214_v34 = vmul.f32 %v7366_v49, %v5156_v55 }
 0x74e   : > { %v5218_v4 = vpack.c.bf16 %v5214_v34, %v5213_v10 }
 0x750   : > { %6745 = vmatmul.mubr.bf16.gmra.mrb[4].mxu1 %v5218_v4 }
 0x813   : > { %v6742_v44 = vpop.f32.mrb[0].mxu1 }
 0x814   : > { %v10145_v27 = vadd.f32 %v6742_v44, %v5928_v7  ;;  %v5324_v37 = vpop.f32.mrb[1].mxu1 }
 0x815   : > { %v10147_v32 = vadd.f32 %v5928_v7, %v5324_v37  ;;  %v6743_v12 = vpop.f32.mrb[2].mxu1 }
 0x816   : > { %5361 = vadd.xlane.f32.xlu1 %v10145_v27  ;;  %v5327_v35 = vpop.f32.mrb[3].mxu1  ;;  %v10151_v24 = vadd.f32 %v6743_v12, %v5928_v7  ;;  %v5383_v2 = vmul.f32 %v10145_v27, %v10145_v27 }
 0x817   : > { %5357 = vadd.xlane.f32.xlu0 %v10147_v32  ;;  %v10156_v17 = vadd.f32 %v5928_v7, %v5327_v35  ;;  %v5381_v51 = vmul.f32 %v10147_v32, %v10147_v32 }
 0x818   : > { %v5384_v38 = vmul.f32 %v10151_v24, %v10151_v24 }
 0x819   : > { %v5382_v46 = vmul.f32 %v10156_v17, %v10156_v17 }
 0x81a   : > { %5363 = vadd.xlane.f32.xlu1 %v10151_v24 }
 0x81b   : > { %5393 = vadd.xlane.f32.xlu0 %v5383_v2 }
 0x81e   : > { %5395 = vadd.xlane.f32.xlu1 %v5384_v38 }
 0x81f   : > { %5359 = vadd.xlane.f32.xlu0 %v10156_v17 }
 0x822   : > { %5391 = vadd.xlane.f32.xlu1 %v5382_v46 }
 0x823   : > { %v6746_v52 = vpop.f32.mrb[4].mxu1  ;;  %5389 = vadd.xlane.f32.xlu0 %v5381_v51 }
 0x824   : > { %v10165_v30 = vadd.f32 %v6746_v52, %v5928_v7  ;;  %v5340_v56 = vpop.f32.mrb[5].mxu1  ;;  %v10201_v52 = vld [vmem:[%s10564_s29] ss:$0 sm:$0xff] }
 0x825   : > { %v6747_v29 = vpop.f32.mrb[6].mxu1  ;;  %v10171_v33 = vadd.f32 %v5928_v7, %v5340_v56 }
 0x826   : > { %v10167_v16 = vadd.f32 %v6747_v29, %v5928_v7  ;;  %v5343_v13 = vpop.f32.mrb[7].mxu1  ;;  %v5387_v40 = vmul.f32 %v10165_v30, %v10165_v30 }
 0x827   : > { %5369 = vadd.xlane.f32.xlu0 %v10165_v30  ;;  %v10173_v15 = vadd.f32 %v5928_v7, %v5343_v13  ;;  %v5385_v11 = vmul.f32 %v10171_v33, %v10171_v33 }
 0x828   : > { %5371 = vadd.xlane.f32.xlu1 %v10167_v16  ;;  %v5388_v25 = vmul.f32 %v10167_v16, %v10167_v16 }
 0x829   : > { %v5386_v23 = vmul.f32 %v10173_v15, %v10173_v15 }
 0x82b   : > { %5365 = vadd.xlane.f32.xlu0 %v10171_v33 }
 0x82c   : > { %5367 = vadd.xlane.f32.xlu1 %v10173_v15 }
 0x82f   : > { %5397 = vadd.xlane.f32.xlu0 %v5385_v11  ;;  %v10207_v11 = vld [vmem:[%s10565_s15] ss:$0 sm:$0xff] }
 0x830   : > { %5399 = vadd.xlane.f32.xlu1 %v5386_v23 }
 0x833   : > { %5401 = vadd.xlane.f32.xlu0 %v5387_v40 }
 0x834   : > { %5403 = vadd.xlane.f32.xlu1 %v5388_v25 }
 0x8a3   : > { %v5362_v1 = vpop.xlane.xlu1 %5361 }
 0x8a4   : > { %v5358_v55 = vpop.xlane.xlu0 %5357  ;;  %v5375_v47 = vmul.f32 0.0078125, %v5362_v1 }
 0x8a5   : > { %v10185_v42 = vmul.f32 0.0078125, %v5358_v55 }
 0x8a6   : > { %v5415_v50 = vmul.f32 %v5375_v47, %v5375_v47  ;;  %v5439_v38 = vsub.f32 %v10145_v27, %v5375_v47 }
 0x8a7   : > { %v5364_v59 = vpop.xlane.xlu1 %5363  ;;  %v5413_v9 = vmul.f32 %v10185_v42, %v10185_v42 }
 0x8a8   : > { %v5376_v45 = vmul.f32 0.0078125, %v5364_v59  ;;  %v5394_v57 = vpop.xlane.xlu0 %5393 }
 0x8a9   : > { %v5407_v5 = vmul.f32 0.0078125, %v5394_v57 }
 0x8aa   : > { %v5416_v18 = vmul.f32 %v5376_v45, %v5376_v45  ;;  %v5440_v13 = vsub.f32 %v10151_v24, %v5376_v45 }
 0x8ab   : > { %v5423_v28 = vsub.f32 %v5407_v5, %v5415_v50  ;;  %v5396_v41 = vpop.xlane.xlu1 %5395  ;;  %v5437_v50 = vsub.f32 %v10147_v32, %v10185_v42 }
 0x8ac   : > { %v5408_v62 = vmul.f32 0.0078125, %v5396_v41  ;;  %v5360_v61 = vpop.xlane.xlu0 %5359 }
 0x8ad   : > { %v5431_v0 = vmax.f32 %v5423_v28, 0.0  ;;  %v10187_v20 = vmul.f32 0.0078125, %v5360_v61 }
 0x8ae   : > { %v5424_v3 = vsub.f32 %v5408_v62, %v5416_v18 }
 0x8af   : > { %v5447_v60 = vadd.f32 1e-05, %v5431_v0  ;;  %v5414_v19 = vmul.f32 %v10187_v20, %v10187_v20  ;;  %v5392_v53 = vpop.xlane.xlu1 %5391  ;;  %v5438_v28 = vsub.f32 %v10156_v17, %v10187_v20 }
 0x8b0   : > { %v5432_v63 = vmax.f32 %v5424_v3, 0.0  ;;  %v5406_v26 = vmul.f32 0.0078125, %v5392_v53  ;;  %v5390_v48 = vpop.xlane.xlu0 %5389 }
 0x8b1   : > { %7367 = vrsqrt.f32 %v5447_v60  ;;  %v5405_v31 = vmul.f32 0.0078125, %v5390_v48 }
 0x8b2   : > { %v5448_v22 = vadd.f32 1e-05, %v5432_v63  ;;  %v5422_v14 = vsub.f32 %v5406_v26, %v5414_v19 }
 0x8b3   : > { %v5421_v49 = vsub.f32 %v5405_v31, %v5413_v9 }
 0x8b4   : > { %7369 = vrsqrt.f32 %v5448_v22  ;;  %v5430_v10 = vmax.f32 %v5422_v14, 0.0  ;;  %v5370_v34 = vpop.xlane.xlu0 %5369 }
 0x8b5   : > { %v5429_v4 = vmax.f32 %v5421_v49, 0.0  ;;  %v5372_v7 = vpop.xlane.xlu1 %5371  ;;  %v10209_v23 = vmul.f32 0.0078125, %v5370_v34 }
 0x8b6   : > { %v5446_v44 = vadd.f32 1e-05, %v5430_v10  ;;  %v10214_v47 = vmul.f32 0.0078125, %v5372_v7 }
 0x8b7   : > { %v5445_v37 = vadd.f32 1e-05, %v5429_v4  ;;  %v5419_v61 = vmul.f32 %v10209_v23, %v10209_v23 }
 0x8b8   : > { %7371 = vrsqrt.f32 %v5446_v44  ;;  %v5366_v12 = vpop.xlane.xlu0 %5365  ;;  %v5420_v32 = vmul.f32 %v10214_v47, %v10214_v47 }
 0x8b9   : > { %7373 = vrsqrt.f32 %v5445_v37  ;;  %v10193_v35 = vmul.f32 0.0078125, %v5366_v12  ;;  %v5368_v2 = vpop.xlane.xlu1 %5367 }
 0x8ba   : > { %v10196_v46 = vmul.f32 0.0078125, %v5368_v2 }
 0x8bb   : > { %v7368_v51 = vpop.eup %7367  ;;  %v5417_v27 = vmul.f32 %v10193_v35, %v10193_v35 }
 0x8bc   : > { %v5463_v56 = vmul.f32 %v7368_v51, %v5439_v38  ;;  %v5398_v29 = vpop.xlane.xlu0 %5397  ;;  %v5418_v24 = vmul.f32 %v10196_v46, %v10196_v46  ;;  %v5441_v38 = vsub.f32 %v10171_v33, %v10193_v35 }
 0x8bd   : > { %v5409_v40 = vmul.f32 0.0078125, %v5398_v29  ;;  %v5400_v25 = vpop.xlane.xlu1 %5399 }
 0x8be   : > { %v7370_v1 = vpop.eup %7369  ;;  %v5477_v55 = vmul.f32 %v10201_v52, %v5463_v56  ;;  %v5410_v59 = vmul.f32 0.0078125, %v5400_v25  ;;  %v5442_v56 = vsub.f32 %v10173_v15, %v10196_v46  ;;  %v5444_v25 = vsub.f32 %v10167_v16, %v10214_v47 }
 0x8bf   : > { %v5464_v45 = vmul.f32 %v7370_v1, %v5440_v13  ;;  %v5425_v57 = vsub.f32 %v5409_v40, %v5417_v27 }
 0x8c0   : > { %v5491_v5 = vadd.f32 %v10207_v11, %v5477_v55  ;;  %v5426_v41 = vsub.f32 %v5410_v59, %v5418_v24  ;;  %v5402_v18 = vpop.xlane.xlu0 %5401 }
 0x8c1   : > { %v5478_v62 = vmul.f32 %v10201_v52, %v5464_v45  ;;  %v5433_v0 = vmax.f32 %v5425_v57, 0.0  ;;  %v5411_v3 = vmul.f32 0.0078125, %v5402_v18  ;;  %v5404_v60 = vpop.xlane.xlu1 %5403 }
 0x8c2   : > { %v7372_v19 = vpop.eup %7371  ;;  %v5499_v53 = vadd.f32 %v5491_v5, %v10082_v36  ;;  %v5434_v42 = vmax.f32 %v5426_v41, 0.0  ;;  %v5412_v63 = vmul.f32 0.0078125, %v5404_v60 }
 0x8c3   : > { %v7374_v26 = vpop.eup %7373  ;;  %v5492_v17 = vadd.f32 %v10207_v11, %v5478_v62  ;;  %v5462_v20 = vmul.f32 %v7372_v19, %v5438_v28  ;;  %v5449_v48 = vadd.f32 1e-05, %v5433_v0  ;;  %v5427_v9 = vsub.f32 %v5411_v3, %v5419_v61 }
 0x8c4   : > { %5507 = vst [vmem:[%s10566_s16 + $0x10] sm:$0xff] %v5499_v53  ;;  %v5461_v31 = vmul.f32 %v7374_v26, %v5437_v50  ;;  %v5450_v22 = vadd.f32 1e-05, %v5434_v42  ;;  %v5428_v14 = vsub.f32 %v5412_v63, %v5420_v32 }
 0x8c5   : > { %v5500_v36 = vadd.f32 %v5492_v17, %v10087_v21  ;;  %v5476_v49 = vmul.f32 %v10201_v52, %v5462_v20  ;;  %7375 = vrsqrt.f32 %v5449_v48  ;;  %v5435_v10 = vmax.f32 %v5427_v9, 0.0 }
 0x8c6   : > { %v5475_v34 = vmul.f32 %v10201_v52, %v5461_v31  ;;  %7377 = vrsqrt.f32 %v5450_v22  ;;  %v5436_v4 = vmax.f32 %v5428_v14, 0.0 }
 0x8c7   : > { %5508 = vst [vmem:[%s10566_s16 + $0x18] sm:$0xff] %v5500_v36  ;;  %v5490_v7 = vadd.f32 %v10207_v11, %v5476_v49  ;;  %v5451_v44 = vadd.f32 1e-05, %v5435_v10 }
 0x8c8   : > { %v5489_v37 = vadd.f32 %v10207_v11, %v5475_v34  ;;  %v5452_v12 = vadd.f32 1e-05, %v5436_v4 }
 0x8c9   : > { %v5498_v21 = vadd.f32 %v5490_v7, %v10060_v39  ;;  %7379 = vrsqrt.f32 %v5451_v44 }
 0x8ca   : > { %v5497_v2 = vadd.f32 %v5489_v37, %v10055_v54  ;;  %7381 = vrsqrt.f32 %v5452_v12  ;;  %v5443_v54 = vsub.f32 %v10165_v30, %v10209_v23 }
 0x8cb   : > { %5506 = vst [vmem:[%s10566_s16 + $0x8] sm:$0xff] %v5498_v21 }
 0x8cc   : > { %5505 = vst [vmem:[%s10566_s16] sm:$0xff] %v5497_v2 }
 0x8cf   : > { %v7376_v51 = vpop.eup %7375 }
 0x8d0   : > { %v7378_v39 = vpop.eup %7377  ;;  %v5465_v29 = vmul.f32 %v7376_v51, %v5441_v38 }
 0x8d1   : > { %v5466_v13 = vmul.f32 %v7378_v39, %v5442_v56 }
 0x8d2   : > { %v5479_v27 = vmul.f32 %v10201_v52, %v5465_v29 }
 0x8d3   : > { %v7380_v40 = vpop.eup %7379  ;;  %v5480_v1 = vmul.f32 %v10201_v52, %v5466_v13 }
 0x8d4   : > { %v7382_v55 = vpop.eup %7381  ;;  %v5493_v33 = vadd.f32 %v10207_v11, %v5479_v27  ;;  %v5467_v35 = vmul.f32 %v7380_v40, %v5443_v54 }
 0x8d5   : > { %v5494_v15 = vadd.f32 %v10207_v11, %v5480_v1  ;;  %v5468_v46 = vmul.f32 %v7382_v55, %v5444_v25 }
 0x8d6   : > { %v5501_v24 = vadd.f32 %v5493_v33, %v10094_v6  ;;  %v5481_v59 = vmul.f32 %v10201_v52, %v5467_v35 }
 0x8d7   : > { %v5502_v30 = vadd.f32 %v5494_v15, %v10099_v8  ;;  %v5482_v23 = vmul.f32 %v10201_v52, %v5468_v46 }
 0x8d8   : > { %5509 = vst [vmem:[%s10566_s16 + $0x20] sm:$0xff] %v5501_v24  ;;  %v5495_v16 = vadd.f32 %v10207_v11, %v5481_v59 }
 0x8d9   : > { %5510 = vst [vmem:[%s10566_s16 + $0x28] sm:$0xff] %v5502_v30  ;;  %v5496_v47 = vadd.f32 %v10207_v11, %v5482_v23 }
 0x8da   : > { %v5503_v6 = vadd.f32 %v5495_v16, %v10106_v58 }
 0x8db   : > { %v5504_v45 = vadd.f32 %v5496_v47, %v10111_v43 }
 0x8dc   : > { %5511 = vst [vmem:[%s10566_s16 + $0x30] sm:$0xff] %v5503_v6 }
 0x8dd   : > { %5512 = vst [vmem:[%s10566_s16 + $0x38] sm:$0xff] %v5504_v45 }
 0x8de PF: > { %s10567_s1 = sld [smem:[#allocation4_spill]] }
 0x8e4   : > { %s28_s27 = sadd.s32 1, %s10567_s1  }
 0x8e5   : > { %p25_p7 = scmp.ge.s32.totalorder %s28_s27, 4  }
 0x8e7   :  { %27 = sbr.rel (!%p25_p7) target bundleno = 9 (0x9), region = 135 }

</bundles_post_ra>
